<compile_context>
chip_gen: v6e
topology: v6e:2x2x1
jax: 0.10.0
libtpu: 0.0.40
codegen_flags: <defaults>
</compile_context>

<pallas_src>
import jax
import jax.numpy as jnp
from jax.experimental import pallas as pl
from jax.experimental.pallas import tpu as pltpu

EPS = 1e-5


def _fused_kernel(xpad_ref, w1_ref, g1_ref, b1_ref, w2_ref, g2_ref, b2_ref,
                  out_ref, acc_ref):
    # Grid axis 0: kh row of the 3x3 kernel (3 steps, reduction -> "arbitrary").
    k = pl.program_id(0)

    Hp, Wp, Cin = xpad_ref.shape
    H, W = Hp - 2, Wp - 2
    HW = H * W

    @pl.when(k == 0)
    def _init():
        acc_ref[...] = jnp.zeros_like(acc_ref)

    # Rows k .. k+H-1 of the padded activation = the kh = k tap row.
    x_rows = xpad_ref[pl.ds(k, H), :, :]                     # (H, W+2, Cin) f32

    def tap(kw):
        patch = x_rows[:, kw:kw + W, :].reshape(HW, Cin).astype(jnp.bfloat16)
        # bf16 operands, f32 MXU accumulation.
        return jnp.dot(patch, w1_ref[kw], preferred_element_type=jnp.float32)

    acc_ref[...] += tap(0) + tap(1) + tap(2)

    @pl.when(k == pl.num_programs(0) - 1)
    def _epilogue():
        acc = acc_ref[...]                                   # (HW, Cmid) f32
        inv_n = 1.0 / acc.shape[0]

        # BatchNorm2d(Cmid), batch stats (one pass), scale/offset form.
        m1 = jnp.sum(acc, axis=0, keepdims=True) * inv_n
        v1 = jnp.maximum(
            jnp.sum(acc * acc, axis=0, keepdims=True) * inv_n - m1 * m1, 0.0)
        s1 = g1_ref[...] * jax.lax.rsqrt(v1 + EPS)
        t1 = b1_ref[...] - m1 * s1
        # ReLU, then bf16 for the second MXU pass.
        y = jnp.maximum(acc * s1 + t1, 0.0).astype(jnp.bfloat16)

        # conv2 (1x1) == channel matmul.
        z = jnp.dot(y, w2_ref[...], preferred_element_type=jnp.float32)

        # BatchNorm2d(Cout), batch stats (one pass), scale/offset form.
        m2 = jnp.sum(z, axis=0, keepdims=True) * inv_n
        v2 = jnp.maximum(
            jnp.sum(z * z, axis=0, keepdims=True) * inv_n - m2 * m2, 0.0)
        s2 = g2_ref[...] * jax.lax.rsqrt(v2 + EPS)
        t2 = b2_ref[...] - m2 * s2
        out_ref[...] = z * s2 + t2


def prepare_params(w1_oihw, g1, b1, w2_oihw, g2, b2):
    """One-time weight layout + dtype prep (hoisted out of the per-call path)."""
    Cmid, Cin = w1_oihw.shape[0], w1_oihw.shape[1]
    Cout = w2_oihw.shape[0]
    # OIHW -> (kh*3+kw, Cin, Cmid) bf16: one weight tile per 3x3 tap.
    w1_taps = (jnp.transpose(w1_oihw, (2, 3, 1, 0))
               .reshape(9, Cin, Cmid).astype(jnp.bfloat16))
    # (Cout, Cmid, 1, 1) -> (Cmid, Cout) bf16.
    w2_mat = jnp.transpose(w2_oihw[:, :, 0, 0], (1, 0)).astype(jnp.bfloat16)
    return (w1_taps,
            g1.reshape(1, Cmid).astype(jnp.float32),
            b1.reshape(1, Cmid).astype(jnp.float32),
            w2_mat,
            g2.reshape(1, Cout).astype(jnp.float32),
            b2.reshape(1, Cout).astype(jnp.float32))


@jax.jit
def fused_forward(x_nchw, w1_taps, g1, b1, w2_mat, g2, b2):
    """x_nchw: (1, Cin, H, W) f32; weights already in kernel layout (bf16)."""
    N, Cin, H, W = x_nchw.shape
    assert N == 1, "kernel is specialized for batch size 1 (as in the module)"
    HW = H * W
    Cmid = w1_taps.shape[2]
    Cout = w2_mat.shape[1]

    # Wrapper work is now just NCHW -> channels-last + zero spatial pad.
    x_hwc = jnp.transpose(x_nchw[0], (1, 2, 0))              # (H, W, Cin)
    xpad = jnp.pad(x_hwc, ((1, 1), (1, 1), (0, 0)))          # (H+2, W+2, Cin)

    flops = 2 * HW * (9 * Cin * Cmid + Cmid * Cout)
    bytes_accessed = (xpad.size * 4 + w1_taps.size * 2 + w2_mat.size * 2
                      + HW * Cout * 4 + (2 * Cmid + 2 * Cout) * 4)

    out = pl.pallas_call(
        _fused_kernel,
        out_shape=jax.ShapeDtypeStruct((HW, Cout), jnp.float32),
        grid_spec=pltpu.PrefetchScalarGridSpec(
            num_scalar_prefetch=0,
            grid=(3,),                                        # one kh row / step
            in_specs=[
                # Full padded activation, resident across the grid.
                pl.BlockSpec((H + 2, W + 2, Cin), lambda k: (0, 0, 0)),
                # One kh row of 3 weight taps per step (streamed, ~1.5 MB bf16).
                pl.BlockSpec((3, Cin, Cmid), lambda k: (k, 0, 0)),
                pl.BlockSpec((1, Cmid), lambda k: (0, 0)),     # g1
                pl.BlockSpec((1, Cmid), lambda k: (0, 0)),     # b1
                pl.BlockSpec((Cmid, Cout), lambda k: (0, 0)),  # w2
                pl.BlockSpec((1, Cout), lambda k: (0, 0)),     # g2
                pl.BlockSpec((1, Cout), lambda k: (0, 0)),     # b2
            ],
            out_specs=pl.BlockSpec((HW, Cout), lambda k: (0, 0)),
            scratch_shapes=[pltpu.VMEM((HW, Cmid), jnp.float32)],
        ),
        compiler_params=pltpu.CompilerParams(
            dimension_semantics=("arbitrary",),
            vmem_limit_bytes=32 << 20,
        ),
        cost_estimate=pl.CostEstimate(
            flops=flops,
            transcendentals=Cmid + Cout,
            bytes_accessed=bytes_accessed),
    )(xpad, w1_taps, g1, b1, w2_mat, g2, b2)

    # (HW, Cout) -> NCHW
    return jnp.transpose(out.reshape(1, H, W, Cout), (0, 3, 1, 2))


if __name__ == "__main__":
    key = jax.random.PRNGKey(0)
    kx, kw1, kw2 = jax.random.split(key, 3)

    # Shapes implied by the module: x = (1, 512, 7, 7).
    x = jax.random.normal(kx, (1, 512, 7, 7), jnp.float32)

    # Deterministic parameter init (shapes from the module's __init__).
    w1 = jax.random.normal(kw1, (512, 512, 3, 3), jnp.float32) * 0.02   # conv2d153
    w2 = jax.random.normal(kw2, (2048, 512, 1, 1), jnp.float32) * 0.02  # conv2d154
    g1 = jnp.ones((512,), jnp.float32)      # batchnorm2d153.weight
    b1 = jnp.zeros((512,), jnp.float32)     # batchnorm2d153.bias
    g2 = jnp.ones((2048,), jnp.float32)     # batchnorm2d154.weight
    b2 = jnp.zeros((2048,), jnp.float32)    # batchnorm2d154.bias

    # One-time layout/dtype prep (outside the per-call hot path).
    params = jax.tree_util.tree_map(jax.block_until_ready,
                                    prepare_params(w1, g1, b1, w2, g2, b2))

    out = fused_forward(x, *params)
    jax.block_until_ready(out)
    assert out.shape == (1, 2048, 7, 7) and out.dtype == jnp.float32
    print("KERNEL_OK")
</pallas_src>

<mosaic_0001>
module attributes {stable_mosaic.version = 11 : i64} {
  func.func @_fused_kernel(%arg0: i32, %arg1: memref<9x9x512xf32, #tpu.memory_space<vmem>>, %arg2: memref<3x512x512xbf16, #tpu.memory_space<vmem>>, %arg3: memref<1x512xf32, #tpu.memory_space<vmem>>, %arg4: memref<1x512xf32, #tpu.memory_space<vmem>>, %arg5: memref<512x2048xbf16, #tpu.memory_space<vmem>>, %arg6: memref<1x2048xf32, #tpu.memory_space<vmem>>, %arg7: memref<1x2048xf32, #tpu.memory_space<vmem>>, %arg8: memref<49x2048xf32, #tpu.memory_space<vmem>>, %arg9: memref<49x512xf32, #tpu.memory_space<vmem>>) attributes {dimension_semantics = [#tpu.dimension_semantics<arbitrary>], iteration_bounds = array<i64: 3>, scalar_prefetch = 0 : i64, scratch_operands = 1 : i64, tpu.core_type = #tpu.core_type<tc>, window_params = [{pipeline_mode = #tpu.pipeline_mode<synchronous>, transform_indices = @transform_0, window_bounds = array<i64: 9, 9, 512>}, {transform_indices = @transform_1, window_bounds = array<i64: 3, 512, 512>}, {pipeline_mode = #tpu.pipeline_mode<synchronous>, transform_indices = @transform_2, window_bounds = array<i64: 1, 512>}, {pipeline_mode = #tpu.pipeline_mode<synchronous>, transform_indices = @transform_3, window_bounds = array<i64: 1, 512>}, {pipeline_mode = #tpu.pipeline_mode<synchronous>, transform_indices = @transform_4, window_bounds = array<i64: 512, 2048>}, {pipeline_mode = #tpu.pipeline_mode<synchronous>, transform_indices = @transform_5, window_bounds = array<i64: 1, 2048>}, {pipeline_mode = #tpu.pipeline_mode<synchronous>, transform_indices = @transform_6, window_bounds = array<i64: 1, 2048>}, {pipeline_mode = #tpu.pipeline_mode<synchronous>, transform_indices = @transform_7, window_bounds = array<i64: 49, 2048>}]} {
    %c0_i32 = arith.constant 0 : i32
    %0 = arith.cmpi eq, %arg0, %c0_i32 : i32
    %1 = arith.extui %0 : i1 to i32
    %c0_i32_0 = arith.constant 0 : i32
    %2 = arith.cmpi ne, %1, %c0_i32_0 : i32
    scf.if %2 {
      %cst_16 = arith.constant 0.000000e+00 : f32
      %31 = vector.broadcast %cst_16 : f32 to vector<49x512xf32>
      %c0_17 = arith.constant 0 : index
      %c0_18 = arith.constant 0 : index
      %32 = vector.load %arg9[%c0_17, %c0_18] : memref<49x512xf32, #tpu.memory_space<vmem>>, vector<49x512xf32>
      tpu.vector_store %arg9[%c0_17, %c0_18], %31 {strides = array<i32>} : memref<49x512xf32, #tpu.memory_space<vmem>>, vector<49x512xf32>,
    } else {
    }
    %3 = arith.index_cast %arg0 : i32 to index
    %c0 = arith.constant 0 : index
    %c0_1 = arith.constant 0 : index
    %4 = vector.load %arg1[%3, %c0, %c0_1] : memref<9x9x512xf32, #tpu.memory_space<vmem>>, vector<7x9x512xf32>
    %c0_2 = arith.constant 0 : index
    %c0_3 = arith.constant 0 : index
    %5 = vector.load %arg9[%c0_2, %c0_3] : memref<49x512xf32, #tpu.memory_space<vmem>>, vector<49x512xf32>
    %6 = vector.extract_strided_slice %4 {offsets = [0, 0, 0], sizes = [7, 7, 512], strides = [1, 1, 1]} : vector<7x9x512xf32> to vector<7x7x512xf32>
    %7 = vector.shape_cast %6 : vector<7x7x512xf32> to vector<49x512xf32>
    %8 = arith.truncf %7 : vector<49x512xf32> to vector<49x512xbf16>
    %c0_4 = arith.constant 0 : index
    %c0_5 = arith.constant 0 : index
    %c0_6 = arith.constant 0 : index
    %9 = vector.load %arg2[%c0_4, %c0_5, %c0_6] : memref<3x512x512xbf16, #tpu.memory_space<vmem>>, vector<1x512x512xbf16>
    %10 = vector.shape_cast %9 : vector<1x512x512xbf16> to vector<512x512xbf16>
    %cst = arith.constant dense<0.000000e+00> : vector<49x512xf32>
    %11 = tpu.matmul %8, %10, %cst {dimension_numbers = #tpu.dot_dimension_numbers<[1], [0], [0], [1], [0, 0, 1, 1], [], []>} : vector<49x512xbf16>, vector<512x512xbf16>, vector<49x512xf32> -> vector<49x512xf32>
    %12 = vector.extract_strided_slice %4 {offsets = [0, 1, 0], sizes = [7, 7, 512], strides = [1, 1, 1]} : vector<7x9x512xf32> to vector<7x7x512xf32>
    %13 = vector.shape_cast %12 : vector<7x7x512xf32> to vector<49x512xf32>
    %14 = arith.truncf %13 : vector<49x512xf32> to vector<49x512xbf16>
    %c1 = arith.constant 1 : index
    %c0_7 = arith.constant 0 : index
    %c0_8 = arith.constant 0 : index
    %15 = vector.load %arg2[%c1, %c0_7, %c0_8] : memref<3x512x512xbf16, #tpu.memory_space<vmem>>, vector<1x512x512xbf16>
    %16 = vector.shape_cast %15 : vector<1x512x512xbf16> to vector<512x512xbf16>
    %cst_9 = arith.constant dense<0.000000e+00> : vector<49x512xf32>
    %17 = tpu.matmul %14, %16, %cst_9 {dimension_numbers = #tpu.dot_dimension_numbers<[1], [0], [0], [1], [0, 0, 1, 1], [], []>} : vector<49x512xbf16>, vector<512x512xbf16>, vector<49x512xf32> -> vector<49x512xf32>
    %18 = arith.addf %11, %17 : vector<49x512xf32>
    %19 = vector.extract_strided_slice %4 {offsets = [0, 2, 0], sizes = [7, 7, 512], strides = [1, 1, 1]} : vector<7x9x512xf32> to vector<7x7x512xf32>
    %20 = vector.shape_cast %19 : vector<7x7x512xf32> to vector<49x512xf32>
    %21 = arith.truncf %20 : vector<49x512xf32> to vector<49x512xbf16>
    %c2 = arith.constant 2 : index
    %c0_10 = arith.constant 0 : index
    %c0_11 = arith.constant 0 : index
    %22 = vector.load %arg2[%c2, %c0_10, %c0_11] : memref<3x512x512xbf16, #tpu.memory_space<vmem>>, vector<1x512x512xbf16>
    %23 = vector.shape_cast %22 : vector<1x512x512xbf16> to vector<512x512xbf16>
    %cst_12 = arith.constant dense<0.000000e+00> : vector<49x512xf32>
    %24 = tpu.matmul %21, %23, %cst_12 {dimension_numbers = #tpu.dot_dimension_numbers<[1], [0], [0], [1], [0, 0, 1, 1], [], []>} : vector<49x512xbf16>, vector<512x512xbf16>, vector<49x512xf32> -> vector<49x512xf32>
    %25 = arith.addf %18, %24 : vector<49x512xf32>
    %26 = arith.addf %5, %25 : vector<49x512xf32>
    %c0_13 = arith.constant 0 : index
    %c0_14 = arith.constant 0 : index
    %27 = vector.load %arg9[%c0_13, %c0_14] : memref<49x512xf32, #tpu.memory_space<vmem>>, vector<49x512xf32>
    tpu.vector_store %arg9[%c0_13, %c0_14], %26 {strides = array<i32>} : memref<49x512xf32, #tpu.memory_space<vmem>>, vector<49x512xf32>,
    %c2_i32 = arith.constant 2 : i32
    %28 = arith.cmpi eq, %arg0, %c2_i32 : i32
    %29 = arith.extui %28 : i1 to i32
    %c0_i32_15 = arith.constant 0 : i32
    %30 = arith.cmpi ne, %29, %c0_i32_15 : i32
    scf.if %30 {
      %c0_16 = arith.constant 0 : index
      %c0_17 = arith.constant 0 : index
      %31 = vector.load %arg9[%c0_16, %c0_17] : memref<49x512xf32, #tpu.memory_space<vmem>>, vector<49x512xf32>
      %cst_18 = arith.constant dense<0.000000e+00> : vector<512xf32>
      %32 = vector.multi_reduction <add>, %31, %cst_18 [0] : vector<49x512xf32> to vector<512xf32>
      %33 = vector.shape_cast %32 : vector<512xf32> to vector<1x512xf32>
      %cst_19 = arith.constant 0.0204081628 : f32
      %34 = vector.broadcast %cst_19 : f32 to vector<1x512xf32>
      %35 = arith.mulf %33, %34 : vector<1x512xf32>
      %36 = arith.mulf %31, %31 : vector<49x512xf32>
      %cst_20 = arith.constant dense<0.000000e+00> : vector<512xf32>
      %37 = vector.multi_reduction <add>, %36, %cst_20 [0] : vector<49x512xf32> to vector<512xf32>
      %38 = vector.shape_cast %37 : vector<512xf32> to vector<1x512xf32>
      %cst_21 = arith.constant 0.0204081628 : f32
      %39 = vector.broadcast %cst_21 : f32 to vector<1x512xf32>
      %40 = arith.mulf %38, %39 : vector<1x512xf32>
      %41 = arith.mulf %35, %35 : vector<1x512xf32>
      %42 = arith.subf %40, %41 : vector<1x512xf32>
      %cst_22 = arith.constant 0.000000e+00 : f32
      %43 = vector.broadcast %cst_22 : f32 to vector<1x512xf32>
      %44 = arith.maximumf %42, %43 : vector<1x512xf32>
      %c0_23 = arith.constant 0 : index
      %c0_24 = arith.constant 0 : index
      %45 = vector.load %arg3[%c0_23, %c0_24] : memref<1x512xf32, #tpu.memory_space<vmem>>, vector<1x512xf32>
      %cst_25 = arith.constant 9.99999974E-6 : f32
      %46 = vector.broadcast %cst_25 : f32 to vector<1x512xf32>
      %47 = arith.addf %44, %46 : vector<1x512xf32>
      %48 = math.rsqrt %47 : vector<1x512xf32>
      %49 = arith.mulf %45, %48 : vector<1x512xf32>
      %c0_26 = arith.constant 0 : index
      %c0_27 = arith.constant 0 : index
      %50 = vector.load %arg4[%c0_26, %c0_27] : memref<1x512xf32, #tpu.memory_space<vmem>>, vector<1x512xf32>
      %51 = arith.mulf %35, %49 : vector<1x512xf32>
      %52 = arith.subf %50, %51 : vector<1x512xf32>
      %53 = vector.broadcast %49 : vector<1x512xf32> to vector<49x512xf32>
      %54 = arith.mulf %31, %53 : vector<49x512xf32>
      %55 = vector.broadcast %52 : vector<1x512xf32> to vector<49x512xf32>
      %56 = arith.addf %54, %55 : vector<49x512xf32>
      %cst_28 = arith.constant 0.000000e+00 : f32
      %57 = vector.broadcast %cst_28 : f32 to vector<49x512xf32>
      %58 = arith.maximumf %56, %57 : vector<49x512xf32>
      %59 = arith.truncf %58 : vector<49x512xf32> to vector<49x512xbf16>
      %c0_29 = arith.constant 0 : index
      %c0_30 = arith.constant 0 : index
      %60 = vector.load %arg5[%c0_29, %c0_30] : memref<512x2048xbf16, #tpu.memory_space<vmem>>, vector<512x2048xbf16>
      %cst_31 = arith.constant dense<0.000000e+00> : vector<49x2048xf32>
      %61 = tpu.matmul %59, %60, %cst_31 {dimension_numbers = #tpu.dot_dimension_numbers<[1], [0], [0], [1], [0, 0, 1, 1], [], []>} : vector<49x512xbf16>, vector<512x2048xbf16>, vector<49x2048xf32> -> vector<49x2048xf32>
      %cst_32 = arith.constant dense<0.000000e+00> : vector<2048xf32>
      %62 = vector.multi_reduction <add>, %61, %cst_32 [0] : vector<49x2048xf32> to vector<2048xf32>
      %63 = vector.shape_cast %62 : vector<2048xf32> to vector<1x2048xf32>
      %cst_33 = arith.constant 0.0204081628 : f32
      %64 = vector.broadcast %cst_33 : f32 to vector<1x2048xf32>
      %65 = arith.mulf %63, %64 : vector<1x2048xf32>
      %66 = arith.mulf %61, %61 : vector<49x2048xf32>
      %cst_34 = arith.constant dense<0.000000e+00> : vector<2048xf32>
      %67 = vector.multi_reduction <add>, %66, %cst_34 [0] : vector<49x2048xf32> to vector<2048xf32>
      %68 = vector.shape_cast %67 : vector<2048xf32> to vector<1x2048xf32>
      %cst_35 = arith.constant 0.0204081628 : f32
      %69 = vector.broadcast %cst_35 : f32 to vector<1x2048xf32>
      %70 = arith.mulf %68, %69 : vector<1x2048xf32>
      %71 = arith.mulf %65, %65 : vector<1x2048xf32>
      %72 = arith.subf %70, %71 : vector<1x2048xf32>
      %cst_36 = arith.constant 0.000000e+00 : f32
      %73 = vector.broadcast %cst_36 : f32 to vector<1x2048xf32>
      %74 = arith.maximumf %72, %73 : vector<1x2048xf32>
      %c0_37 = arith.constant 0 : index
      %c0_38 = arith.constant 0 : index
      %75 = vector.load %arg6[%c0_37, %c0_38] : memref<1x2048xf32, #tpu.memory_space<vmem>>, vector<1x2048xf32>
      %cst_39 = arith.constant 9.99999974E-6 : f32
      %76 = vector.broadcast %cst_39 : f32 to vector<1x2048xf32>
      %77 = arith.addf %74, %76 : vector<1x2048xf32>
      %78 = math.rsqrt %77 : vector<1x2048xf32>
      %79 = arith.mulf %75, %78 : vector<1x2048xf32>
      %c0_40 = arith.constant 0 : index
      %c0_41 = arith.constant 0 : index
      %80 = vector.load %arg7[%c0_40, %c0_41] : memref<1x2048xf32, #tpu.memory_space<vmem>>, vector<1x2048xf32>
      %81 = arith.mulf %65, %79 : vector<1x2048xf32>
      %82 = arith.subf %80, %81 : vector<1x2048xf32>
      %83 = vector.broadcast %79 : vector<1x2048xf32> to vector<49x2048xf32>
      %84 = arith.mulf %61, %83 : vector<49x2048xf32>
      %85 = vector.broadcast %82 : vector<1x2048xf32> to vector<49x2048xf32>
      %86 = arith.addf %84, %85 : vector<49x2048xf32>
      %c0_42 = arith.constant 0 : index
      %c0_43 = arith.constant 0 : index
      %87 = vector.load %arg8[%c0_42, %c0_43] : memref<49x2048xf32, #tpu.memory_space<vmem>>, vector<49x2048xf32>
      tpu.vector_store %arg8[%c0_42, %c0_43], %86 {strides = array<i32>} : memref<49x2048xf32, #tpu.memory_space<vmem>>, vector<49x2048xf32>,
    } else {
    }
    return
  }
  func.func @transform_0(%arg0: i32) -> (i32, i32, i32) {
    %c0_i32 = arith.constant 0 : i32
    %c0_i32_0 = arith.constant 0 : i32
    %c0_i32_1 = arith.constant 0 : i32
    %c0_i32_2 = arith.constant 0 : i32
    return %c0_i32, %c0_i32_0, %c0_i32_1 : i32, i32, i32
  }
  func.func @transform_1(%arg0: i32) -> (i32, i32, i32) {
    %c0_i32 = arith.constant 0 : i32
    %c0_i32_0 = arith.constant 0 : i32
    %c0_i32_1 = arith.constant 0 : i32
    return %arg0, %c0_i32, %c0_i32_0 : i32, i32, i32
  }
  func.func @transform_2(%arg0: i32) -> (i32, i32) {
    %c0_i32 = arith.constant 0 : i32
    %c0_i32_0 = arith.constant 0 : i32
    %c0_i32_1 = arith.constant 0 : i32
    return %c0_i32, %c0_i32_0 : i32, i32
  }
  func.func @transform_3(%arg0: i32) -> (i32, i32) {
    %c0_i32 = arith.constant 0 : i32
    %c0_i32_0 = arith.constant 0 : i32
    %c0_i32_1 = arith.constant 0 : i32
    return %c0_i32, %c0_i32_0 : i32, i32
  }
  func.func @transform_4(%arg0: i32) -> (i32, i32) {
    %c0_i32 = arith.constant 0 : i32
    %c0_i32_0 = arith.constant 0 : i32
    %c0_i32_1 = arith.constant 0 : i32
    return %c0_i32, %c0_i32_0 : i32, i32
  }
  func.func @transform_5(%arg0: i32) -> (i32, i32) {
    %c0_i32 = arith.constant 0 : i32
    %c0_i32_0 = arith.constant 0 : i32
    %c0_i32_1 = arith.constant 0 : i32
    return %c0_i32, %c0_i32_0 : i32, i32
  }
  func.func @transform_6(%arg0: i32) -> (i32, i32) {
    %c0_i32 = arith.constant 0 : i32
    %c0_i32_0 = arith.constant 0 : i32
    %c0_i32_1 = arith.constant 0 : i32
    return %c0_i32, %c0_i32_0 : i32, i32
  }
  func.func @transform_7(%arg0: i32) -> (i32, i32) {
    %c0_i32 = arith.constant 0 : i32
    %c0_i32_0 = arith.constant 0 : i32
    %c0_i32_1 = arith.constant 0 : i32
    return %c0_i32, %c0_i32_0 : i32, i32
  }
}

</mosaic_0001>

<bundles_post_ra>
// kernel: fused_forward.1
= control target key start
LH: loop header
LB: loop body
LE: loop exit
PB: predicated region body
PF: predicated region fallthrough
CT: control target
= control target key end

     0   :  { %12 = vsyncpa [#allocation4], 0  ;;  %s19033_s0 = inlined_call_operand.vmem [shape: f32[9,9,512], index: 0, kind: input, shape index: {}]   ;;  %s19034_s1 = inlined_call_operand.hbm [shape: bf16[9,512,512], index: 1, kind: input, shape index: {}]   ;;  %s19035_s2 = inlined_call_operand.hbm [shape: f32[1,512], index: 2, kind: input, shape index: {}]   ;;  %s19036_s3 = inlined_call_operand.hbm [shape: f32[1,512], index: 3, kind: input, shape index: {}]   ;;  %s19037_s4 = inlined_call_operand.hbm [shape: bf16[512,2048], index: 4, kind: input, shape index: {}]   ;;  %s19038_s5 = inlined_call_operand.hbm [shape: f32[1,2048], index: 5, kind: input, shape index: {}]   ;;  %s19039_s6 = inlined_call_operand.hbm [shape: f32[1,2048], index: 6, kind: input, shape index: {}]   ;;  %s19040_s7 = inlined_call_operand.vmem [shape: f32[49,2048], index: 7, kind: output, shape index: {}]  }
   0x1   :  { %14 = vsyncpa [#allocation4 + $0x1], 0 }
   0x2   :  { %15 = vsyncpa [#allocation6], 0 }
   0x3   :  { %16 = vsyncpa [#allocation9], 0 }
   0x4   :  { %17 = vsyncpa [#allocation12], 0  ;;  %s14042_s24 = smov 0   ;;  %s14044_s25 = smov 0  }
   0x5   :  { %s14046_s26 = smov 0   ;;  %s14048_s27 = smov 0  }
   0x6 LB: > { %s13990_s28 = smov [#allocation5]   ;;  %s14063_s30 = sadd.s32 4294967295, %s13988_s27   ;;  %s13988_s27 = sphi %s14048_s27, %s19721_s27   ;;  %s13984_s26 = sphi %s14046_s26, %s19720_s26   ;;  %s13980_s25 = sphi %s14044_s25, %s19719_s25   ;;  %s13976_s24 = sphi %s14042_s24, %s19718_s24  }
   0x7   : > { %s217_s29 = sshll.u32 %s13990_s28, 4  ;;  %p11823_p0 = scmp.ge.s32.totalorder %s13988_s27, 1  ;;  %s218_s29 = int_to_ptr.vmem [resolvable:$true] %s217_s29 }
   0x8   : > { %p19041_p1 = scmp.eq.s32.totalorder %s14063_s30, 0  ;;  %p201_p2 = scmp.lt.s32.totalorder %s13988_s27, 4 }
   0x9   : > { %s13991_s9 = smov [#allocation8]   ;;  %s13992_s12 = smov [#allocation7]  }
   0xa   : > { %p14069_p4 = pnand %p11823_p0, %p201_p2  ;;  %s238_s10 = sshll.u32 %s13991_s9, 4  ;;  %s14075_s10 = int_to_ptr.vmem [resolvable:$true] %s238_s10 }
   0xb   : > { %s228_s13 = sshll.u32 %s13992_s12, 4  ;;  %s13795_s15 = scalar_lea.vmem %s218_s29, 64  ;;  %s14083_s13 = int_to_ptr.vmem [resolvable:$true] %s228_s13 }
   0xc   : > { %s19223_s8 = scalar_select %p14069_p4, 1, 0 }
   0xd   : > { %p13038_p5 = pneg %p14069_p4  ;;  %p13796_p8 = scmp.ne.s32.totalorder %s218_s29, %s13795_s15 }
   0xe   : > { %p13803_p11 = scmp.lt.s32.totalorder %s218_s29, %s218_s29  ;;  %p13804_p12 = scmp.lt.s32.totalorder %s13795_s15, %s13795_s15 }
   0xf   : > { %p14079_p6 = pnand %p13038_p5, %p19041_p1 }
  0x10   : > { %p13805_p13 = por %p13804_p12, %p13803_p11 }
  0x11   : > { %p14087_p7 = pneg %p14079_p6 }
  0x13   : > { %p13798_p9 = pnand %p13796_p8, %p14087_p7 }
  0x15   : > { %p13799_p10 = pneg %p13798_p9 }
  0x17   : > { %p13806_p0 = pnand %p13805_p13, %p13799_p10 }
  0x19   : > { %13809 = shalt.err (!%p13806_p0)
}
  0x1a   : > { %13041 = dma.hbm_to_vmem [thread:$0]  (!%p14079_p6), %s19035_s2, 64, %s218_s29, [#allocation6]  }
  0x1b   : > { %s13821_s18 = scalar_lea.vmem %s14075_s10, 65536  ;;  %p13829_p9 = scmp.lt.s32.totalorder %s14075_s10, %s14075_s10 }
  0x1c   : > { %p13822_p2 = scmp.ne.s32.totalorder %s14075_s10, %s13821_s18  ;;  %p13830_p11 = scmp.lt.s32.totalorder %s13821_s18, %s13821_s18 }
  0x1e   : > { %p13824_p5 = pnand %p13822_p2, %p14087_p7  ;;  %p13831_p10 = por %p13830_p11, %p13829_p9 }
  0x20   : > { %p13825_p8 = pneg %p13824_p5 }
  0x22   : > { %p13832_p12 = pnand %p13831_p10, %p13825_p8 }
  0x24   : > { %13835 = shalt.err (!%p13832_p12)
}
  0x25   : > { %s13993_s19 = smov 1024   ;;  %s13994_s20 = smov 64  }
  0x26   : > { %13047 = dma.hbm_to_vmem [thread:$0]  (!%p14079_p6), %s19037_s4, 65536, %s14075_s10, [#allocation9], %s13993_s19, %s13993_s19, %s13994_s20  }
  0x27   : > { %s13847_s23 = scalar_lea.vmem %s14083_s13, 64  ;;  %p13855_p5 = scmp.lt.s32.totalorder %s14083_s13, %s14083_s13 }
  0x28   : > { %p13848_p13 = scmp.ne.s32.totalorder %s14083_s13, %s13847_s23  ;;  %p13856_p8 = scmp.lt.s32.totalorder %s13847_s23, %s13847_s23 }
  0x2a   : > { %p13850_p0 = pnand %p13848_p13, %p14087_p7  ;;  %p13857_p9 = por %p13856_p8, %p13855_p5 }
  0x2c   : > { %p13851_p2 = pneg %p13850_p0 }
  0x2e   : > { %p13858_p11 = pnand %p13857_p9, %p13851_p2 }
  0x30   : > { %13861 = shalt.err (!%p13858_p11)
}
  0x31   : > { %13044 = dma.hbm_to_vmem [thread:$0]  (!%p14079_p6), %s19036_s3, 64, %s14083_s13, [#allocation6]  }
  0x32   : > { %s13995_s9 = smov [#allocation10]   ;;  %s13996_s12 = smov [#allocation11]  }
  0x33   : > { %s252_s10 = sshll.u32 %s13995_s9, 4  ;;  %s263_s15 = sshll.u32 %s13996_s12, 4  ;;  %s253_s10 = int_to_ptr.vmem [resolvable:$true] %s252_s10  ;;  %s264_s15 = int_to_ptr.vmem [resolvable:$true] %s263_s15 }
  0x34   : > { %s13873_s16 = scalar_lea.vmem %s253_s10, 256  ;;  %p13881_p0 = scmp.lt.s32.totalorder %s253_s10, %s253_s10 }
  0x35   : > { %p13874_p10 = scmp.ne.s32.totalorder %s253_s10, %s13873_s16  ;;  %p13882_p2 = scmp.lt.s32.totalorder %s13873_s16, %s13873_s16 }
  0x37   : > { %p13876_p12 = pnand %p13874_p10, %p14087_p7  ;;  %p13883_p5 = por %p13882_p2, %p13881_p0 }
  0x39   : > { %p13877_p13 = pneg %p13876_p12 }
  0x3b   : > { %p13884_p8 = pnand %p13883_p5, %p13877_p13 }
  0x3d   : > { %13887 = shalt.err (!%p13884_p8)
}
  0x3e   : > { %13050 = dma.hbm_to_vmem [thread:$0]  (!%p14079_p6), %s19038_s5, 256, %s253_s10, [#allocation9]  }
  0x3f   : > { %s13899_s13 = scalar_lea.vmem %s264_s15, 256  ;;  %p13907_p10 = scmp.lt.s32.totalorder %s264_s15, %s264_s15 }
  0x40   : > { %p13900_p9 = scmp.ne.s32.totalorder %s264_s15, %s13899_s13  ;;  %p13908_p12 = scmp.lt.s32.totalorder %s13899_s13, %s13899_s13 }
  0x42   : > { %p13902_p11 = pnand %p13900_p9, %p14087_p7  ;;  %p13909_p1 = por %p13908_p12, %p13907_p10 }
  0x44   : > { %p13903_p3 = pneg %p13902_p11 }
  0x46   : > { %p13910_p4 = pnand %p13909_p1, %p13903_p3 }
  0x48   : > { %13913 = shalt.err (!%p13910_p4)
}
  0x49   : > { %13053 = dma.hbm_to_vmem [thread:$0]  (!%p14079_p6), %s19039_s6, 256, %s264_s15, [#allocation12]  }
  0x4a   : > { %s14137_s14 = sadd.s32 1, %s13988_s27   ;;  %s51_s21 = sadd.s32 1, %s13984_s26 }
  0x4b   : > { %s48_s11 = ssub.s32 %s13988_s27, %s14137_s14  ;;  %p58_p3 = scmp.ne.s32.totalorder %s13984_s26, %s13980_s25 }
  0x4c   : > { %p49_p1 = scmp.eq.s32.totalorder %s48_s11, 0  ;;  %p59_p4 = scmp.eq.s32.totalorder %s13988_s27, 0 }
  0x4d   : > { %p64_p7 = scmp.ne.s32.totalorder %s13980_s25, %s13976_s24  ;;  %p19226_p0 = scmp.eq.s32.totalorder %s14063_s30, 0 }
  0x4e   : > { %s14148_s22 = scalar_select %p49_p1, %s13984_s26, %s51_s21  }
  0x4f   : > { %p60_p13 = por %p59_p4, %p58_p3  ;;  %p14152_p2 = por %p19226_p0, %p64_p7 }
  0x50   : > { %p13063_p5 = scmp.lt.s32.totalorder %s13988_s27, 3  ;;  %s274_s28 = sand.u32 1, %s13984_s26  }
  0x51   : > { %s19227_s23 = scalar_select %p14152_p2, 1, 0 }
  0x52   : > { %s13014_s29 = smul.u32 3072, %s274_s28  ;;  %p14159_p6 = pnand %p13063_p5, %p60_p13 }
  0x53   : > { %s13013_s9 = smul.u32 49152, %s13988_s27  ;;  %s14170_s18 = scalar_lea.sflag [#allocation4], %s274_s28 }
  0x54   : > { %s278_s16 = scalar_lea.vmem [#allocation3], %s13014_s29  ;;  %p13916_p9 = pneg %p14159_p6 }
  0x55   : > { %s14166_s24 = scalar_lea.hbm %s19034_s1, %s13013_s9  ;;  %s286_s17 = sshll.u32 %s278_s16, 4  ;;  %s14168_s17 = int_to_ptr.vmem [resolvable:$true] %s286_s17 }
  0x56   : > { %s13914_s27 = scalar_lea.hbm %s14166_s24, 49152  ;;  %s13919_s20 = scalar_lea.hbm %s19034_s1, 147456 }
  0x57   : > { %p13915_p8 = scmp.ne.s32.totalorder %s14166_s24, %s13914_s27  ;;  %p13920_p12 = scmp.lt.s32.totalorder %s14166_s24, %s19034_s1 }
  0x58   : > { %p13921_p1 = scmp.lt.s32.totalorder %s13919_s20, %s13914_s27 }
  0x59   : > { %p13917_p11 = pnand %p13916_p9, %p13915_p8 }
  0x5a   : > { %p13922_p3 = por %p13921_p1, %p13920_p12 }
  0x5b   : > { %p13918_p10 = pneg %p13917_p11 }
  0x5d   : > { %p13923_p4 = pnand %p13922_p3, %p13918_p10 }
  0x5f   : > { %13926 = shalt.err (!%p13923_p4)
}
  0x60   : > { %s13927_s28 = scalar_lea.vmem %s14168_s17, 49152  ;;  %s13997_s29 = smov [#allocation3]  }
  0x61   : > { %p13928_p7 = scmp.ne.s32.totalorder %s14168_s17, %s13927_s28  ;;  %s13932_s9 = sshll.u32 %s13997_s29, 4  ;;  %s13933_s9 = int_to_ptr.vmem [resolvable:$false] %s13932_s9 }
  0x62   : > { %s13934_s12 = scalar_lea.vmem %s13933_s9, 98304  ;;  %p13935_p5 = scmp.lt.s32.totalorder %s14168_s17, %s13933_s9 }
  0x63   : > { %p13930_p13 = pnand %p13928_p7, %p13916_p9  ;;  %p13936_p8 = scmp.lt.s32.totalorder %s13934_s12, %s13927_s28 }
  0x65   : > { %p13931_p0 = pneg %p13930_p13  ;;  %p13937_p11 = por %p13936_p8, %p13935_p5 }
  0x67   : > { %p13938_p2 = pnand %p13937_p11, %p13931_p0 }
  0x69   : > { %13941 = shalt.err (!%p13938_p2)
}
  0x6a   : > { %s13998_s15 = smov 256   ;;  %s13999_s16 = smov 16  }
  0x6b   : > { %13057 = dma.hbm_to_vmem [thread:$0]  (!%p14159_p6), %s14166_s24, 49152, %s14168_s17, %s14170_s18, %s13998_s15, %s13998_s15, %s13999_s16  }
  0x6c   : > { %p19229_p9 = scmp.ne.s32.totalorder %s19223_s8, 0 }
  0x6e   : > { %298 = sbr.rel (%p19229_p9) target bundleno = 1718 (0x6b6), region = 48 }
  0x73   : > { %s300_s27 = sand.u32 1, %s13980_s25   ;;  %p19230_p10 = scmp.ne.s32.totalorder %s19227_s23, 0 }
  0x74   : > { %s13015_s13 = smul.u32 3072, %s300_s27  ;;  %s301_s19 = scalar_lea.sflag [#allocation4], %s300_s27 }
  0x76   : > { %s14194_s20 = scalar_lea.vmem [#allocation3], %s13015_s13 }
  0x77   : > { %13959 = dma.done.wait (%p19230_p10), %s301_s19, 49152  }
  0x78   : > { %13961 = vsyncadd (%p19230_p10), %s301_s19, 4294918144  ;;  %p19231_p2 = scmp.eq.s32.totalorder %s14063_s30, 0 }
  0x7a   : > { %13963 = dma.done.wait (%p19231_p2), [#allocation6], 128   ;;  %p19232_p6 = pmov %p19231_p2 }
  0x7b   : > { %p19233_p12 = pmov %p19231_p2 }
  0x7c   : > { %13965 = vsyncadd (%p19232_p6), [#allocation6], 4294967168 }
  0x7d   : > { %13967 = dma.done.wait (%p19233_p12), [#allocation9], 65792   ;;  %p19234_p1 = pmov %p19231_p2 }
  0x7f   : > { %13969 = vsyncadd (%p19234_p1), [#allocation9], 4294901504  ;;  %p19235_p3 = pmov %p19234_p1 }
  0x80   : > { %p19236_p4 = pmov %p19234_p1 }
  0x81   : > { %13971 = dma.done.wait (%p19235_p3), [#allocation12], 256  }
  0x82   : > { %13973 = vsyncadd (%p19236_p4), [#allocation12], 4294967040  ;;  %p19237_p7 = scmp.ne.s32.totalorder %s14063_s30, 0 }
  0x84   : > { %354 = sbr.rel (%p19237_p7) target bundleno = 152 (0x98), region = 76 }
  0x89   : > { %v14000_v0 = vmov 0.0  }
  0x8a   : > { %355 = vst [vmem:[#allocation2 + $0xb0] sm:$0xff] %v14000_v0  ;;  %356 = vst [vmem:[#allocation2] sm:$0xff] %v14000_v0 }
  0x8b   : > { %357 = vst [vmem:[#allocation2 + $0xd8] sm:$0xff] %v14000_v0  ;;  %358 = vst [vmem:[#allocation2 + $0x18] sm:$0xff] %v14000_v0 }
  0x8c   : > { %359 = vst [vmem:[#allocation2 + $0x50] sm:$0xff] %v14000_v0  ;;  %360 = vst [vmem:[#allocation2 + $0x68] sm:$0xff] %v14000_v0 }
  0x8d   : > { %361 = vst [vmem:[#allocation2 + $0x30] sm:$0xff] %v14000_v0  ;;  %362 = vst [vmem:[#allocation2 + $0x48] sm:$0xff] %v14000_v0 }
  0x8e   : > { %363 = vst [vmem:[#allocation2 + $0x80] sm:$0xff] %v14000_v0  ;;  %364 = vst [vmem:[#allocation2 + $0x88] sm:$0xff] %v14000_v0 }
  0x8f   : > { %365 = vst [vmem:[#allocation2 + $0x8] sm:$0xff] %v14000_v0  ;;  %366 = vst [vmem:[#allocation2 + $0x58] sm:$0xff] %v14000_v0 }
  0x90   : > { %367 = vst [vmem:[#allocation2 + $0x38] sm:$0xff] %v14000_v0  ;;  %368 = vst [vmem:[#allocation2 + $0x90] sm:$0xff] %v14000_v0 }
  0x91   : > { %369 = vst [vmem:[#allocation2 + $0x78] sm:$0xff] %v14000_v0  ;;  %370 = vst [vmem:[#allocation2 + $0xb8] sm:$0xff] %v14000_v0 }
  0x92   : > { %371 = vst [vmem:[#allocation2 + $0x40] sm:$0xff] %v14000_v0  ;;  %372 = vst [vmem:[#allocation2 + $0x28] sm:$0xff] %v14000_v0 }
  0x93   : > { %373 = vst [vmem:[#allocation2 + $0xc0] sm:$0xff] %v14000_v0  ;;  %374 = vst [vmem:[#allocation2 + $0x60] sm:$0xff] %v14000_v0 }
  0x94   : > { %375 = vst [vmem:[#allocation2 + $0xd0] sm:$0xff] %v14000_v0  ;;  %376 = vst [vmem:[#allocation2 + $0xa8] sm:$0xff] %v14000_v0 }
  0x95   : > { %377 = vst [vmem:[#allocation2 + $0x98] sm:$0xff] %v14000_v0  ;;  %378 = vst [vmem:[#allocation2 + $0xa0] sm:$0xff] %v14000_v0 }
  0x96   : > { %379 = vst [vmem:[#allocation2 + $0x20] sm:$0x1] %v14000_v0  ;;  %380 = vst [vmem:[#allocation2 + $0x10] sm:$0x1] %v14000_v0 }
  0x97   : > { %381 = vst [vmem:[#allocation2 + $0xc8] sm:$0x1] %v14000_v0  ;;  %382 = vst [vmem:[#allocation2 + $0x70] sm:$0x1] %v14000_v0 }
  0x98 PF: > { %v13112_v1 = vld [vmem:[%s14194_s20 + $0x4e4] ss:$16 sps:$4 sm:$0xff]   ;;  %v13116_v3 = vld [vmem:[%s14194_s20 + $0x4e0] ss:$16 sps:$4 sm:$0xff]   ;;  %v14001_v42 = vmov 1966171168   ;;  %v505_v44 = vlaneseq }
  0x99   : > { %v13114_v2 = vld [vmem:[%s14194_s20 + $0x6e4] ss:$16 sps:$4 sm:$0xff]   ;;  %2823 = vmatprep.subr.bf16.mxu0 %v13112_v1  ;;  %v13117_v4 = vld [vmem:[%s14194_s20 + $0x6e0] ss:$16 sps:$4 sm:$0xff]   ;;  %v503_v43 = vunpack.c.l.s4 %v14001_v42  ;;  %s13012_s8 = sshll.u32 %s14063_s30, 6  ;;  %p12495_p13 = scmp.ne.s32.totalorder %s14063_s30, 2 }
  0x9a   : > { %2894 = vmatprep.subr.bf16.mxu1 %v13114_v2  ;;  %v13118_v5 = vld [vmem:[%s14194_s20 + $0x4c4] ss:$16 sps:$4 sm:$0xff]   ;;  %2824 = vmatpush1.bf16.msra.mxu0 %v13116_v3  ;;  %v13122_v7 = vld [vmem:[%s14194_s20 + $0x4c0] ss:$16 sps:$4 sm:$0xff]   ;;  %v14260_v50 = vshrl.u32 %v505_v44, 7  ;;  %s14266_s24 = scalar_lea.vmem %s19033_s0, %s13012_s8 }
  0x9b   : > { %2895 = vmatpush1.bf16.msra.mxu1 %v13117_v4  ;;  %v13120_v6 = vld [vmem:[%s14194_s20 + $0x6c4] ss:$16 sps:$4 sm:$0xff]   ;;  %2825 = vmatprep.subr.bf16.mxu0 %v13118_v5  ;;  %v13123_v8 = vld [vmem:[%s14194_s20 + $0x6c0] ss:$16 sps:$4 sm:$0xff]   ;;  %v504_v49 = vunpack.c.0.s8 %v503_v43 }
  0x9c   : > { %2896 = vmatprep.subr.bf16.mxu1 %v13120_v6  ;;  %v13124_v9 = vld [vmem:[%s14194_s20 + $0x4a4] ss:$16 sps:$4 sm:$0xff]   ;;  %v13128_v11 = vld [vmem:[%s14194_s20 + $0x4a0] ss:$16 sps:$4 sm:$0xff]   ;;  %19238 = vst [vmem:[#allocation17_spill] sm:$0xff] %v14260_v50 }
  0x9d   : > { %v13126_v10 = vld [vmem:[%s14194_s20 + $0x6a4] ss:$16 sps:$4 sm:$0xff]   ;;  %v13129_v12 = vld [vmem:[%s14194_s20 + $0x6a0] ss:$16 sps:$4 sm:$0xff]   ;;  %v14273_v56 = vsub.s32 %v504_v49, %v14260_v50  ;;  %v13300_v50 = vld [vmem:[%s14194_s20 + $0x5ac] ss:$16 sps:$4 sm:$0xff]  }
  0x9e   : > { %2826 = vmatpush1.bf16.msra.mxu0 %v13122_v7  ;;  %v13130_v13 = vld [vmem:[%s14194_s20 + $0x484] ss:$16 sps:$4 sm:$0xff]   ;;  %v13134_v15 = vld [vmem:[%s14194_s20 + $0x480] ss:$16 sps:$4 sm:$0xff]  }
  0x9f   : > { %2897 = vmatpush1.bf16.msra.mxu1 %v13123_v8  ;;  %2827 = vmatprep.subr.bf16.mxu0 %v13124_v9  ;;  %v13132_v14 = vld [vmem:[%s14194_s20 + $0x684] ss:$16 sps:$4 sm:$0xff]   ;;  %v13135_v16 = vld [vmem:[%s14194_s20 + $0x680] ss:$16 sps:$4 sm:$0xff]   ;;  %19239 = vst [vmem:[#allocation18_spill] sm:$0xff] %v14273_v56 }
  0xa0   : > { %2898 = vmatprep.subr.bf16.mxu1 %v13126_v10  ;;  %v13136_v17 = vld [vmem:[%s14194_s20 + $0x464] ss:$16 sps:$4 sm:$0xff]   ;;  %v13140_v19 = vld [vmem:[%s14194_s20 + $0x460] ss:$16 sps:$4 sm:$0xff]  }
  0xa1   : > { %v13138_v18 = vld [vmem:[%s14194_s20 + $0x664] ss:$16 sps:$4 sm:$0xff]   ;;  %v13141_v20 = vld [vmem:[%s14194_s20 + $0x660] ss:$16 sps:$4 sm:$0xff]  }
  0xa2   : > { %2828 = vmatpush1.bf16.msra.mxu0 %v13128_v11  ;;  %v13142_v21 = vld [vmem:[%s14194_s20 + $0x444] ss:$16 sps:$4 sm:$0xff]   ;;  %v13146_v23 = vld [vmem:[%s14194_s20 + $0x440] ss:$16 sps:$4 sm:$0xff]  }
  0xa3   : > { %2899 = vmatpush1.bf16.msra.mxu1 %v13129_v12  ;;  %2829 = vmatprep.subr.bf16.mxu0 %v13130_v13  ;;  %v13144_v22 = vld [vmem:[%s14194_s20 + $0x644] ss:$16 sps:$4 sm:$0xff]   ;;  %v13147_v24 = vld [vmem:[%s14194_s20 + $0x640] ss:$16 sps:$4 sm:$0xff]  }
  0xa4   : > { %2900 = vmatprep.subr.bf16.mxu1 %v13132_v14  ;;  %v13148_v25 = vld [vmem:[%s14194_s20 + $0x424] ss:$16 sps:$4 sm:$0xff]   ;;  %v13152_v27 = vld [vmem:[%s14194_s20 + $0x420] ss:$16 sps:$4 sm:$0xff]  }
  0xa5   : > { %v13150_v26 = vld [vmem:[%s14194_s20 + $0x624] ss:$16 sps:$4 sm:$0xff]   ;;  %v13153_v28 = vld [vmem:[%s14194_s20 + $0x620] ss:$16 sps:$4 sm:$0xff]  }
  0xa6   : > { %2830 = vmatpush1.bf16.msra.mxu0 %v13134_v15  ;;  %v13154_v29 = vld [vmem:[%s14194_s20 + $0x404] ss:$16 sps:$4 sm:$0xff]   ;;  %v13158_v31 = vld [vmem:[%s14194_s20 + $0x400] ss:$16 sps:$4 sm:$0xff]  }
  0xa7   : > { %2901 = vmatpush1.bf16.msra.mxu1 %v13135_v16  ;;  %2831 = vmatprep.subr.bf16.mxu0 %v13136_v17  ;;  %v13156_v30 = vld [vmem:[%s14194_s20 + $0x604] ss:$16 sps:$4 sm:$0xff]   ;;  %v13159_v32 = vld [vmem:[%s14194_s20 + $0x600] ss:$16 sps:$4 sm:$0xff]  }
  0xa8   : > { %2902 = vmatprep.subr.bf16.mxu1 %v13138_v18  ;;  %v13160_v33 = vld [vmem:[%s14194_s20 + $0x5e4] ss:$16 sps:$4 sm:$0xff]   ;;  %v13164_v35 = vld [vmem:[%s14194_s20 + $0x5e0] ss:$16 sps:$4 sm:$0xff]  }
  0xa9   : > { %v13162_v34 = vld [vmem:[%s14194_s20 + $0x7e4] ss:$16 sps:$4 sm:$0xff]   ;;  %v13165_v36 = vld [vmem:[%s14194_s20 + $0x7e0] ss:$16 sps:$4 sm:$0xff]  }
  0xaa   : > { %2832 = vmatpush1.bf16.msra.mxu0 %v13140_v19  ;;  %v13166_v37 = vld [vmem:[%s14194_s20 + $0x5c4] ss:$16 sps:$4 sm:$0xff]   ;;  %v13170_v39 = vld [vmem:[%s14194_s20 + $0x5c0] ss:$16 sps:$4 sm:$0xff]  }
  0xab   : > { %2903 = vmatpush1.bf16.msra.mxu1 %v13141_v20  ;;  %2833 = vmatprep.subr.bf16.mxu0 %v13142_v21  ;;  %v13168_v38 = vld [vmem:[%s14194_s20 + $0x7c4] ss:$16 sps:$4 sm:$0xff]   ;;  %v13171_v40 = vld [vmem:[%s14194_s20 + $0x7c0] ss:$16 sps:$4 sm:$0xff]  }
  0xac   : > { %2904 = vmatprep.subr.bf16.mxu1 %v13144_v22  ;;  %v13172_v41 = vld [vmem:[%s14194_s20 + $0x5a4] ss:$16 sps:$4 sm:$0xff]   ;;  %v13176_v46 = vld [vmem:[%s14194_s20 + $0x5a0] ss:$16 sps:$4 sm:$0xff]  }
  0xad   : > { %v13174_v45 = vld [vmem:[%s14194_s20 + $0x7a4] ss:$16 sps:$4 sm:$0xff]   ;;  %v13177_v47 = vld [vmem:[%s14194_s20 + $0x7a0] ss:$16 sps:$4 sm:$0xff]  }
  0xae   : > { %2834 = vmatpush1.bf16.msra.mxu0 %v13146_v23  ;;  %v13178_v48 = vld [vmem:[%s14194_s20 + $0x584] ss:$16 sps:$4 sm:$0xff]   ;;  %v13182_v52 = vld [vmem:[%s14194_s20 + $0x580] ss:$16 sps:$4 sm:$0xff]  }
  0xaf   : > { %2905 = vmatpush1.bf16.msra.mxu1 %v13147_v24  ;;  %2835 = vmatprep.subr.bf16.mxu0 %v13148_v25  ;;  %v13180_v51 = vld [vmem:[%s14194_s20 + $0x784] ss:$16 sps:$4 sm:$0xff]   ;;  %v13183_v53 = vld [vmem:[%s14194_s20 + $0x780] ss:$16 sps:$4 sm:$0xff]  }
  0xb0   : > { %2906 = vmatprep.subr.bf16.mxu1 %v13150_v26  ;;  %v13184_v54 = vld [vmem:[%s14194_s20 + $0x564] ss:$16 sps:$4 sm:$0xff]   ;;  %v13188_v57 = vld [vmem:[%s14194_s20 + $0x560] ss:$16 sps:$4 sm:$0xff]  }
  0xb1   : > { %v13186_v55 = vld [vmem:[%s14194_s20 + $0x764] ss:$16 sps:$4 sm:$0xff]   ;;  %v13189_v58 = vld [vmem:[%s14194_s20 + $0x760] ss:$16 sps:$4 sm:$0xff]  }
  0xb2   : > { %2836 = vmatpush1.bf16.msra.mxu0 %v13152_v27  ;;  %v13208_v59 = vld [vmem:[%s14266_s24] ss:$8 sps:$4 sm:$0xff]   ;;  %v13210_v60 = vld [vmem:[%s14266_s24 + $0x4] ss:$8 sps:$4 sm:$0xff]   ;;  %v13211_v61 = vld [vmem:[%s14266_s24 + $0x10] ss:$8 sps:$4 sm:$0xff]  }
  0xb3   : > { %2907 = vmatpush1.bf16.msra.mxu1 %v13153_v28  ;;  %2837 = vmatprep.subr.bf16.mxu0 %v13154_v29  ;;  %v13213_v62 = vld [vmem:[%s14266_s24 + $0x14] ss:$8 sps:$4 sm:$0xff]   ;;  %v508_v63 = vrot.slane %v13208_v59, %v14273_v56  ;;  %v13214_v0 = vld [vmem:[%s14266_s24 + $0x40] ss:$8 sps:$4 sm:$0xff]   ;;  %v13216_v1 = vld [vmem:[%s14266_s24 + $0x44] ss:$8 sps:$4 sm:$0xff]   ;;  %v515_v5 = vrot.slane %v13210_v60, %v14273_v56  ;;  %v522_v6 = vrot.slane %v13211_v61, %v14273_v56 }
  0xb4   : > { %2908 = vmatprep.subr.bf16.mxu1 %v13156_v30  ;;  %v13217_v2 = vld [vmem:[%s14266_s24 + $0x50] ss:$8 sps:$4 sm:$0xff]   ;;  %v13190_v3 = vld [vmem:[%s14194_s20 + $0x544] ss:$16 sps:$4 sm:$0xff]   ;;  %v529_v7 = vrot.slane %v13213_v62, %v14273_v56  ;;  %v575_v11 = vrot.slane %v13214_v0, %v14273_v56  ;;  %v582_v12 = vrot.slane %v13216_v1, %v14273_v56  ;;  %v13220_v23 = vld [vmem:[%s14266_s24 + $0x80] ss:$8 sps:$4 sm:$0xff]  }
  0xb5   : > { %v13192_v4 = vld [vmem:[%s14194_s20 + $0x744] ss:$16 sps:$4 sm:$0xff]   ;;  %v13194_v9 = vld [vmem:[%s14194_s20 + $0x540] ss:$16 sps:$4 sm:$0xff]   ;;  %v589_v13 = vrot.slane %v13217_v2, %v14273_v56  ;;  %v530_v16 = vcombine.low %v508_v63, %v522_v6  ;;  %v531_v17 = vcombine.high %v508_v63, %v522_v6  ;;  %v13228_v1 = vld [vmem:[%s14194_s20 + $0x4ec] ss:$16 sps:$4 sm:$0xff]  }
  0xb6   : > { %2838 = vmatpush1.bf16.msra.mxu0 %v13158_v31  ;;  %v13219_v8 = vld [vmem:[%s14266_s24 + $0x54] ss:$8 sps:$4 sm:$0xff]   ;;  %v13195_v10 = vld [vmem:[%s14194_s20 + $0x740] ss:$16 sps:$4 sm:$0xff]   ;;  %v532_v18 = vcombine.low %v515_v5, %v529_v7  ;;  %v533_v19 = vcombine.high %v515_v5, %v529_v7 }
  0xb7   : > { %2909 = vmatpush1.bf16.msra.mxu1 %v13159_v32  ;;  %2839 = vmatprep.subr.bf16.mxu0 %v13160_v33  ;;  %v13196_v14 = vld [vmem:[%s14194_s20 + $0x524] ss:$16 sps:$4 sm:$0xff]   ;;  %v596_v20 = vrot.slane %v13219_v8, %v14273_v56  ;;  %v597_v21 = vcombine.low %v575_v11, %v589_v13  ;;  %v598_v22 = vcombine.high %v575_v11, %v589_v13  ;;  %v13223_v27 = vld [vmem:[%s14266_s24 + $0x90] ss:$8 sps:$4 sm:$0xff]   ;;  %v13231_v7 = vld [vmem:[%s14194_s20 + $0x6ec] ss:$16 sps:$4 sm:$0xff]  }
  0xb8   : > { %2910 = vmatprep.subr.bf16.mxu1 %v13162_v34  ;;  %v13198_v15 = vld [vmem:[%s14194_s20 + $0x724] ss:$16 sps:$4 sm:$0xff]   ;;  %v14301_v24 = vrot.slane %v530_v16, %v14273_v56  ;;  %v14304_v25 = vrot.slane %v532_v18, %v14273_v56  ;;  %v14307_v26 = vrot.slane %v531_v17, %v14273_v56  ;;  %v14311_v28 = vrot.slane %v533_v19, %v14273_v56  ;;  %v13200_v32 = vld [vmem:[%s14194_s20 + $0x520] ss:$16 sps:$4 sm:$0xff]  }
  0xb9   : > { %v599_v29 = vcombine.low %v582_v12, %v596_v20  ;;  %v600_v30 = vcombine.high %v582_v12, %v596_v20  ;;  %v14314_v31 = vrot.slane %v597_v21, %v14273_v56  ;;  %v13201_v33 = vld [vmem:[%s14194_s20 + $0x720] ss:$16 sps:$4 sm:$0xff]   ;;  %v13204_v42 = vld [vmem:[%s14194_s20 + $0x704] ss:$16 sps:$4 sm:$0xff]   ;;  %v656_v43 = vrot.slane %v13223_v27, %v14273_v56 }
  0xba   : > { %2840 = vmatpush2.bf16.msra.mxu0 %v13164_v35  ;;  %19240 = vst [vmem:[#allocation19_spill] sm:$0xff] %v14304_v25  ;;  %19241 = vst [vmem:[#allocation20_spill] sm:$0xff] %v14311_v28  ;;  %v562_v34 = vcombine.high %v14301_v24, %v14301_v24  ;;  %v14322_v35 = vcombine.high %v14304_v25, %v14304_v25  ;;  %v1571_v44 = vcombine.high %v14311_v28, %v14311_v28  ;;  %v13225_v2 = vld [vmem:[%s14266_s24 + $0x94] ss:$8 sps:$4 sm:$0xff]  }
  0xbb   : > { %2911 = vmatpush2.bf16.msra.mxu1 %v13165_v36  ;;  %2841 = vmatprep.subr.bf16.mxu0 %v13166_v37  ;;  %v564_v36 = vcombine.high %v14307_v26, %v14307_v26  ;;  %v14327_v37 = vrot.slane %v598_v22, %v14273_v56  ;;  %v663_v22 = vrot.slane %v13225_v2, %v14273_v56 }
  0xbc   : > { %2912 = vmatprep.subr.bf16.mxu1 %v13168_v38  ;;  %v13202_v38 = vld [vmem:[%s14194_s20 + $0x504] ss:$16 sps:$4 sm:$0xff]  }
  0xbe   : > { %2842 = vmatpush2.bf16.msra.mxu0 %v13170_v39  ;;  %v14331_v39 = vrot.slane %v599_v29, %v14273_v56 }
  0xbf   : > { %2913 = vmatpush2.bf16.msra.mxu1 %v13171_v40  ;;  %2843 = vmatprep.subr.bf16.mxu0 %v13172_v41  ;;  %v14334_v40 = vrot.slane %v600_v30, %v14273_v56  ;;  %v642_v41 = vrot.slane %v13220_v23, %v14273_v56 }
  0xc0   : > { %2914 = vmatprep.subr.bf16.mxu1 %v13174_v45  ;;  %v1578_v45 = vcombine.low %v14307_v26, %v562_v34 }
  0xc1   : > { %v1647_v49 = vcombine.low %v14331_v39, %v14334_v40  ;;  %v11846_v61 = vcombine.high %v14331_v39, %v14334_v40 }
  0xc2   : > { %2844 = vmatpush2.bf16.msra.mxu0 %v13176_v46  ;;  %v1579_v46 = vcombine.low %v564_v36, %v14304_v25 }
  0xc3   : > { %2915 = vmatpush2.bf16.msra.mxu1 %v13177_v47  ;;  %2845 = vmatprep.subr.bf16.mxu0 %v13178_v48  ;;  %v1580_v47 = vcombine.low %v14311_v28, %v14322_v35  ;;  %v11845_v48 = vcombine.high %v14314_v31, %v14327_v37  ;;  %v1663_v5 = vrot.slane %v1647_v49, %v14273_v56 }
  0xc4   : > { %2916 = vmatprep.subr.bf16.mxu1 %v13180_v51  ;;  %v13206_v51 = vld [vmem:[%s14194_s20 + $0x500] ss:$16 sps:$4 sm:$0xff]   ;;  %v1595_v59 = vrot.slane %v1579_v46, %v14273_v56  ;;  %v1670_v6 = vrot.slane %v11846_v61, %v14273_v56  ;;  %v631_v46 = vcombine.high %v14327_v37, %v14327_v37 }
  0xc5   : > { %v1602_v60 = vrot.slane %v1580_v47, %v14273_v56  ;;  %v967_v47 = vcombine.low %v14301_v24, %v14307_v26 }
  0xc6   : > { %2846 = vmatpush2.bf16.msra.mxu0 %v13182_v52  ;;  %v13207_v52 = vld [vmem:[%s14194_s20 + $0x700] ss:$16 sps:$4 sm:$0xff]  }
  0xc7   : > { %2917 = vmatpush2.bf16.msra.mxu1 %v13183_v53  ;;  %2847 = vmatprep.subr.bf16.mxu0 %v13184_v54  ;;  %v664_v53 = vcombine.low %v642_v41, %v656_v43  ;;  %v665_v54 = vcombine.high %v642_v41, %v656_v43 }
  0xc8   : > { %2918 = vmatprep.subr.bf16.mxu1 %v13186_v55  ;;  %v1581_v55 = vcombine.low %v1571_v44, %v14327_v37 }
  0xc9   : > { %v14359_v62 = vrot.slane %v664_v53, %v14273_v56  ;;  %v14362_v63 = vrot.slane %v665_v54, %v14273_v56 }
  0xca   : > { %2848 = vmatpush2.bf16.msra.mxu0 %v13188_v57  ;;  %v1588_v57 = vrot.slane %v1578_v45, %v14273_v56  ;;  %v1609_v0 = vrot.slane %v1581_v55, %v14273_v56 }
  0xcb   : > { %2919 = vmatpush2.bf16.msra.mxu1 %v13189_v58  ;;  %2849 = vmatprep.subr.bf16.mxu0 %v13190_v3  ;;  %v13222_v58 = vld [vmem:[%s14266_s24 + $0x84] ss:$8 sps:$4 sm:$0xff]   ;;  %v696_v8 = vcombine.high %v14359_v62, %v14359_v62  ;;  %v698_v36 = vcombine.high %v14362_v63, %v14362_v63 }
  0xcc   : > { %2920 = vmatprep.subr.bf16.mxu1 %v13192_v4  ;;  %v1611_v3 = vcombine.high %v1588_v57, %v1595_v59  ;;  %v1656_v4 = vrot.slane %v11845_v48, %v14273_v56  ;;  %v1612_v11 = vcombine.low %v1602_v60, %v1609_v0  ;;  %v649_v21 = vrot.slane %v13222_v58, %v14273_v56 }
  0xcd   : > { %v1649_v16 = vcombine.low %v14362_v63, %v696_v8 }
  0xce   : > { %2850 = vmatpush2.bf16.msra.mxu0 %v13194_v9  ;;  %v1613_v9 = vcombine.high %v1602_v60, %v1609_v0  ;;  %v1627_v12 = vrot.slane %v1611_v3, %v14273_v56  ;;  %v1679_v13 = vcombine.high %v1656_v4, %v1663_v5  ;;  %v1634_v18 = vrot.slane %v1612_v11, %v14273_v56  ;;  %v13234_v0 = vld [vmem:[%s14194_s20 + $0x4cc] ss:$16 sps:$4 sm:$0xff]  }
  0xcf   : > { %2921 = vmatpush2.bf16.msra.mxu1 %v13195_v10  ;;  %2851 = vmatprep.subr.bf16.mxu0 %v13196_v14  ;;  %v1610_v10 = vcombine.low %v1588_v57, %v1595_v59  ;;  %v1678_v14 = vcombine.low %v1656_v4, %v1663_v5  ;;  %v1677_v27 = vrot.slane %v1649_v16, %v14273_v56 }
  0xd0   : > { %2922 = vmatprep.subr.bf16.mxu1 %v13198_v15  ;;  %v1641_v15 = vrot.slane %v1613_v9, %v14273_v56  ;;  %v1695_v19 = vrot.slane %v1679_v13, %v14273_v56  ;;  %v667_v34 = vcombine.high %v649_v21, %v663_v22  ;;  %v970_v57 = vcombine.low %v14322_v35, %v14314_v31  ;;  %v13235_v13 = vld [vmem:[%s14194_s20 + $0x6c8] ss:$16 sps:$4 sm:$0xff]  }
  0xd1   : > { %v1620_v17 = vrot.slane %v1610_v10, %v14273_v56  ;;  %v1688_v20 = vrot.slane %v1678_v14, %v14273_v56  ;;  %v1680_v41 = vcombine.low %v1670_v6, %v1677_v27  ;;  %v13280_v14 = vld [vmem:[%s14266_s24 + $0xc0] ss:$8 sps:$4 sm:$0xff]  }
  0xd2   : > { %2852 = vmatpush2.bf16.msra.mxu0 %v13200_v32  ;;  %v1644_v23 = vcombine.low %v1627_v12, %v1641_v15  ;;  %v1645_v29 = vcombine.high %v1627_v12, %v1641_v15  ;;  %v14395_v45 = vrot.slane %v667_v34, %v14273_v56  ;;  %v14446_v10 = vrot.slane %v970_v57, %v14273_v56  ;;  %v13232_v12 = vld [vmem:[%s14194_s20 + $0x4c8] ss:$16 sps:$4 sm:$0xff]   ;;  %v13282_v15 = vld [vmem:[%s14266_s24 + $0xc4] ss:$8 sps:$4 sm:$0xff]  }
  0xd3   : > { %2923 = vmatpush2.bf16.msra.mxu1 %v13201_v33  ;;  %2853 = vmatprep.subr.bf16.mxu0 %v13202_v38  ;;  %v1642_v30 = vcombine.low %v1620_v17, %v1634_v18  ;;  %v1643_v32 = vcombine.high %v1620_v17, %v1634_v18  ;;  %v666_v33 = vcombine.low %v649_v21, %v663_v22  ;;  %v13285_v21 = vld [vmem:[%s14266_s24 + $0xd4] ss:$8 sps:$4 sm:$0xff]   ;;  %v13286_v22 = vld [vmem:[%s14266_s24 + $0x100] ss:$8 sps:$4 sm:$0xff]   ;;  %v13289_v34 = vld [vmem:[%s14266_s24 + $0x110] ss:$8 sps:$4 sm:$0xff]  }
  0xd4   : > { %2924 = vmatprep.subr.bf16.mxu1 %v13204_v42  ;;  %v1681_v38 = vcombine.high %v1670_v6, %v1677_v27  ;;  %v14387_v42 = vcombine.high %v14314_v31, %v14314_v31  ;;  %v1702_v49 = vrot.slane %v1680_v41, %v14273_v56  ;;  %v1573_v54 = vcombine.high %v14395_v45, %v14395_v45  ;;  %v13243_v41 = vld [vmem:[%s14194_s20 + $0x6ac] ss:$16 sps:$4 sm:$0xff]   ;;  %v13238_v57 = vld [vmem:[%s14194_s20 + $0x4a8] ss:$16 sps:$4 sm:$0xff]  }
  0xd5   : > { %v14392_v44 = vrot.slane %v666_v33, %v14273_v56  ;;  %v14426_v31 = vrot.slane %v967_v47, %v14273_v56  ;;  %v14461_v18 = vcombine.low %v631_v46, %v14331_v39  ;;  %v13288_v33 = vld [vmem:[%s14266_s24 + $0x104] ss:$8 sps:$4 sm:$0xff]   ;;  %v730_v47 = vrot.slane %v13285_v21, %v14273_v56 }
  0xd6   : > { %2854 = vmatpush2.bf16.msra.mxu0 %v13206_v51  ;;  %v1709_v48 = vrot.slane %v1681_v38, %v14273_v56  ;;  %v11841_v51 = vcombine.high %v14301_v24, %v14307_v26  ;;  %v1710_v60 = vcombine.low %v1688_v20, %v1702_v49  ;;  %v1711_v61 = vcombine.high %v1688_v20, %v1702_v49  ;;  %v13226_v24 = vld [vmem:[%s14194_s20 + $0x4e8] ss:$16 sps:$4 sm:$0xff]   ;;  %v13312_v17 = vld [vmem:[%s14266_s24 + $0x184] ss:$8 sps:$4 sm:$0xff]  }
  0xd7   : > { %2925 = vmatpush2.bf16.msra.mxu1 %v13207_v52  ;;  %2965 = vmatprep.subr.bf16.mxu0 %v13228_v1  ;;  %v969_v52 = vcombine.low %v14304_v25, %v14311_v28  ;;  %v14409_v53 = vcombine.high %v14392_v44, %v14392_v44  ;;  %v1714_v55 = vcombine.low %v698_v36, %v14392_v44  ;;  %v13229_v26 = vld [vmem:[%s14194_s20 + $0x6e8] ss:$16 sps:$4 sm:$0xff]   ;;  %v13237_v1 = vld [vmem:[%s14194_s20 + $0x6cc] ss:$16 sps:$4 sm:$0xff]  }
  0xd8   : > { %3036 = vmatprep.subr.bf16.mxu1 %v13231_v7  ;;  %v1712_v58 = vcombine.low %v1695_v19, %v1709_v48  ;;  %v1713_v59 = vcombine.high %v1695_v19, %v1709_v48  ;;  %v14429_v35 = vrot.slane %v11841_v51, %v14273_v56  ;;  %v14435_v6 = vpack.c.bf16 %v1710_v60, %v1642_v30  ;;  %v13240_v19 = vld [vmem:[%s14194_s20 + $0x4ac] ss:$16 sps:$4 sm:$0xff]   ;;  %v13283_v20 = vld [vmem:[%s14266_s24 + $0xd0] ss:$8 sps:$4 sm:$0xff]  }
  0xd9   : > { %v1715_v2 = vcombine.low %v14395_v45, %v14409_v53  ;;  %v14423_v3 = vrot.slane %v1714_v55, %v14273_v56  ;;  %v14437_v7 = vpack.c.bf16 %v1711_v61, %v1643_v32  ;;  %v14443_v9 = vrot.slane %v969_v52, %v14273_v56  ;;  %v13291_v36 = vld [vmem:[%s14266_s24 + $0x114] ss:$8 sps:$4 sm:$0xff]   ;;  %v13313_v38 = vld [vmem:[%s14266_s24 + $0x190] ss:$8 sps:$4 sm:$0xff]  }
  0xda   : > { %19242 = vst [vmem:[#allocation21_spill] sm:$0xff] %v14429_v35  ;;  %v14431_v4 = vpack.c.bf16 %v1712_v58, %v1644_v23  ;;  %v14433_v5 = vpack.c.bf16 %v1713_v59, %v1645_v29  ;;  %v709_v30 = vrot.slane %v13280_v14, %v14273_v56  ;;  %v716_v32 = vrot.slane %v13282_v15, %v14273_v56  ;;  %v13256_v29 = vld [vmem:[%s14194_s20 + $0x448] ss:$16 sps:$4 sm:$0xff]  }
  0xdb   : > { %v14440_v8 = vrot.slane %v1715_v2, %v14273_v56  ;;  %19243 = vst [vmem:[#allocation22_spill] sm:$0xff] %v14443_v9  ;;  %v723_v46 = vrot.slane %v13283_v20, %v14273_v56  ;;  %v776_v48 = vrot.slane %v13286_v22, %v14273_v56  ;;  %v783_v49 = vrot.slane %v13288_v33, %v14273_v56  ;;  %v13244_v20 = vld [vmem:[%s14194_s20 + $0x488] ss:$16 sps:$4 sm:$0xff]  }
  0xdc   : > { %2855 = vmatprep.mubr.bf16.mxu0 %v14431_v4  ;;  %2926 = vmatprep.mubr.bf16.mxu1 %v14433_v5  ;;  %v790_v51 = vrot.slane %v13289_v34, %v14273_v56  ;;  %v797_v52 = vrot.slane %v13291_v36, %v14273_v56  ;;  %v733_v60 = vcombine.low %v716_v32, %v730_v47 }
  0xdd   : > { %2856 = vmatmul.mubr.bf16.vlgmr.msra.gmra.mxu0 %v14435_v6  ;;  %2927 = vmatmul.mubr.bf16.vlgmr.msra.gmra.mxu1 %v14437_v7  ;;  %v1747_v23 = vcombine.high %v14423_v3, %v14440_v8  ;;  %v1746_v27 = vcombine.low %v14423_v3, %v14440_v8  ;;  %v731_v58 = vcombine.low %v709_v30, %v723_v46  ;;  %v13249_v3 = vld [vmem:[%s14194_s20 + $0x68c] ss:$16 sps:$4 sm:$0xff]  }
  0xde   : > { %2966 = vmatpush1.bf16.msra.mxu0 %v13226_v24  ;;  %3037 = vmatpush1.bf16.msra.mxu1 %v13229_v26  ;;  %v732_v59 = vcombine.high %v709_v30, %v723_v46  ;;  %v734_v61 = vcombine.high %v716_v32, %v730_v47  ;;  %v13241_v24 = vld [vmem:[%s14194_s20 + $0x6a8] ss:$16 sps:$4 sm:$0xff]   ;;  %v13246_v26 = vld [vmem:[%s14194_s20 + $0x48c] ss:$16 sps:$4 sm:$0xff]   ;;  %v800_v2 = vcombine.low %v783_v49, %v797_v52 }
  0xdf   : > { %2967 = vmatprep.subr.bf16.mxu0 %v13234_v0  ;;  %3038 = vmatprep.subr.bf16.mxu1 %v13237_v1  ;;  %v14490_v55 = vrot.slane %v1747_v23, %v14273_v56  ;;  %v798_v0 = vcombine.low %v776_v48, %v790_v51  ;;  %v799_v1 = vcombine.high %v776_v48, %v790_v51  ;;  %v13250_v51 = vld [vmem:[%s14194_s20 + $0x468] ss:$16 sps:$4 sm:$0xff]  }
  0xe0   : > { %v14497_v8 = vrot.slane %v731_v58, %v14273_v56  ;;  %v14500_v14 = vrot.slane %v733_v60, %v14273_v56  ;;  %v14503_v15 = vrot.slane %v732_v59, %v14273_v56  ;;  %v14514_v21 = vrot.slane %v800_v2, %v14273_v56  ;;  %v13306_v60 = vld [vmem:[%s14266_s24 + $0x144] ss:$8 sps:$4 sm:$0xff]  }
  0xe1   : > { %v14517_v22 = vrot.slane %v799_v1, %v14273_v56  ;;  %v14526_v32 = vrot.slane %v1746_v27, %v14273_v56  ;;  %v801_v33 = vcombine.high %v783_v49, %v797_v52  ;;  %v13255_v27 = vld [vmem:[%s14194_s20 + $0x66c] ss:$16 sps:$4 sm:$0xff]   ;;  %v13304_v49 = vld [vmem:[%s14266_s24 + $0x140] ss:$8 sps:$4 sm:$0xff]  }
  0xe2   : > { %2968 = vmatpush1.bf16.msra.mxu0 %v13232_v12  ;;  %3039 = vmatpush1.bf16.msra.mxu1 %v13235_v13  ;;  %v13247_v12 = vld [vmem:[%s14194_s20 + $0x688] ss:$16 sps:$4 sm:$0xff]   ;;  %v14508_v13 = vrot.slane %v734_v61, %v14273_v56  ;;  %v1716_v23 = vcombine.low %v1573_v54, %v14503_v15  ;;  %v11847_v30 = vcombine.high %v14497_v8, %v14503_v15 }
  0xe3   : > { %2969 = vmatprep.subr.bf16.mxu0 %v13240_v19  ;;  %3040 = vmatprep.subr.bf16.mxu1 %v13243_v41  ;;  %v14511_v19 = vrot.slane %v798_v0, %v14273_v56  ;;  %v832_v36 = vcombine.high %v14517_v22, %v14517_v22  ;;  %v13252_v41 = vld [vmem:[%s14194_s20 + $0x46c] ss:$16 sps:$4 sm:$0xff]   ;;  %v14546_v59 = vrot.slane %v801_v33, %v14273_v56  ;;  %v13253_v61 = vld [vmem:[%s14194_s20 + $0x668] ss:$16 sps:$4 sm:$0xff]  }
  0xe4   : > { %v1782_v54 = vcombine.low %v14500_v14, %v14508_v13  ;;  %v1738_v46 = vrot.slane %v1716_v23, %v14273_v56  ;;  %v1745_v47 = vrot.slane %v11847_v30, %v14273_v56  ;;  %v11848_v48 = vcombine.high %v14500_v14, %v14508_v13  ;;  %v13307_v33 = vld [vmem:[%s14266_s24 + $0x150] ss:$8 sps:$4 sm:$0xff]  }
  0xe5   : > { %v830_v34 = vcombine.high %v14511_v19, %v14511_v19  ;;  %v14554_v2 = vcombine.high %v14514_v21, %v14514_v21 }
  0xe6   : > { %2970 = vmatpush1.bf16.msra.mxu0 %v13238_v57  ;;  %3041 = vmatpush1.bf16.msra.mxu1 %v13241_v24  ;;  %v1785_v57 = vcombine.low %v832_v36, %v14514_v21  ;;  %v1792_v58 = vrot.slane %v1782_v54, %v14273_v56  ;;  %v13258_v24 = vld [vmem:[%s14194_s20 + $0x44c] ss:$16 sps:$4 sm:$0xff]   ;;  %v1799_v0 = vrot.slane %v11848_v48, %v14273_v56 }
  0xe7   : > { %2971 = vmatprep.subr.bf16.mxu0 %v13246_v26  ;;  %3042 = vmatprep.subr.bf16.mxu1 %v13249_v3  ;;  %v1784_v52 = vcombine.low %v14517_v22, %v830_v34  ;;  %v1749_v26 = vcombine.high %v1738_v46, %v1745_v47  ;;  %v1748_v1 = vcombine.low %v1738_v46, %v1745_v47  ;;  %v13261_v3 = vld [vmem:[%s14194_s20 + $0x64c] ss:$16 sps:$4 sm:$0xff]  }
  0xe8   : > { %v1813_v30 = vrot.slane %v1785_v57, %v14273_v56  ;;  %v843_v34 = vrot.slane %v13304_v49, %v14273_v56  ;;  %v1815_v54 = vcombine.high %v1792_v58, %v1799_v0  ;;  %v1814_v47 = vcombine.low %v1792_v58, %v1799_v0  ;;  %v13259_v57 = vld [vmem:[%s14194_s20 + $0x648] ss:$16 sps:$4 sm:$0xff]   ;;  %v13267_v58 = vld [vmem:[%s14194_s20 + $0x62c] ss:$16 sps:$4 sm:$0xff]  }
  0xe9   : > { %v1806_v23 = vrot.slane %v1784_v52, %v14273_v56  ;;  %v1777_v36 = vrot.slane %v1749_v26, %v14273_v56  ;;  %v850_v52 = vrot.slane %v13306_v60, %v14273_v56  ;;  %v13264_v26 = vld [vmem:[%s14194_s20 + $0x42c] ss:$16 sps:$4 sm:$0xff]  }
  0xea   : > { %2972 = vmatpush1.bf16.msra.mxu0 %v13244_v20  ;;  %3043 = vmatpush1.bf16.msra.mxu1 %v13247_v12  ;;  %v1770_v20 = vrot.slane %v1748_v1, %v14273_v56  ;;  %v13309_v12 = vld [vmem:[%s14266_s24 + $0x154] ss:$8 sps:$4 sm:$0xff]   ;;  %v1824_v60 = vrot.slane %v1814_v47, %v14273_v56 }
  0xeb   : > { %2973 = vmatprep.subr.bf16.mxu0 %v13252_v41  ;;  %3044 = vmatprep.subr.bf16.mxu1 %v13255_v27  ;;  %v1817_v46 = vcombine.high %v1806_v23, %v1813_v30  ;;  %v1816_v48 = vcombine.low %v1806_v23, %v1813_v30  ;;  %v1780_v11 = vcombine.low %v14490_v55, %v1777_v36  ;;  %v13262_v30 = vld [vmem:[%s14194_s20 + $0x428] ss:$16 sps:$4 sm:$0xff]  }
  0xec   : > { %v1831_v41 = vrot.slane %v1815_v54, %v14273_v56  ;;  %v1781_v27 = vcombine.high %v14490_v55, %v1777_v36  ;;  %v1778_v49 = vcombine.low %v14526_v32, %v1770_v20  ;;  %v1779_v23 = vcombine.high %v14526_v32, %v1770_v20  ;;  %v13315_v32 = vld [vmem:[%s14266_s24 + $0x194] ss:$8 sps:$4 sm:$0xff]  }
  0xed   : > { %v1845_v0 = vrot.slane %v1817_v46, %v14273_v56  ;;  %v1838_v1 = vrot.slane %v1816_v48, %v14273_v56  ;;  %v857_v55 = vrot.slane %v13307_v33, %v14273_v56  ;;  %v13265_v33 = vld [vmem:[%s14194_s20 + $0x628] ss:$16 sps:$4 sm:$0xff]   ;;  %v13270_v20 = vld [vmem:[%s14194_s20 + $0x40c] ss:$16 sps:$4 sm:$0xff]  }
  0xee   : > { %2974 = vmatpush1.bf16.msra.mxu0 %v13250_v51  ;;  %3045 = vmatpush1.bf16.msra.mxu1 %v13253_v61  ;;  %v864_v51 = vrot.slane %v13309_v12, %v14273_v56  ;;  %v13310_v61 = vld [vmem:[%s14266_s24 + $0x180] ss:$8 sps:$4 sm:$0xff]  }
  0xef   : > { %2975 = vmatprep.subr.bf16.mxu0 %v13258_v24  ;;  %3046 = vmatprep.subr.bf16.mxu1 %v13261_v3  ;;  %v1848_v36 = vcombine.low %v1831_v41, %v1845_v0  ;;  %v1849_v54 = vcombine.high %v1831_v41, %v1845_v0  ;;  %v1846_v46 = vcombine.low %v1824_v60, %v1838_v1  ;;  %v13273_v0 = vld [vmem:[%s14194_s20 + $0x60c] ss:$16 sps:$4 sm:$0xff]  }
  0xf0   : > { %v1847_v47 = vcombine.high %v1824_v60, %v1838_v1  ;;  %v865_v24 = vcombine.low %v843_v34, %v857_v55  ;;  %v866_v48 = vcombine.high %v843_v34, %v857_v55  ;;  %v867_v3 = vcombine.low %v850_v52, %v864_v51  ;;  %v13271_v1 = vld [vmem:[%s14194_s20 + $0x608] ss:$16 sps:$4 sm:$0xff]  }
  0xf1   : > { %v868_v43 = vcombine.high %v850_v52, %v864_v51  ;;  %v14586_v12 = vpack.c.bf16 %v1848_v36, %v1780_v11  ;;  %v14588_v16 = vpack.c.bf16 %v1849_v54, %v1781_v27  ;;  %v14590_v41 = vpack.c.bf16 %v1846_v46, %v1778_v49  ;;  %v13268_v27 = vld [vmem:[%s14194_s20 + $0x408] ss:$16 sps:$4 sm:$0xff]  }
  0xf2   : > { %2976 = vmatpush1.bf16.msra.mxu0 %v13256_v29  ;;  %3047 = vmatpush1.bf16.msra.mxu1 %v13259_v57  ;;  %v14593_v60 = vpack.c.bf16 %v1847_v47, %v1779_v23  ;;  %v14596_v34 = vrot.slane %v865_v24, %v14273_v56  ;;  %v14599_v29 = vrot.slane %v867_v3, %v14273_v56  ;;  %v13274_v24 = vld [vmem:[%s14194_s20 + $0x5e8] ss:$16 sps:$4 sm:$0xff]  }
  0xf3   : > { %19244 = vst [vmem:[#allocation23_spill] sm:$0xff] %v14590_v41  ;;  %2977 = vmatprep.subr.bf16.mxu0 %v13264_v26  ;;  %3048 = vmatprep.subr.bf16.mxu1 %v13267_v58  ;;  %v14604_v11 = vrot.slane %v866_v48, %v14273_v56  ;;  %v14607_v52 = vrot.slane %v868_v43, %v14273_v56  ;;  %v13276_v43 = vld [vmem:[%s14194_s20 + $0x5ec] ss:$16 sps:$4 sm:$0xff]  }
  0xf4   : > { %19245 = vst [vmem:[#allocation24_spill] sm:$0xff] %v14593_v60  ;;  %2865 = vmatprep.mubr.bf16.mxu0 %v14586_v12  ;;  %2936 = vmatprep.mubr.bf16.mxu1 %v14588_v16  ;;  %v910_v57 = vrot.slane %v13310_v61, %v14273_v56  ;;  %v917_v49 = vrot.slane %v13312_v17, %v14273_v56  ;;  %v13279_v17 = vld [vmem:[%s14194_s20 + $0x7ec] ss:$16 sps:$4 sm:$0xff]  }
  0xf5   : > { %2866 = vmatmul.mubr.bf16.gmra.mxu0 %v14590_v41  ;;  %2937 = vmatmul.mubr.bf16.gmra.mxu1 %v14593_v60  ;;  %v924_v26 = vrot.slane %v13313_v38, %v14273_v56  ;;  %v931_v58 = vrot.slane %v13315_v32, %v14273_v56  ;;  %v1575_v23 = vcombine.high %v14546_v59, %v14546_v59  ;;  %v13318_v41 = vld [vmem:[%s14194_s20 + $0x58c] ss:$16 sps:$4 sm:$0xff]  }
  0xf6   : > { %2978 = vmatpush1.bf16.msra.mxu0 %v13262_v30  ;;  %3049 = vmatpush1.bf16.msra.mxu1 %v13265_v33  ;;  %v1850_v55 = vcombine.low %v14546_v59, %v14554_v2  ;;  %v11849_v51 = vcombine.high %v14596_v34, %v14604_v11  ;;  %v1853_v46 = vcombine.low %v14599_v29, %v14607_v52 }
  0xf7   : > { %2979 = vmatprep.subr.bf16.mxu0 %v13270_v20  ;;  %3050 = vmatprep.subr.bf16.mxu1 %v13273_v0  ;;  %v932_v38 = vcombine.low %v910_v57, %v924_v26  ;;  %v933_v61 = vcombine.high %v910_v57, %v924_v26  ;;  %v934_v30 = vcombine.low %v917_v49, %v931_v58  ;;  %v13277_v20 = vld [vmem:[%s14194_s20 + $0x7e8] ss:$16 sps:$4 sm:$0xff]   ;;  %v13294_v0 = vld [vmem:[%s14194_s20 + $0x5cc] ss:$16 sps:$4 sm:$0xff]  }
  0xf8   : > { %v935_v36 = vcombine.high %v917_v49, %v931_v58  ;;  %v1851_v54 = vcombine.low %v1575_v23, %v14604_v11  ;;  %v1860_v47 = vrot.slane %v1850_v55, %v14273_v56  ;;  %v1874_v33 = vrot.slane %v11849_v51, %v14273_v56  ;;  %v13297_v58 = vld [vmem:[%s14194_s20 + $0x7cc] ss:$16 sps:$4 sm:$0xff]  }
  0xf9   : > { %v14631_v48 = vrot.slane %v932_v38, %v14273_v56  ;;  %v14634_v3 = vrot.slane %v934_v30, %v14273_v56  ;;  %v14637_v32 = vrot.slane %v933_v61, %v14273_v56  ;;  %v1881_v26 = vrot.slane %v1853_v46, %v14273_v56  ;;  %v13295_v46 = vld [vmem:[%s14194_s20 + $0x7c8] ss:$16 sps:$4 sm:$0xff]  }
  0xfa   : > { %2980 = vmatpush1.bf16.msra.mxu0 %v13268_v27  ;;  %3051 = vmatpush1.bf16.msra.mxu1 %v13271_v1  ;;  %v14643_v57 = vrot.slane %v935_v36, %v14273_v56  ;;  %v1867_v49 = vrot.slane %v1851_v54, %v14273_v56  ;;  %v11850_v38 = vcombine.high %v14599_v29, %v14607_v52 }
  0xfb   : > { %19246 = vst [vmem:[#allocation25_spill] sm:$0xff] %v14634_v3  ;;  %2981 = vmatprep.subr.bf16.mxu0 %v13276_v43  ;;  %3052 = vmatprep.subr.bf16.mxu1 %v13279_v17  ;;  %v964_v23 = vcombine.high %v14631_v48, %v14631_v48  ;;  %v14652_v27 = vcombine.high %v14634_v3, %v14634_v3  ;;  %v13292_v17 = vld [vmem:[%s14194_s20 + $0x5c8] ss:$16 sps:$4 sm:$0xff]  }
  0xfc   : > { %v966_v1 = vcombine.high %v14637_v32, %v14637_v32  ;;  %v1883_v55 = vcombine.high %v1860_v47, %v1867_v49  ;;  %v1885_v51 = vcombine.high %v1874_v33, %v1881_v26  ;;  %v1882_v43 = vcombine.low %v1860_v47, %v1867_v49  ;;  %v13303_v49 = vld [vmem:[%s14194_s20 + $0x7ac] ss:$16 sps:$4 sm:$0xff]  }
  0xfd   : > { %19247 = vst [vmem:[#allocation26_spill] sm:$0xff] %v14652_v27  ;;  %v1919_v61 = vcombine.low %v14637_v32, %v964_v23  ;;  %v1921_v36 = vcombine.low %v14643_v57, %v14652_v27  ;;  %v1884_v54 = vcombine.low %v1874_v33, %v1881_v26  ;;  %v1928_v47 = vrot.slane %v11850_v38, %v14273_v56 }
  0xfe   : > { %v1920_v30 = vcombine.low %v966_v1, %v14634_v3  ;;  %2982 = vmatpush2.bf16.msra.mxu0 %v13274_v24  ;;  %3053 = vmatpush2.bf16.msra.mxu1 %v13277_v20  ;;  %v1899_v25 = vrot.slane %v1883_v55, %v14273_v56  ;;  %v1913_v28 = vrot.slane %v1885_v51, %v14273_v56  ;;  %v13298_v51 = vld [vmem:[%s14194_s20 + $0x5a8] ss:$16 sps:$4 sm:$0xff]  }
  0xff   : > { %2983 = vmatprep.subr.bf16.mxu0 %v13294_v0  ;;  %3054 = vmatprep.subr.bf16.mxu1 %v13297_v58  ;;  %v1935_v23 = vrot.slane %v1919_v61, %v14273_v56  ;;  %v1949_v24 = vrot.slane %v1921_v36, %v14273_v56  ;;  %v1892_v26 = vrot.slane %v1882_v43, %v14273_v56  ;;  %v13301_v61 = vld [vmem:[%s14194_s20 + $0x7a8] ss:$16 sps:$4 sm:$0xff]  }
 0x100   : > { %v1942_v1 = vrot.slane %v1920_v30, %v14273_v56  ;;  %v1916_v33 = vcombine.low %v1899_v25, %v1913_v28  ;;  %v1917_v20 = vcombine.high %v1899_v25, %v1913_v28  ;;  %v1906_v55 = vrot.slane %v1884_v54, %v14273_v56  ;;  %v13321_v54 = vld [vmem:[%s14194_s20 + $0x78c] ss:$16 sps:$4 sm:$0xff]  }
 0x101   : > { %v1951_v27 = vcombine.high %v1928_v47, %v1935_v23  ;;  %v1950_v58 = vcombine.low %v1928_v47, %v1935_v23  ;;  %v1577_v36 = vcombine.high %v14643_v57, %v14643_v57  ;;  %v19248_v47 = vcombine.high %v14426_v31, %v14429_v35 }
 0x102   : > { %v1953_v0 = vcombine.high %v1942_v1, %v1949_v24  ;;  %v1952_v38 = vcombine.low %v1942_v1, %v1949_v24  ;;  %2984 = vmatpush2.bf16.msra.mxu0 %v13292_v17  ;;  %3055 = vmatpush2.bf16.msra.mxu1 %v13295_v46  ;;  %v1914_v60 = vcombine.low %v1892_v26, %v1906_v55 }
 0x103   : > { %v1915_v30 = vcombine.high %v1892_v26, %v1906_v55  ;;  %2985 = vmatprep.subr.bf16.mxu0 %v13300_v50  ;;  %3056 = vmatprep.subr.bf16.mxu1 %v13303_v49  ;;  %v1967_v25 = vrot.slane %v1951_v27, %v14273_v56  ;;  %v1960_v43 = vrot.slane %v1950_v58, %v14273_v56 }
 0x104   : > { %v1981_v28 = vrot.slane %v1953_v0, %v14273_v56  ;;  %v1974_v17 = vrot.slane %v1952_v38, %v14273_v56  ;;  %v1992_v46 = vrot.slane %v1577_v36, %v14273_v56  ;;  %v14689_v23 = vrot.slane %v19248_v47, %v14273_v56  ;;  %v13316_v38 = vld [vmem:[%s14194_s20 + $0x588] ss:$16 sps:$4 sm:$0xff]  }
 0x105   : > { %v19249_v50 = vcombine.high %v14443_v9, %v14446_v10  ;;  %v19250_v24 = vcombine.high %v14331_v39, %v14331_v39  ;;  %v1038_v55 = vcombine.low %v14359_v62, %v14362_v63  ;;  %v13319_v36 = vld [vmem:[%s14194_s20 + $0x788] ss:$16 sps:$4 sm:$0xff]   ;;  %v13324_v39 = vld [vmem:[%s14194_s20 + $0x56c] ss:$16 sps:$4 sm:$0xff]  }
 0x106   : > { %v1984_v49 = vcombine.low %v1967_v25, %v1981_v28  ;;  %v1985_v1 = vcombine.high %v1967_v25, %v1981_v28  ;;  %2986 = vmatpush2.bf16.msra.mxu0 %v13298_v51  ;;  %3057 = vmatpush2.bf16.msra.mxu1 %v13301_v61  ;;  %v1982_v0 = vcombine.low %v1960_v43, %v1974_v17  ;;  %v13327_v61 = vld [vmem:[%s14194_s20 + $0x76c] ss:$16 sps:$4 sm:$0xff]  }
 0x107   : > { %v14695_v27 = vrot.slane %v19249_v50, %v14273_v56  ;;  %v1037_v26 = vcombine.low %v14334_v40, %v19250_v24  ;;  %v1983_v58 = vcombine.high %v1960_v43, %v1974_v17  ;;  %v1993_v47 = vcombine.high %v1992_v46, %v1992_v46  ;;  %2987 = vmatprep.subr.bf16.mxu0 %v13318_v41  ;;  %v13325_v17 = vld [vmem:[%s14194_s20 + $0x768] ss:$16 sps:$4 sm:$0xff]  }
 0x108   : > { %v14705_v50 = vpack.c.bf16 %v1984_v49, %v1916_v33  ;;  %v14707_v3 = vpack.c.bf16 %v1985_v1, %v1917_v20  ;;  %3058 = vmatprep.subr.bf16.mxu1 %v13321_v54  ;;  %v2000_v25 = vrot.slane %v1992_v46, %v14273_v56  ;;  %v14711_v28 = vpack.c.bf16 %v1982_v0, %v1914_v60  ;;  %v13322_v54 = vld [vmem:[%s14194_s20 + $0x568] ss:$16 sps:$4 sm:$0xff]  }
 0x109   : > { %v14713_v51 = vpack.c.bf16 %v1983_v58, %v1915_v30  ;;  %v2007_v43 = vrot.slane %v1993_v47, %v14273_v56  ;;  %v19251_v60 = vcombine.low %v14327_v37, %v14387_v42  ;;  %v14735_v1 = vrot.slane %v14461_v18, %v14273_v56  ;;  %v13330_v37 = vld [vmem:[%s14194_s20 + $0x54c] ss:$16 sps:$4 sm:$0xff]  }
 0x10a   : > { %2875 = vmatprep.mubr.bf16.mxu0 %v14705_v50  ;;  %2946 = vmatprep.mubr.bf16.mxu1 %v14707_v3  ;;  %v14721_v41 = vpack.c.bf16 %v2000_v25, %v2000_v25  ;;  %v2008_v20 = vcombine.high %v2000_v25, %v2000_v25  ;;  %v14741_v0 = vrot.slane %v1037_v26, %v14273_v56  ;;  %v13333_v25 = vld [vmem:[%s14194_s20 + $0x74c] ss:$16 sps:$4 sm:$0xff]  }
 0x10b   : > { %v1045_v30 = vrot.slane %v19251_v60, %v14273_v56  ;;  %2876 = vmatmul.mubr.bf16.gmra.mxu0 %v14711_v28  ;;  %2947 = vmatmul.mubr.bf16.gmra.mxu1 %v14713_v51  ;;  %v14731_v46 = vpack.c.bf16 %v2007_v43, %v2007_v43  ;;  %v2009_v49 = vcombine.high %v2007_v43, %v2007_v43 }
 0x10c   : > { %19252 = vst [vmem:[#allocation27_spill] sm:$0xff] %v14735_v1  ;;  %2988 = vmatpush2.bf16.msra.mxu0 %v13316_v38  ;;  %3059 = vmatpush2.bf16.msra.mxu1 %v13319_v36  ;;  %v14737_v24 = vpack.c.bf16 %v2008_v20, %v2008_v20  ;;  %19253 = vst [vmem:[#allocation28_spill] sm:$0xff] %v14741_v0  ;;  %v1066_v58 = vrot.slane %v1038_v55, %v14273_v56  ;;  %v13331_v20 = vld [vmem:[%s14194_s20 + $0x748] ss:$16 sps:$4 sm:$0xff]  }
 0x10d   : > { %2989 = vmatprep.subr.bf16.mxu0 %v13324_v39  ;;  %3060 = vmatprep.subr.bf16.mxu1 %v13327_v61  ;;  %v14744_v47 = vpack.c.bf16 %v2009_v49, %v2009_v49  ;;  %v1067_v18 = vcombine.low %v1045_v30, %v14735_v1  ;;  %v1068_v38 = vcombine.high %v1045_v30, %v14735_v1  ;;  %v13328_v61 = vld [vmem:[%s14194_s20 + $0x548] ss:$16 sps:$4 sm:$0xff]  }
 0x10e   : > { %2885 = vmatprep.mubr.bf16.mxu0 %v14731_v46  ;;  %v1069_v36 = vcombine.low %v14741_v0, %v1066_v58  ;;  %v1070_v43 = vcombine.high %v14741_v0, %v1066_v58  ;;  %v1034_v26 = vcombine.high %v14689_v23, %v14695_v27  ;;  %v19254_v55 = vcombine.low %v14426_v31, %v14429_v35  ;;  %v13336_v31 = vld [vmem:[%s14194_s20 + $0x52c] ss:$16 sps:$4 sm:$0xff]  }
 0x10f   : > { %2956 = vmatprep.mubr.bf16.mxu1 %v14744_v47  ;;  %v1084_v60 = vrot.slane %v1068_v38, %v14273_v56  ;;  %v19255_v30 = vcombine.low %v14443_v9, %v14446_v10  ;;  %v1077_v58 = vrot.slane %v1067_v18, %v14273_v56  ;;  %v14769_v33 = vcombine.high %v14497_v8, %v14497_v8  ;;  %v13339_v10 = vld [vmem:[%s14194_s20 + $0x72c] ss:$16 sps:$4 sm:$0xff]  }
 0x110   : > { %v1009_v39 = vrot.slane %v19254_v55, %v14273_v56  ;;  %2990 = vmatpush2.bf16.msra.mxu0 %v13322_v54  ;;  %3061 = vmatpush2.bf16.msra.mxu1 %v13325_v17  ;;  %v1098_v55 = vrot.slane %v1070_v43, %v14273_v56  ;;  %v1091_v38 = vrot.slane %v1069_v36, %v14273_v56  ;;  %v13334_v36 = vld [vmem:[%s14194_s20 + $0x528] ss:$16 sps:$4 sm:$0xff]  }
 0x111   : > { %v1023_v49 = vrot.slane %v19255_v30, %v14273_v56  ;;  %v764_v1 = vcombine.high %v14500_v14, %v14500_v14  ;;  %2991 = vmatprep.subr.bf16.mxu0 %v13330_v37  ;;  %3062 = vmatprep.subr.bf16.mxu1 %v13333_v25  ;;  %v765_v54 = vcombine.high %v14503_v15, %v14503_v15  ;;  %v13337_v43 = vld [vmem:[%s14194_s20 + $0x728] ss:$16 sps:$4 sm:$0xff]  }
 0x112   : > { %v1101_v17 = vcombine.low %v1084_v60, %v1098_v55  ;;  %v1102_v0 = vcombine.high %v1084_v60, %v1098_v55  ;;  %v1099_v35 = vcombine.low %v1077_v58, %v1091_v38  ;;  %v1100_v9 = vcombine.high %v1077_v58, %v1091_v38  ;;  %v13342_v60 = vld [vmem:[%s14194_s20 + $0x50c] ss:$16 sps:$4 sm:$0xff]  }
 0x113   : > { %v1031_v18 = vcombine.low %v1009_v39, %v1023_v49  ;;  %v1032_v30 = vcombine.high %v1009_v39, %v1023_v49  ;;  %2886 = vmatmul.mubr.bf16.gmra.mxu0 %v14721_v41  ;;  %2957 = vmatmul.mubr.bf16.gmra.mxu1 %v14737_v24  ;;  %v11842_v37 = vcombine.high %v14359_v62, %v14362_v63  ;;  %v13345_v62 = vld [vmem:[%s14194_s20 + $0x70c] ss:$16 sps:$4 sm:$0xff]  }
 0x114   : > { %v1104_v25 = vcombine.low %v14392_v44, %v14395_v45  ;;  %v1105_v39 = vcombine.low %v14409_v53, %v14497_v8  ;;  %2992 = vmatpush2.bf16.msra.mxu0 %v13328_v61  ;;  %3063 = vmatpush2.bf16.msra.mxu1 %v13331_v20  ;;  %v19256_v49 = vcombine.low %v14689_v23, %v14695_v27  ;;  %v13340_v27 = vld [vmem:[%s14194_s20 + $0x508] ss:$16 sps:$4 sm:$0xff]  }
 0x115   : > { %v14795_v55 = vpack.c.bf16 %v1102_v0, %v1034_v26  ;;  %v14797_v38 = vpack.c.bf16 %v1099_v35, %v1031_v18  ;;  %2993 = vmatprep.subr.bf16.mxu0 %v13336_v31  ;;  %3064 = vmatprep.subr.bf16.mxu1 %v13339_v10  ;;  %v14800_v63 = vpack.c.bf16 %v1100_v9, %v1032_v30  ;;  %v13343_v0 = vld [vmem:[%s14194_s20 + $0x708] ss:$16 sps:$4 sm:$0xff]   ;;  %v13351_v31 = vld [vmem:[%s14194_s20 + $0x2e4] ss:$16 sps:$4 sm:$0xff]  }
 0x116   : > { %v14793_v58 = vpack.c.bf16 %v1101_v17, %v19256_v49  ;;  %v1106_v53 = vcombine.low %v14503_v15, %v14769_v33  ;;  %v14805_v8 = vrot.slane %v11842_v37, %v14273_v56  ;;  %2997 = vmatprep.mubr.bf16.mxu0 %v14431_v4  ;;  %3068 = vmatprep.mubr.bf16.mxu1 %v14433_v5  ;;  %v13348_v5 = vld [vmem:[%s14194_s20 + $0xe4] ss:$16 sps:$4 sm:$0xff]  }
 0x117   : > { %v14810_v23 = vrot.slane %v1104_v25, %v14273_v56  ;;  %v1127_v35 = vrot.slane %v1105_v39, %v14273_v56  ;;  %v1171_v9 = vcombine.low %v765_v54, %v14500_v14  ;;  %v1172_v15 = vcombine.low %v14508_v13, %v764_v1  ;;  %v13354_v49 = vld [vmem:[%s14194_s20 + $0xc4] ss:$16 sps:$4 sm:$0xff]  }
 0x118   : > { %v1134_v26 = vrot.slane %v1106_v53, %v14273_v56  ;;  %v1173_v61 = vcombine.low %v14511_v19, %v14517_v22  ;;  %v11843_v4 = vcombine.high %v14511_v19, %v14517_v22  ;;  %2994 = vmatpush2.bf16.msra.mxu0 %v13334_v36  ;;  %3065 = vmatpush2.bf16.msra.mxu1 %v13337_v43  ;;  %v13346_v36 = vld [vmem:[%s14194_s20 + $0xe0] ss:$16 sps:$4 sm:$0xff]  }
 0x119   : > { %v1136_v14 = vcombine.high %v14805_v8, %v14810_v23  ;;  %v14826_v20 = vrot.slane %v1171_v9, %v14273_v56  ;;  %v1135_v1 = vcombine.low %v14805_v8, %v14810_v23  ;;  %2995 = vmatprep.subr.bf16.mxu0 %v13342_v60  ;;  %3066 = vmatprep.subr.bf16.mxu1 %v13345_v62  ;;  %v13349_v43 = vld [vmem:[%s14194_s20 + $0x2e0] ss:$16 sps:$4 sm:$0xff]   ;;  %v13357_v9 = vld [vmem:[%s14194_s20 + $0x2c4] ss:$16 sps:$4 sm:$0xff]  }
 0x11a   : > { %v1138_v10 = vcombine.high %v1127_v35, %v1134_v26  ;;  %v14832_v19 = vrot.slane %v1172_v15, %v14273_v56  ;;  %v1195_v22 = vrot.slane %v1173_v61, %v14273_v56  ;;  %v14837_v30 = vrot.slane %v11843_v4, %v14273_v56 }
 0x11b   : > { %v1152_v18 = vrot.slane %v1136_v14, %v14273_v56  ;;  %v1137_v54 = vcombine.low %v1127_v35, %v1134_v26  ;;  %v1145_v17 = vrot.slane %v1135_v1, %v14273_v56  ;;  %v14849_v60 = vcombine.high %v14596_v34, %v14596_v34  ;;  %v13355_v1 = vld [vmem:[%s14194_s20 + $0x2c0] ss:$16 sps:$4 sm:$0xff]  }
 0x11c   : > { %v1166_v37 = vrot.slane %v1138_v10, %v14273_v56  ;;  %v1204_v25 = vcombine.high %v14826_v20, %v14832_v19  ;;  %v1203_v39 = vcombine.low %v14826_v20, %v14832_v19  ;;  %2996 = vmatpush2.bf16.msra.mxu0 %v13340_v27  ;;  %3067 = vmatpush2.bf16.msra.mxu1 %v13343_v0 }
 0x11d   : > { %v1206_v62 = vcombine.high %v1195_v22, %v14837_v30  ;;  %v1159_v53 = vrot.slane %v1137_v54, %v14273_v56  ;;  %v1205_v35 = vcombine.low %v1195_v22, %v14837_v30  ;;  %3747 = vmatprep.subr.bf16.mxu0 %v13348_v5  ;;  %3818 = vmatprep.subr.bf16.mxu1 %v13351_v31  ;;  %v13352_v5 = vld [vmem:[%s14194_s20 + $0xc0] ss:$16 sps:$4 sm:$0xff]   ;;  %v13360_v54 = vld [vmem:[%s14194_s20 + $0xa4] ss:$16 sps:$4 sm:$0xff]  }
 0x11e   : > { %v1169_v26 = vcombine.low %v1152_v18, %v1166_v37  ;;  %v1220_v15 = vrot.slane %v1204_v25, %v14273_v56  ;;  %v1213_v61 = vrot.slane %v1203_v39, %v14273_v56  ;;  %v1170_v14 = vcombine.high %v1152_v18, %v1166_v37 }
 0x11f   : > { %v1234_v27 = vrot.slane %v1206_v62, %v14273_v56  ;;  %v1167_v0 = vcombine.low %v1145_v17, %v1159_v53  ;;  %v1227_v4 = vrot.slane %v1205_v35, %v14273_v56  ;;  %2998 = vmatmul.mubr.bf16.vlgmr.msra.gmra.mxu0 %v14435_v6  ;;  %3069 = vmatmul.mubr.bf16.vlgmr.msra.gmra.mxu1 %v14437_v7  ;;  %v13363_v6 = vld [vmem:[%s14194_s20 + $0x2a4] ss:$16 sps:$4 sm:$0xff]   ;;  %v13358_v62 = vld [vmem:[%s14194_s20 + $0xa0] ss:$16 sps:$4 sm:$0xff]  }
 0x120   : > { %v1168_v31 = vcombine.high %v1145_v17, %v1159_v53  ;;  %v898_v10 = vcombine.high %v14599_v29, %v14599_v29  ;;  %v899_v22 = vcombine.high %v14604_v11, %v14604_v11  ;;  %3748 = vmatpush1.bf16.msra.mxu0 %v13346_v36  ;;  %3819 = vmatpush1.bf16.msra.mxu1 %v13349_v43  ;;  %v13361_v53 = vld [vmem:[%s14194_s20 + $0x2a0] ss:$16 sps:$4 sm:$0xff]  }
 0x121   : > { %v1237_v18 = vcombine.low %v1220_v15, %v1234_v27  ;;  %v1235_v37 = vcombine.low %v1213_v61, %v1227_v4  ;;  %v1238_v25 = vcombine.high %v1220_v15, %v1234_v27  ;;  %3749 = vmatprep.subr.bf16.mxu0 %v13354_v49  ;;  %3820 = vmatprep.subr.bf16.mxu1 %v13357_v9 }
 0x122   : > { %v1236_v7 = vcombine.high %v1213_v61, %v1227_v4  ;;  %v1239_v17 = vcombine.low %v14514_v21, %v14546_v59  ;;  %v1240_v39 = vcombine.low %v14554_v2, %v14596_v34  ;;  %3007 = vmatprep.mubr.bf16.mxu0 %v14586_v12  ;;  %3078 = vmatprep.mubr.bf16.mxu1 %v14588_v16  ;;  %v13366_v16 = vld [vmem:[%s14194_s20 + $0x84] ss:$16 sps:$4 sm:$0xff]   ;;  %v19257_v4 = vld [vmem:[#allocation25_spill] sm:$0xff] }
 0x123   : > { %v14876_v36 = vpack.c.bf16 %v1237_v18, %v1169_v26  ;;  %v14878_v43 = vpack.c.bf16 %v1235_v37, %v1167_v0  ;;  %v14880_v49 = vpack.c.bf16 %v1238_v25, %v1170_v14  ;;  %v1241_v9 = vcombine.low %v14604_v11, %v14849_v60  ;;  %v13369_v11 = vld [vmem:[%s14194_s20 + $0x284] ss:$16 sps:$4 sm:$0xff]  }
 0x124   : > { %v14884_v35 = vpack.c.bf16 %v1236_v7, %v1168_v31  ;;  %v1242_v2 = vcombine.low %v899_v22, %v14599_v29  ;;  %v14890_v12 = vrot.slane %v1239_v17, %v14273_v56  ;;  %3750 = vmatpush1.bf16.msra.mxu0 %v13352_v5  ;;  %3821 = vmatpush1.bf16.msra.mxu1 %v13355_v1  ;;  %v13364_v31 = vld [vmem:[%s14194_s20 + $0x80] ss:$16 sps:$4 sm:$0xff]   ;;  %v19258_v22 = vld [vmem:[#allocation23_spill] sm:$0xff]  ;;  %v13372_v37 = vld [vmem:[%s14194_s20 + $0x64] ss:$16 sps:$4 sm:$0xff]  }
 0x125   : > { %v1256_v34 = vrot.slane %v1240_v39, %v14273_v56  ;;  %v1307_v26 = vcombine.low %v14607_v52, %v898_v10  ;;  %v1308_v15 = vcombine.low %v14631_v48, %v14637_v32  ;;  %3751 = vmatprep.subr.bf16.mxu0 %v13360_v54  ;;  %3822 = vmatprep.subr.bf16.mxu1 %v13363_v6  ;;  %v13367_v10 = vld [vmem:[%s14194_s20 + $0x280] ss:$16 sps:$4 sm:$0xff]   ;;  %v13375_v17 = vld [vmem:[%s14194_s20 + $0x264] ss:$16 sps:$4 sm:$0xff]  }
 0x126   : > { %v1263_v29 = vrot.slane %v1241_v9, %v14273_v56  ;;  %v14900_v61 = vrot.slane %v1242_v2, %v14273_v56  ;;  %v11844_v27 = vcombine.high %v14631_v48, %v14637_v32  ;;  %v1310_v14 = vcombine.low %v19257_v4, %v14643_v57  ;;  %v19259_v54 = vld [vmem:[#allocation24_spill] sm:$0xff] }
 0x127   : > { %v1272_v0 = vcombine.high %v14890_v12, %v1256_v34  ;;  %v14908_v5 = vrot.slane %v1307_v26, %v14273_v56  ;;  %v1324_v1 = vrot.slane %v1308_v15, %v14273_v56  ;;  %3008 = vmatmul.mubr.bf16.gmra.mxu0 %v19258_v22  ;;  %3079 = vmatmul.mubr.bf16.gmra.mxu1 %v19259_v54  ;;  %v13373_v26 = vld [vmem:[%s14194_s20 + $0x260] ss:$16 sps:$4 sm:$0xff]  }
 0x128   : > { %v1274_v18 = vcombine.high %v1263_v29, %v14900_v61  ;;  %v14917_v48 = vrot.slane %v11844_v27, %v14273_v56  ;;  %v1271_v32 = vcombine.low %v14890_v12, %v1256_v34  ;;  %3752 = vmatpush1.bf16.msra.mxu0 %v13358_v62  ;;  %3823 = vmatpush1.bf16.msra.mxu1 %v13361_v53  ;;  %v13370_v34 = vld [vmem:[%s14194_s20 + $0x60] ss:$16 sps:$4 sm:$0xff]  }
 0x129   : > { %v1288_v25 = vrot.slane %v1272_v0, %v14273_v56  ;;  %v14923_v6 = vrot.slane %v1310_v14, %v14273_v56  ;;  %v1340_v7 = vcombine.high %v14908_v5, %v1324_v1  ;;  %3753 = vmatprep.subr.bf16.mxu0 %v13366_v16  ;;  %3824 = vmatprep.subr.bf16.mxu1 %v13369_v11  ;;  %v13381_v14 = vld [vmem:[%s14194_s20 + $0x244] ss:$16 sps:$4 sm:$0xff]  }
 0x12a   : > { %v1302_v39 = vrot.slane %v1274_v18, %v14273_v56  ;;  %v1273_v9 = vcombine.low %v1263_v29, %v14900_v61  ;;  %v1281_v62 = vrot.slane %v1271_v32, %v14273_v56  ;;  %3017 = vmatprep.mubr.bf16.mxu0 %v14705_v50  ;;  %3088 = vmatprep.mubr.bf16.mxu1 %v14707_v3  ;;  %v13378_v3 = vld [vmem:[%s14194_s20 + $0x44] ss:$16 sps:$4 sm:$0xff]  }
 0x12b   : > { %v1342_v53 = vcombine.high %v14917_v48, %v14923_v6  ;;  %v1356_v2 = vrot.slane %v1340_v7, %v14273_v56  ;;  %v1339_v16 = vcombine.low %v14908_v5, %v1324_v1  ;;  %v1341_v29 = vcombine.low %v14917_v48, %v14923_v6  ;;  %v13376_v7 = vld [vmem:[%s14194_s20 + $0x40] ss:$16 sps:$4 sm:$0xff]  }
 0x12c   : > { %v1305_v15 = vcombine.low %v1288_v25, %v1302_v39  ;;  %v1295_v11 = vrot.slane %v1273_v9, %v14273_v56  ;;  %v1306_v50 = vcombine.high %v1288_v25, %v1302_v39  ;;  %3754 = vmatpush1.bf16.msra.mxu0 %v13364_v31  ;;  %3825 = vmatpush1.bf16.msra.mxu1 %v13367_v10  ;;  %v13379_v25 = vld [vmem:[%s14194_s20 + $0x240] ss:$16 sps:$4 sm:$0xff]  }
 0x12d   : > { %v1370_v27 = vrot.slane %v1342_v53, %v14273_v56  ;;  %v1349_v0 = vrot.slane %v1339_v16, %v14273_v56  ;;  %3755 = vmatprep.subr.bf16.mxu0 %v13372_v37  ;;  %3826 = vmatprep.subr.bf16.mxu1 %v13375_v17  ;;  %v1363_v22 = vrot.slane %v1341_v29, %v14273_v56  ;;  %v13384_v37 = vld [vmem:[%s14194_s20 + $0x24] ss:$16 sps:$4 sm:$0xff]   ;;  %v13385_v53 = vld [vmem:[%s14194_s20 + $0x220] ss:$16 sps:$4 sm:$0xff]  }
 0x12e   : > { %v1303_v1 = vcombine.low %v1281_v62, %v1295_v11  ;;  %v1304_v54 = vcombine.high %v1281_v62, %v1295_v11  ;;  %v13382_v62 = vld [vmem:[%s14194_s20 + $0x20] ss:$16 sps:$4 sm:$0xff]   ;;  %v13393_v16 = vld [vmem:[%s14194_s20 + $0x204] ss:$16 sps:$4 sm:$0xff]  }
 0x12f   : > { %v1373_v18 = vcombine.low %v1356_v2, %v1370_v27  ;;  %v1374_v32 = vcombine.high %v1356_v2, %v1370_v27  ;;  %3018 = vmatmul.mubr.bf16.gmra.mxu0 %v14711_v28  ;;  %3089 = vmatmul.mubr.bf16.gmra.mxu1 %v14713_v51  ;;  %v1371_v31 = vcombine.low %v1349_v0, %v1363_v22  ;;  %v13387_v28 = vld [vmem:[%s14194_s20 + $0x224] ss:$16 sps:$4 sm:$0xff]   ;;  %v13400_v29 = vld [vmem:[%s14194_s20 + $0x1c0] ss:$16 sps:$4 sm:$0xff]  }
 0x130   : > { %v1372_v10 = vcombine.high %v1349_v0, %v1363_v22  ;;  %3756 = vmatpush1.bf16.msra.mxu0 %v13370_v34  ;;  %3827 = vmatpush1.bf16.msra.mxu1 %v13373_v26  ;;  %v13390_v2 = vld [vmem:[%s14194_s20 + $0x4] ss:$16 sps:$4 sm:$0xff]   ;;  %v13388_v34 = vld [vmem:[%s14194_s20] ss:$16 sps:$4 sm:$0xff]  }
 0x131   : > { %v14951_v17 = vpack.c.bf16 %v1373_v18, %v1305_v15  ;;  %v14953_v39 = vpack.c.bf16 %v1374_v32, %v1306_v50  ;;  %3757 = vmatprep.subr.bf16.mxu0 %v13378_v3  ;;  %3828 = vmatprep.subr.bf16.mxu1 %v13381_v14  ;;  %v14956_v9 = vpack.c.bf16 %v1371_v31, %v1303_v1  ;;  %v13391_v26 = vld [vmem:[%s14194_s20 + $0x200] ss:$16 sps:$4 sm:$0xff]   ;;  %v13405_v11 = vld [vmem:[%s14194_s20 + $0x3c4] ss:$16 sps:$4 sm:$0xff]  }
 0x132   : > { %v14958_v51 = vpack.c.bf16 %v1372_v10, %v1304_v54  ;;  %3027 = vmatprep.mubr.bf16.mxu0 %v14731_v46  ;;  %3098 = vmatprep.mubr.bf16.mxu1 %v14744_v47  ;;  %v13396_v46 = vld [vmem:[%s14194_s20 + $0x1e4] ss:$16 sps:$4 sm:$0xff]   ;;  %v13394_v15 = vld [vmem:[%s14194_s20 + $0x1e0] ss:$16 sps:$4 sm:$0xff]  }
 0x133   : > { %v13399_v47 = vld [vmem:[%s14194_s20 + $0x3e4] ss:$16 sps:$4 sm:$0xff]   ;;  %v13403_v50 = vld [vmem:[%s14194_s20 + $0x3c0] ss:$16 sps:$4 sm:$0xff]  }
 0x134   : > { %3758 = vmatpush1.bf16.msra.mxu0 %v13376_v7  ;;  %3829 = vmatpush1.bf16.msra.mxu1 %v13379_v25  ;;  %v13408_v3 = vld [vmem:[%s14194_s20 + $0x1a4] ss:$16 sps:$4 sm:$0xff]   ;;  %v13406_v0 = vld [vmem:[%s14194_s20 + $0x1a0] ss:$16 sps:$4 sm:$0xff]  }
 0x135   : > { %3759 = vmatprep.subr.bf16.mxu0 %v13384_v37  ;;  %3830 = vmatprep.subr.bf16.mxu1 %v13387_v28  ;;  %v13411_v27 = vld [vmem:[%s14194_s20 + $0x3a4] ss:$16 sps:$4 sm:$0xff]   ;;  %v13409_v14 = vld [vmem:[%s14194_s20 + $0x3a0] ss:$16 sps:$4 sm:$0xff]  }
 0x136   : > { %v13414_v1 = vld [vmem:[%s14194_s20 + $0x184] ss:$16 sps:$4 sm:$0xff]   ;;  %v13412_v54 = vld [vmem:[%s14194_s20 + $0x180] ss:$16 sps:$4 sm:$0xff]  }
 0x137   : > { %3028 = vmatmul.mubr.bf16.gmra.mxu0 %v14721_v41  ;;  %3099 = vmatmul.mubr.bf16.gmra.mxu1 %v14737_v24  ;;  %v13397_v41 = vld [vmem:[%s14194_s20 + $0x3e0] ss:$16 sps:$4 sm:$0xff]   ;;  %v13402_v24 = vld [vmem:[%s14194_s20 + $0x1c4] ss:$16 sps:$4 sm:$0xff]  }
 0x138   : > { %3760 = vmatpush1.bf16.msra.mxu0 %v13382_v62  ;;  %3831 = vmatpush1.bf16.msra.mxu1 %v13385_v53  ;;  %v13417_v22 = vld [vmem:[%s14194_s20 + $0x384] ss:$16 sps:$4 sm:$0xff]   ;;  %v13415_v18 = vld [vmem:[%s14194_s20 + $0x380] ss:$16 sps:$4 sm:$0xff]  }
 0x139   : > { %3761 = vmatprep.subr.bf16.mxu0 %v13390_v2  ;;  %3832 = vmatprep.subr.bf16.mxu1 %v13393_v16  ;;  %v13420_v32 = vld [vmem:[%s14194_s20 + $0x164] ss:$16 sps:$4 sm:$0xff]   ;;  %v13418_v25 = vld [vmem:[%s14194_s20 + $0x160] ss:$16 sps:$4 sm:$0xff]  }
 0x13a   : > { %3779 = vmatprep.mubr.bf16.mxu0 %v14793_v58  ;;  %3850 = vmatprep.mubr.bf16.mxu1 %v14795_v55  ;;  %v13423_v7 = vld [vmem:[%s14194_s20 + $0x364] ss:$16 sps:$4 sm:$0xff]   ;;  %v13421_v31 = vld [vmem:[%s14194_s20 + $0x360] ss:$16 sps:$4 sm:$0xff]  }
 0x13b   : > { %v13426_v10 = vld [vmem:[%s14194_s20 + $0x144] ss:$16 sps:$4 sm:$0xff]   ;;  %v13424_v28 = vld [vmem:[%s14194_s20 + $0x140] ss:$16 sps:$4 sm:$0xff]  }
 0x13c   : > { %3762 = vmatpush1.bf16.msra.mxu0 %v13388_v34  ;;  %3833 = vmatpush1.bf16.msra.mxu1 %v13391_v26  ;;  %v13429_v37 = vld [vmem:[%s14194_s20 + $0x344] ss:$16 sps:$4 sm:$0xff]   ;;  %v13427_v62 = vld [vmem:[%s14194_s20 + $0x340] ss:$16 sps:$4 sm:$0xff]  }
 0x13d   : > { %3763 = vmatprep.subr.bf16.mxu0 %v13396_v46  ;;  %3834 = vmatprep.subr.bf16.mxu1 %v13399_v47  ;;  %v13432_v53 = vld [vmem:[%s14194_s20 + $0x124] ss:$16 sps:$4 sm:$0xff]   ;;  %v13430_v16 = vld [vmem:[%s14194_s20 + $0x120] ss:$16 sps:$4 sm:$0xff]  }
 0x13e   : > { %v13435_v2 = vld [vmem:[%s14194_s20 + $0x324] ss:$16 sps:$4 sm:$0xff]   ;;  %v13433_v34 = vld [vmem:[%s14194_s20 + $0x320] ss:$16 sps:$4 sm:$0xff]  }
 0x13f   : > { %v13438_v26 = vld [vmem:[%s14194_s20 + $0x104] ss:$16 sps:$4 sm:$0xff]   ;;  %v13436_v47 = vld [vmem:[%s14194_s20 + $0x100] ss:$16 sps:$4 sm:$0xff]  }
 0x140   : > { %3764 = vmatpush2.bf16.msra.mxu0 %v13394_v15  ;;  %3835 = vmatpush2.bf16.msra.mxu1 %v13397_v41  ;;  %v13441_v46 = vld [vmem:[%s14194_s20 + $0x304] ss:$16 sps:$4 sm:$0xff]   ;;  %v13439_v15 = vld [vmem:[%s14194_s20 + $0x300] ss:$16 sps:$4 sm:$0xff]   ;;  %v13444_v41 = vld [vmem:[%s14194_s20 + $0xec] ss:$16 sps:$4 sm:$0xff]  }
 0x141   : > { %3765 = vmatprep.subr.bf16.mxu0 %v13402_v24  ;;  %3836 = vmatprep.subr.bf16.mxu1 %v13405_v11  ;;  %v13447_v24 = vld [vmem:[%s14194_s20 + $0x2ec] ss:$16 sps:$4 sm:$0xff]   ;;  %v13442_v11 = vld [vmem:[%s14194_s20 + $0xe8] ss:$16 sps:$4 sm:$0xff]  }
 0x144   : > { %3766 = vmatpush2.bf16.msra.mxu0 %v13400_v29  ;;  %3837 = vmatpush2.bf16.msra.mxu1 %v13403_v50  ;;  %v13445_v29 = vld [vmem:[%s14194_s20 + $0x2e8] ss:$16 sps:$4 sm:$0xff]   ;;  %v13450_v50 = vld [vmem:[%s14194_s20 + $0xcc] ss:$16 sps:$4 sm:$0xff]  }
 0x145   : > { %3767 = vmatprep.subr.bf16.mxu0 %v13408_v3  ;;  %3838 = vmatprep.subr.bf16.mxu1 %v13411_v27  ;;  %v13453_v3 = vld [vmem:[%s14194_s20 + $0x2cc] ss:$16 sps:$4 sm:$0xff]   ;;  %v19260_v27 = vld [vmem:[#allocation26_spill] sm:$0xff] }
 0x148   : > { %3768 = vmatpush2.bf16.msra.mxu0 %v13406_v0  ;;  %3839 = vmatpush2.bf16.msra.mxu1 %v13409_v14  ;;  %v1381_v0 = vrot.slane %v19260_v27, %v14273_v56  ;;  %v13448_v14 = vld [vmem:[%s14194_s20 + $0xc8] ss:$16 sps:$4 sm:$0xff]  }
 0x149   : > { %3769 = vmatprep.subr.bf16.mxu0 %v13414_v1  ;;  %3840 = vmatprep.subr.bf16.mxu1 %v13417_v22  ;;  %v13451_v1 = vld [vmem:[%s14194_s20 + $0x2c8] ss:$16 sps:$4 sm:$0xff]   ;;  %v13456_v22 = vld [vmem:[%s14194_s20 + $0xac] ss:$16 sps:$4 sm:$0xff]  }
 0x14c   : > { %3770 = vmatpush2.bf16.msra.mxu0 %v13412_v54  ;;  %3841 = vmatpush2.bf16.msra.mxu1 %v13415_v18  ;;  %v13459_v54 = vld [vmem:[%s14194_s20 + $0x2ac] ss:$16 sps:$4 sm:$0xff]   ;;  %v1382_v18 = vcombine.high %v1381_v0, %v1381_v0 }
 0x14d   : > { %3771 = vmatprep.subr.bf16.mxu0 %v13420_v32  ;;  %3842 = vmatprep.subr.bf16.mxu1 %v13423_v7  ;;  %v13454_v32 = vld [vmem:[%s14194_s20 + $0xa8] ss:$16 sps:$4 sm:$0xff]  }
 0x14e   : > { %v13457_v7 = vld [vmem:[%s14194_s20 + $0x2a8] ss:$16 sps:$4 sm:$0xff]  }
 0x150   : > { %3772 = vmatpush2.bf16.msra.mxu0 %v13418_v25  ;;  %3843 = vmatpush2.bf16.msra.mxu1 %v13421_v31  ;;  %v13462_v25 = vld [vmem:[%s14194_s20 + $0x8c] ss:$16 sps:$4 sm:$0xff]  }
 0x151   : > { %3773 = vmatprep.subr.bf16.mxu0 %v13426_v10  ;;  %3844 = vmatprep.subr.bf16.mxu1 %v13429_v37  ;;  %v13465_v31 = vld [vmem:[%s14194_s20 + $0x28c] ss:$16 sps:$4 sm:$0xff]   ;;  %v1396_v10 = vrot.slane %v1382_v18, %v14273_v56  ;;  %v13460_v37 = vld [vmem:[%s14194_s20 + $0x88] ss:$16 sps:$4 sm:$0xff]  }
 0x152   : > { %v13484_v18 = vld [vmem:[%s14194_s20 + $0x8] ss:$16 sps:$4 sm:$0xff]  }
 0x154   : > { %3774 = vmatpush2.bf16.msra.mxu0 %v13424_v28  ;;  %3845 = vmatpush2.bf16.msra.mxu1 %v13427_v62  ;;  %v13463_v28 = vld [vmem:[%s14194_s20 + $0x288] ss:$16 sps:$4 sm:$0xff]   ;;  %v13468_v62 = vld [vmem:[%s14194_s20 + $0x6c] ss:$16 sps:$4 sm:$0xff]  }
 0x155   : > { %3775 = vmatprep.subr.bf16.mxu0 %v13432_v53  ;;  %3846 = vmatprep.subr.bf16.mxu1 %v13435_v2  ;;  %v13471_v53 = vld [vmem:[%s14194_s20 + $0x26c] ss:$16 sps:$4 sm:$0xff]   ;;  %v1398_v2 = vcombine.high %v1396_v10, %v1396_v10 }
 0x158   : > { %3776 = vmatpush2.bf16.msra.mxu0 %v13430_v16  ;;  %3847 = vmatpush2.bf16.msra.mxu1 %v13433_v34  ;;  %v13466_v16 = vld [vmem:[%s14194_s20 + $0x68] ss:$16 sps:$4 sm:$0xff]  }
 0x159   : > { %3777 = vmatprep.subr.bf16.mxu0 %v13438_v26  ;;  %3848 = vmatprep.subr.bf16.mxu1 %v13441_v46  ;;  %v13469_v34 = vld [vmem:[%s14194_s20 + $0x268] ss:$16 sps:$4 sm:$0xff]   ;;  %v1389_v26 = vrot.slane %v1381_v0, %v14273_v56  ;;  %v13474_v46 = vld [vmem:[%s14194_s20 + $0x4c] ss:$16 sps:$4 sm:$0xff]  }
 0x15a   : > { %v13478_v0 = vld [vmem:[%s14194_s20 + $0x28] ss:$16 sps:$4 sm:$0xff]  }
 0x15b   : > { %v15050_v27 = vpack.c.bf16 %v1389_v26, %v1389_v26 }
 0x15c   : > { %3778 = vmatpush2.bf16.msra.mxu0 %v13436_v47  ;;  %3849 = vmatpush2.bf16.msra.mxu1 %v13439_v15  ;;  %v13477_v47 = vld [vmem:[%s14194_s20 + $0x24c] ss:$16 sps:$4 sm:$0xff]   ;;  %v15038_v15 = vpack.c.bf16 %v1396_v10, %v1396_v10  ;;  %v13493_v10 = vld [vmem:[%s14194_s20 + $0x3e8] ss:$16 sps:$4 sm:$0xff]  }
 0x15d   : > { %3889 = vmatprep.subr.bf16.mxu0 %v13444_v41  ;;  %3960 = vmatprep.subr.bf16.mxu1 %v13447_v24  ;;  %v15040_v41 = vpack.c.bf16 %v1398_v2, %v1398_v2  ;;  %v13472_v24 = vld [vmem:[%s14194_s20 + $0x48] ss:$16 sps:$4 sm:$0xff]  }
 0x15e   : > { %v13502_v2 = vld [vmem:[%s14194_s20 + $0x1a8] ss:$16 sps:$4 sm:$0xff]  }
 0x15f   : > { %3780 = vmatmul.mubr.bf16.vlgmr.msra.gmra.mxu0 %v14797_v38  ;;  %3851 = vmatmul.mubr.bf16.vlgmr.msra.gmra.mxu1 %v14800_v63 }
 0x160   : > { %3890 = vmatpush1.bf16.msra.mxu0 %v13442_v11  ;;  %3961 = vmatpush1.bf16.msra.mxu1 %v13445_v29  ;;  %v13475_v11 = vld [vmem:[%s14194_s20 + $0x248] ss:$16 sps:$4 sm:$0xff]   ;;  %v1397_v29 = vcombine.high %v1389_v26, %v1389_v26  ;;  %v13513_v26 = vld [vmem:[%s14194_s20 + $0x38c] ss:$16 sps:$4 sm:$0xff]  }
 0x161   : > { %3891 = vmatprep.subr.bf16.mxu0 %v13450_v50  ;;  %3962 = vmatprep.subr.bf16.mxu1 %v13453_v3  ;;  %v13480_v50 = vld [vmem:[%s14194_s20 + $0x2c] ss:$16 sps:$4 sm:$0xff]  }
 0x162   : > { %3789 = vmatprep.mubr.bf16.mxu0 %v14876_v36  ;;  %3860 = vmatprep.mubr.bf16.mxu1 %v14880_v49  ;;  %v13483_v3 = vld [vmem:[%s14194_s20 + $0x22c] ss:$16 sps:$4 sm:$0xff]  }
 0x164   : > { %3892 = vmatpush1.bf16.msra.mxu0 %v13448_v14  ;;  %3963 = vmatpush1.bf16.msra.mxu1 %v13451_v1  ;;  %v13481_v14 = vld [vmem:[%s14194_s20 + $0x228] ss:$16 sps:$4 sm:$0xff]   ;;  %v15054_v1 = vpack.c.bf16 %v1397_v29, %v1397_v29 }
 0x165   : > { %3893 = vmatprep.subr.bf16.mxu0 %v13456_v22  ;;  %3964 = vmatprep.subr.bf16.mxu1 %v13459_v54  ;;  %v13486_v22 = vld [vmem:[%s14194_s20 + $0xc] ss:$16 sps:$4 sm:$0xff]   ;;  %v13514_v29 = vld [vmem:[%s14194_s20 + $0x168] ss:$16 sps:$4 sm:$0xff]  }
 0x166   : > { %v13489_v54 = vld [vmem:[%s14194_s20 + $0x20c] ss:$16 sps:$4 sm:$0xff]  }
 0x167   : > { %3790 = vmatmul.mubr.bf16.gmra.mxu0 %v14878_v43  ;;  %3861 = vmatmul.mubr.bf16.gmra.mxu1 %v14884_v35 }
 0x168   : > { %3894 = vmatpush1.bf16.msra.mxu0 %v13454_v32  ;;  %3965 = vmatpush1.bf16.msra.mxu1 %v13457_v7  ;;  %v13487_v32 = vld [vmem:[%s14194_s20 + $0x208] ss:$16 sps:$4 sm:$0xff]   ;;  %v13492_v7 = vld [vmem:[%s14194_s20 + $0x1ec] ss:$16 sps:$4 sm:$0xff]  }
 0x169   : > { %3895 = vmatprep.subr.bf16.mxu0 %v13462_v25  ;;  %3966 = vmatprep.subr.bf16.mxu1 %v13465_v31  ;;  %v13495_v25 = vld [vmem:[%s14194_s20 + $0x3ec] ss:$16 sps:$4 sm:$0xff]   ;;  %v13490_v31 = vld [vmem:[%s14194_s20 + $0x1e8] ss:$16 sps:$4 sm:$0xff]  }
 0x16a   : > { %3799 = vmatprep.mubr.bf16.mxu0 %v14951_v17  ;;  %3870 = vmatprep.mubr.bf16.mxu1 %v14953_v39 }
 0x16c   : > { %3896 = vmatpush1.bf16.msra.mxu0 %v13460_v37  ;;  %3967 = vmatpush1.bf16.msra.mxu1 %v13463_v28  ;;  %v13498_v37 = vld [vmem:[%s14194_s20 + $0x1cc] ss:$16 sps:$4 sm:$0xff]  }
 0x16d   : > { %3897 = vmatprep.subr.bf16.mxu0 %v13468_v62  ;;  %3968 = vmatprep.subr.bf16.mxu1 %v13471_v53  ;;  %v13501_v28 = vld [vmem:[%s14194_s20 + $0x3cc] ss:$16 sps:$4 sm:$0xff]   ;;  %v13499_v62 = vld [vmem:[%s14194_s20 + $0x3c8] ss:$16 sps:$4 sm:$0xff]  }
 0x16e   : > { %v13507_v53 = vld [vmem:[%s14194_s20 + $0x3ac] ss:$16 sps:$4 sm:$0xff]  }
 0x16f   : > { %3800 = vmatmul.mubr.bf16.gmra.mxu0 %v14956_v9  ;;  %3871 = vmatmul.mubr.bf16.gmra.mxu1 %v14958_v51 }
 0x170   : > { %3898 = vmatpush1.bf16.msra.mxu0 %v13466_v16  ;;  %3969 = vmatpush1.bf16.msra.mxu1 %v13469_v34  ;;  %v13505_v16 = vld [vmem:[%s14194_s20 + $0x3a8] ss:$16 sps:$4 sm:$0xff]   ;;  %v13510_v34 = vld [vmem:[%s14194_s20 + $0x18c] ss:$16 sps:$4 sm:$0xff]  }
 0x171   : > { %3899 = vmatprep.subr.bf16.mxu0 %v13474_v46  ;;  %3970 = vmatprep.subr.bf16.mxu1 %v13477_v47  ;;  %v13508_v46 = vld [vmem:[%s14194_s20 + $0x188] ss:$16 sps:$4 sm:$0xff]  }
 0x172   : > { %3809 = vmatprep.mubr.bf16.mxu0 %v15038_v15  ;;  %3880 = vmatprep.mubr.bf16.mxu1 %v15040_v41  ;;  %v13511_v47 = vld [vmem:[%s14194_s20 + $0x388] ss:$16 sps:$4 sm:$0xff]  }
 0x174   : > { %3900 = vmatpush1.bf16.msra.mxu0 %v13472_v24  ;;  %3971 = vmatpush1.bf16.msra.mxu1 %v13475_v11  ;;  %v13516_v24 = vld [vmem:[%s14194_s20 + $0x16c] ss:$16 sps:$4 sm:$0xff]  }
 0x175   : > { %3901 = vmatprep.subr.bf16.mxu0 %v13480_v50  ;;  %3972 = vmatprep.subr.bf16.mxu1 %v13483_v3  ;;  %v13519_v11 = vld [vmem:[%s14194_s20 + $0x36c] ss:$16 sps:$4 sm:$0xff]   ;;  %v13517_v50 = vld [vmem:[%s14194_s20 + $0x368] ss:$16 sps:$4 sm:$0xff]  }
 0x176   : > { %v13634_v3 = vld [vmem:[%s14266_s24 + $0x20] ss:$8 sps:$4 sm:$0x11]  }
 0x177   : > { %3810 = vmatmul.mubr.bf16.gmra.mxu0 %v15050_v27  ;;  %3881 = vmatmul.mubr.bf16.gmra.mxu1 %v15054_v1 }
 0x178   : > { %3902 = vmatpush1.bf16.msra.mxu0 %v13478_v0  ;;  %3973 = vmatpush1.bf16.msra.mxu1 %v13481_v14  ;;  %v13522_v0 = vld [vmem:[%s14194_s20 + $0x14c] ss:$16 sps:$4 sm:$0xff]  }
 0x179   : > { %3903 = vmatprep.subr.bf16.mxu0 %v13486_v22  ;;  %3974 = vmatprep.subr.bf16.mxu1 %v13489_v54  ;;  %v13525_v14 = vld [vmem:[%s14194_s20 + $0x34c] ss:$16 sps:$4 sm:$0xff]   ;;  %v13635_v22 = vld [vmem:[%s14266_s24 + $0x30] ss:$8 sps:$4 sm:$0x11]  }
 0x17a   : > { %3921 = vmatprep.mubr.bf16.mxu0 %v14793_v58  ;;  %3992 = vmatprep.mubr.bf16.mxu1 %v14795_v55  ;;  %v13496_v58 = vld [vmem:[%s14194_s20 + $0x1c8] ss:$16 sps:$4 sm:$0xff]   ;;  %v13504_v55 = vld [vmem:[%s14194_s20 + $0x1ac] ss:$16 sps:$4 sm:$0xff]  }
 0x17b   : > { %v13636_v54 = vld [vmem:[%s14266_s24 + $0x60] ss:$8 sps:$4 sm:$0x11]  }
 0x17c   : > { %3904 = vmatpush1.bf16.msra.mxu0 %v13484_v18  ;;  %3975 = vmatpush1.bf16.msra.mxu1 %v13487_v32  ;;  %v13637_v18 = vld [vmem:[%s14266_s24 + $0x70] ss:$8 sps:$4 sm:$0x11]  }
 0x17d   : > { %3905 = vmatprep.subr.bf16.mxu0 %v13492_v7  ;;  %3976 = vmatprep.subr.bf16.mxu1 %v13495_v25  ;;  %v13520_v32 = vld [vmem:[%s14194_s20 + $0x148] ss:$16 sps:$4 sm:$0xff]  }
 0x17e   : > { %v13523_v7 = vld [vmem:[%s14194_s20 + $0x348] ss:$16 sps:$4 sm:$0xff]  }
 0x17f   : > { %v13666_v25 = vld [vmem:[%s14266_s24 + $0x120] ss:$8 sps:$4 sm:$0x11]  }
 0x180   : > { %3906 = vmatpush2.bf16.msra.mxu0 %v13490_v31  ;;  %3977 = vmatpush2.bf16.msra.mxu1 %v13493_v10  ;;  %v13667_v31 = vld [vmem:[%s14266_s24 + $0x130] ss:$8 sps:$4 sm:$0x11]   ;;  %v4067_v10 = vrot.slane %v13634_v3, %v14273_v56  ;;  %v13534_v3 = vld [vmem:[%s14194_s20 + $0x10c] ss:$16 sps:$4 sm:$0xff]  }
 0x181   : > { %3907 = vmatprep.subr.bf16.mxu0 %v13498_v37  ;;  %3978 = vmatprep.subr.bf16.mxu1 %v13501_v28  ;;  %v13668_v37 = vld [vmem:[%s14266_s24 + $0x160] ss:$8 sps:$4 sm:$0x11]   ;;  %v13669_v28 = vld [vmem:[%s14266_s24 + $0x170] ss:$8 sps:$4 sm:$0x11]  }
 0x184   : > { %3908 = vmatpush2.bf16.msra.mxu0 %v13496_v58  ;;  %3979 = vmatpush2.bf16.msra.mxu1 %v13499_v62  ;;  %v12238_v58 = vcombine.high %v19257_v4, %v14643_v57  ;;  %v13528_v62 = vld [vmem:[%s14194_s20 + $0x12c] ss:$16 sps:$4 sm:$0xff]   ;;  %v4194_v57 = vrot.slane %v13669_v28, %v14273_v56  ;;  %v12237_v4 = vcombine.high %v14514_v21, %v14546_v59  ;;  %v13543_v28 = vld [vmem:[%s14194_s20 + $0xae4] ss:$16 sps:$4 sm:$0xff]  }
 0x185   : > { %3909 = vmatprep.subr.bf16.mxu0 %v13504_v55  ;;  %3980 = vmatprep.subr.bf16.mxu1 %v13507_v53  ;;  %v13531_v55 = vld [vmem:[%s14194_s20 + $0x32c] ss:$16 sps:$4 sm:$0xff]   ;;  %v4074_v53 = vrot.slane %v13635_v22, %v14273_v56 }
 0x187   : > { %v4075_v22 = vcombine.low %v4067_v10, %v4074_v53 }
 0x188   : > { %3910 = vmatpush2.bf16.msra.mxu0 %v13502_v2  ;;  %3981 = vmatpush2.bf16.msra.mxu1 %v13505_v16  ;;  %v4091_v2 = vrot.slane %v13636_v54, %v14273_v56  ;;  %v4163_v16 = vrot.slane %v13666_v25, %v14273_v56  ;;  %v13535_v25 = vld [vmem:[%s14194_s20 + $0x308] ss:$16 sps:$4 sm:$0xff]  }
 0x189   : > { %3911 = vmatprep.subr.bf16.mxu0 %v13510_v34  ;;  %3982 = vmatprep.subr.bf16.mxu1 %v13513_v26  ;;  %v4098_v34 = vrot.slane %v13637_v18, %v14273_v56  ;;  %v4170_v26 = vrot.slane %v13667_v31, %v14273_v56  ;;  %v13532_v18 = vld [vmem:[%s14194_s20 + $0x108] ss:$16 sps:$4 sm:$0xff]   ;;  %v13540_v31 = vld [vmem:[%s14194_s20 + $0x8e4] ss:$16 sps:$4 sm:$0xff]  }
 0x18b   : > { %v4099_v21 = vcombine.low %v4091_v2, %v4098_v34  ;;  %v13541_v34 = vld [vmem:[%s14194_s20 + $0xae0] ss:$16 sps:$4 sm:$0xff]  }
 0x18c   : > { %3912 = vmatpush2.bf16.msra.mxu0 %v13508_v46  ;;  %3983 = vmatpush2.bf16.msra.mxu1 %v13511_v47  ;;  %v4187_v46 = vrot.slane %v13668_v37, %v14273_v56  ;;  %v13526_v47 = vld [vmem:[%s14194_s20 + $0x128] ss:$16 sps:$4 sm:$0xff]   ;;  %v4437_v37 = vcombine.low %v14900_v61, %v14908_v5 }
 0x18d   : > { %3913 = vmatprep.subr.bf16.mxu0 %v13516_v24  ;;  %3984 = vmatprep.subr.bf16.mxu1 %v13519_v11  ;;  %v13529_v24 = vld [vmem:[%s14194_s20 + $0x328] ss:$16 sps:$4 sm:$0xff]   ;;  %v4171_v11 = vcombine.low %v4163_v16, %v4170_v26  ;;  %v4106_v53 = vrot.slane %v4099_v21, %v14273_v56  ;;  %v13538_v16 = vld [vmem:[%s14194_s20 + $0x8e0] ss:$16 sps:$4 sm:$0xff]  }
 0x18f   : > { %v4178_v59 = vrot.slane %v4171_v11, %v14273_v56 }
 0x190   : > { %3914 = vmatpush2.bf16.msra.mxu0 %v13514_v29  ;;  %3985 = vmatpush2.bf16.msra.mxu1 %v13517_v50  ;;  %v4195_v29 = vcombine.low %v4187_v46, %v4194_v57  ;;  %v4486_v50 = vrot.slane %v12238_v58, %v14273_v56  ;;  %v1572_v58 = vcombine.high %v14334_v40, %v14334_v40  ;;  %v13546_v40 = vld [vmem:[%s14194_s20 + $0x8c4] ss:$16 sps:$4 sm:$0xff]  }
 0x191   : > { %3915 = vmatprep.subr.bf16.mxu0 %v13522_v0  ;;  %3986 = vmatprep.subr.bf16.mxu1 %v13525_v14  ;;  %v13537_v0 = vld [vmem:[%s14194_s20 + $0x30c] ss:$16 sps:$4 sm:$0xff]   ;;  %v1576_v14 = vcombine.high %v14607_v52, %v14607_v52  ;;  %v4420_v52 = vcombine.low %v4178_v59, %v14849_v60 }
 0x192   : > { %v4202_v54 = vrot.slane %v4195_v29, %v14273_v56  ;;  %v4490_v10 = vcombine.high %v14923_v6, %v4486_v50  ;;  %v4489_v2 = vcombine.low %v14923_v6, %v4486_v50  ;;  %v13549_v6 = vld [vmem:[%s14194_s20 + $0xac4] ss:$16 sps:$4 sm:$0xff]  }
 0x193   : > { %v4434_v60 = vrot.slane %v4420_v52, %v14273_v56 }
 0x194   : > { %3916 = vmatpush2.bf16.msra.mxu0 %v13520_v32  ;;  %3987 = vmatpush2.bf16.msra.mxu1 %v13523_v7  ;;  %v4427_v32 = vrot.slane %v12237_v4, %v14273_v56  ;;  %v4438_v7 = vcombine.high %v14900_v61, %v14908_v5  ;;  %v19261_v61 = vld [vmem:[#allocation20_spill] sm:$0xff]  ;;  %v19262_v5 = vld [vmem:[#allocation19_spill] sm:$0xff]  ;;  %v4511_v59 = vrot.slane %v4489_v2, %v14273_v56 }
 0x195   : > { %3917 = vmatprep.subr.bf16.mxu0 %v13528_v62  ;;  %3988 = vmatprep.subr.bf16.mxu1 %v13531_v55  ;;  %v4471_v62 = vcombine.low %v1576_v14, %v4202_v54  ;;  %v4082_v55 = vrot.slane %v4075_v22, %v14273_v56  ;;  %v12235_v26 = vcombine.high %v19262_v5, %v19261_v61  ;;  %v13553_v61 = vld [vmem:[%s14194_s20 + $0xaa0] ss:$16 sps:$4 sm:$0xff]  }
 0x196   : > { %v4466_v46 = vrot.slane %v4438_v7, %v14273_v56  ;;  %v4436_v4 = vcombine.high %v4427_v32, %v4434_v60  ;;  %v4435_v29 = vcombine.low %v4427_v32, %v4434_v60  ;;  %v4279_v22 = vcombine.low %v1572_v58, %v4106_v53  ;;  %v13547_v32 = vld [vmem:[%s14194_s20 + $0xac0] ss:$16 sps:$4 sm:$0xff]  }
 0x197   : > { %v4479_v57 = vrot.slane %v4471_v62, %v14273_v56  ;;  %v4228_v14 = vcombine.low %v4082_v55, %v14387_v42 }
 0x198   : > { %3918 = vmatpush2.bf16.msra.mxu0 %v13526_v47  ;;  %3989 = vmatpush2.bf16.msra.mxu1 %v13529_v24  ;;  %v4518_v47 = vrot.slane %v4490_v10, %v14273_v56  ;;  %v4459_v24 = vrot.slane %v4437_v37, %v14273_v56  ;;  %v4452_v21 = vrot.slane %v4436_v4, %v14273_v56 }
 0x199   : > { %3919 = vmatprep.subr.bf16.mxu0 %v13534_v3  ;;  %3990 = vmatprep.subr.bf16.mxu1 %v13537_v0  ;;  %v4488_v11 = vcombine.high %v4479_v57, %v14917_v48  ;;  %v4487_v50 = vcombine.low %v4479_v57, %v14917_v48  ;;  %v4445_v7 = vrot.slane %v4435_v29, %v14273_v56 }
 0x19a   : > { %v4469_v52 = vcombine.low %v4452_v21, %v4466_v46  ;;  %v4470_v10 = vcombine.high %v4452_v21, %v4466_v46  ;;  %v15176_v4 = vrot.slane %v12235_v26, %v14273_v56  ;;  %v13556_v26 = vld [vmem:[%s14194_s20 + $0x880] ss:$16 sps:$4 sm:$0xff]  }
 0x19b   : > { %v4504_v48 = vrot.slane %v4488_v11, %v14273_v56  ;;  %v4497_v37 = vrot.slane %v4487_v50, %v14273_v56  ;;  %v4467_v53 = vcombine.low %v4445_v7, %v4459_v24  ;;  %v4468_v2 = vcombine.high %v4445_v7, %v4459_v24  ;;  %v19263_v21 = vld [vmem:[#allocation22_spill] sm:$0xff] }
 0x19c   : > { %3920 = vmatpush2.bf16.msra.mxu0 %v13532_v18  ;;  %3991 = vmatpush2.bf16.msra.mxu1 %v13535_v25  ;;  %v13544_v18 = vld [vmem:[%s14194_s20 + $0x8c0] ss:$16 sps:$4 sm:$0xff]   ;;  %v15184_v11 = vrot.slane %v4228_v14, %v14273_v56  ;;  %v15189_v50 = vrot.slane %v4279_v22, %v14273_v56  ;;  %v13567_v14 = vld [vmem:[%s14194_s20 + $0xa64] ss:$16 sps:$4 sm:$0xff]  }
 0x19d   : > { %5360 = vmatprep.subr.bf16.mxu0 %v13540_v31  ;;  %5431 = vmatprep.subr.bf16.mxu1 %v13543_v28  ;;  %v2857_v3 = vpop.f32.mrf.mxu0  ;;  %v2928_v0 = vpop.f32.mrf.mxu1  ;;  %v13552_v31 = vld [vmem:[%s14194_s20 + $0x8a4] ss:$16 sps:$4 sm:$0xff]   ;;  %v4521_v28 = vcombine.low %v4504_v48, %v4518_v47  ;;  %v4522_v58 = vcombine.high %v4504_v48, %v4518_v47  ;;  %v4519_v60 = vcombine.low %v4497_v37, %v4511_v59  ;;  %v13562_v7 = vld [vmem:[%s14194_s20 + $0x860] ss:$16 sps:$4 sm:$0xff]  }
 0x19e   : > { %v15151_v54 = vadd.f32 %v2928_v0, %v2857_v3  ;;  %v4520_v57 = vcombine.high %v4497_v37, %v4511_v59  ;;  %v13559_v3 = vld [vmem:[%s14194_s20 + $0xa80] ss:$16 sps:$4 sm:$0xff]   ;;  %v13564_v0 = vld [vmem:[%s14194_s20 + $0x864] ss:$16 sps:$4 sm:$0xff]   ;;  %v19264_v59 = vld [vmem:[#allocation21_spill] sm:$0xff]  ;;  %v4290_v48 = vcombine.high %v15189_v50, %v14805_v8 }
 0x19f   : > { %3922 = vmatmul.mubr.bf16.vlgmr.msra.gmra.mxu0 %v14797_v38  ;;  %3993 = vmatmul.mubr.bf16.vlgmr.msra.gmra.mxu1 %v14800_v63  ;;  %v2859_v42 = vpop.f32.mrf.mxu0  ;;  %v2930_v25 = vpop.f32.mrf.mxu1  ;;  %v13555_v63 = vld [vmem:[%s14194_s20 + $0xaa4] ss:$16 sps:$4 sm:$0xff]   ;;  %v15170_v5 = vpack.c.bf16 %v4521_v28, %v4469_v52  ;;  %v15172_v46 = vpack.c.bf16 %v4522_v58, %v4470_v10  ;;  %v15178_v47 = vpack.c.bf16 %v4519_v60, %v4467_v53  ;;  %v13568_v37 = vld [vmem:[%s14194_s20 + $0x840] ss:$16 sps:$4 sm:$0xff]  }
 0x1a0   : > { %5361 = vmatpush1.bf16.msra.mxu0 %v13538_v16  ;;  %5432 = vmatpush1.bf16.msra.mxu1 %v13541_v34  ;;  %v15161_v38 = vadd.f32 %v2930_v25, %v2859_v42  ;;  %v13550_v34 = vld [vmem:[%s14194_s20 + $0x8a0] ss:$16 sps:$4 sm:$0xff]   ;;  %v15186_v29 = vpack.c.bf16 %v4520_v57, %v4468_v2  ;;  %v4244_v22 = vcombine.high %v19264_v59, %v19263_v21  ;;  %v13570_v25 = vld [vmem:[%s14194_s20 + $0x844] ss:$16 sps:$4 sm:$0xff]  }
 0x1a1   : > { %5362 = vmatprep.subr.bf16.mxu0 %v13546_v40  ;;  %5433 = vmatprep.subr.bf16.mxu1 %v13549_v6  ;;  %v2861_v62 = vpop.f32.mrf.mxu0  ;;  %v2932_v55 = vpop.f32.mrf.mxu1  ;;  %v13561_v6 = vld [vmem:[%s14194_s20 + $0xa84] ss:$16 sps:$4 sm:$0xff]   ;;  %v13565_v42 = vld [vmem:[%s14194_s20 + $0xa60] ss:$16 sps:$4 sm:$0xff]   ;;  %v4318_v10 = vrot.slane %v4290_v48, %v14273_v56 }
 0x1a2   : > { %3931 = vmatprep.mubr.bf16.mxu0 %v14876_v36  ;;  %4002 = vmatprep.mubr.bf16.mxu1 %v14880_v49  ;;  %v15166_v16 = vadd.f32 %v2932_v55, %v2861_v62  ;;  %v13558_v49 = vld [vmem:[%s14194_s20 + $0x884] ss:$16 sps:$4 sm:$0xff]   ;;  %v13574_v53 = vld [vmem:[%s14194_s20 + $0x820] ss:$16 sps:$4 sm:$0xff]  }
 0x1a3   : > { %v2863_v36 = vpop.f32.mrf.mxu0  ;;  %v2934_v40 = vpop.f32.mrf.mxu1  ;;  %v13576_v28 = vld [vmem:[%s14194_s20 + $0x824] ss:$16 sps:$4 sm:$0xff]   ;;  %v13577_v60 = vld [vmem:[%s14194_s20 + $0xa20] ss:$16 sps:$4 sm:$0xff]  }
 0x1a4   : > { %5363 = vmatpush1.bf16.msra.mxu0 %v13544_v18  ;;  %5434 = vmatpush1.bf16.msra.mxu1 %v13547_v32  ;;  %v15180_v24 = vadd.f32 %v2934_v40, %v2863_v36  ;;  %v19266_v18 = vld [vmem:[#allocation27_spill] sm:$0xff]  ;;  %v13579_v58 = vld [vmem:[%s14194_s20 + $0xa24] ss:$16 sps:$4 sm:$0xff]   ;;  %v13580_v36 = vld [vmem:[%s14194_s20 + $0x800] ss:$16 sps:$4 sm:$0xff]  }
 0x1a5   : > { %5364 = vmatprep.subr.bf16.mxu0 %v13552_v31  ;;  %5435 = vmatprep.subr.bf16.mxu1 %v13555_v63  ;;  %v13571_v63 = vld [vmem:[%s14194_s20 + $0xa40] ss:$16 sps:$4 sm:$0xff]   ;;  %v13582_v2 = vld [vmem:[%s14194_s20 + $0x804] ss:$16 sps:$4 sm:$0xff]  }
 0x1a6   : > { %v13653_v48 = vld [vmem:[%s14266_s24 + $0xf0] ss:$8 sps:$4 sm:$0x11]  }
 0x1a7   : > { %3932 = vmatmul.mubr.bf16.gmra.mxu0 %v14878_v43  ;;  %4003 = vmatmul.mubr.bf16.gmra.mxu1 %v14884_v35  ;;  %v4246_v43 = vcombine.high %v15176_v4, %v15184_v11  ;;  %v19265_v35 = vld [vmem:[#allocation28_spill] sm:$0xff] }
 0x1a8   : > { %5365 = vmatpush1.bf16.msra.mxu0 %v13550_v34  ;;  %5436 = vmatpush1.bf16.msra.mxu1 %v13553_v61  ;;  %v4288_v32 = vcombine.high %v19266_v18, %v19265_v35  ;;  %v13585_v34 = vld [vmem:[%s14194_s20 + $0xa04] ss:$16 sps:$4 sm:$0xff]  }
 0x1a9   : > { %5366 = vmatprep.subr.bf16.mxu0 %v13558_v49  ;;  %5437 = vmatprep.subr.bf16.mxu1 %v13561_v6  ;;  %v4274_v31 = vrot.slane %v4246_v43, %v14273_v56  ;;  %v13583_v49 = vld [vmem:[%s14194_s20 + $0xa00] ss:$16 sps:$4 sm:$0xff]   ;;  %v13588_v6 = vld [vmem:[%s14194_s20 + $0x9e4] ss:$16 sps:$4 sm:$0xff]  }
 0x1aa   : > { %3941 = vmatprep.mubr.bf16.mxu0 %v14951_v17  ;;  %4012 = vmatprep.mubr.bf16.mxu1 %v14953_v39  ;;  %v13573_v17 = vld [vmem:[%s14194_s20 + $0xa44] ss:$16 sps:$4 sm:$0xff]   ;;  %v4260_v39 = vrot.slane %v4244_v22, %v14273_v56  ;;  %v4304_v52 = vrot.slane %v4288_v32, %v14273_v56  ;;  %v13652_v32 = vld [vmem:[%s14266_s24 + $0xe0] ss:$8 sps:$4 sm:$0x11]  }
 0x1ac   : > { %5367 = vmatpush1.bf16.msra.mxu0 %v13556_v26  ;;  %5438 = vmatpush1.bf16.msra.mxu1 %v13559_v3  ;;  %v4277_v62 = vcombine.low %v4260_v39, %v4274_v31  ;;  %v4278_v55 = vcombine.high %v4260_v39, %v4274_v31  ;;  %v13591_v26 = vld [vmem:[%s14194_s20 + $0xbe4] ss:$16 sps:$4 sm:$0xff]  }
 0x1ad   : > { %5368 = vmatprep.subr.bf16.mxu0 %v13564_v0  ;;  %5439 = vmatprep.subr.bf16.mxu1 %v13567_v14  ;;  %v13594_v31 = vld [vmem:[%s14194_s20 + $0x9c4] ss:$16 sps:$4 sm:$0xff]  }
 0x1af   : > { %3942 = vmatmul.mubr.bf16.gmra.mxu0 %v14956_v9  ;;  %4013 = vmatmul.mubr.bf16.gmra.mxu1 %v14958_v51  ;;  %v4321_v9 = vcombine.low %v4304_v52, %v4318_v10  ;;  %v4322_v51 = vcombine.high %v4304_v52, %v4318_v10  ;;  %v13597_v52 = vld [vmem:[%s14194_s20 + $0xbc4] ss:$16 sps:$4 sm:$0xff]  }
 0x1b0   : > { %5369 = vmatpush1.bf16.msra.mxu0 %v13562_v7  ;;  %5440 = vmatpush1.bf16.msra.mxu1 %v13565_v42  ;;  %v13586_v42 = vld [vmem:[%s14194_s20 + $0x9e0] ss:$16 sps:$4 sm:$0xff]  }
 0x1b1   : > { %5370 = vmatprep.subr.bf16.mxu0 %v13570_v25  ;;  %5441 = vmatprep.subr.bf16.mxu1 %v13573_v17  ;;  %v13589_v25 = vld [vmem:[%s14194_s20 + $0xbe0] ss:$16 sps:$4 sm:$0xff]  }
 0x1b2   : > { %3951 = vmatprep.mubr.bf16.mxu0 %v15038_v15  ;;  %4022 = vmatprep.mubr.bf16.mxu1 %v15040_v41  ;;  %v15227_v15 = vpack.c.bf16 %v4321_v9, %v4277_v62  ;;  %v15229_v41 = vpack.c.bf16 %v4322_v51, %v4278_v55  ;;  %v13592_v62 = vld [vmem:[%s14194_s20 + $0x9c0] ss:$16 sps:$4 sm:$0xff]   ;;  %v13600_v55 = vld [vmem:[%s14194_s20 + $0x9a4] ss:$16 sps:$4 sm:$0xff]  }
 0x1b3   : > { %v13595_v9 = vld [vmem:[%s14194_s20 + $0xbc0] ss:$16 sps:$4 sm:$0xff]   ;;  %v13603_v51 = vld [vmem:[%s14194_s20 + $0xba4] ss:$16 sps:$4 sm:$0xff]  }
 0x1b4   : > { %5371 = vmatpush1.bf16.msra.mxu0 %v13568_v37  ;;  %5442 = vmatpush1.bf16.msra.mxu1 %v13571_v63 }
 0x1b5   : > { %5372 = vmatprep.subr.bf16.mxu0 %v13576_v28  ;;  %5443 = vmatprep.subr.bf16.mxu1 %v13579_v58  ;;  %v2867_v61 = vpop.f32.mrf.mxu0  ;;  %v2938_v57 = vpop.f32.mrf.mxu1  ;;  %v4139_v28 = vrot.slane %v13652_v32, %v14273_v56  ;;  %v4146_v58 = vrot.slane %v13653_v48, %v14273_v56 }
 0x1b6   : > { %v15234_v40 = vadd.f32 %v2938_v57, %v2867_v61  ;;  %v13606_v61 = vld [vmem:[%s14194_s20 + $0x984] ss:$16 sps:$4 sm:$0xff]  }
 0x1b7   : > { %3952 = vmatmul.mubr.bf16.gmra.mxu0 %v15050_v27  ;;  %4023 = vmatmul.mubr.bf16.gmra.mxu1 %v15054_v1  ;;  %v2869_v3 = vpop.f32.mrf.mxu0  ;;  %v2940_v0 = vpop.f32.mrf.mxu1  ;;  %v13650_v27 = vld [vmem:[%s14266_s24 + $0xa0] ss:$8 sps:$4 sm:$0x11]   ;;  %v13651_v1 = vld [vmem:[%s14266_s24 + $0xb0] ss:$8 sps:$4 sm:$0x11]  }
 0x1b8   : > { %5373 = vmatpush1.bf16.msra.mxu0 %v13574_v53  ;;  %5444 = vmatpush1.bf16.msra.mxu1 %v13577_v60  ;;  %v15239_v14 = vadd.f32 %v2940_v0, %v2869_v3  ;;  %v4115_v37 = vrot.slane %v13650_v27, %v14273_v56  ;;  %v4122_v63 = vrot.slane %v13651_v1, %v14273_v56  ;;  %v13609_v57 = vld [vmem:[%s14194_s20 + $0xb84] ss:$16 sps:$4 sm:$0xff]   ;;  %v13607_v3 = vld [vmem:[%s14194_s20 + $0xb80] ss:$16 sps:$4 sm:$0xff]  }
 0x1b9   : > { %5374 = vmatprep.subr.bf16.mxu0 %v13582_v2  ;;  %5445 = vmatprep.subr.bf16.mxu1 %v13585_v34  ;;  %v2871_v22 = vpop.f32.mrf.mxu0  ;;  %v2942_v43 = vpop.f32.mrf.mxu1  ;;  %v4147_v60 = vcombine.low %v4139_v28, %v4146_v58  ;;  %v13598_v2 = vld [vmem:[%s14194_s20 + $0x9a0] ss:$16 sps:$4 sm:$0xff]   ;;  %v12236_v0 = vcombine.high %v14392_v44, %v14395_v45  ;;  %v13612_v27 = vld [vmem:[%s14194_s20 + $0x964] ss:$16 sps:$4 sm:$0xff]   ;;  %v4243_v44 = vcombine.low %v19264_v59, %v19263_v21 }
 0x1ba   : > { %5392 = vmatprep.mubr.bf16.mxu0 %v15227_v15  ;;  %5463 = vmatprep.mubr.bf16.mxu1 %v15229_v41  ;;  %v15247_v7 = vadd.f32 %v2942_v43, %v2871_v22  ;;  %v4123_v53 = vcombine.low %v4115_v37, %v4122_v63  ;;  %v13601_v34 = vld [vmem:[%s14194_s20 + $0xba0] ss:$16 sps:$4 sm:$0xff]   ;;  %v13615_v1 = vld [vmem:[%s14194_s20 + $0xb64] ss:$16 sps:$4 sm:$0xff]  }
 0x1bb   : > { %v2873_v17 = vpop.f32.mrf.mxu0  ;;  %v2944_v39 = vpop.f32.mrf.mxu1  ;;  %v15285_v45 = vrot.slane %v12236_v0, %v14273_v56  ;;  %v13682_v59 = vld [vmem:[%s14266_s24 + $0x1a0] ss:$8 sps:$4 sm:$0x11]   ;;  %v13683_v28 = vld [vmem:[%s14266_s24 + $0x1b0] ss:$8 sps:$4 sm:$0x11]  }
 0x1bc   : > { %5375 = vmatpush1.bf16.msra.mxu0 %v13580_v36  ;;  %5446 = vmatpush1.bf16.msra.mxu1 %v13583_v49  ;;  %v15253_v10 = vadd.f32 %v2944_v39, %v2873_v17  ;;  %v4130_v36 = vrot.slane %v4123_v53, %v14273_v56  ;;  %v1574_v49 = vcombine.high %v14508_v13, %v14508_v13  ;;  %v13618_v39 = vld [vmem:[%s14194_s20 + $0x944] ss:$16 sps:$4 sm:$0xff]  }
 0x1bd   : > { %5376 = vmatprep.subr.bf16.mxu0 %v13588_v6  ;;  %5447 = vmatprep.subr.bf16.mxu1 %v13591_v26  ;;  %v4154_v6 = vrot.slane %v4147_v60, %v14273_v56  ;;  %v13604_v26 = vld [vmem:[%s14194_s20 + $0x980] ss:$16 sps:$4 sm:$0xff]   ;;  %v15310_v53 = vrot.slane %v4243_v44, %v14273_v56  ;;  %v4340_v60 = vcombine.high %v14810_v23, %v15285_v45 }
 0x1be   : > { %v4324_v22 = vcombine.low %v4130_v36, %v14769_v33 }
 0x1bf   : > { %v4375_v13 = vcombine.low %v1574_v49, %v4154_v6  ;;  %v4211_v49 = vrot.slane %v13682_v59, %v14273_v56  ;;  %v4218_v6 = vrot.slane %v13683_v28, %v14273_v56 }
 0x1c0   : > { %5377 = vmatpush2.bf16.msra.mxu0 %v13586_v42  ;;  %5448 = vmatpush2.bf16.msra.mxu1 %v13589_v25  ;;  %v13610_v42 = vld [vmem:[%s14194_s20 + $0x960] ss:$16 sps:$4 sm:$0xff]   ;;  %v15292_v37 = vrot.slane %v4324_v22, %v14273_v56 }
 0x1c1   : > { %5378 = vmatprep.subr.bf16.mxu0 %v13594_v31  ;;  %5449 = vmatprep.subr.bf16.mxu1 %v13597_v52  ;;  %v13613_v25 = vld [vmem:[%s14194_s20 + $0xb60] ss:$16 sps:$4 sm:$0xff]   ;;  %v13621_v31 = vld [vmem:[%s14194_s20 + $0xb44] ss:$16 sps:$4 sm:$0xff]   ;;  %v4245_v52 = vcombine.low %v15176_v4, %v15184_v11  ;;  %v15297_v21 = vrot.slane %v4375_v13, %v14273_v56  ;;  %v4287_v4 = vcombine.low %v19266_v18, %v19265_v35 }
 0x1c2   : > { %v4342_v18 = vcombine.high %v15292_v37, %v14826_v20  ;;  %v13622_v13 = vld [vmem:[%s14194_s20 + $0x920] ss:$16 sps:$4 sm:$0xff]  }
 0x1c3   : > { %v4267_v35 = vrot.slane %v4245_v52, %v14273_v56  ;;  %v4384_v36 = vcombine.high %v14832_v19, %v15297_v21  ;;  %v4297_v0 = vrot.slane %v4287_v4, %v14273_v56  ;;  %v4383_v4 = vcombine.low %v14832_v19, %v15297_v21 }
 0x1c4   : > { %5379 = vmatpush2.bf16.msra.mxu0 %v13592_v62  ;;  %5450 = vmatpush2.bf16.msra.mxu1 %v13595_v9  ;;  %v4289_v9 = vcombine.low %v15189_v50, %v14805_v8  ;;  %v13624_v8 = vld [vmem:[%s14194_s20 + $0x924] ss:$16 sps:$4 sm:$0xff]  }
 0x1c5   : > { %5380 = vmatprep.subr.bf16.mxu0 %v13600_v55  ;;  %5451 = vmatprep.subr.bf16.mxu1 %v13603_v51  ;;  %v13616_v55 = vld [vmem:[%s14194_s20 + $0x940] ss:$16 sps:$4 sm:$0xff]   ;;  %v13627_v50 = vld [vmem:[%s14194_s20 + $0xb24] ss:$16 sps:$4 sm:$0xff]   ;;  %v4275_v52 = vcombine.low %v15310_v53, %v4267_v35 }
 0x1c6   : > { %v13619_v51 = vld [vmem:[%s14194_s20 + $0xb40] ss:$16 sps:$4 sm:$0xff]  }
 0x1c8   : > { %5381 = vmatpush2.bf16.msra.mxu0 %v13598_v2  ;;  %5452 = vmatpush2.bf16.msra.mxu1 %v13601_v34 }
 0x1c9   : > { %5382 = vmatprep.subr.bf16.mxu0 %v13606_v61  ;;  %5453 = vmatprep.subr.bf16.mxu1 %v13609_v57  ;;  %v4386_v61 = vcombine.high %v14837_v30, %v14890_v12 }
 0x1cb   : > { %v2877_v43 = vpop.f32.mrf.mxu0  ;;  %v2948_v32 = vpop.f32.mrf.mxu1 }
 0x1cc   : > { %v15278_v48 = vadd.f32 %v2948_v32, %v2877_v43  ;;  %5383 = vmatpush2.bf16.msra.mxu0 %v13604_v26  ;;  %5454 = vmatpush2.bf16.msra.mxu1 %v13607_v3  ;;  %v13625_v43 = vld [vmem:[%s14194_s20 + $0xb20] ss:$16 sps:$4 sm:$0xff]   ;;  %v4356_v32 = vrot.slane %v4340_v60, %v14273_v56  ;;  %v13640_v60 = vld [vmem:[%s14194_s20 + $0x8ec] ss:$16 sps:$4 sm:$0xff]  }
 0x1cd   : > { %v2879_v17 = vpop.f32.mrf.mxu0  ;;  %v2950_v33 = vpop.f32.mrf.mxu1  ;;  %5384 = vmatprep.subr.bf16.mxu0 %v13612_v27  ;;  %5455 = vmatprep.subr.bf16.mxu1 %v13615_v1  ;;  %v4311_v27 = vrot.slane %v4289_v9, %v14273_v56  ;;  %v4339_v1 = vcombine.low %v14810_v23, %v15285_v45  ;;  %v4370_v23 = vrot.slane %v4342_v18, %v14273_v56 }
 0x1ce   : > { %v15294_v63 = vadd.f32 %v2950_v33, %v2879_v17  ;;  %v13630_v17 = vld [vmem:[%s14194_s20 + $0x904] ss:$16 sps:$4 sm:$0xff]   ;;  %v4414_v45 = vrot.slane %v4386_v61, %v14273_v56 }
 0x1cf   : > { %v2881_v58 = vpop.f32.mrf.mxu0  ;;  %v2952_v62 = vpop.f32.mrf.mxu1  ;;  %v13633_v33 = vld [vmem:[%s14194_s20 + $0xb04] ss:$16 sps:$4 sm:$0xff]   ;;  %v4320_v9 = vcombine.high %v4297_v0, %v4311_v27  ;;  %v4374_v21 = vcombine.high %v4356_v32, %v4370_v23 }
 0x1d0   : > { %v15305_v11 = vadd.f32 %v2952_v62, %v2881_v58  ;;  %5385 = vmatpush2.bf16.msra.mxu0 %v13610_v42  ;;  %5456 = vmatpush2.bf16.msra.mxu1 %v13613_v25  ;;  %v4385_v42 = vcombine.low %v14837_v30, %v14890_v12  ;;  %v4400_v30 = vrot.slane %v4384_v36, %v14273_v56 }
 0x1d1   : > { %v2883_v2 = vpop.f32.mrf.mxu0  ;;  %v2954_v34 = vpop.f32.mrf.mxu1  ;;  %5386 = vmatprep.subr.bf16.mxu0 %v13618_v39  ;;  %5457 = vmatprep.subr.bf16.mxu1 %v13621_v31  ;;  %v4341_v39 = vcombine.low %v15292_v37, %v14826_v20  ;;  %v4219_v12 = vcombine.low %v4211_v49, %v4218_v6  ;;  %v4319_v58 = vcombine.low %v4297_v0, %v4311_v27  ;;  %v13628_v20 = vld [vmem:[%s14194_s20 + $0x900] ss:$16 sps:$4 sm:$0xff]   ;;  %v13638_v6 = vld [vmem:[%s14194_s20 + $0x8e8] ss:$16 sps:$4 sm:$0xff]   ;;  %v13649_v0 = vld [vmem:[%s14194_s20 + $0xacc] ss:$16 sps:$4 sm:$0xff]  }
 0x1d2   : > { %v15321_v57 = vadd.f32 %v2954_v34, %v2883_v2  ;;  %v4276_v62 = vcombine.high %v15310_v53, %v4267_v35  ;;  %v13631_v37 = vld [vmem:[%s14194_s20 + $0xb00] ss:$16 sps:$4 sm:$0xff]   ;;  %v13643_v2 = vld [vmem:[%s14194_s20 + $0xaec] ss:$16 sps:$4 sm:$0xff]   ;;  %v4373_v34 = vcombine.low %v4356_v32, %v4370_v23  ;;  %v4417_v19 = vcombine.low %v4400_v30, %v4414_v45  ;;  %v13644_v23 = vld [vmem:[%s14194_s20 + $0x8c8] ss:$16 sps:$4 sm:$0xff]  }
 0x1d3   : > { %v2887_v26 = vpop.f32.mrf.mxu0  ;;  %v2958_v3 = vpop.f32.mrf.mxu1  ;;  %v4363_v53 = vrot.slane %v4341_v39, %v14273_v56  ;;  %v4226_v35 = vrot.slane %v4219_v12, %v14273_v56  ;;  %v15358_v18 = vpack.c.bf16 %v4319_v58, %v4275_v52  ;;  %v4393_v36 = vrot.slane %v4383_v4, %v14273_v56  ;;  %v13659_v12 = vld [vmem:[%s14194_s20 + $0xaac] ss:$16 sps:$4 sm:$0xff]  }
 0x1d4   : > { %v15331_v22 = vadd.f32 %v2958_v3, %v2887_v26  ;;  %5387 = vmatpush2.bf16.msra.mxu0 %v13616_v55  ;;  %5458 = vmatpush2.bf16.msra.mxu1 %v13619_v51  ;;  %v15360_v61 = vpack.c.bf16 %v4320_v9, %v4276_v62  ;;  %v4407_v49 = vrot.slane %v4385_v42, %v14273_v56  ;;  %v13641_v26 = vld [vmem:[%s14194_s20 + $0xae8] ss:$16 sps:$4 sm:$0xff]   ;;  %v13646_v3 = vld [vmem:[%s14194_s20 + $0x8cc] ss:$16 sps:$4 sm:$0xff]  }
 0x1d5   : > { %v2889_v25 = vpop.f32.mrf.mxu0  ;;  %v2960_v44 = vpop.f32.mrf.mxu1  ;;  %5388 = vmatprep.subr.bf16.mxu0 %v13624_v8  ;;  %5459 = vmatprep.subr.bf16.mxu1 %v13627_v50  ;;  %v4349_v8 = vrot.slane %v4339_v1, %v14273_v56  ;;  %v4418_v50 = vcombine.high %v4400_v30, %v4414_v45  ;;  %v15368_v27 = vpack.c.bf16 %v4417_v19, %v4373_v34  ;;  %v13647_v45 = vld [vmem:[%s14194_s20 + $0xac8] ss:$16 sps:$4 sm:$0xff]   ;;  %v13656_v30 = vld [vmem:[%s14194_s20 + $0x8ac] ss:$16 sps:$4 sm:$0xff]  }
 0x1d6   : > { %v15344_v31 = vadd.f32 %v2960_v44, %v2889_v25  ;;  %v4415_v25 = vcombine.low %v4393_v36, %v4407_v49  ;;  %v13665_v34 = vld [vmem:[%s14194_s20 + $0xa8c] ss:$16 sps:$4 sm:$0xff]  }
 0x1d7   : > { %v2891_v59 = vpop.f32.mrf.mxu0  ;;  %v2962_v28 = vpop.f32.mrf.mxu1  ;;  %v15370_v1 = vpack.c.bf16 %v4418_v50, %v4374_v21  ;;  %v4372_v44 = vcombine.high %v4349_v8, %v4363_v53  ;;  %v13660_v50 = vld [vmem:[%s14194_s20 + $0x888] ss:$16 sps:$4 sm:$0xff]  }
 0x1d8   : > { %5389 = vmatpush2.bf16.msra.mxu0 %v13622_v13  ;;  %5460 = vmatpush2.bf16.msra.mxu1 %v13625_v43  ;;  %v4371_v13 = vcombine.low %v4349_v8, %v4363_v53  ;;  %v4529_v43 = vrot.slane %v4226_v35, %v14273_v56  ;;  %v13663_v35 = vld [vmem:[%s14194_s20 + $0xa88] ss:$16 sps:$4 sm:$0xff]  }
 0x1d9   : > { %v2892_v55 = vpop.f32.mrf.mxu0  ;;  %v2963_v51 = vpop.f32.mrf.mxu1  ;;  %5390 = vmatprep.subr.bf16.mxu0 %v13630_v17  ;;  %5461 = vmatprep.subr.bf16.mxu1 %v13633_v33  ;;  %v4416_v17 = vcombine.high %v4393_v36, %v4407_v49  ;;  %v13672_v49 = vld [vmem:[%s14194_s20 + $0x86c] ss:$16 sps:$4 sm:$0xff]  }
 0x1da   : > { %v4530_v28 = vcombine.high %v4529_v43, %v4529_v43  ;;  %v15385_v9 = vpack.c.bf16 %v4415_v25, %v4371_v13  ;;  %v13657_v55 = vld [vmem:[%s14194_s20 + $0xaa8] ss:$16 sps:$4 sm:$0xff]  }
 0x1db   : > { %v15387_v4 = vpack.c.bf16 %v4416_v17, %v4372_v44  ;;  %v13670_v44 = vld [vmem:[%s14194_s20 + $0x868] ss:$16 sps:$4 sm:$0xff]  }
 0x1dc   : > { %5391 = vmatpush2.bf16.msra.mxu0 %v13628_v20  ;;  %5462 = vmatpush2.bf16.msra.mxu1 %v13631_v37  ;;  %v13654_v37 = vld [vmem:[%s14194_s20 + $0x8a8] ss:$16 sps:$4 sm:$0xff]   ;;  %v4544_v53 = vrot.slane %v4530_v28, %v14273_v56 }
 0x1dd   : > { %5502 = vmatprep.subr.bf16.mxu0 %v13640_v60  ;;  %5573 = vmatprep.subr.bf16.mxu1 %v13643_v2  ;;  %v13662_v2 = vld [vmem:[%s14194_s20 + $0x88c] ss:$16 sps:$4 sm:$0xff]   ;;  %v13673_v17 = vld [vmem:[%s14194_s20 + $0xa68] ss:$16 sps:$4 sm:$0xff]  }
 0x1df   : > { %v2999_v32 = vpop.f32.mrf.mxu0  ;;  %v3070_v42 = vpop.f32.mrf.mxu1  ;;  %5393 = vmatmul.mubr.bf16.vlgmr.msra.gmra.mxu0 %v15358_v18  ;;  %5464 = vmatmul.mubr.bf16.vlgmr.msra.gmra.mxu1 %v15360_v61 }
 0x1e0   : > { %v15375_v33 = vadd.f32 %v3070_v42, %v2999_v32  ;;  %5503 = vmatpush1.bf16.msra.mxu0 %v13638_v6  ;;  %5574 = vmatpush1.bf16.msra.mxu1 %v13641_v26  ;;  %v13675_v6 = vld [vmem:[%s14194_s20 + $0xa6c] ss:$16 sps:$4 sm:$0xff]   ;;  %v4537_v32 = vrot.slane %v4529_v43, %v14273_v56 }
 0x1e1   : > { %v3001_v39 = vpop.f32.mrf.mxu0  ;;  %v3072_v52 = vpop.f32.mrf.mxu1  ;;  %5504 = vmatprep.subr.bf16.mxu0 %v13646_v3  ;;  %5575 = vmatprep.subr.bf16.mxu1 %v13649_v0  ;;  %v4546_v0 = vcombine.high %v4544_v53, %v4544_v53 }
 0x1e2   : > { %v15381_v59 = vadd.f32 %v3072_v52, %v3001_v39  ;;  %5402 = vmatprep.mubr.bf16.mxu0 %v15368_v27  ;;  %5473 = vmatprep.mubr.bf16.mxu1 %v15370_v1  ;;  %v13681_v39 = vld [vmem:[%s14194_s20 + $0xa4c] ss:$16 sps:$4 sm:$0xff]  }
 0x1e3   : > { %v3003_v58 = vpop.f32.mrf.mxu0  ;;  %v3074_v62 = vpop.f32.mrf.mxu1  ;;  %v15419_v43 = vpack.c.bf16 %v4546_v0, %v4546_v0 }
 0x1e4   : > { %v15389_v20 = vadd.f32 %v3074_v62, %v3003_v58  ;;  %5505 = vmatpush1.bf16.msra.mxu0 %v13644_v23  ;;  %5576 = vmatpush1.bf16.msra.mxu1 %v13647_v45  ;;  %v13678_v45 = vld [vmem:[%s14194_s20 + $0x84c] ss:$16 sps:$4 sm:$0xff]   ;;  %v4545_v58 = vcombine.high %v4537_v32, %v4537_v32 }
 0x1e5   : > { %v3005_v51 = vpop.f32.mrf.mxu0  ;;  %v3076_v60 = vpop.f32.mrf.mxu1  ;;  %5506 = vmatprep.subr.bf16.mxu0 %v13656_v30  ;;  %5577 = vmatprep.subr.bf16.mxu1 %v13659_v12  ;;  %v15417_v12 = vpack.c.bf16 %v4544_v53, %v4544_v53 }
 0x1e6   : > { %v15395_v8 = vadd.f32 %v3076_v60, %v3005_v51  ;;  %v13679_v51 = vld [vmem:[%s14194_s20 + $0xa48] ss:$16 sps:$4 sm:$0xff]  }
 0x1e7   : > { %5403 = vmatmul.mubr.bf16.gmra.mxu0 %v15385_v9  ;;  %5474 = vmatmul.mubr.bf16.gmra.mxu1 %v15387_v4  ;;  %v3009_v19 = vpop.f32.mrf.mxu0  ;;  %v3080_v21 = vpop.f32.mrf.mxu1 }
 0x1e8   : > { %5507 = vmatpush1.bf16.msra.mxu0 %v13654_v37  ;;  %5578 = vmatpush1.bf16.msra.mxu1 %v13657_v55  ;;  %v15402_v36 = vadd.f32 %v3080_v21, %v3009_v19  ;;  %v13676_v55 = vld [vmem:[%s14194_s20 + $0x848] ss:$16 sps:$4 sm:$0xff]  }
 0x1e9   : > { %5508 = vmatprep.subr.bf16.mxu0 %v13662_v2  ;;  %5579 = vmatprep.subr.bf16.mxu1 %v13665_v34  ;;  %v3011_v26 = vpop.f32.mrf.mxu0  ;;  %v3082_v3 = vpop.f32.mrf.mxu1  ;;  %v13686_v2 = vld [vmem:[%s14194_s20 + $0x82c] ss:$16 sps:$4 sm:$0xff]  }
 0x1ea   : > { %5412 = vmatprep.mubr.bf16.mxu0 %v15170_v5  ;;  %5483 = vmatprep.mubr.bf16.mxu1 %v15172_v46  ;;  %v15408_v13 = vadd.f32 %v3082_v3, %v3011_v26  ;;  %v13689_v34 = vld [vmem:[%s14194_s20 + $0xa2c] ss:$16 sps:$4 sm:$0xff]   ;;  %v13684_v26 = vld [vmem:[%s14194_s20 + $0x828] ss:$16 sps:$4 sm:$0xff]  }
 0x1eb   : > { %v3013_v42 = vpop.f32.mrf.mxu0  ;;  %v3084_v25 = vpop.f32.mrf.mxu1  ;;  %v13687_v3 = vld [vmem:[%s14194_s20 + $0xa28] ss:$16 sps:$4 sm:$0xff]  }
 0x1ec   : > { %5509 = vmatpush1.bf16.msra.mxu0 %v13660_v50  ;;  %5580 = vmatpush1.bf16.msra.mxu1 %v13663_v35  ;;  %v15413_v23 = vadd.f32 %v3084_v25, %v3013_v42  ;;  %v15435_v50 = vpack.c.bf16 %v4537_v32, %v4537_v32  ;;  %v15437_v35 = vpack.c.bf16 %v4545_v58, %v4545_v58  ;;  %v13692_v42 = vld [vmem:[%s14194_s20 + $0x80c] ss:$16 sps:$4 sm:$0xff]  }
 0x1ed   : > { %5510 = vmatprep.subr.bf16.mxu0 %v13672_v49  ;;  %5581 = vmatprep.subr.bf16.mxu1 %v13675_v6  ;;  %v3015_v52 = vpop.f32.mrf.mxu0  ;;  %v3086_v30 = vpop.f32.mrf.mxu1  ;;  %v13695_v25 = vld [vmem:[%s14194_s20 + $0xa0c] ss:$16 sps:$4 sm:$0xff]  }
 0x1ee   : > { %v15421_v28 = vadd.f32 %v3086_v30, %v3015_v52  ;;  %v13690_v52 = vld [vmem:[%s14194_s20 + $0x808] ss:$16 sps:$4 sm:$0xff]  }
 0x1ef   : > { %5413 = vmatmul.mubr.bf16.gmra.mxu0 %v15178_v47  ;;  %5484 = vmatmul.mubr.bf16.gmra.mxu1 %v15186_v29  ;;  %v3019_v62 = vpop.f32.mrf.mxu0  ;;  %v3090_v37 = vpop.f32.mrf.mxu1  ;;  %v13693_v30 = vld [vmem:[%s14194_s20 + $0xa08] ss:$16 sps:$4 sm:$0xff]  }
 0x1f0   : > { %5511 = vmatpush1.bf16.msra.mxu0 %v13670_v44  ;;  %5582 = vmatpush1.bf16.msra.mxu1 %v13673_v17  ;;  %v15427_v60 = vadd.f32 %v3090_v37, %v3019_v62  ;;  %v13698_v62 = vld [vmem:[%s14194_s20 + $0x9ec] ss:$16 sps:$4 sm:$0xff]  }
 0x1f1   : > { %5512 = vmatprep.subr.bf16.mxu0 %v13678_v45  ;;  %5583 = vmatprep.subr.bf16.mxu1 %v13681_v39  ;;  %v3021_v53 = vpop.f32.mrf.mxu0  ;;  %v3092_v19 = vpop.f32.mrf.mxu1  ;;  %v13701_v37 = vld [vmem:[%s14194_s20 + $0xbec] ss:$16 sps:$4 sm:$0xff]  }
 0x1f2   : > { %5422 = vmatprep.mubr.bf16.mxu0 %v15417_v12  ;;  %5493 = vmatprep.mubr.bf16.mxu1 %v15419_v43  ;;  %v15433_v21 = vadd.f32 %v3092_v19, %v3021_v53  ;;  %v13696_v19 = vld [vmem:[%s14194_s20 + $0x9e8] ss:$16 sps:$4 sm:$0xff]  }
 0x1f3   : > { %v3023_v49 = vpop.f32.mrf.mxu0  ;;  %v3094_v6 = vpop.f32.mrf.mxu1 }
 0x1f4   : > { %5513 = vmatpush1.bf16.msra.mxu0 %v13676_v55  ;;  %5584 = vmatpush1.bf16.msra.mxu1 %v13679_v51  ;;  %v15441_v0 = vadd.f32 %v3094_v6, %v3023_v49  ;;  %v13699_v49 = vld [vmem:[%s14194_s20 + $0xbe8] ss:$16 sps:$4 sm:$0xff]   ;;  %v13704_v6 = vld [vmem:[%s14194_s20 + $0x9cc] ss:$16 sps:$4 sm:$0xff]  }
 0x1f5   : > { %5514 = vmatprep.subr.bf16.mxu0 %v13686_v2  ;;  %5585 = vmatprep.subr.bf16.mxu1 %v13689_v34  ;;  %v3025_v32 = vpop.f32.mrf.mxu0  ;;  %v3096_v44 = vpop.f32.mrf.mxu1 }
 0x1f6   : > { %v15445_v17 = vadd.f32 %v3096_v44, %v3025_v32  ;;  %v13713_v32 = vld [vmem:[%s14194_s20 + $0xbac] ss:$16 sps:$4 sm:$0xff]   ;;  %v13708_v44 = vld [vmem:[%s14194_s20 + $0x9a8] ss:$16 sps:$4 sm:$0xff]  }
 0x1f7   : > { %5423 = vmatmul.mubr.bf16.gmra.mxu0 %v15435_v50  ;;  %5494 = vmatmul.mubr.bf16.gmra.mxu1 %v15437_v35  ;;  %v3029_v45 = vpop.f32.mrf.mxu0  ;;  %v3100_v39 = vpop.f32.mrf.mxu1 }
 0x1f8   : > { %5515 = vmatpush1.bf16.msra.mxu0 %v13684_v26  ;;  %5586 = vmatpush1.bf16.msra.mxu1 %v13687_v3  ;;  %v15451_v58 = vadd.f32 %v3100_v39, %v3029_v45  ;;  %v13707_v26 = vld [vmem:[%s14194_s20 + $0xbcc] ss:$16 sps:$4 sm:$0xff]   ;;  %v13711_v45 = vld [vmem:[%s14194_s20 + $0xba8] ss:$16 sps:$4 sm:$0xff]  }
 0x1f9   : > { %5516 = vmatprep.subr.bf16.mxu0 %v13692_v42  ;;  %5587 = vmatprep.subr.bf16.mxu1 %v13695_v25  ;;  %v3031_v55 = vpop.f32.mrf.mxu0  ;;  %v3102_v51 = vpop.f32.mrf.mxu1  ;;  %v13705_v42 = vld [vmem:[%s14194_s20 + $0xbc8] ss:$16 sps:$4 sm:$0xff]   ;;  %v13710_v25 = vld [vmem:[%s14194_s20 + $0x9ac] ss:$16 sps:$4 sm:$0xff]  }
 0x1fa   : > { %v15455_v2 = vadd.f32 %v3102_v51, %v3031_v55  ;;  %5534 = vmatprep.mubr.bf16.mxu0 %v15227_v15  ;;  %5605 = vmatprep.mubr.bf16.mxu1 %v15229_v41  ;;  %v13702_v41 = vld [vmem:[%s14194_s20 + $0x9c8] ss:$16 sps:$4 sm:$0xff]   ;;  %v13716_v39 = vld [vmem:[%s14194_s20 + $0x98c] ss:$16 sps:$4 sm:$0xff]  }
 0x1fb   : > { %v3033_v34 = vpop.f32.mrf.mxu0  ;;  %v3104_v53 = vpop.f32.mrf.mxu1  ;;  %v13725_v55 = vld [vmem:[%s14194_s20 + $0xb6c] ss:$16 sps:$4 sm:$0xff]   ;;  %v13720_v51 = vld [vmem:[%s14194_s20 + $0x968] ss:$16 sps:$4 sm:$0xff]  }
 0x1fc   : > { %5517 = vmatpush1.bf16.msra.mxu0 %v13690_v52  ;;  %5588 = vmatpush1.bf16.msra.mxu1 %v13693_v30  ;;  %v13719_v52 = vld [vmem:[%s14194_s20 + $0xb8c] ss:$16 sps:$4 sm:$0xff]   ;;  %v13714_v30 = vld [vmem:[%s14194_s20 + $0x988] ss:$16 sps:$4 sm:$0xff]  }
 0x1fd   : > { %5518 = vmatprep.subr.bf16.mxu0 %v13698_v62  ;;  %5589 = vmatprep.subr.bf16.mxu1 %v13701_v37  ;;  %v3034_v3 = vpop.f32.mrf.mxu0  ;;  %v3105_v15 = vpop.f32.mrf.mxu1  ;;  %v13717_v62 = vld [vmem:[%s14194_s20 + $0xb88] ss:$16 sps:$4 sm:$0xff]   ;;  %v13722_v37 = vld [vmem:[%s14194_s20 + $0x96c] ss:$16 sps:$4 sm:$0xff]  }
 0x1fe   : > { %v13723_v34 = vld [vmem:[%s14194_s20 + $0xb68] ss:$16 sps:$4 sm:$0xff]   ;;  %v13728_v53 = vld [vmem:[%s14194_s20 + $0x94c] ss:$16 sps:$4 sm:$0xff]  }
 0x1ff   : > { %v13737_v3 = vld [vmem:[%s14194_s20 + $0xb2c] ss:$16 sps:$4 sm:$0xff]   ;;  %v13732_v15 = vld [vmem:[%s14194_s20 + $0x928] ss:$16 sps:$4 sm:$0xff]  }
 0x200   : > { %5519 = vmatpush2.bf16.msra.mxu0 %v13696_v19  ;;  %5590 = vmatpush2.bf16.msra.mxu1 %v13699_v49  ;;  %v13731_v19 = vld [vmem:[%s14194_s20 + $0xb4c] ss:$16 sps:$4 sm:$0xff]   ;;  %v13726_v49 = vld [vmem:[%s14194_s20 + $0x948] ss:$16 sps:$4 sm:$0xff]  }
 0x201   : > { %5520 = vmatprep.subr.bf16.mxu0 %v13704_v6  ;;  %5591 = vmatprep.subr.bf16.mxu1 %v13707_v26  ;;  %v13729_v6 = vld [vmem:[%s14194_s20 + $0xb48] ss:$16 sps:$4 sm:$0xff]   ;;  %v13734_v26 = vld [vmem:[%s14194_s20 + $0x92c] ss:$16 sps:$4 sm:$0xff]  }
 0x204   : > { %5521 = vmatpush2.bf16.msra.mxu0 %v13702_v41  ;;  %5592 = vmatpush2.bf16.msra.mxu1 %v13705_v42  ;;  %v13735_v41 = vld [vmem:[%s14194_s20 + $0xb28] ss:$16 sps:$4 sm:$0xff]   ;;  %v13740_v42 = vld [vmem:[%s14194_s20 + $0x90c] ss:$16 sps:$4 sm:$0xff]  }
 0x205   : > { %5522 = vmatprep.subr.bf16.mxu0 %v13710_v25  ;;  %5593 = vmatprep.subr.bf16.mxu1 %v13713_v32  ;;  %v13743_v25 = vld [vmem:[%s14194_s20 + $0xb0c] ss:$16 sps:$4 sm:$0xff]   ;;  %v13738_v32 = vld [vmem:[%s14194_s20 + $0x908] ss:$16 sps:$4 sm:$0xff]  }
 0x208   : > { %5523 = vmatpush2.bf16.msra.mxu0 %v13708_v44  ;;  %5594 = vmatpush2.bf16.msra.mxu1 %v13711_v45  ;;  %v13741_v44 = vld [vmem:[%s14194_s20 + $0xb08] ss:$16 sps:$4 sm:$0xff]  }
 0x209   : > { %5524 = vmatprep.subr.bf16.mxu0 %v13716_v39  ;;  %5595 = vmatprep.subr.bf16.mxu1 %v13719_v52 }
 0x20c   : > { %5525 = vmatpush2.bf16.msra.mxu0 %v13714_v30  ;;  %5596 = vmatpush2.bf16.msra.mxu1 %v13717_v62 }
 0x20d   : > { %5526 = vmatprep.subr.bf16.mxu0 %v13722_v37  ;;  %5597 = vmatprep.subr.bf16.mxu1 %v13725_v55 }
 0x210   : > { %5527 = vmatpush2.bf16.msra.mxu0 %v13720_v51  ;;  %5598 = vmatpush2.bf16.msra.mxu1 %v13723_v34 }
 0x211   : > { %5528 = vmatprep.subr.bf16.mxu0 %v13728_v53  ;;  %5599 = vmatprep.subr.bf16.mxu1 %v13731_v19 }
 0x214   : > { %5529 = vmatpush2.bf16.msra.mxu0 %v13726_v49  ;;  %5600 = vmatpush2.bf16.msra.mxu1 %v13729_v6 }
 0x215   : > { %5530 = vmatprep.subr.bf16.mxu0 %v13734_v26  ;;  %5601 = vmatprep.subr.bf16.mxu1 %v13737_v3 }
 0x218   : > { %5531 = vmatpush2.bf16.msra.mxu0 %v13732_v15  ;;  %5602 = vmatpush2.bf16.msra.mxu1 %v13735_v41 }
 0x219   : > { %5532 = vmatprep.subr.bf16.mxu0 %v13740_v42  ;;  %5603 = vmatprep.subr.bf16.mxu1 %v13743_v25 }
 0x21c   : > { %5533 = vmatpush2.bf16.msra.mxu0 %v13738_v32  ;;  %5604 = vmatpush2.bf16.msra.mxu1 %v13741_v44 }
 0x21f   : > { %v3781_v45 = vpop.f32.mrf.mxu0  ;;  %v3852_v39 = vpop.f32.mrf.mxu1  ;;  %5535 = vmatmul.mubr.bf16.vlgmr.msra.gmra.mxu0 %v15358_v18  ;;  %5606 = vmatmul.mubr.bf16.vlgmr.msra.gmra.mxu1 %v15360_v61 }
 0x220   : > { %v3782_v52 = vadd.f32 %v3781_v45, %v15151_v54  ;;  %5544 = vmatprep.mubr.bf16.mxu0 %v15368_v27  ;;  %5615 = vmatprep.mubr.bf16.mxu1 %v15370_v1 }
 0x221   : > { %v3783_v30 = vpop.f32.mrf.mxu0  ;;  %v3854_v62 = vpop.f32.mrf.mxu1 }
 0x222   : > { %v15494_v37 = vadd.f32 %v3852_v39, %v3782_v52  ;;  %v3784_v55 = vadd.f32 %v3783_v30, %v15161_v38 }
 0x223   : > { %v3785_v51 = vpop.f32.mrf.mxu0  ;;  %v3856_v34 = vpop.f32.mrf.mxu1 }
 0x224   : > { %v15497_v53 = vadd.f32 %v3854_v62, %v3784_v55  ;;  %v3786_v18 = vadd.f32 %v3785_v51, %v15166_v16 }
 0x225   : > { %v3787_v19 = vpop.f32.mrf.mxu0  ;;  %v3858_v61 = vpop.f32.mrf.mxu1 }
 0x226   : > { %v15500_v49 = vadd.f32 %v3856_v34, %v3786_v18  ;;  %v3788_v54 = vadd.f32 %v3787_v19, %v15180_v24 }
 0x227   : > { %v3791_v27 = vpop.f32.mrf.mxu0  ;;  %5545 = vmatmul.mubr.bf16.gmra.mxu0 %v15385_v9  ;;  %5616 = vmatmul.mubr.bf16.gmra.mxu1 %v15387_v4  ;;  %v3862_v1 = vpop.f32.mrf.mxu1 }
 0x228   : > { %v15505_v6 = vadd.f32 %v3858_v61, %v3788_v54  ;;  %v3792_v38 = vadd.f32 %v3791_v27, %v15234_v40  ;;  %5554 = vmatprep.mubr.bf16.mxu0 %v15170_v5  ;;  %5625 = vmatprep.mubr.bf16.mxu1 %v15172_v46 }
 0x229   : > { %v3793_v16 = vpop.f32.mrf.mxu0  ;;  %v3864_v26 = vpop.f32.mrf.mxu1 }
 0x22a   : > { %v3794_v3 = vadd.f32 %v3793_v16, %v15239_v14  ;;  %v15511_v15 = vadd.f32 %v3862_v1, %v3792_v38 }
 0x22b   : > { %v3795_v24 = vpop.f32.mrf.mxu0  ;;  %v3866_v41 = vpop.f32.mrf.mxu1 }
 0x22c   : > { %v3796_v9 = vadd.f32 %v3795_v24, %v15247_v7  ;;  %v15514_v4 = vadd.f32 %v3864_v26, %v3794_v3 }
 0x22d   : > { %v3797_v42 = vpop.f32.mrf.mxu0  ;;  %v3868_v25 = vpop.f32.mrf.mxu1 }
 0x22e   : > { %v3798_v40 = vadd.f32 %v3797_v42, %v15253_v10  ;;  %v15517_v32 = vadd.f32 %v3866_v41, %v3796_v9 }
 0x22f   : > { %v3801_v5 = vpop.f32.mrf.mxu0  ;;  %5555 = vmatmul.mubr.bf16.gmra.mxu0 %v15178_v47  ;;  %5626 = vmatmul.mubr.bf16.gmra.mxu1 %v15186_v29  ;;  %v3872_v46 = vpop.f32.mrf.mxu1 }
 0x230   : > { %v3802_v14 = vadd.f32 %v3801_v5, %v15278_v48  ;;  %v15522_v44 = vadd.f32 %v3868_v25, %v3798_v40  ;;  %5564 = vmatprep.mubr.bf16.mxu0 %v15417_v12  ;;  %5635 = vmatprep.mubr.bf16.mxu1 %v15419_v43 }
 0x231   : > { %v3803_v7 = vpop.f32.mrf.mxu0  ;;  %v3874_v45 = vpop.f32.mrf.mxu1 }
 0x232   : > { %v3804_v10 = vadd.f32 %v3803_v7, %v15294_v63  ;;  %v15527_v39 = vadd.f32 %v3872_v46, %v3802_v14 }
 0x233   : > { %v3805_v52 = vpop.f32.mrf.mxu0  ;;  %v3876_v30 = vpop.f32.mrf.mxu1 }
 0x234   : > { %v3806_v47 = vadd.f32 %v3805_v52, %v15305_v11  ;;  %v15530_v29 = vadd.f32 %v3874_v45, %v3804_v10 }
 0x235   : > { %v3807_v62 = vpop.f32.mrf.mxu0  ;;  %v3878_v48 = vpop.f32.mrf.mxu1 }
 0x236   : > { %v3808_v55 = vadd.f32 %v3807_v62, %v15321_v57  ;;  %v15533_v51 = vadd.f32 %v3876_v30, %v3806_v47 }
 0x237   : > { %v3811_v12 = vpop.f32.mrf.mxu0  ;;  %5565 = vmatmul.mubr.bf16.gmra.mxu0 %v15435_v50  ;;  %5636 = vmatmul.mubr.bf16.gmra.mxu1 %v15437_v35  ;;  %v3882_v63 = vpop.f32.mrf.mxu1 }
 0x238   : > { %v3812_v43 = vadd.f32 %v3811_v12, %v15331_v22  ;;  %v15538_v34 = vadd.f32 %v3878_v48, %v3808_v55 }
 0x239   : > { %v3813_v18 = vpop.f32.mrf.mxu0  ;;  %v3884_v11 = vpop.f32.mrf.mxu1 }
 0x23a   : > { %v3814_v19 = vadd.f32 %v3813_v18, %v15344_v31  ;;  %v15541_v61 = vadd.f32 %v3882_v63, %v3812_v43 }
 0x23b   : > { %v3815_v54 = vpop.f32.mrf.mxu0  ;;  %v3886_v57 = vpop.f32.mrf.mxu1 }
 0x23c   : > { %v15543_v27 = vadd.f32 %v3884_v11, %v3814_v19 }
 0x23d   : > { %v3816_v1 = vpop.f32.mrf.mxu0  ;;  %v3887_v38 = vpop.f32.mrf.mxu1 }
 0x25f   : > { %v3923_v50 = vpop.f32.mrf.mxu0  ;;  %v3994_v16 = vpop.f32.mrf.mxu1 }
 0x260   : > { %v3924_v35 = vadd.f32 %v3923_v50, %v15375_v33 }
 0x261   : > { %v3925_v26 = vpop.f32.mrf.mxu0  ;;  %v3996_v22 = vpop.f32.mrf.mxu1 }
 0x262   : > { %v15546_v3 = vadd.f32 %v3994_v16, %v3924_v35  ;;  %v3926_v24 = vadd.f32 %v3925_v26, %v15381_v59 }
 0x263   : > { %v3927_v41 = vpop.f32.mrf.mxu0  ;;  %v3998_v31 = vpop.f32.mrf.mxu1 }
 0x264   : > { %v15549_v9 = vadd.f32 %v3996_v22, %v3926_v24  ;;  %v3928_v42 = vadd.f32 %v3927_v41, %v15389_v20 }
 0x265   : > { %v3929_v25 = vpop.f32.mrf.mxu0  ;;  %v4000_v40 = vpop.f32.mrf.mxu1 }
 0x266   : > { %v15552_v5 = vadd.f32 %v3998_v31, %v3928_v42  ;;  %v3930_v46 = vadd.f32 %v3929_v25, %v15395_v8 }
 0x267   : > { %v3933_v14 = vpop.f32.mrf.mxu0  ;;  %v4004_v33 = vpop.f32.mrf.mxu1 }
 0x268   : > { %v15555_v7 = vadd.f32 %v4000_v40, %v3930_v46  ;;  %v3934_v45 = vadd.f32 %v3933_v14, %v15402_v36 }
 0x269   : > { %v3935_v10 = vpop.f32.mrf.mxu0  ;;  %v4006_v59 = vpop.f32.mrf.mxu1 }
 0x26a   : > { %v3936_v52 = vadd.f32 %v3935_v10, %v15408_v13  ;;  %v15559_v30 = vadd.f32 %v4004_v33, %v3934_v45 }
 0x26b   : > { %v3937_v47 = vpop.f32.mrf.mxu0  ;;  %v4008_v20 = vpop.f32.mrf.mxu1 }
 0x26c   : > { %v3938_v62 = vadd.f32 %v3937_v47, %v15413_v23  ;;  %v15562_v48 = vadd.f32 %v4006_v59, %v3936_v52  ;;  %v442_v59 = vld [vmem:[#allocation2 + $0xb0] sm:$0xff] }
 0x26d   : > { %v3939_v55 = vpop.f32.mrf.mxu0  ;;  %v4010_v8 = vpop.f32.mrf.mxu1 }
 0x26e   : > { %v3940_v12 = vadd.f32 %v3939_v55, %v15421_v28  ;;  %v15565_v63 = vadd.f32 %v4008_v20, %v3938_v62  ;;  %v443_v62 = vld [vmem:[#allocation2] sm:$0xff] }
 0x26f   : > { %v3943_v43 = vpop.f32.mrf.mxu0  ;;  %v4014_v36 = vpop.f32.mrf.mxu1 }
 0x270   : > { %v3944_v18 = vadd.f32 %v3943_v43, %v15427_v60  ;;  %v15568_v11 = vadd.f32 %v4010_v8, %v3940_v12 }
 0x271   : > { %v3945_v13 = vpop.f32.mrf.mxu0  ;;  %v4016_v19 = vpop.f32.mrf.mxu1 }
 0x272   : > { %v3946_v54 = vadd.f32 %v3945_v13, %v15433_v21  ;;  %v15571_v57 = vadd.f32 %v4014_v36, %v3944_v18  ;;  %v446_v36 = vld [vmem:[#allocation2 + $0x50] sm:$0xff] }
 0x273   : > { %v3947_v23 = vpop.f32.mrf.mxu0  ;;  %v4018_v1 = vpop.f32.mrf.mxu1 }
 0x274   : > { %v3948_v38 = vadd.f32 %v3947_v23, %v15441_v0  ;;  %v15574_v50 = vadd.f32 %v4016_v19, %v3946_v54 }
 0x275   : > { %v3949_v28 = vpop.f32.mrf.mxu0  ;;  %v4020_v16 = vpop.f32.mrf.mxu1 }
 0x276   : > { %v3950_v35 = vadd.f32 %v3949_v28, %v15445_v17  ;;  %v15577_v26 = vadd.f32 %v4018_v1, %v3948_v38  ;;  %v447_v1 = vld [vmem:[#allocation2 + $0x68] sm:$0xff] }
 0x277   : > { %v3953_v60 = vpop.f32.mrf.mxu0  ;;  %v4024_v22 = vpop.f32.mrf.mxu1 }
 0x278   : > { %v3954_v24 = vadd.f32 %v3953_v60, %v15451_v58  ;;  %v15580_v41 = vadd.f32 %v4020_v16, %v3950_v35  ;;  %v450_v60 = vld [vmem:[#allocation2 + $0x80] sm:$0xff] }
 0x279   : > { %v3955_v21 = vpop.f32.mrf.mxu0  ;;  %v4026_v31 = vpop.f32.mrf.mxu1 }
 0x27a   : > { %v3956_v42 = vadd.f32 %v3955_v21, %v15455_v2  ;;  %v15583_v25 = vadd.f32 %v4024_v22, %v3954_v24 }
 0x27b   : > { %v3957_v0 = vpop.f32.mrf.mxu0  ;;  %v4028_v40 = vpop.f32.mrf.mxu1 }
 0x27c   : > { %v15585_v46 = vadd.f32 %v4026_v31, %v3956_v42  ;;  %v451_v42 = vld [vmem:[#allocation2 + $0x88] sm:$0xff] }
 0x27d   : > { %v3958_v14 = vpop.f32.mrf.mxu0  ;;  %v4029_v17 = vpop.f32.mrf.mxu1 }
 0x29f   : > { %v5394_v33 = vpop.f32.mrf.mxu0  ;;  %v5465_v45 = vpop.f32.mrf.mxu1 }
 0x2a0   : > { %v5466_v10 = vadd.f32 %v5465_v45, %v5394_v33  ;;  %v454_v33 = vld [vmem:[#allocation2 + $0x38] sm:$0xff] }
 0x2a1   : > { %v5396_v52 = vpop.f32.mrf.mxu0  ;;  %v5467_v58 = vpop.f32.mrf.mxu1 }
 0x2a2   : > { %v5644_v47 = vadd.f32 %v5466_v10, %v15494_v37  ;;  %v5468_v20 = vadd.f32 %v5467_v58, %v5396_v52  ;;  %v455_v58 = vld [vmem:[#allocation2 + $0x90] sm:$0xff] }
 0x2a3   : > { %v5398_v55 = vpop.f32.mrf.mxu0  ;;  %v5469_v2 = vpop.f32.mrf.mxu1 }
 0x2a4   : > { %v5672_v8 = vadd.f32 %v5644_v47, %v442_v59  ;;  %v5645_v12 = vadd.f32 %v5468_v20, %v15497_v53  ;;  %v5470_v43 = vadd.f32 %v5469_v2, %v5398_v55  ;;  %v458_v2 = vld [vmem:[#allocation2 + $0x40] sm:$0xff] }
 0x2a5   : > { %v5400_v18 = vpop.f32.mrf.mxu0  ;;  %v5471_v13 = vpop.f32.mrf.mxu1 }
 0x2a6   : > { %5700 = vst [vmem:[#allocation2 + $0xb0] sm:$0xff] %v5672_v8  ;;  %v5673_v19 = vadd.f32 %v5645_v12, %v443_v62  ;;  %v5648_v54 = vadd.f32 %v5470_v43, %v15500_v49  ;;  %v5472_v23 = vadd.f32 %v5471_v13, %v5400_v18  ;;  %v459_v18 = vld [vmem:[#allocation2 + $0x28] sm:$0xff] }
 0x2a7   : > { %v5404_v38 = vpop.f32.mrf.mxu0  ;;  %v5475_v28 = vpop.f32.mrf.mxu1 }
 0x2a8   : > { %5701 = vst [vmem:[#allocation2] sm:$0xff] %v5673_v19  ;;  %v5676_v37 = vadd.f32 %v5648_v54, %v446_v36  ;;  %v5649_v16 = vadd.f32 %v5472_v23, %v15505_v6  ;;  %v5476_v35 = vadd.f32 %v5475_v28, %v5404_v38 }
 0x2a9   : > { %v5406_v22 = vpop.f32.mrf.mxu0  ;;  %v5477_v53 = vpop.f32.mrf.mxu1 }
 0x2aa   : > { %5704 = vst [vmem:[#allocation2 + $0x50] sm:$0xff] %v5676_v37  ;;  %v5677_v24 = vadd.f32 %v5649_v16, %v447_v1  ;;  %v5652_v21 = vadd.f32 %v5476_v35, %v15511_v15  ;;  %v5478_v31 = vadd.f32 %v5477_v53, %v5406_v22  ;;  %v462_v1 = vld [vmem:[#allocation2 + $0xd0] sm:$0xff]  ;;  %v463_v35 = vld [vmem:[#allocation2 + $0xa8] sm:$0xff] }
 0x2ab   : > { %v5408_v0 = vpop.f32.mrf.mxu0  ;;  %v5479_v49 = vpop.f32.mrf.mxu1 }
 0x2ac   : > { %5705 = vst [vmem:[#allocation2 + $0x68] sm:$0xff] %v5677_v24  ;;  %v5680_v40 = vadd.f32 %v5652_v21, %v450_v60  ;;  %v5653_v14 = vadd.f32 %v5478_v31, %v15514_v4  ;;  %v5480_v17 = vadd.f32 %v5479_v49, %v5408_v0  ;;  %v466_v21 = vld [vmem:[#allocation2 + $0x20] sm:$0x1] }
 0x2ad   : > { %v5410_v45 = vpop.f32.mrf.mxu0  ;;  %v5481_v6 = vpop.f32.mrf.mxu1 }
 0x2ae   : > { %5708 = vst [vmem:[#allocation2 + $0x80] sm:$0xff] %v5680_v40  ;;  %v5681_v10 = vadd.f32 %v5653_v14, %v451_v42  ;;  %v5656_v59 = vadd.f32 %v5480_v17, %v15517_v32  ;;  %v5482_v52 = vadd.f32 %v5481_v6, %v5410_v45  ;;  %v467_v40 = vld [vmem:[#allocation2 + $0x10] sm:$0x1] }
 0x2af   : > { %v5414_v47 = vpop.f32.mrf.mxu0  ;;  %v5485_v15 = vpop.f32.mrf.mxu1 }
 0x2b0   : > { %5709 = vst [vmem:[#allocation2 + $0x88] sm:$0xff] %v5681_v10  ;;  %v5684_v20 = vadd.f32 %v5656_v59, %v454_v33  ;;  %v5657_v62 = vadd.f32 %v5482_v52, %v15522_v44  ;;  %v5486_v55 = vadd.f32 %v5485_v15, %v5414_v47 }
 0x2b1   : > { %v5416_v8 = vpop.f32.mrf.mxu0  ;;  %v5487_v4 = vpop.f32.mrf.mxu1 }
 0x2b2   : > { %5712 = vst [vmem:[#allocation2 + $0x38] sm:$0xff] %v5684_v20  ;;  %v5685_v12 = vadd.f32 %v5657_v62, %v455_v58  ;;  %v5660_v43 = vadd.f32 %v5486_v55, %v15527_v39  ;;  %v5488_v36 = vadd.f32 %v5487_v4, %v5416_v8  ;;  %v444_v58 = vld [vmem:[#allocation2 + $0xd8] sm:$0xff] }
 0x2b3   : > { %v5418_v13 = vpop.f32.mrf.mxu0  ;;  %v5489_v32 = vpop.f32.mrf.mxu1  ;;  %v445_v62 = vld [vmem:[#allocation2 + $0x18] sm:$0xff] }
 0x2b4   : > { %5713 = vst [vmem:[#allocation2 + $0x90] sm:$0xff] %v5685_v12  ;;  %v5688_v19 = vadd.f32 %v5660_v43, %v458_v2  ;;  %v5661_v54 = vadd.f32 %v5488_v36, %v15530_v29  ;;  %v5490_v23 = vadd.f32 %v5489_v32, %v5418_v13  ;;  %v448_v12 = vld [vmem:[#allocation2 + $0x30] sm:$0xff] }
 0x2b5   : > { %v5420_v38 = vpop.f32.mrf.mxu0  ;;  %v5491_v44 = vpop.f32.mrf.mxu1 }
 0x2b6   : > { %5716 = vst [vmem:[#allocation2 + $0x40] sm:$0xff] %v5688_v19  ;;  %v5689_v28 = vadd.f32 %v5661_v54, %v459_v18  ;;  %v5664_v37 = vadd.f32 %v5490_v23, %v15533_v51  ;;  %v5492_v16 = vadd.f32 %v5491_v44, %v5420_v38  ;;  %v449_v19 = vld [vmem:[#allocation2 + $0x48] sm:$0xff] }
 0x2b7   : > { %v5424_v60 = vpop.f32.mrf.mxu0  ;;  %v5495_v39 = vpop.f32.mrf.mxu1  ;;  %v452_v44 = vld [vmem:[#allocation2 + $0x8] sm:$0xff] }
 0x2b8   : > { %5717 = vst [vmem:[#allocation2 + $0x28] sm:$0xff] %v5689_v28  ;;  %v5692_v22 = vadd.f32 %v5664_v37, %v462_v1  ;;  %v5665_v53 = vadd.f32 %v5492_v16, %v15538_v34  ;;  %v5496_v24 = vadd.f32 %v5495_v39, %v5424_v60  ;;  %v453_v60 = vld [vmem:[#allocation2 + $0x58] sm:$0xff] }
 0x2b9   : > { %v5426_v31 = vpop.f32.mrf.mxu0  ;;  %v5497_v29 = vpop.f32.mrf.mxu1 }
 0x2ba   : > { %5720 = vst [vmem:[#allocation2 + $0xd0] sm:$0xff] %v5692_v22  ;;  %v5693_v42 = vadd.f32 %v5665_v53, %v463_v35  ;;  %v5668_v0 = vadd.f32 %v5496_v24, %v15541_v61  ;;  %v5498_v49 = vadd.f32 %v5497_v29, %v5426_v31 }
 0x2bb   : > { %v5428_v14 = vpop.f32.mrf.mxu0  ;;  %v5499_v51 = vpop.f32.mrf.mxu1 }
 0x2bc   : > { %5721 = vst [vmem:[#allocation2 + $0xa8] sm:$0xff] %v5693_v42  ;;  %v5696_v17 = vadd.f32 %v5668_v0, %v466_v21  ;;  %v5669_v33 = vadd.f32 %v5498_v49, %v15543_v27  ;;  %v456_v21 = vld [vmem:[#allocation2 + $0x78] sm:$0xff] }
 0x2bd   : > { %v5429_v45 = vpop.f32.mrf.mxu0  ;;  %v5500_v6 = vpop.f32.mrf.mxu1  ;;  %v457_v49 = vld [vmem:[#allocation2 + $0xb8] sm:$0xff] }
 0x2be   : > { %5724 = vst [vmem:[#allocation2 + $0x20] sm:$0x1] %v5696_v17  ;;  %v5697_v34 = vadd.f32 %v5669_v33, %v467_v40  ;;  %v460_v33 = vld [vmem:[#allocation2 + $0xc0] sm:$0xff] }
 0x2c0   : > { %5725 = vst [vmem:[#allocation2 + $0x10] sm:$0x1] %v5697_v34 }
 0x2df   : > { %v5536_v10 = vpop.f32.mrf.mxu0  ;;  %v5607_v59 = vpop.f32.mrf.mxu1 }
 0x2e0   : > { %v5608_v52 = vadd.f32 %v5607_v59, %v5536_v10  ;;  %v461_v59 = vld [vmem:[#allocation2 + $0x60] sm:$0xff] }
 0x2e1   : > { %v5538_v47 = vpop.f32.mrf.mxu0  ;;  %v5609_v15 = vpop.f32.mrf.mxu1 }
 0x2e2   : > { %v5646_v61 = vadd.f32 %v5608_v52, %v15546_v3  ;;  %v5610_v20 = vadd.f32 %v5609_v15, %v5538_v47 }
 0x2e3   : > { %v5540_v55 = vpop.f32.mrf.mxu0  ;;  %v5611_v2 = vpop.f32.mrf.mxu1 }
 0x2e4   : > { %v5674_v8 = vadd.f32 %v5646_v61, %v444_v58  ;;  %v5647_v27 = vadd.f32 %v5610_v20, %v15549_v9  ;;  %v5612_v4 = vadd.f32 %v5611_v2, %v5540_v55  ;;  %v464_v61 = vld [vmem:[#allocation2 + $0x98] sm:$0xff] }
 0x2e5   : > { %v5542_v43 = vpop.f32.mrf.mxu0  ;;  %v5613_v36 = vpop.f32.mrf.mxu1 }
 0x2e6   : > { %5702 = vst [vmem:[#allocation2 + $0xd8] sm:$0xff] %v5674_v8  ;;  %v5675_v18 = vadd.f32 %v5647_v27, %v445_v62  ;;  %v5650_v13 = vadd.f32 %v5612_v4, %v15552_v5  ;;  %v5614_v32 = vadd.f32 %v5613_v36, %v5542_v43  ;;  %v465_v8 = vld [vmem:[#allocation2 + $0xa0] sm:$0xff]  ;;  %v468_v36 = vld [vmem:[#allocation2 + $0xc8] sm:$0x1] }
 0x2e7   : > { %v5546_v54 = vpop.f32.mrf.mxu0  ;;  %v5617_v23 = vpop.f32.mrf.mxu1 }
 0x2e8   : > { %5703 = vst [vmem:[#allocation2 + $0x18] sm:$0xff] %v5675_v18  ;;  %v5678_v3 = vadd.f32 %v5650_v13, %v448_v12  ;;  %v5651_v1 = vadd.f32 %v5614_v32, %v15555_v7  ;;  %v5618_v38 = vadd.f32 %v5617_v23, %v5546_v54  ;;  %v469_v54 = vld [vmem:[#allocation2 + $0x70] sm:$0x1] }
 0x2e9   : > { %v5548_v28 = vpop.f32.mrf.mxu0  ;;  %v5619_v9 = vpop.f32.mrf.mxu1 }
 0x2ea   : > { %5706 = vst [vmem:[#allocation2 + $0x30] sm:$0xff] %v5678_v3  ;;  %v5679_v37 = vadd.f32 %v5651_v1, %v449_v19  ;;  %v5654_v16 = vadd.f32 %v5618_v38, %v15559_v30  ;;  %v5620_v35 = vadd.f32 %v5619_v9, %v5548_v28 }
 0x2eb   : > { %v5550_v39 = vpop.f32.mrf.mxu0  ;;  %v5621_v5 = vpop.f32.mrf.mxu1 }
 0x2ec   : > { %5707 = vst [vmem:[#allocation2 + $0x48] sm:$0xff] %v5679_v37  ;;  %v5682_v22 = vadd.f32 %v5654_v16, %v452_v44  ;;  %v5655_v53 = vadd.f32 %v5620_v35, %v15562_v48  ;;  %v5622_v24 = vadd.f32 %v5621_v5, %v5550_v39 }
 0x2ed   : > { %v5552_v31 = vpop.f32.mrf.mxu0  ;;  %v5623_v7 = vpop.f32.mrf.mxu1 }
 0x2ee   : > { %5710 = vst [vmem:[#allocation2 + $0x8] sm:$0xff] %v5682_v22  ;;  %v5683_v29 = vadd.f32 %v5655_v53, %v453_v60  ;;  %v5658_v42 = vadd.f32 %v5622_v24, %v15565_v63  ;;  %v5624_v0 = vadd.f32 %v5623_v7, %v5552_v31 }
 0x2ef   : > { %v5556_v40 = vpop.f32.mrf.mxu0  ;;  %v5627_v30 = vpop.f32.mrf.mxu1 }
 0x2f0   : > { %5711 = vst [vmem:[#allocation2 + $0x58] sm:$0xff] %v5683_v29  ;;  %v5686_v14 = vadd.f32 %v5658_v42, %v456_v21  ;;  %v5659_v51 = vadd.f32 %v5624_v0, %v15568_v11  ;;  %v5628_v17 = vadd.f32 %v5627_v30, %v5556_v40 }
 0x2f1   : > { %v5558_v45 = vpop.f32.mrf.mxu0  ;;  %v5629_v48 = vpop.f32.mrf.mxu1 }
 0x2f2   : > { %5714 = vst [vmem:[#allocation2 + $0x78] sm:$0xff] %v5686_v14  ;;  %v5687_v6 = vadd.f32 %v5659_v51, %v457_v49  ;;  %v5662_v34 = vadd.f32 %v5628_v17, %v15571_v57  ;;  %v5630_v10 = vadd.f32 %v5629_v48, %v5558_v45 }
 0x2f3   : > { %v5560_v52 = vpop.f32.mrf.mxu0  ;;  %v5631_v63 = vpop.f32.mrf.mxu1 }
 0x2f4   : > { %5715 = vst [vmem:[#allocation2 + $0xb8] sm:$0xff] %v5687_v6  ;;  %v5690_v58 = vadd.f32 %v5662_v34, %v460_v33  ;;  %v5663_v47 = vadd.f32 %v5630_v10, %v15574_v50  ;;  %v5632_v15 = vadd.f32 %v5631_v63, %v5560_v52 }
 0x2f5   : > { %v5562_v20 = vpop.f32.mrf.mxu0  ;;  %v5633_v11 = vpop.f32.mrf.mxu1 }
 0x2f6   : > { %5718 = vst [vmem:[#allocation2 + $0xc0] sm:$0xff] %v5690_v58  ;;  %v5691_v62 = vadd.f32 %v5663_v47, %v461_v59  ;;  %v5666_v55 = vadd.f32 %v5632_v15, %v15577_v26  ;;  %v5634_v2 = vadd.f32 %v5633_v11, %v5562_v20 }
 0x2f7   : > { %v5566_v27 = vpop.f32.mrf.mxu0  ;;  %v5637_v57 = vpop.f32.mrf.mxu1 }
 0x2f8   : > { %5719 = vst [vmem:[#allocation2 + $0x60] sm:$0xff] %v5691_v62  ;;  %v5694_v4 = vadd.f32 %v5666_v55, %v464_v61  ;;  %v5667_v12 = vadd.f32 %v5634_v2, %v15580_v41  ;;  %v5638_v43 = vadd.f32 %v5637_v57, %v5566_v27 }
 0x2f9   : > { %v5568_v18 = vpop.f32.mrf.mxu0  ;;  %v5639_v50 = vpop.f32.mrf.mxu1 }
 0x2fa   : > { %5722 = vst [vmem:[#allocation2 + $0x98] sm:$0xff] %v5694_v4  ;;  %v5695_v13 = vadd.f32 %v5667_v12, %v465_v8  ;;  %v5670_v32 = vadd.f32 %v5638_v43, %v15583_v25  ;;  %v5640_v19 = vadd.f32 %v5639_v50, %v5568_v18 }
 0x2fb   : > { %v5570_v23 = vpop.f32.mrf.mxu0  ;;  %v5641_v26 = vpop.f32.mrf.mxu1 }
 0x2fc   : > { %5723 = vst [vmem:[#allocation2 + $0xa0] sm:$0xff] %v5695_v13  ;;  %v5698_v3 = vadd.f32 %v5670_v32, %v468_v36  ;;  %v5671_v1 = vadd.f32 %v5640_v19, %v15585_v46  ;;  %5731 = sbr.rel (%p12495_p13) target bundleno = 1718 (0x6b6), region = 80 }
 0x2fd   : > { %v5571_v38 = vpop.f32.mrf.mxu0  ;;  %v5642_v44 = vpop.f32.mrf.mxu1 }
 0x2fe   : > { %5726 = vst [vmem:[#allocation2 + $0xc8] sm:$0x1] %v5698_v3  ;;  %v5699_v41 = vadd.f32 %v5671_v1, %v469_v54 }
 0x300   : > { %5727 = vst [vmem:[#allocation2 + $0x70] sm:$0x1] %v5699_v41 }
 0x301   : > { %v6241_v28 = vld [vmem:[#allocation8 + $0x380] sm:$0xff]  ;;  %vm5765_vm0 = vcmask 1040384  }
 0x302   : > { %v6249_v9 = vld [vmem:[#allocation8 + $0x3c0] sm:$0xff] }
 0x303   : > { %v6497_v37 = vld [vmem:[#allocation8 + $0xb80] sm:$0xff]  ;;  %v12609_v25 = vcombine.high %v6241_v28, %v6249_v9  ;;  %v12608_v35 = vcombine.low %v6241_v28, %v6249_v9 }
 0x304   : > { %v6505_v16 = vld [vmem:[#allocation8 + $0xbc0] sm:$0xff] }
 0x305   : > { %v6225_v60 = vld [vmem:[#allocation8 + $0x300] sm:$0xff]  ;;  %v12865_v5 = vcombine.high %v6497_v37, %v6505_v16  ;;  %v12864_v22 = vcombine.low %v6497_v37, %v6505_v16  ;;  %9201 = vmatprep.subr.bf16.mxu0 %v12609_v25 }
 0x306   : > { %v6233_v39 = vld [vmem:[#allocation8 + $0x340] sm:$0xff]  ;;  %9202 = vmatpush1.bf16.msra.mxu0 %v12608_v35 }
 0x307   : > { %v12593_v53 = vcombine.high %v6225_v60, %v6233_v39  ;;  %v6481_v46 = vld [vmem:[#allocation8 + $0xb00] sm:$0xff]  ;;  %9272 = vmatprep.subr.bf16.mxu1 %v12865_v5  ;;  %v12592_v0 = vcombine.low %v6225_v60, %v6233_v39 }
 0x308   : > { %v6489_v24 = vld [vmem:[#allocation8 + $0xb40] sm:$0xff]  ;;  %9273 = vmatpush1.bf16.msra.mxu1 %v12864_v22 }
 0x309   : > { %v6209_v21 = vld [vmem:[#allocation8 + $0x280] sm:$0xff]  ;;  %v12849_v31 = vcombine.high %v6481_v46, %v6489_v24  ;;  %9203 = vmatprep.subr.bf16.mxu0 %v12593_v53  ;;  %v12848_v49 = vcombine.low %v6481_v46, %v6489_v24 }
 0x30a   : > { %v6217_v7 = vld [vmem:[#allocation8 + $0x2c0] sm:$0xff]  ;;  %9204 = vmatpush1.bf16.msra.mxu0 %v12592_v0 }
 0x30b   : > { %v6465_v29 = vld [vmem:[#allocation8 + $0xa80] sm:$0xff]  ;;  %v12577_v40 = vcombine.high %v6209_v21, %v6217_v7  ;;  %9274 = vmatprep.subr.bf16.mxu1 %v12849_v31  ;;  %v12576_v45 = vcombine.low %v6209_v21, %v6217_v7 }
 0x30c   : > { %v6473_v42 = vld [vmem:[#allocation8 + $0xac0] sm:$0xff]  ;;  %9275 = vmatpush1.bf16.msra.mxu1 %v12848_v49 }
 0x30d   : > { %v12833_v30 = vcombine.high %v6465_v29, %v6473_v42  ;;  %v6193_v14 = vld [vmem:[#allocation8 + $0x200] sm:$0xff]  ;;  %9205 = vmatprep.subr.bf16.mxu0 %v12577_v40  ;;  %v12832_v48 = vcombine.low %v6465_v29, %v6473_v42 }
 0x30e   : > { %v6201_v51 = vld [vmem:[#allocation8 + $0x240] sm:$0xff]  ;;  %9206 = vmatpush1.bf16.msra.mxu0 %v12576_v45  ;;  %v15786_v45 = vld [vmem:[#allocation2 + $0x38] sm:$0xff] }
 0x30f   : > { %v6449_v17 = vld [vmem:[#allocation8 + $0xa00] sm:$0xff]  ;;  %v12561_v6 = vcombine.high %v6193_v14, %v6201_v51  ;;  %9276 = vmatprep.subr.bf16.mxu1 %v12833_v30  ;;  %v12560_v61 = vcombine.low %v6193_v14, %v6201_v51  ;;  %v15784_v14 = vld [vmem:[#allocation2 + $0x58] sm:$0xff]  ;;  %19279 = vst [vmem:[#allocation41_spill] sm:$0xff] %v15786_v45  ;;  %v15788_v30 = vld [vmem:[#allocation2 + $0x90] sm:$0xff] }
 0x310   : > { %v6457_v33 = vld [vmem:[#allocation8 + $0xa40] sm:$0xff]  ;;  %9277 = vmatpush1.bf16.msra.mxu1 %v12832_v48 }
 0x311   : > { %v6177_v34 = vld [vmem:[#allocation8 + $0x180] sm:$0xff]  ;;  %v12817_v10 = vcombine.high %v6449_v17, %v6457_v33  ;;  %9207 = vmatprep.subr.bf16.mxu0 %v12561_v6  ;;  %v12816_v55 = vcombine.low %v6449_v17, %v6457_v33 }
 0x312   : > { %v6185_v59 = vld [vmem:[#allocation8 + $0x1c0] sm:$0xff]  ;;  %9208 = vmatpush1.bf16.msra.mxu0 %v12560_v61 }
 0x313   : > { %v15616_v52 = vld [vmem:[#allocation8 + $0x980] sm:$0xff]  ;;  %v12545_v2 = vcombine.high %v6177_v34, %v6185_v59  ;;  %9278 = vmatprep.subr.bf16.mxu1 %v12817_v10  ;;  %v12544_v50 = vcombine.low %v6177_v34, %v6185_v59  ;;  %v15730_v10 = vld [vmem:[#allocation2 + $0xb0] sm:$0xff]  ;;  %v15732_v59 = vld [vmem:[#allocation2] sm:$0xff] }
 0x314   : > { %v15618_v63 = vld [vmem:[#allocation8 + $0x9c0] sm:$0xff]  ;;  %9279 = vmatpush1.bf16.msra.mxu1 %v12816_v55  ;;  %19269 = vst [vmem:[#allocation31_spill] sm:$0xff] %v15730_v10  ;;  %19270 = vst [vmem:[#allocation32_spill] sm:$0xff] %v15732_v59  ;;  %v15748_v55 = vld [vmem:[#allocation2 + $0x18] sm:$0xff]  ;;  %v15814_v5 = vmul.f32 %v15730_v10, %v15730_v10 }
 0x315   : > { %v15620_v58 = vld [vmem:[#allocation8 + $0x100] sm:$0xff]  ;;  %v12801_v12 = vcombine.high %v15616_v52, %v15618_v63  ;;  %v12800_v54 = vcombine.low %v15616_v52, %v15618_v63  ;;  %9209 = vmatprep.subr.bf16.mxu0 %v12545_v2  ;;  %19274 = vst [vmem:[#allocation36_spill] sm:$0xff] %v15748_v55  ;;  %v15750_v2 = vld [vmem:[#allocation2 + $0x50] sm:$0xff]  ;;  %v15800_v63 = vld [vmem:[#allocation2 + $0x40] sm:$0xff] }
 0x316   : > { %v15622_v47 = vld [vmem:[#allocation8 + $0x140] sm:$0xff]  ;;  %9210 = vmatpush1.bf16.msra.mxu0 %v12544_v50  ;;  %19275 = vst [vmem:[#allocation37_spill] sm:$0xff] %v15750_v2 }
 0x317   : > { %v15624_v15 = vld [vmem:[#allocation8 + $0x900] sm:$0xff]  ;;  %v12529_v23 = vcombine.high %v15620_v58, %v15622_v47  ;;  %v12528_v3 = vcombine.low %v15620_v58, %v15622_v47  ;;  %9280 = vmatprep.subr.bf16.mxu1 %v12801_v12  ;;  %v5760_v58 = vadd.f32 %v15750_v2, %v15730_v10  ;;  %v15768_v12 = vld [vmem:[#allocation2 + $0x80] sm:$0xff] }
 0x318   : > { %v15626_v20 = vld [vmem:[#allocation8 + $0x940] sm:$0xff]  ;;  %9281 = vmatpush1.bf16.msra.mxu1 %v12800_v54  ;;  %v15844_v10 = vld [vmem:[#allocation2 + $0x20] sm:$0x1] }
 0x319   : > { %v15628_v11 = vld [vmem:[#allocation8 + $0x80] sm:$0xff]  ;;  %v12785_v26 = vcombine.high %v15624_v15, %v15626_v20  ;;  %v12784_v41 = vcombine.low %v15624_v15, %v15626_v20  ;;  %9211 = vmatprep.subr.bf16.mxu0 %v12529_v23  ;;  %v15746_v20 = vld [vmem:[#allocation2 + $0xd8] sm:$0xff]  ;;  %v5761_v40 = vadd.f32 %v5760_v58, %v15768_v12  ;;  %19284 = vst [vmem:[#allocation44_spill] sm:$0xff] %v15844_v10 }
 0x31a   : > { %v15630_v62 = vld [vmem:[#allocation8 + $0xc0] sm:$0xff]  ;;  %19273 = vst [vmem:[#allocation35_spill] sm:$0xff] %v15746_v20  ;;  %9212 = vmatpush1.bf16.msra.mxu0 %v12528_v3  ;;  %v15798_v3 = vld [vmem:[#allocation2 + $0xb8] sm:$0xff]  ;;  %v15834_v60 = vmul.f32 %v15746_v20, %v15746_v20 }
 0x31b   : > { %v15632_v8 = vld [vmem:[#allocation8 + $0x880] sm:$0xff]  ;;  %v12513_v28 = vcombine.high %v15628_v11, %v15630_v62  ;;  %v12512_v9 = vcombine.low %v15628_v11, %v15630_v62  ;;  %9282 = vmatprep.subr.bf16.mxu1 %v12785_v26  ;;  %v15760_v26 = vld [vmem:[#allocation2 + $0x30] sm:$0xff] }
 0x31c   : > { %v15634_v27 = vld [vmem:[#allocation8 + $0x8c0] sm:$0xff]  ;;  %19277 = vst [vmem:[#allocation39_spill] sm:$0xff] %v15760_v26  ;;  %v5787_v6 = vadd.f32 %v15760_v26, %v15746_v20  ;;  %9283 = vmatpush1.bf16.msra.mxu1 %v12784_v41  ;;  %v5762_v41 = vadd.f32 %v5761_v40, %v15786_v45  ;;  %v15862_v20 = vld [vmem:[#allocation2 + $0x70] sm:$0x1] }
 0x31d   : > { %v15636_v57 = vld [vmem:[#allocation8] sm:$0xff]  ;;  %v12769_v35 = vcombine.high %v15632_v8, %v15634_v27  ;;  %9213 = vmatprep.subr.bf16.mxu0 %v12513_v28  ;;  %v15796_v28 = vld [vmem:[#allocation2 + $0x78] sm:$0xff]  ;;  %v19282_v11 = vcombine.low %v15632_v8, %v15634_v27  ;;  %v5821_v8 = vmul.f32 %v15750_v2, %v15750_v2 }
 0x31e   : > { %v15638_v4 = vld [vmem:[#allocation8 + $0x40] sm:$0xff]  ;;  %19280 = vst [vmem:[#allocation42_spill] sm:$0xff] %v15796_v28  ;;  %9214 = vmatpush1.bf16.msra.mxu0 %v12512_v9  ;;  %v15842_v9 = vld [vmem:[#allocation2 + $0x98] sm:$0xff] }
 0x31f   : > { %v15642_v43 = vld [vmem:[#allocation8 + $0x800] sm:$0xff]  ;;  %9284 = vmatprep.subr.bf16.mxu1 %v12769_v35  ;;  %v15809_v35 = vld [vmem:[#allocation2 + $0xc0] sm:$0xff]  ;;  %v19283_v62 = vcombine.high %v15636_v57, %v15638_v4 }
 0x320   : > { %v15644_v36 = vld [vmem:[#allocation8 + $0x840] sm:$0xff]  ;;  %19281 = vst [vmem:[#allocation43_spill] sm:$0xff] %v15809_v35  ;;  %9285 = vmatpush1.bf16.msra.mxu1 %v19282_v11  ;;  %v15858_v11 = vld [vmem:[#allocation2 + $0xa0] sm:$0xff] }
 0x321   : > { %v15646_v18 = vld [vmem:[#allocation8 + $0x780] sm:$0xff]  ;;  %9215 = vmatprep.subr.bf16.mxu0 %v19283_v62  ;;  %v19285_v27 = vcombine.high %v15642_v43, %v15644_v36 }
 0x322   : > { %v15648_v13 = vld [vmem:[#allocation8 + $0x7c0] sm:$0xff] }
 0x323   : > { %v15650_v32 = vld [vmem:[#allocation8 + $0xf80] sm:$0xff]  ;;  %9286 = vmatprep.subr.bf16.mxu1 %v19285_v27 }
 0x324   : > { %v15652_v19 = vld [vmem:[#allocation8 + $0xfc0] sm:$0xff] }
 0x325   : > { %v15662_v1 = vld [vmem:[#allocation8 + $0x700] sm:$0xff] }
 0x326   : > { %v15664_v38 = vld [vmem:[#allocation8 + $0x740] sm:$0xff] }
 0x327   : > { %v15666_v44 = vld [vmem:[#allocation8 + $0xf00] sm:$0xff] }
 0x328   : > { %v15674_v37 = vld [vmem:[#allocation8 + $0xf40] sm:$0xff] }
 0x329   : > { %v15676_v25 = vld [vmem:[#allocation8 + $0x680] sm:$0xff] }
 0x32a   : > { %v15678_v16 = vld [vmem:[#allocation8 + $0x6c0] sm:$0xff] }
 0x32b   : > { %v15688_v22 = vld [vmem:[#allocation8 + $0xe80] sm:$0xff] }
 0x32c   : > { %v15690_v53 = vld [vmem:[#allocation8 + $0xec0] sm:$0xff] }
 0x32d   : > { %v15692_v46 = vld [vmem:[#allocation8 + $0x600] sm:$0xff] }
 0x32e   : > { %v15702_v29 = vld [vmem:[#allocation8 + $0x640] sm:$0xff] }
 0x32f   : > { %v15704_v42 = vld [vmem:[#allocation8 + $0xe00] sm:$0xff] }
 0x330   : > { %v15706_v0 = vld [vmem:[#allocation8 + $0xe40] sm:$0xff] }
 0x331   : > { %v15716_v51 = vld [vmem:[#allocation8 + $0x580] sm:$0xff] }
 0x332   : > { %v15718_v17 = vld [vmem:[#allocation8 + $0x5c0] sm:$0xff] }
 0x333   : > { %v15720_v33 = vld [vmem:[#allocation8 + $0xd80] sm:$0xff] }
 0x334   : > { %19267 = vst [vmem:[#allocation29_spill] sm:$0xff] %v15720_v33  ;;  %v15728_v34 = vld [vmem:[#allocation8 + $0xdc0] sm:$0xff] }
 0x335   : > { %19268 = vst [vmem:[#allocation30_spill] sm:$0xff] %v15728_v34  ;;  %v15742_v15 = vld [vmem:[#allocation8 + $0x500] sm:$0xff] }
 0x336   : > { %19271 = vst [vmem:[#allocation33_spill] sm:$0xff] %v15742_v15  ;;  %v15744_v61 = vld [vmem:[#allocation8 + $0x540] sm:$0xff]  ;;  %v19286_v15 = vcombine.low %v15636_v57, %v15638_v4 }
 0x337   : > { %19272 = vst [vmem:[#allocation34_spill] sm:$0xff] %v15744_v61  ;;  %v15758_v23 = vld [vmem:[#allocation2 + $0x68] sm:$0xff]  ;;  %v19287_v61 = vcombine.low %v15642_v43, %v15644_v36  ;;  %v5825_v43 = vmul.f32 %v15768_v12, %v15768_v12 }
 0x338   : > { %19276 = vst [vmem:[#allocation38_spill] sm:$0xff] %v15758_v23  ;;  %v15762_v47 = vld [vmem:[#allocation2 + $0x48] sm:$0xff]  ;;  %v5774_v54 = vadd.f32 %v15758_v23, %v15732_v59  ;;  %v5822_v2 = vmul.f32 %v15758_v23, %v15758_v23  ;;  %9216 = vmatpush1.bf16.msra.mxu0 %v19286_v15  ;;  %v5805_v23 = vsel %vm5765_vm0, %v15862_v20, 0.0  ;;  %v19289_v15 = vcombine.high %v15650_v32, %v15652_v19 }
 0x339   : > { %v15770_v52 = vld [vmem:[#allocation2 + $0x88] sm:$0xff]  ;;  %v5800_v48 = vadd.f32 %v15762_v47, %v15748_v55  ;;  %9287 = vmatpush1.bf16.msra.mxu1 %v19287_v61 }
 0x33a   : > { %v15772_v50 = vld [vmem:[#allocation2 + $0x8] sm:$0xff]  ;;  %v5775_v49 = vadd.f32 %v5774_v54, %v15770_v52  ;;  %v15818_v54 = vmul.f32 %v15732_v59, %v15732_v59  ;;  %9288 = vmatprep.subr.bf16.mxu1 %v19289_v15  ;;  %v5826_v36 = vmul.f32 %v15770_v52, %v15770_v52 }
 0x33b   : > { %19278 = vst [vmem:[#allocation40_spill] sm:$0xff] %v15772_v50  ;;  %v5788_v7 = vadd.f32 %v5787_v6, %v15772_v50  ;;  %v5801_v58 = vadd.f32 %v5800_v48, %v15784_v14  ;;  %v15807_v21 = vld [vmem:[#allocation2 + $0x28] sm:$0xff]  ;;  %v15823_v48 = vld [vmem:[#allocation2 + $0x60] sm:$0xff]  ;;  %v15825_v6 = vld [vmem:[#allocation2 + $0xd0] sm:$0xff] }
 0x33c   : > { %v15827_v31 = vld [vmem:[#allocation2 + $0xa8] sm:$0xff]  ;;  %v5776_v40 = vadd.f32 %v5775_v49, %v15788_v30  ;;  %v15846_v49 = vld [vmem:[#allocation2 + $0x10] sm:$0x1] }
 0x33d   : > { %v5789_v24 = vadd.f32 %v5788_v7, %v15796_v28  ;;  %v5802_v39 = vadd.f32 %v5801_v58, %v15798_v3  ;;  %v5763_v7 = vadd.f32 %v5762_v41, %v15800_v63  ;;  %v15851_v58 = vmul.f32 %v15748_v55, %v15748_v55  ;;  %v15860_v62 = vld [vmem:[#allocation2 + $0xc8] sm:$0x1] }
 0x33e   : > { %v5766_v41 = vsel %vm5765_vm0, %v15844_v10, 0.0  ;;  %v5777_v59 = vadd.f32 %v5776_v40, %v15807_v21  ;;  %v5779_v27 = vsel %vm5765_vm0, %v15846_v49, 0.0  ;;  %v5792_v34 = vsel %vm5765_vm0, %v15860_v62, 0.0 }
 0x33f   : > { %v5790_v55 = vadd.f32 %v5789_v24, %v15809_v35  ;;  %v5764_v56 = vadd.f32 %v5763_v7, %v15825_v6  ;;  %v5803_v33 = vadd.f32 %v5802_v39, %v15823_v48  ;;  %v5823_v7 = vmul.f32 %v15760_v26, %v15760_v26 }
 0x340   : > { %v5778_v40 = vadd.f32 %v5777_v59, %v15827_v31  ;;  %v19288_v39 = vcombine.high %v15646_v18, %v15648_v13  ;;  %v5824_v59 = vmul.f32 %v15762_v47, %v15762_v47 }
 0x341   : > { %v5791_v24 = vadd.f32 %v5790_v55, %v15842_v9  ;;  %v5767_v57 = vadd.f32 %v5766_v41, %v5764_v56  ;;  %v5804_v4 = vadd.f32 %v5803_v33, %v15858_v11  ;;  %v5827_v56 = vmul.f32 %v15772_v50, %v15772_v50 }
 0x342   : > { %9217 = vmatprep.subr.bf16.mxu0 %v19288_v39  ;;  %v5780_v55 = vadd.f32 %v5779_v27, %v5778_v40  ;;  %v5828_v33 = vmul.f32 %v15784_v14, %v15784_v14  ;;  %v19290_v41 = vcombine.low %v15646_v18, %v15648_v13  ;;  %v5829_v40 = vmul.f32 %v15786_v45, %v15786_v45 }
 0x343   : > { %v5793_v26 = vadd.f32 %v5792_v34, %v5791_v24  ;;  %v5768_v61 = vrot.slane %v5767_v57, 4  ;;  %v5806_v39 = vadd.f32 %v5805_v23, %v5804_v4  ;;  %v5830_v24 = vmul.f32 %v15788_v30, %v15788_v30 }
 0x344   : > { %9218 = vmatpush2.bf16.msra.mxu0 %v19290_v41  ;;  %v5781_v27 = vrot.slane %v5780_v55, 4  ;;  %v19291_v23 = vcombine.low %v15650_v32, %v15652_v19  ;;  %v19292_v4 = vcombine.high %v15662_v1, %v15664_v38  ;;  %v5831_v18 = vmul.f32 %v15796_v28, %v15796_v28 }
 0x345   : > { %v5794_v34 = vrot.slane %v5793_v26, 4  ;;  %v5769_v15 = vadd.f32 %v5768_v61, %v5767_v57  ;;  %v5807_v50 = vrot.slane %v5806_v39, 4  ;;  %v5832_v13 = vmul.f32 %v15798_v3, %v15798_v3 }
 0x346   : > { %9289 = vmatpush2.bf16.msra.mxu1 %v19291_v23  ;;  %9219 = vmatprep.subr.bf16.mxu0 %v19292_v4  ;;  %v19293_v41 = vcombine.high %v15666_v44, %v15674_v37  ;;  %v5782_v45 = vadd.f32 %v5781_v27, %v5780_v55  ;;  %v5833_v32 = vmul.f32 %v15800_v63, %v15800_v63 }
 0x347   : > { %v5834_v19 = vmul.f32 %v15807_v21, %v15807_v21  ;;  %v5835_v57 = vmul.f32 %v15809_v35, %v15809_v35  ;;  %v5795_v61 = vadd.f32 %v5794_v34, %v5793_v26  ;;  %v5836_v23 = vmul.f32 %v15823_v48, %v15823_v48 }
 0x348   : > { %9290 = vmatprep.subr.bf16.mxu1 %v19293_v41  ;;  %v5837_v4 = vmul.f32 %v15825_v6, %v15825_v6  ;;  %v5845_v28 = vadd.f32 %v5821_v8, %v15814_v5  ;;  %v19294_v55 = vcombine.low %v15662_v1, %v15664_v38  ;;  %v5808_v27 = vadd.f32 %v5807_v50, %v5806_v39 }
 0x349   : > { %v5838_v41 = vmul.f32 %v15827_v31, %v15827_v31  ;;  %v5839_v35 = vmul.f32 %v15842_v9, %v15842_v9  ;;  %v5858_v26 = vadd.f32 %v5822_v2, %v15818_v54  ;;  %v19295_v34 = vcombine.low %v15666_v44, %v15674_v37 }
 0x34a   : > { %9220 = vmatpush2.bf16.msra.mxu0 %v19294_v55  ;;  %v19296_v5 = vcombine.high %v15676_v25, %v15678_v16  ;;  %v5770_v8 = vrot.slane %v5769_v15, 2  ;;  %v5840_v1 = vmul.f32 %v15858_v11, %v15858_v11  ;;  %v5846_v38 = vadd.f32 %v5845_v28, %v5825_v43 }
 0x34b   : > { %9291 = vmatpush2.bf16.msra.mxu1 %v19295_v34  ;;  %v5871_v50 = vadd.f32 %v5823_v7, %v15834_v60  ;;  %v19297_v39 = vcombine.high %v15688_v22, %v15690_v53  ;;  %v5783_v2 = vrot.slane %v5782_v45, 2  ;;  %v5841_v44 = vmul.f32 %v15844_v10, %v15844_v10 }
 0x34c   : > { %9221 = vmatprep.subr.bf16.mxu0 %v19296_v5  ;;  %v5842_v37 = vmul.f32 %v15846_v49, %v15846_v49  ;;  %v5859_v54 = vadd.f32 %v5858_v26, %v5826_v36  ;;  %v5796_v55 = vrot.slane %v5795_v61, 2  ;;  %v5843_v34 = vmul.f32 %v15860_v62, %v15860_v62 }
 0x34d   : > { %9292 = vmatprep.subr.bf16.mxu1 %v19297_v39  ;;  %v5847_v5 = vadd.f32 %v5846_v38, %v5829_v40  ;;  %v5872_v28 = vadd.f32 %v5871_v50, %v5827_v56  ;;  %v19298_v60 = vcombine.low %v15676_v25, %v15678_v16  ;;  %v5809_v7 = vrot.slane %v5808_v27, 2 }
 0x34e   : > { %v5844_v43 = vmul.f32 %v15862_v20, %v15862_v20  ;;  %v5860_v39 = vadd.f32 %v5859_v54, %v5830_v24  ;;  %v5884_v10 = vadd.f32 %v5824_v59, %v15851_v58  ;;  %v19299_v36 = vcombine.low %v15688_v22, %v15690_v53  ;;  %v6545_v59 = vld [vmem:[#allocation8 + $0xd00] sm:$0xff] }
 0x34f   : > { %9222 = vmatpush2.bf16.msra.mxu0 %v19298_v60  ;;  %v19300_v26 = vcombine.high %v15692_v46, %v15702_v29  ;;  %v5771_v56 = vadd.f32 %v5770_v8, %v5769_v15  ;;  %v5848_v40 = vadd.f32 %v5847_v5, %v5833_v32  ;;  %v5873_v38 = vadd.f32 %v5872_v28, %v5831_v18  ;;  %v6553_v54 = vld [vmem:[#allocation8 + $0xd40] sm:$0xff] }
 0x350   : > { %9293 = vmatpush2.bf16.msra.mxu1 %v19299_v36  ;;  %v19301_v25 = vcombine.high %v15704_v42, %v15706_v0  ;;  %v5784_v16 = vadd.f32 %v5783_v2, %v5782_v45  ;;  %v5850_v24 = vsel %vm5765_vm0, %v5841_v44, 0.0  ;;  %v5861_v50 = vadd.f32 %v5860_v39, %v5834_v19  ;;  %v6537_v5 = vld [vmem:[#allocation8 + $0xcc0] sm:$0xff] }
 0x351   : > { %9223 = vmatprep.subr.bf16.mxu0 %v19300_v26  ;;  %v5885_v58 = vadd.f32 %v5884_v10, %v5828_v33  ;;  %v5797_v22 = vadd.f32 %v5796_v55, %v5795_v61  ;;  %v5849_v53 = vadd.f32 %v5848_v40, %v5837_v4  ;;  %v5863_v60 = vsel %vm5765_vm0, %v5842_v37, 0.0  ;;  %v19305_v33 = vld [vmem:[#allocation34_spill] sm:$0xff]  ;;  %v19306_v61 = vld [vmem:[#allocation33_spill] sm:$0xff] }
 0x352   : > { %9294 = vmatprep.subr.bf16.mxu1 %v19301_v25  ;;  %v5874_v36 = vadd.f32 %v5873_v38, %v5835_v57  ;;  %v19302_v15 = vcombine.low %v15692_v46, %v15702_v29  ;;  %v5810_v18 = vadd.f32 %v5809_v7, %v5808_v27  ;;  %v5862_v32 = vadd.f32 %v5861_v50, %v5838_v41  ;;  %v19307_v29 = vld [vmem:[#allocation29_spill] sm:$0xff]  ;;  %v19308_v27 = vld [vmem:[#allocation30_spill] sm:$0xff] }
 0x353   : > { %v5876_v8 = vsel %vm5765_vm0, %v5843_v34, 0.0  ;;  %v5886_v45 = vadd.f32 %v5885_v58, %v5832_v13  ;;  %v19303_v19 = vcombine.low %v15704_v42, %v15706_v0  ;;  %v19304_v10 = vcombine.high %v15716_v51, %v15718_v17  ;;  %v6273_v13 = vld [vmem:[#allocation8 + $0x480] sm:$0xff] }
 0x354   : > { %9224 = vmatpush2.bf16.msra.mxu0 %v19302_v15  ;;  %v12656_v57 = vcombine.low %v19306_v61, %v19305_v33  ;;  %v5772_v4 = vrot.slane %v5771_v56, 1  ;;  %v5851_v2 = vadd.f32 %v5850_v24, %v5849_v53  ;;  %v5875_v46 = vadd.f32 %v5874_v36, %v5839_v35  ;;  %v6281_v37 = vld [vmem:[#allocation8 + $0x4c0] sm:$0xff] }
 0x355   : > { %9295 = vmatpush2.bf16.msra.mxu1 %v19303_v19  ;;  %9225 = vmatprep.subr.bf16.mxu0 %v19304_v10  ;;  %v19309_v41 = vcombine.high %v19307_v29, %v19308_v27  ;;  %v12913_v44 = vcombine.high %v6545_v59, %v6553_v54  ;;  %v5785_v55 = vrot.slane %v5784_v16, 1  ;;  %v5864_v42 = vadd.f32 %v5863_v60, %v5862_v32  ;;  %v6529_v34 = vld [vmem:[#allocation8 + $0xc80] sm:$0xff] }
 0x356   : > { %v5887_v0 = vadd.f32 %v5886_v45, %v5836_v23  ;;  %v5798_v28 = vrot.slane %v5797_v22, 1  ;;  %v5852_v7 = vrot.slane %v5851_v2, 4  ;;  %v5877_v39 = vadd.f32 %v5876_v8, %v5875_v46  ;;  %v6513_v32 = vld [vmem:[#allocation8 + $0xc00] sm:$0xff] }
 0x357   : > { %9296 = vmatprep.subr.bf16.mxu1 %v19309_v41  ;;  %v5889_v26 = vsel %vm5765_vm0, %v5844_v43, 0.0  ;;  %v19310_v35 = vcombine.low %v15716_v51, %v15718_v17  ;;  %v12912_v40 = vcombine.low %v6545_v59, %v6553_v54  ;;  %v5811_v38 = vrot.slane %v5810_v18, 1  ;;  %v6257_v51 = vld [vmem:[#allocation8 + $0x400] sm:$0xff] }
 0x358   : > { %v5865_v25 = vrot.slane %v5864_v42, 4  ;;  %v5888_v24 = vadd.f32 %v5887_v0, %v5840_v1  ;;  %v19311_v50 = vcombine.low %v19307_v29, %v19308_v27  ;;  %v19312_v23 = vcombine.high %v19306_v61, %v19305_v33  ;;  %v6265_v17 = vld [vmem:[#allocation8 + $0x440] sm:$0xff]  ;;  %v16014_v0 = vld [vmem:[#allocation8 + $0xb88] sm:$0xff] }
 0x359   : > { %9226 = vmatpush2.bf16.msra.mxu0 %v19310_v35  ;;  %v12641_v58 = vcombine.high %v6273_v13, %v6281_v37  ;;  %v5773_v53 = vadd.f32 %v5772_v4, %v5771_v56  ;;  %v5853_v60 = vadd.f32 %v5852_v7, %v5851_v2  ;;  %v5878_v43 = vrot.slane %v5877_v39, 4  ;;  %v6521_v8 = vld [vmem:[#allocation8 + $0xc40] sm:$0xff] }
 0x35a   : > { %9297 = vmatpush2.bf16.msra.mxu1 %v19311_v50  ;;  %9227 = vmatprep.subr.bf16.mxu0 %v19312_v23  ;;  %v12897_v36 = vcombine.high %v6529_v34, %v6537_v5  ;;  %v5786_v59 = vadd.f32 %v5785_v55, %v5784_v16  ;;  %v5866_v54 = vadd.f32 %v5865_v25, %v5864_v42 }
 0x35b   : > { %9298 = vmatprep.subr.bf16.mxu1 %v12913_v44  ;;  %v5890_v15 = vadd.f32 %v5889_v26, %v5888_v24  ;;  %v12640_v1 = vcombine.low %v6273_v13, %v6281_v37  ;;  %v5799_v45 = vadd.f32 %v5798_v28, %v5797_v22  ;;  %v5854_v19 = vrot.slane %v5853_v60, 2  ;;  %v16008_v13 = vld [vmem:[#allocation8 + $0x388] sm:$0xff] }
 0x35c   : > { %v5879_v10 = vadd.f32 %v5878_v43, %v5877_v39  ;;  %v12896_v33 = vcombine.low %v6529_v34, %v6537_v5  ;;  %v5812_v61 = vadd.f32 %v5811_v38, %v5810_v18  ;;  %v5867_v46 = vrot.slane %v5866_v54, 2  ;;  %v16016_v34 = vld [vmem:[#allocation8 + $0xbc8] sm:$0xff] }
 0x35d   : > { %9228 = vmatpush2.bf16.msra.mxu0 %v12656_v57  ;;  %v5891_v56 = vrot.slane %v5890_v15, 4  ;;  %v12625_v4 = vcombine.high %v6257_v51, %v6265_v17  ;;  %v16004_v2 = vmul.f32 0.020408163, %v5773_v53  ;;  %v5855_v29 = vadd.f32 %v5854_v19, %v5853_v60  ;;  %v16010_v57 = vld [vmem:[#allocation8 + $0x3c8] sm:$0xff] }
 0x35e   : > { %9299 = vmatpush2.bf16.msra.mxu1 %v12912_v40  ;;  %9229 = vmatprep.subr.bf16.mxu0 %v12641_v58  ;;  %v5880_v16 = vrot.slane %v5879_v10, 2  ;;  %v12881_v27 = vcombine.high %v6513_v32, %v6521_v8  ;;  %v16006_v41 = vmul.f32 0.020408163, %v5786_v59  ;;  %v5868_v44 = vadd.f32 %v5867_v46, %v5866_v54 }
 0x35f   : > { %9300 = vmatprep.subr.bf16.mxu1 %v12897_v36  ;;  %v5892_v22 = vadd.f32 %v5891_v56, %v5890_v15  ;;  %v12624_v18 = vcombine.low %v6257_v51, %v6265_v17  ;;  %v16012_v37 = vmul.f32 0.020408163, %v5799_v45  ;;  %v5856_v55 = vrot.slane %v5855_v29, 1 }
 0x360   : > { %v5881_v42 = vadd.f32 %v5880_v16, %v5879_v10  ;;  %v12880_v5 = vcombine.low %v6513_v32, %v6521_v8  ;;  %v16018_v28 = vmul.f32 0.020408163, %v5812_v61  ;;  %v5869_v7 = vrot.slane %v5868_v44, 1 }
 0x361   : > { %9230 = vmatpush2.bf16.msra.mxu0 %v12640_v1  ;;  %v5893_v39 = vrot.slane %v5892_v22, 2  ;;  %v5857_v26 = vadd.f32 %v5856_v55, %v5855_v29  ;;  %v5901_v40 = vmul.f32 %v16004_v2, %v16004_v2  ;;  %v12611_v38 = vcombine.high %v16008_v13, %v16010_v57  ;;  %v19313_v55 = vld [vmem:[#allocation18_spill] sm:$0xff] }
 0x362   : > { %9301 = vmatpush2.bf16.msra.mxu1 %v12896_v33  ;;  %9231 = vmatprep.subr.bf16.mxu0 %v12625_v4  ;;  %v5882_v35 = vrot.slane %v5881_v42, 1  ;;  %v5870_v25 = vadd.f32 %v5869_v7, %v5868_v44  ;;  %v5902_v50 = vmul.f32 %v16006_v41, %v16006_v41  ;;  %v12867_v23 = vcombine.high %v16014_v0, %v16016_v34 }
 0x363   : > { %9302 = vmatprep.subr.bf16.mxu1 %v12881_v27  ;;  %v5894_v24 = vadd.f32 %v5893_v39, %v5892_v22  ;;  %v5897_v53 = vmul.f32 0.020408163, %v5857_v26  ;;  %v5903_v60 = vmul.f32 %v16012_v37, %v16012_v37  ;;  %v5904_v54 = vmul.f32 %v16018_v28, %v16018_v28  ;;  %v5913_v39 = vld [vmem:[#allocation5] sm:$0xf]  ;;  %v19314_v26 = vld [vmem:[#allocation17_spill] sm:$0xff] }
 0x364   : > { %v5883_v58 = vadd.f32 %v5882_v35, %v5881_v42  ;;  %v5898_v36 = vmul.f32 0.020408163, %v5870_v25  ;;  %v16035_v35 = vsub.s32 0, %v19314_v26  ;;  %v16042_v25 = vsub.s32 2, %v19314_v26 }
 0x365   : > { %9232 = vmatpush2.bf16.msra.mxu0 %v12624_v18  ;;  %v5895_v43 = vrot.slane %v5894_v24, 1  ;;  %v5905_v17 = vsub.f32 %v5897_v53, %v5901_v40 }
 0x366   : > { %9303 = vmatpush2.bf16.msra.mxu1 %v12880_v5  ;;  %v5899_v51 = vmul.f32 0.020408163, %v5883_v58  ;;  %9343 = vmatprep.subr.bf16.mxu0 %v12611_v38  ;;  %v5906_v15 = vsub.f32 %v5898_v36, %v5902_v50  ;;  %19315 = vst [vmem:[#allocation34_spill] sm:$0xff] %v16035_v35  ;;  %v16039_v38 = vsub.s32 1, %v19314_v26  ;;  %19317 = vst [vmem:[#allocation29_spill] sm:$0xff] %v16042_v25 }
 0x367   : > { %v5896_v59 = vadd.f32 %v5895_v43, %v5894_v24  ;;  %9414 = vmatprep.subr.bf16.mxu1 %v12867_v23  ;;  %v5909_v32 = vmax.f32 %v5905_v17, 0.0  ;;  %v16045_v24 = vsub.s32 3, %v19314_v26  ;;  %v16059_v43 = vld [vmem:[#allocation8 + $0x308] sm:$0xff] }
 0x368   : > { %v5907_v1 = vsub.f32 %v5899_v51, %v5903_v60  ;;  %v5910_v45 = vmax.f32 %v5906_v15, 0.0  ;;  %19316 = vst [vmem:[#allocation33_spill] sm:$0xff] %v16039_v38  ;;  %v16071_v15 = vld [vmem:[#allocation8 + $0xb08] sm:$0xff] }
 0x369   : > { %v5900_v8 = vmul.f32 0.020408163, %v5896_v59  ;;  %v5914_v10 = vadd.f32 1e-05, %v5909_v32  ;;  %19318 = vst [vmem:[#allocation30_spill] sm:$0xff] %v16045_v24  ;;  %v16075_v32 = vld [vmem:[#allocation8 + $0x288] sm:$0xff] }
 0x36a   : > { %v5911_v19 = vmax.f32 %v5907_v1, 0.0  ;;  %v5915_v61 = vadd.f32 1e-05, %v5910_v45  ;;  %v16073_v1 = vld [vmem:[#allocation8 + $0xb48] sm:$0xff] }
 0x36b   : > { %v5908_v33 = vsub.f32 %v5900_v8, %v5904_v54  ;;  %13744 = vrsqrt.f32 %v5914_v10  ;;  %v16069_v54 = vld [vmem:[#allocation8 + $0x348] sm:$0xff] }
 0x36c   : > { %v5916_v46 = vadd.f32 1e-05, %v5911_v19  ;;  %13746 = vrsqrt.f32 %v5915_v61  ;;  %v16077_v8 = vld [vmem:[#allocation8 + $0x2c8] sm:$0xff] }
 0x36d   : > { %v5912_v56 = vmax.f32 %v5908_v33, 0.0  ;;  %v16085_v19 = vld [vmem:[#allocation8 + $0xac8] sm:$0xff] }
 0x36e   : > { %13748 = vrsqrt.f32 %v5916_v46  ;;  %v16087_v10 = vld [vmem:[#allocation8 + $0x208] sm:$0xff] }
 0x36f   : > { %v5917_v4 = vadd.f32 1e-05, %v5912_v56  ;;  %v16089_v33 = vld [vmem:[#allocation8 + $0x248] sm:$0xff] }
 0x370   : > { %v6158_v26 = vld [vmem:[#allocation8 + $0xe8] sm:$0xff] }
 0x371   : > { %13750 = vrsqrt.f32 %v5917_v4 }
 0x378   : > { %v13745_v29 = vpop.eup %13744 }
 0x379   : > { %v13747_v16 = vpop.eup %13746 }
 0x37a   : > { %v5926_v27 = vcombine.low %v13745_v29, %v13747_v16 }
 0x37b   : > { %v13749_v44 = vpop.eup %13748 }
 0x37c   : > { %v5934_v42 = vrot.slane %v5926_v27, %v19313_v55  ;;  %v19324_v27 = vld [vmem:[#allocation35_spill] sm:$0xff] }
 0x37e   : > { %v13751_v22 = vpop.eup %13750 }
 0x37f   : > { %v5927_v18 = vcombine.low %v13749_v44, %v13751_v22  ;;  %v19319_v22 = vld [vmem:[#allocation32_spill] sm:$0xff] }
 0x380   : > { %v19327_v44 = vld [vmem:[#allocation40_spill] sm:$0xff] }
 0x381   : > { %v5941_v5 = vrot.slane %v5927_v18, %v19313_v55 }
 0x383   : > { %v5942_v7 = vcombine.low %v5934_v42, %v5941_v5  ;;  %v19326_v5 = vld [vmem:[#allocation41_spill] sm:$0xff] }
 0x385   : > { %v5949_v40 = vrot.slane %v5942_v7, %v19313_v55 }
 0x387   : > { %v5951_v50 = vmul.f32 %v5949_v40, %v5913_v39  ;;  %v19320_v40 = vld [vmem:[#allocation38_spill] sm:$0xff] }
 0x389   : > { %v16048_v23 = vrot.slane %v5951_v50, %v16035_v35  ;;  %v16051_v58 = vrot.slane %v5951_v50, %v16039_v38  ;;  %v16054_v53 = vrot.slane %v5951_v50, %v16042_v25  ;;  %v16057_v60 = vrot.slane %v5951_v50, %v16045_v24 }
 0x38b   : > { %v5974_v36 = vmul.f32 %v16048_v23, %v16004_v2  ;;  %v5975_v51 = vmul.f32 %v16051_v58, %v16006_v41  ;;  %v5976_v17 = vmul.f32 %v16054_v53, %v16012_v37  ;;  %v5977_v59 = vmul.f32 %v16057_v60, %v16018_v28  ;;  %v16079_v2 = vld [vmem:[#allocation8 + $0xa88] sm:$0xff] }
 0x38c   : > { %v6009_v18 = vmul.f32 %v16051_v58, %v19319_v22  ;;  %v6013_v50 = vmul.f32 %v16051_v58, %v19320_v40  ;;  %v19323_v22 = vld [vmem:[#allocation37_spill] sm:$0xff]  ;;  %v6010_v7 = vmul.f32 %v16054_v53, %v19324_v27  ;;  %v6016_v27 = vmul.f32 %v16048_v23, %v15768_v12 }
 0x38d   : > { %v5982_v45 = vcombine.low %v5974_v36, %v5975_v51  ;;  %v5983_v41 = vcombine.low %v5976_v17, %v5977_v59  ;;  %v19321_v36 = vld [vmem:[#allocation36_spill] sm:$0xff]  ;;  %v6015_v17 = vmul.f32 %v16057_v60, %v15762_v47  ;;  %v6012_v42 = vmul.f32 %v16048_v23, %v19323_v22 }
 0x38e   : > { %v6011_v51 = vmul.f32 %v16057_v60, %v19321_v36  ;;  %v5952_v59 = vld [vmem:[#allocation7] sm:$0xf]  ;;  %v6017_v36 = vmul.f32 %v16051_v58, %v15770_v52  ;;  %v6021_v47 = vmul.f32 %v16051_v58, %v15788_v30  ;;  %v6023_v22 = vmul.f32 %v16057_v60, %v15798_v3  ;;  %v19328_v52 = vld [vmem:[#allocation42_spill] sm:$0xff] }
 0x38f   : > { %v5990_v29 = vrot.slane %v5982_v45, %v19313_v55  ;;  %v5997_v16 = vrot.slane %v5983_v41, %v19313_v55  ;;  %v19322_v45 = vld [vmem:[#allocation31_spill] sm:$0xff]  ;;  %v6022_v61 = vmul.f32 %v16054_v53, %v19328_v52  ;;  %v6025_v30 = vmul.f32 %v16051_v58, %v15807_v21 }
 0x390   : > { %v6008_v41 = vmul.f32 %v16048_v23, %v19322_v45  ;;  %v6019_v45 = vmul.f32 %v16057_v60, %v15784_v14  ;;  %v6029_v14 = vmul.f32 %v16051_v58, %v15827_v31  ;;  %v16150_v3 = vmul.f32 %v16057_v60, %v15823_v48 }
 0x391   : > { %v5998_v39 = vcombine.low %v5990_v29, %v5997_v16  ;;  %v19325_v29 = vld [vmem:[#allocation39_spill] sm:$0xff]  ;;  %v16154_v12 = vmul.f32 %v16057_v60, %v15858_v11  ;;  %v16190_v52 = vmul.f32 %v16057_v60, %v15862_v20 }
 0x392   : > { %v6014_v16 = vmul.f32 %v16054_v53, %v19325_v29  ;;  %v6020_v29 = vmul.f32 %v16048_v23, %v19326_v5  ;;  %v16162_v5 = vmul.f32 %v16048_v23, %v15825_v6  ;;  %v16182_v6 = vmul.f32 %v16054_v53, %v15842_v9 }
 0x393   : > { %v6005_v40 = vrot.slane %v5998_v39, %v19313_v55  ;;  %v6018_v39 = vmul.f32 %v16054_v53, %v19327_v44  ;;  %v16158_v44 = vmul.f32 %v16048_v23, %v15800_v63 }
 0x395   : > { %v6007_v56 = vsub.f32 %v5952_v59, %v6005_v40  ;;  %v19329_v59 = vld [vmem:[#allocation43_spill] sm:$0xff]  ;;  %v16186_v40 = vmul.f32 %v16051_v58, %v15846_v49 }
 0x396   : > { %v16178_v63 = vmul.f32 %v16054_v53, %v19329_v59 }
 0x397   : > { %v16165_v21 = vrot.slane %v6007_v56, %v16039_v38  ;;  %v16168_v31 = vrot.slane %v6007_v56, %v16045_v24  ;;  %v16171_v48 = vrot.slane %v6007_v56, %v16035_v35  ;;  %v16174_v11 = vrot.slane %v6007_v56, %v16042_v25 }
 0x399   : > { %v6058_v4 = vadd.f32 %v16165_v21, %v6009_v18  ;;  %v6062_v56 = vadd.f32 %v16165_v21, %v6013_v50  ;;  %v6060_v46 = vadd.f32 %v16168_v31, %v6011_v51  ;;  %v6064_v59 = vadd.f32 %v16168_v31, %v6015_v17 }
 0x39a   : > { %v6057_v28 = vadd.f32 %v16171_v48, %v6008_v41  ;;  %v6061_v9 = vadd.f32 %v16171_v48, %v6012_v42  ;;  %v6059_v37 = vadd.f32 %v16174_v11, %v6010_v7  ;;  %v6063_v49 = vadd.f32 %v16174_v11, %v6014_v16 }
 0x39b   : > { %v6086_v58 = vmax.f32 %v6058_v4, 0.0  ;;  %v6090_v24 = vmax.f32 %v6062_v56, 0.0  ;;  %v6088_v20 = vmax.f32 %v6060_v46, 0.0  ;;  %v6092_v60 = vmax.f32 %v6064_v59, 0.0 }
 0x39c   : > { %v6085_v25 = vmax.f32 %v6057_v28, 0.0  ;;  %v6089_v18 = vmax.f32 %v6061_v9, 0.0  ;;  %v6087_v38 = vmax.f32 %v6059_v37, 0.0  ;;  %v6091_v50 = vmax.f32 %v6063_v49, 0.0  ;;  %v6450_v49 = vld [vmem:[#allocation8 + $0xa08] sm:$0xff] }
 0x39d   : > { %v16200_v35 = vpack.c.bf16 %v6090_v24, %v6086_v58  ;;  %v16202_v51 = vpack.c.bf16 %v6092_v60, %v6088_v20  ;;  %v6066_v17 = vadd.f32 %v16165_v21, %v6017_v36  ;;  %v6070_v42 = vadd.f32 %v16165_v21, %v6021_v47 }
 0x39e   : > { %v16206_v41 = vpack.c.bf16 %v6089_v18, %v6085_v25  ;;  %v16208_v7 = vpack.c.bf16 %v6091_v50, %v6087_v38  ;;  %v6068_v4 = vadd.f32 %v16168_v31, %v6019_v45  ;;  %v6072_v46 = vadd.f32 %v16168_v31, %v6023_v22 }
 0x39f   : > { %19330 = vst [vmem:[#allocation32_spill] sm:$0xff] %v16202_v51  ;;  %9233 = vmatprep.mubr.bf16.mxu0 %v16200_v35  ;;  %9304 = vmatprep.mubr.bf16.mxu1 %v16202_v51  ;;  %v6094_v24 = vmax.f32 %v6066_v17, 0.0  ;;  %v6098_v37 = vmax.f32 %v6070_v42, 0.0  ;;  %v6065_v28 = vadd.f32 %v16171_v48, %v6016_v27  ;;  %v6069_v16 = vadd.f32 %v16171_v48, %v6020_v29 }
 0x3a0   : > { %19331 = vst [vmem:[#allocation38_spill] sm:$0xff] %v16206_v41  ;;  %19332 = vst [vmem:[#allocation36_spill] sm:$0xff] %v16208_v7  ;;  %9234 = vmatmul.mubr.bf16.vlgmr.msra.gmra.mxu0 %v16206_v41  ;;  %9305 = vmatmul.mubr.bf16.vlgmr.msra.gmra.mxu1 %v16208_v7  ;;  %v6096_v38 = vmax.f32 %v6068_v4, 0.0  ;;  %v6100_v25 = vmax.f32 %v6072_v46, 0.0  ;;  %v6067_v36 = vadd.f32 %v16174_v11, %v6018_v39 }
 0x3a1   : > { %v6071_v47 = vadd.f32 %v16174_v11, %v6022_v61  ;;  %v19333_v45 = vcombine.low %v16008_v13, %v16010_v57  ;;  %v19334_v22 = vcombine.low %v16014_v0, %v16016_v34  ;;  %v16226_v27 = vpack.c.bf16 %v6098_v37, %v6094_v24 }
 0x3a2   : > { %v6093_v29 = vmax.f32 %v6065_v28, 0.0  ;;  %v6097_v56 = vmax.f32 %v6069_v16, 0.0  ;;  %v6074_v59 = vadd.f32 %v16165_v21, %v6025_v30  ;;  %v19336_v9 = vcombine.high %v16059_v43, %v16069_v54  ;;  %v6458_v30 = vld [vmem:[#allocation8 + $0xa48] sm:$0xff] }
 0x3a3   : > { %9344 = vmatpush1.bf16.msra.mxu0 %v19333_v45  ;;  %9415 = vmatpush1.bf16.msra.mxu1 %v19334_v22  ;;  %19335 = vst [vmem:[#allocation31_spill] sm:$0xff] %v16226_v27  ;;  %v19337_v61 = vcombine.high %v16071_v15, %v16073_v1  ;;  %v16235_v13 = vpack.c.bf16 %v6100_v25, %v6096_v38  ;;  %v6095_v57 = vmax.f32 %v6067_v36, 0.0  ;;  %v6099_v39 = vmax.f32 %v6071_v47, 0.0  ;;  %v6434_v16 = vld [vmem:[#allocation8 + $0x988] sm:$0xff] }
 0x3a4   : > { %9345 = vmatprep.subr.bf16.mxu0 %v19336_v9  ;;  %v6078_v0 = vadd.f32 %v16165_v21, %v6029_v14  ;;  %9243 = vmatprep.mubr.bf16.mxu0 %v16226_v27  ;;  %v16239_v34 = vpack.c.bf16 %v6097_v56, %v6093_v29  ;;  %v6102_v58 = vmax.f32 %v6074_v59, 0.0  ;;  %v6076_v20 = vadd.f32 %v16168_v31, %v16150_v3  ;;  %v6442_v38 = vld [vmem:[#allocation8 + $0x9c8] sm:$0xff] }
 0x3a5   : > { %9416 = vmatprep.subr.bf16.mxu1 %v19337_v61  ;;  %19338 = vst [vmem:[#allocation37_spill] sm:$0xff] %v16235_v13  ;;  %v6080_v60 = vadd.f32 %v16168_v31, %v16154_v12  ;;  %9314 = vmatprep.mubr.bf16.mxu1 %v16235_v13  ;;  %v16246_v18 = vpack.c.bf16 %v6099_v39, %v6095_v57  ;;  %v6162_v56 = vld [vmem:[#allocation8 + $0x108] sm:$0xff] }
 0x3a6   : > { %19339 = vst [vmem:[#allocation35_spill] sm:$0xff] %v16239_v34  ;;  %v6106_v50 = vmax.f32 %v6078_v0, 0.0  ;;  %v6073_v14 = vadd.f32 %v16171_v48, %v16158_v44  ;;  %v6077_v17 = vadd.f32 %v16171_v48, %v16162_v5  ;;  %v19341_v42 = vcombine.low %v16059_v43, %v16069_v54  ;;  %v6178_v5 = vld [vmem:[#allocation8 + $0x188] sm:$0xff] }
 0x3a7   : > { %19340 = vst [vmem:[#allocation39_spill] sm:$0xff] %v16246_v18  ;;  %v19342_v3 = vcombine.low %v16071_v15, %v16073_v1  ;;  %v6104_v12 = vmax.f32 %v6076_v20, 0.0  ;;  %v6108_v4 = vmax.f32 %v6080_v60, 0.0  ;;  %v6075_v46 = vadd.f32 %v16174_v11, %v16178_v63  ;;  %v19345_v15 = vld [vmem:[#allocation44_spill] sm:$0xff]  ;;  %v6154_v60 = vld [vmem:[#allocation8 + $0xc8] sm:$0xff] }
 0x3a8   : > { %9346 = vmatpush1.bf16.msra.mxu0 %v19341_v42  ;;  %v6079_v24 = vadd.f32 %v16174_v11, %v16182_v6  ;;  %v19343_v44 = vcombine.high %v16075_v32, %v16077_v8  ;;  %v19344_v43 = vcombine.high %v16079_v2, %v16085_v19  ;;  %v12819_v54 = vcombine.high %v6450_v49, %v6458_v30  ;;  %v6186_v6 = vld [vmem:[#allocation8 + $0x1c8] sm:$0xff] }
 0x3a9   : > { %9417 = vmatpush1.bf16.msra.mxu1 %v19342_v3  ;;  %v6032_v1 = vmul.f32 %v16048_v23, %v19345_v15  ;;  %v6034_v37 = vmul.f32 %v16054_v53, %v15860_v62  ;;  %v16272_v63 = vpack.c.bf16 %v6106_v50, %v6102_v58  ;;  %v16274_v28 = vpack.c.bf16 %v6108_v4, %v6104_v12  ;;  %v6402_v50 = vld [vmem:[#allocation8 + $0x888] sm:$0xff] }
 0x3aa   : > { %9347 = vmatprep.subr.bf16.mxu0 %v19343_v44  ;;  %9418 = vmatprep.subr.bf16.mxu1 %v19344_v43  ;;  %v6082_v25 = vadd.f32 %v16165_v21, %v16186_v40  ;;  %v6084_v36 = vadd.f32 %v16168_v31, %v16190_v52  ;;  %v6101_v23 = vmax.f32 %v6073_v14, 0.0  ;;  %v6105_v47 = vmax.f32 %v6077_v17, 0.0  ;;  %v6410_v14 = vld [vmem:[#allocation8 + $0x8c8] sm:$0xff] }
 0x3ab   : > { %19346 = vst [vmem:[#allocation41_spill] sm:$0xff] %v16272_v63  ;;  %19347 = vst [vmem:[#allocation40_spill] sm:$0xff] %v16274_v28  ;;  %9244 = vmatmul.mubr.bf16.gmra.mxu0 %v16239_v34  ;;  %9315 = vmatmul.mubr.bf16.gmra.mxu1 %v16246_v18  ;;  %v6103_v62 = vmax.f32 %v6075_v46, 0.0  ;;  %v6107_v53 = vmax.f32 %v6079_v24, 0.0  ;;  %v19348_v45 = vcombine.low %v16075_v32, %v16077_v8  ;;  %v6170_v32 = vld [vmem:[#allocation8 + $0x148] sm:$0xff] }
 0x3ac   : > { %v19349_v22 = vcombine.low %v16079_v2, %v16085_v19  ;;  %v12562_v21 = vcombine.low %v16087_v10, %v16089_v33  ;;  %v12818_v31 = vcombine.low %v6450_v49, %v6458_v30  ;;  %v19350_v40 = vcombine.high %v16087_v10, %v16089_v33  ;;  %9253 = vmatprep.mubr.bf16.mxu0 %v16272_v63  ;;  %v6418_v8 = vld [vmem:[#allocation8 + $0x908] sm:$0xff] }
 0x3ad   : > { %9348 = vmatpush1.bf16.msra.mxu0 %v19348_v45  ;;  %v12547_v52 = vcombine.high %v6178_v5, %v6186_v6  ;;  %v12803_v29 = vcombine.high %v6434_v16, %v6442_v38  ;;  %9324 = vmatprep.mubr.bf16.mxu1 %v16274_v28  ;;  %v6426_v2 = vld [vmem:[#allocation8 + $0x948] sm:$0xff]  ;;  %v6110_v19 = vmax.f32 %v6082_v25, 0.0  ;;  %v6112_v59 = vmax.f32 %v6084_v36, 0.0 }
 0x3ae   : > { %9419 = vmatpush1.bf16.msra.mxu1 %v19349_v22  ;;  %9349 = vmatprep.subr.bf16.mxu0 %v19350_v40  ;;  %v16295_v9 = vpack.c.bf16 %v6105_v47, %v6101_v23  ;;  %v16297_v61 = vpack.c.bf16 %v6107_v53, %v6103_v62  ;;  %v6081_v10 = vadd.f32 %v16171_v48, %v6032_v1  ;;  %v6146_v30 = vld [vmem:[#allocation8 + $0x88] sm:$0xff] }
 0x3af   : > { %9420 = vmatprep.subr.bf16.mxu1 %v12819_v54  ;;  %v6083_v33 = vadd.f32 %v16174_v11, %v6034_v37  ;;  %v12546_v57 = vcombine.low %v6178_v5, %v6186_v6  ;;  %v12802_v39 = vcombine.low %v6434_v16, %v6442_v38  ;;  %v12531_v0 = vcombine.high %v6162_v56, %v6170_v32  ;;  %v6130_v4 = vld [vmem:[#allocation8 + $0x8] sm:$0xff] }
 0x3b0   : > { %19351 = vst [vmem:[#allocation42_spill] sm:$0xff] %v16295_v9  ;;  %19352 = vst [vmem:[#allocation43_spill] sm:$0xff] %v16297_v61  ;;  %v12787_v49 = vcombine.high %v6418_v8, %v6426_v2  ;;  %v16301_v58 = vpack.c.bf16 %v6110_v19, %v6110_v19  ;;  %v16303_v20 = vpack.c.bf16 %v6112_v59, %v6112_v59  ;;  %v6109_v48 = vmax.f32 %v6081_v10, 0.0  ;;  %v6138_v46 = vld [vmem:[#allocation8 + $0x48] sm:$0xff] }
 0x3b1   : > { %9350 = vmatpush1.bf16.msra.mxu0 %v12562_v21  ;;  %v6111_v11 = vmax.f32 %v6083_v33, 0.0  ;;  %v12530_v17 = vcombine.low %v6162_v56, %v6170_v32  ;;  %v12786_v42 = vcombine.low %v6418_v8, %v6426_v2  ;;  %v12515_v3 = vcombine.high %v6146_v30, %v6154_v60  ;;  %v6386_v24 = vld [vmem:[#allocation8 + $0x808] sm:$0xff] }
 0x3b2   : > { %9421 = vmatpush1.bf16.msra.mxu1 %v12818_v31  ;;  %9351 = vmatprep.subr.bf16.mxu0 %v12547_v52  ;;  %19353 = vst [vmem:[#allocation44_spill] sm:$0xff] %v16301_v58  ;;  %19354 = vst [vmem:[#allocation45_spill] sm:$0xff] %v16303_v20  ;;  %v12771_v12 = vcombine.high %v6402_v50, %v6410_v14  ;;  %v6394_v44 = vld [vmem:[#allocation8 + $0x848] sm:$0xff]  ;;  %v16309_v43 = vpack.c.bf16 %v6109_v48, %v6109_v48 }
 0x3b3   : > { %9422 = vmatprep.subr.bf16.mxu1 %v12803_v29  ;;  %9254 = vmatmul.mubr.bf16.gmra.mxu0 %v16295_v9  ;;  %v16311_v54 = vpack.c.bf16 %v6111_v11, %v6111_v11  ;;  %v12514_v5 = vcombine.low %v6146_v30, %v6154_v60  ;;  %v12770_v15 = vcombine.low %v6402_v50, %v6410_v14  ;;  %v6370_v6 = vld [vmem:[#allocation8 + $0x788] sm:$0xff] }
 0x3b4   : > { %9325 = vmatmul.mubr.bf16.gmra.mxu1 %v16297_v61  ;;  %9263 = vmatprep.mubr.bf16.mxu0 %v16301_v58  ;;  %v12499_v1 = vcombine.high %v6130_v4, %v6138_v46  ;;  %v12755_v37 = vcombine.high %v6386_v24, %v6394_v44  ;;  %v6378_v16 = vld [vmem:[#allocation8 + $0x7c8] sm:$0xff]  ;;  %v12498_v36 = vcombine.low %v6130_v4, %v6138_v46 }
 0x3b5   : > { %9352 = vmatpush1.bf16.msra.mxu0 %v12546_v57  ;;  %9334 = vmatprep.mubr.bf16.mxu1 %v16303_v20  ;;  %v6626_v38 = vld [vmem:[#allocation8 + $0xf88] sm:$0xff]  ;;  %v12754_v23 = vcombine.low %v6386_v24, %v6394_v44  ;;  %v12739_v47 = vcombine.high %v6370_v6, %v6378_v16  ;;  %v12738_v31 = vcombine.low %v6370_v6, %v6378_v16 }
 0x3b6   : > { %9423 = vmatpush1.bf16.msra.mxu1 %v12802_v39  ;;  %9353 = vmatprep.subr.bf16.mxu0 %v12531_v0  ;;  %v6634_v25 = vld [vmem:[#allocation8 + $0xfc8] sm:$0xff] }
 0x3b7   : > { %9424 = vmatprep.subr.bf16.mxu1 %v12787_v49  ;;  %v12995_v62 = vcombine.high %v6626_v38, %v6634_v25  ;;  %v6354_v53 = vld [vmem:[#allocation8 + $0x708] sm:$0xff]  ;;  %v12994_v40 = vcombine.low %v6626_v38, %v6634_v25 }
 0x3b8   : > { %v6362_v45 = vld [vmem:[#allocation8 + $0x748] sm:$0xff] }
 0x3b9   : > { %9354 = vmatpush1.bf16.msra.mxu0 %v12530_v17  ;;  %v6610_v22 = vld [vmem:[#allocation8 + $0xf08] sm:$0xff]  ;;  %v12723_v52 = vcombine.high %v6354_v53, %v6362_v45  ;;  %v12722_v19 = vcombine.low %v6354_v53, %v6362_v45 }
 0x3ba   : > { %9425 = vmatpush1.bf16.msra.mxu1 %v12786_v42  ;;  %9355 = vmatprep.subr.bf16.mxu0 %v12515_v3  ;;  %v6618_v21 = vld [vmem:[#allocation8 + $0xf48] sm:$0xff] }
 0x3bb   : > { %9426 = vmatprep.subr.bf16.mxu1 %v12771_v12  ;;  %9264 = vmatmul.mubr.bf16.gmra.mxu0 %v16309_v43  ;;  %v12979_v29 = vcombine.high %v6610_v22, %v6618_v21  ;;  %v6338_v56 = vld [vmem:[#allocation8 + $0x688] sm:$0xff]  ;;  %v12978_v59 = vcombine.low %v6610_v22, %v6618_v21 }
 0x3bc   : > { %9335 = vmatmul.mubr.bf16.gmra.mxu1 %v16311_v54  ;;  %9375 = vmatprep.mubr.bf16.mxu0 %v16200_v35  ;;  %v6346_v32 = vld [vmem:[#allocation8 + $0x6c8] sm:$0xff] }
 0x3bd   : > { %9356 = vmatpush1.bf16.msra.mxu0 %v12514_v5  ;;  %9446 = vmatprep.mubr.bf16.mxu1 %v16202_v51  ;;  %v6594_v8 = vld [vmem:[#allocation8 + $0xe88] sm:$0xff]  ;;  %v12707_v10 = vcombine.high %v6338_v56, %v6346_v32  ;;  %v12706_v30 = vcombine.low %v6338_v56, %v6346_v32 }
 0x3be   : > { %9427 = vmatpush1.bf16.msra.mxu1 %v12770_v15  ;;  %9357 = vmatprep.subr.bf16.mxu0 %v12499_v1  ;;  %v6602_v2 = vld [vmem:[#allocation8 + $0xec8] sm:$0xff] }
 0x3bf   : > { %9428 = vmatprep.subr.bf16.mxu1 %v12755_v37  ;;  %v12963_v33 = vcombine.high %v6594_v8, %v6602_v2  ;;  %v6322_v57 = vld [vmem:[#allocation8 + $0x608] sm:$0xff]  ;;  %v12962_v60 = vcombine.low %v6594_v8, %v6602_v2  ;;  %v6243_v8 = vld [vmem:[#allocation8 + $0x390] sm:$0xff] }
 0x3c0   : > { %v6330_v39 = vld [vmem:[#allocation8 + $0x648] sm:$0xff]  ;;  %v6251_v2 = vld [vmem:[#allocation8 + $0x3d0] sm:$0xff] }
 0x3c1   : > { %9358 = vmatpush1.bf16.msra.mxu0 %v12498_v36  ;;  %v6578_v0 = vld [vmem:[#allocation8 + $0xe08] sm:$0xff]  ;;  %v12691_v50 = vcombine.high %v6322_v57, %v6330_v39  ;;  %v12690_v3 = vcombine.low %v6322_v57, %v6330_v39  ;;  %v12613_v57 = vcombine.high %v6243_v8, %v6251_v2 }
 0x3c2   : > { %9429 = vmatpush1.bf16.msra.mxu1 %v12754_v23  ;;  %9359 = vmatprep.subr.bf16.mxu0 %v12739_v47  ;;  %v6586_v49 = vld [vmem:[#allocation8 + $0xe48] sm:$0xff] }
 0x3c3   : > { %9430 = vmatprep.subr.bf16.mxu1 %v12995_v62  ;;  %v12947_v14 = vcombine.high %v6578_v0, %v6586_v49  ;;  %v6306_v48 = vld [vmem:[#allocation8 + $0x588] sm:$0xff]  ;;  %v12946_v12 = vcombine.low %v6578_v0, %v6586_v49  ;;  %v6227_v0 = vld [vmem:[#allocation8 + $0x310] sm:$0xff] }
 0x3c4   : > { %v6314_v11 = vld [vmem:[#allocation8 + $0x5c8] sm:$0xff]  ;;  %v6235_v49 = vld [vmem:[#allocation8 + $0x350] sm:$0xff] }
 0x3c5   : > { %9360 = vmatpush2.bf16.msra.mxu0 %v12738_v31  ;;  %v6562_v17 = vld [vmem:[#allocation8 + $0xd88] sm:$0xff]  ;;  %v12675_v4 = vcombine.high %v6306_v48, %v6314_v11  ;;  %v12674_v1 = vcombine.low %v6306_v48, %v6314_v11  ;;  %v12597_v48 = vcombine.high %v6227_v0, %v6235_v49 }
 0x3c6   : > { %9431 = vmatpush2.bf16.msra.mxu1 %v12994_v40  ;;  %9361 = vmatprep.subr.bf16.mxu0 %v12723_v52  ;;  %v6570_v42 = vld [vmem:[#allocation8 + $0xdc8] sm:$0xff] }
 0x3c7   : > { %9432 = vmatprep.subr.bf16.mxu1 %v12979_v29  ;;  %v12931_v46 = vcombine.high %v6562_v17, %v6570_v42  ;;  %v6290_v24 = vld [vmem:[#allocation8 + $0x508] sm:$0xff]  ;;  %v12930_v37 = vcombine.low %v6562_v17, %v6570_v42  ;;  %v6211_v17 = vld [vmem:[#allocation8 + $0x290] sm:$0xff] }
 0x3c8   : > { %v6298_v44 = vld [vmem:[#allocation8 + $0x548] sm:$0xff]  ;;  %v6219_v42 = vld [vmem:[#allocation8 + $0x2d0] sm:$0xff] }
 0x3c9   : > { %9362 = vmatpush2.bf16.msra.mxu0 %v12722_v19  ;;  %v6546_v5 = vld [vmem:[#allocation8 + $0xd08] sm:$0xff]  ;;  %v12659_v6 = vcombine.high %v6290_v24, %v6298_v44  ;;  %v12658_v47 = vcombine.low %v6290_v24, %v6298_v44  ;;  %v6499_v19 = vld [vmem:[#allocation8 + $0xb90] sm:$0xff]  ;;  %v12581_v24 = vcombine.high %v6211_v17, %v6219_v42 }
 0x3ca   : > { %9433 = vmatpush2.bf16.msra.mxu1 %v12978_v59  ;;  %9363 = vmatprep.subr.bf16.mxu0 %v12707_v10  ;;  %v6554_v15 = vld [vmem:[#allocation8 + $0xd48] sm:$0xff]  ;;  %v6507_v59 = vld [vmem:[#allocation8 + $0xbd0] sm:$0xff] }
 0x3cb   : > { %9434 = vmatprep.subr.bf16.mxu1 %v12963_v33  ;;  %v12915_v16 = vcombine.high %v6546_v5, %v6554_v15  ;;  %v6274_v38 = vld [vmem:[#allocation8 + $0x488] sm:$0xff]  ;;  %v12914_v62 = vcombine.low %v6546_v5, %v6554_v15  ;;  %v12869_v39 = vcombine.high %v6499_v19, %v6507_v59  ;;  %v6195_v5 = vld [vmem:[#allocation8 + $0x210] sm:$0xff] }
 0x3cc   : > { %v6282_v25 = vld [vmem:[#allocation8 + $0x4c8] sm:$0xff]  ;;  %v6203_v15 = vld [vmem:[#allocation8 + $0x250] sm:$0xff] }
 0x3cd   : > { %9364 = vmatpush2.bf16.msra.mxu0 %v12706_v30  ;;  %v6530_v36 = vld [vmem:[#allocation8 + $0xc88] sm:$0xff]  ;;  %v12643_v53 = vcombine.high %v6274_v38, %v6282_v25  ;;  %v12642_v52 = vcombine.low %v6274_v38, %v6282_v25  ;;  %v6483_v30 = vld [vmem:[#allocation8 + $0xb10] sm:$0xff]  ;;  %v12565_v38 = vcombine.high %v6195_v5, %v6203_v15 }
 0x3ce   : > { %9435 = vmatpush2.bf16.msra.mxu1 %v12962_v60  ;;  %9365 = vmatprep.subr.bf16.mxu0 %v12691_v50  ;;  %v6538_v23 = vld [vmem:[#allocation8 + $0xcc8] sm:$0xff]  ;;  %v6491_v60 = vld [vmem:[#allocation8 + $0xb50] sm:$0xff]  ;;  %v12612_v50 = vcombine.low %v6243_v8, %v6251_v2 }
 0x3cf   : > { %9436 = vmatprep.subr.bf16.mxu1 %v12947_v14  ;;  %v12899_v45 = vcombine.high %v6530_v36, %v6538_v23  ;;  %v6258_v22 = vld [vmem:[#allocation8 + $0x408] sm:$0xff]  ;;  %v12898_v29 = vcombine.low %v6530_v36, %v6538_v23  ;;  %v12868_v14 = vcombine.low %v6499_v19, %v6507_v59  ;;  %v12853_v11 = vcombine.high %v6483_v30, %v6491_v60  ;;  %v6179_v36 = vld [vmem:[#allocation8 + $0x190] sm:$0xff] }
 0x3d0   : > { %v6266_v21 = vld [vmem:[#allocation8 + $0x448] sm:$0xff]  ;;  %v6187_v23 = vld [vmem:[#allocation8 + $0x1d0] sm:$0xff] }
 0x3d1   : > { %9366 = vmatpush2.bf16.msra.mxu0 %v12690_v3  ;;  %v6514_v31 = vld [vmem:[#allocation8 + $0xc08] sm:$0xff]  ;;  %v12627_v56 = vcombine.high %v6258_v22, %v6266_v21  ;;  %v12626_v10 = vcombine.low %v6258_v22, %v6266_v21  ;;  %v6467_v3 = vld [vmem:[#allocation8 + $0xa90] sm:$0xff]  ;;  %v12549_v22 = vcombine.high %v6179_v36, %v6187_v23 }
 0x3d2   : > { %9437 = vmatpush2.bf16.msra.mxu1 %v12946_v12  ;;  %9367 = vmatprep.subr.bf16.mxu0 %v12675_v4  ;;  %v6522_v40 = vld [vmem:[#allocation8 + $0xc48] sm:$0xff]  ;;  %v6475_v12 = vld [vmem:[#allocation8 + $0xad0] sm:$0xff]  ;;  %v12596_v4 = vcombine.low %v6227_v0, %v6235_v49 }
 0x3d3   : > { %9438 = vmatprep.subr.bf16.mxu1 %v12931_v46  ;;  %v12883_v32 = vcombine.high %v6514_v31, %v6522_v40  ;;  %v12882_v33 = vcombine.low %v6514_v31, %v6522_v40  ;;  %v12852_v46 = vcombine.low %v6483_v30, %v6491_v60  ;;  %v12837_v44 = vcombine.high %v6467_v3, %v6475_v12  ;;  %v6163_v31 = vld [vmem:[#allocation8 + $0x110] sm:$0xff] }
 0x3d4   : > { %v6171_v40 = vld [vmem:[#allocation8 + $0x150] sm:$0xff] }
 0x3d5   : > { %9368 = vmatpush2.bf16.msra.mxu0 %v12674_v1  ;;  %v6451_v1 = vld [vmem:[#allocation8 + $0xa10] sm:$0xff]  ;;  %v12533_v8 = vcombine.high %v6163_v31, %v6171_v40 }
 0x3d6   : > { %9439 = vmatpush2.bf16.msra.mxu1 %v12930_v37  ;;  %9369 = vmatprep.subr.bf16.mxu0 %v12659_v6  ;;  %v6459_v37 = vld [vmem:[#allocation8 + $0xa50] sm:$0xff]  ;;  %v12580_v6 = vcombine.low %v6211_v17, %v6219_v42 }
 0x3d7   : > { %9440 = vmatprep.subr.bf16.mxu1 %v12915_v16  ;;  %v12836_v16 = vcombine.low %v6467_v3, %v6475_v12  ;;  %v12821_v25 = vcombine.high %v6451_v1, %v6459_v37  ;;  %v6147_v19 = vld [vmem:[#allocation8 + $0x90] sm:$0xff] }
 0x3d8   : > { %v6155_v59 = vld [vmem:[#allocation8 + $0xd0] sm:$0xff] }
 0x3d9   : > { %9370 = vmatpush2.bf16.msra.mxu0 %v12658_v47  ;;  %v6435_v47 = vld [vmem:[#allocation8 + $0x990] sm:$0xff]  ;;  %v12517_v0 = vcombine.high %v6147_v19, %v6155_v59 }
 0x3da   : > { %9441 = vmatpush2.bf16.msra.mxu1 %v12914_v62  ;;  %9371 = vmatprep.subr.bf16.mxu0 %v12643_v53  ;;  %v6443_v62 = vld [vmem:[#allocation8 + $0x9d0] sm:$0xff]  ;;  %v12564_v53 = vcombine.low %v6195_v5, %v6203_v15 }
 0x3db   : > { %9442 = vmatprep.subr.bf16.mxu1 %v12899_v45  ;;  %v12820_v45 = vcombine.low %v6451_v1, %v6459_v37  ;;  %v12805_v21 = vcombine.high %v6435_v47, %v6443_v62  ;;  %v6131_v30 = vld [vmem:[#allocation8 + $0x10] sm:$0xff] }
 0x3dc   : > { %v6139_v60 = vld [vmem:[#allocation8 + $0x50] sm:$0xff] }
 0x3dd   : > { %9372 = vmatpush2.bf16.msra.mxu0 %v12642_v52  ;;  %v6419_v52 = vld [vmem:[#allocation8 + $0x910] sm:$0xff]  ;;  %v12501_v17 = vcombine.high %v6131_v30, %v6139_v60 }
 0x3de   : > { %9443 = vmatpush2.bf16.msra.mxu1 %v12898_v29  ;;  %9373 = vmatprep.subr.bf16.mxu0 %v12627_v56  ;;  %v6427_v29 = vld [vmem:[#allocation8 + $0x950] sm:$0xff]  ;;  %v12548_v56 = vcombine.low %v6179_v36, %v6187_v23 }
 0x3df   : > { %9444 = vmatprep.subr.bf16.mxu1 %v12883_v32  ;;  %v12804_v32 = vcombine.low %v6435_v47, %v6443_v62  ;;  %v12789_v2 = vcombine.high %v6419_v52, %v6427_v29  ;;  %v6371_v3 = vld [vmem:[#allocation8 + $0x790] sm:$0xff] }
 0x3e0   : > { %v6379_v12 = vld [vmem:[#allocation8 + $0x7d0] sm:$0xff] }
 0x3e1   : > { %9374 = vmatpush2.bf16.msra.mxu0 %v12626_v10  ;;  %v6403_v10 = vld [vmem:[#allocation8 + $0x890] sm:$0xff]  ;;  %v12741_v5 = vcombine.high %v6371_v3, %v6379_v12 }
 0x3e2   : > { %9445 = vmatpush2.bf16.msra.mxu1 %v12882_v33  ;;  %9485 = vmatprep.subr.bf16.mxu0 %v12613_v57  ;;  %v6411_v33 = vld [vmem:[#allocation8 + $0x8d0] sm:$0xff]  ;;  %v12532_v57 = vcombine.low %v6163_v31, %v6171_v40 }
 0x3e3   : > { %9556 = vmatprep.subr.bf16.mxu1 %v12869_v39  ;;  %v12788_v39 = vcombine.low %v6419_v52, %v6427_v29  ;;  %v12773_v49 = vcombine.high %v6403_v10, %v6411_v33  ;;  %v6355_v1 = vld [vmem:[#allocation8 + $0x710] sm:$0xff] }
 0x3e4   : > { %9376 = vmatmul.mubr.bf16.vlgmr.msra.gmra.mxu0 %v16206_v41  ;;  %v6363_v37 = vld [vmem:[#allocation8 + $0x750] sm:$0xff] }
 0x3e5   : > { %9447 = vmatmul.mubr.bf16.vlgmr.msra.gmra.mxu1 %v16208_v7  ;;  %9486 = vmatpush1.bf16.msra.mxu0 %v12612_v50  ;;  %v6387_v50 = vld [vmem:[#allocation8 + $0x810] sm:$0xff]  ;;  %v12725_v36 = vcombine.high %v6355_v1, %v6363_v37 }
 0x3e6   : > { %9557 = vmatpush1.bf16.msra.mxu1 %v12868_v14  ;;  %9487 = vmatprep.subr.bf16.mxu0 %v12597_v48  ;;  %v6395_v14 = vld [vmem:[#allocation8 + $0x850] sm:$0xff]  ;;  %v12516_v48 = vcombine.low %v6147_v19, %v6155_v59 }
 0x3e7   : > { %9558 = vmatprep.subr.bf16.mxu1 %v12853_v11  ;;  %9385 = vmatprep.mubr.bf16.mxu0 %v16226_v27  ;;  %v12772_v11 = vcombine.low %v6403_v10, %v6411_v33  ;;  %v12757_v42 = vcombine.high %v6387_v50, %v6395_v14  ;;  %v6339_v47 = vld [vmem:[#allocation8 + $0x690] sm:$0xff] }
 0x3e8   : > { %9456 = vmatprep.mubr.bf16.mxu1 %v16235_v13  ;;  %v6347_v62 = vld [vmem:[#allocation8 + $0x6d0] sm:$0xff] }
 0x3e9   : > { %9488 = vmatpush1.bf16.msra.mxu0 %v12596_v4  ;;  %v6627_v4 = vld [vmem:[#allocation8 + $0xf90] sm:$0xff]  ;;  %v12709_v31 = vcombine.high %v6339_v47, %v6347_v62 }
 0x3ea   : > { %9559 = vmatpush1.bf16.msra.mxu1 %v12852_v46  ;;  %9489 = vmatprep.subr.bf16.mxu0 %v12581_v24  ;;  %v6635_v46 = vld [vmem:[#allocation8 + $0xfd0] sm:$0xff]  ;;  %v12500_v24 = vcombine.low %v6131_v30, %v6139_v60 }
 0x3eb   : > { %9560 = vmatprep.subr.bf16.mxu1 %v12837_v44  ;;  %v12756_v44 = vcombine.low %v6387_v50, %v6395_v14  ;;  %v12997_v15 = vcombine.high %v6627_v4, %v6635_v46  ;;  %v6323_v52 = vld [vmem:[#allocation8 + $0x610] sm:$0xff] }
 0x3ec   : > { %9386 = vmatmul.mubr.bf16.gmra.mxu0 %v16239_v34  ;;  %v6331_v29 = vld [vmem:[#allocation8 + $0x650] sm:$0xff] }
 0x3ed   : > { %9457 = vmatmul.mubr.bf16.gmra.mxu1 %v16246_v18  ;;  %9490 = vmatpush1.bf16.msra.mxu0 %v12580_v6  ;;  %v6611_v6 = vld [vmem:[#allocation8 + $0xf10] sm:$0xff]  ;;  %v12693_v19 = vcombine.high %v6323_v52, %v6331_v29 }
 0x3ee   : > { %9561 = vmatpush1.bf16.msra.mxu1 %v12836_v16  ;;  %9491 = vmatprep.subr.bf16.mxu0 %v12565_v38  ;;  %v6619_v16 = vld [vmem:[#allocation8 + $0xf50] sm:$0xff]  ;;  %v12740_v38 = vcombine.low %v6371_v3, %v6379_v12 }
 0x3ef   : > { %9562 = vmatprep.subr.bf16.mxu1 %v12821_v25  ;;  %9395 = vmatprep.mubr.bf16.mxu0 %v16272_v63  ;;  %v12996_v25 = vcombine.low %v6627_v4, %v6635_v46  ;;  %v12981_v23 = vcombine.high %v6611_v6, %v6619_v16  ;;  %v6307_v10 = vld [vmem:[#allocation8 + $0x590] sm:$0xff] }
 0x3f0   : > { %9466 = vmatprep.mubr.bf16.mxu1 %v16274_v28  ;;  %v6315_v33 = vld [vmem:[#allocation8 + $0x5d0] sm:$0xff] }
 0x3f1   : > { %9492 = vmatpush1.bf16.msra.mxu0 %v12564_v53  ;;  %v6595_v53 = vld [vmem:[#allocation8 + $0xe90] sm:$0xff]  ;;  %v12677_v30 = vcombine.high %v6307_v10, %v6315_v33 }
 0x3f2   : > { %9563 = vmatpush1.bf16.msra.mxu1 %v12820_v45  ;;  %9493 = vmatprep.subr.bf16.mxu0 %v12549_v22  ;;  %v6603_v45 = vld [vmem:[#allocation8 + $0xed0] sm:$0xff]  ;;  %v12724_v22 = vcombine.low %v6355_v1, %v6363_v37 }
 0x3f3   : > { %9564 = vmatprep.subr.bf16.mxu1 %v12805_v21  ;;  %v12980_v21 = vcombine.low %v6611_v6, %v6619_v16  ;;  %v12965_v40 = vcombine.high %v6595_v53, %v6603_v45  ;;  %v6291_v50 = vld [vmem:[#allocation8 + $0x510] sm:$0xff] }
 0x3f4   : > { %9396 = vmatmul.mubr.bf16.gmra.mxu0 %v16295_v9  ;;  %v6299_v14 = vld [vmem:[#allocation8 + $0x550] sm:$0xff] }
 0x3f5   : > { %9467 = vmatmul.mubr.bf16.gmra.mxu1 %v16297_v61  ;;  %9494 = vmatpush1.bf16.msra.mxu0 %v12548_v56  ;;  %v6579_v56 = vld [vmem:[#allocation8 + $0xe10] sm:$0xff]  ;;  %v12661_v3 = vcombine.high %v6291_v50, %v6299_v14 }
 0x3f6   : > { %9565 = vmatpush1.bf16.msra.mxu1 %v12804_v32  ;;  %9495 = vmatprep.subr.bf16.mxu0 %v12533_v8  ;;  %v6587_v32 = vld [vmem:[#allocation8 + $0xe50] sm:$0xff]  ;;  %v12708_v8 = vcombine.low %v6339_v47, %v6347_v62 }
 0x3f7   : > { %9566 = vmatprep.subr.bf16.mxu1 %v12789_v2  ;;  %9405 = vmatprep.mubr.bf16.mxu0 %v16301_v58  ;;  %v12964_v2 = vcombine.low %v6595_v53, %v6603_v45  ;;  %v12949_v59 = vcombine.high %v6579_v56, %v6587_v32  ;;  %v6275_v4 = vld [vmem:[#allocation8 + $0x490] sm:$0xff]  ;;  %v6244_v53 = vld [vmem:[#allocation8 + $0x398] sm:$0xff] }
 0x3f8   : > { %9476 = vmatprep.mubr.bf16.mxu1 %v16303_v20  ;;  %v6283_v46 = vld [vmem:[#allocation8 + $0x4d0] sm:$0xff]  ;;  %v6252_v45 = vld [vmem:[#allocation8 + $0x3d8] sm:$0xff] }
 0x3f9   : > { %9496 = vmatpush1.bf16.msra.mxu0 %v12532_v57  ;;  %v6563_v57 = vld [vmem:[#allocation8 + $0xd90] sm:$0xff]  ;;  %v12645_v1 = vcombine.high %v6275_v4, %v6283_v46 }
 0x3fa   : > { %9567 = vmatpush1.bf16.msra.mxu1 %v12788_v39  ;;  %9497 = vmatprep.subr.bf16.mxu0 %v12517_v0  ;;  %v6571_v39 = vld [vmem:[#allocation8 + $0xdd0] sm:$0xff]  ;;  %v12692_v0 = vcombine.low %v6323_v52, %v6331_v29  ;;  %v12615_v52 = vcombine.high %v6244_v53, %v6252_v45 }
 0x3fb   : > { %9568 = vmatprep.subr.bf16.mxu1 %v12773_v49  ;;  %v12948_v49 = vcombine.low %v6579_v56, %v6587_v32  ;;  %v12933_v60 = vcombine.high %v6563_v57, %v6571_v39  ;;  %v6259_v6 = vld [vmem:[#allocation8 + $0x410] sm:$0xff]  ;;  %v6228_v56 = vld [vmem:[#allocation8 + $0x318] sm:$0xff] }
 0x3fc   : > { %9406 = vmatmul.mubr.bf16.gmra.mxu0 %v16309_v43  ;;  %v6267_v16 = vld [vmem:[#allocation8 + $0x450] sm:$0xff]  ;;  %v6236_v32 = vld [vmem:[#allocation8 + $0x358] sm:$0xff] }
 0x3fd   : > { %9477 = vmatmul.mubr.bf16.gmra.mxu1 %v16311_v54  ;;  %9498 = vmatpush1.bf16.msra.mxu0 %v12516_v48  ;;  %v6547_v48 = vld [vmem:[#allocation8 + $0xd10] sm:$0xff]  ;;  %v12629_v47 = vcombine.high %v6259_v6, %v6267_v16 }
 0x3fe   : > { %9569 = vmatpush1.bf16.msra.mxu1 %v12772_v11  ;;  %9499 = vmatprep.subr.bf16.mxu0 %v12501_v17  ;;  %v6555_v11 = vld [vmem:[#allocation8 + $0xd50] sm:$0xff]  ;;  %v12676_v17 = vcombine.low %v6307_v10, %v6315_v33  ;;  %v12599_v10 = vcombine.high %v6228_v56, %v6236_v32 }
 0x3ff   : > { %9570 = vmatprep.subr.bf16.mxu1 %v12757_v42  ;;  %9517 = vmatprep.mubr.bf16.mxu0 %v16200_v35  ;;  %v12932_v42 = vcombine.low %v6563_v57, %v6571_v39  ;;  %v12917_v12 = vcombine.high %v6547_v48, %v6555_v11  ;;  %v6212_v57 = vld [vmem:[#allocation8 + $0x298] sm:$0xff] }
 0x400   : > { %9588 = vmatprep.mubr.bf16.mxu1 %v16202_v51  ;;  %v6220_v39 = vld [vmem:[#allocation8 + $0x2d8] sm:$0xff] }
 0x401   : > { %9500 = vmatpush1.bf16.msra.mxu0 %v12500_v24  ;;  %v6531_v24 = vld [vmem:[#allocation8 + $0xc90] sm:$0xff] }
 0x402   : > { %9571 = vmatpush1.bf16.msra.mxu1 %v12756_v44  ;;  %9501 = vmatprep.subr.bf16.mxu0 %v12741_v5  ;;  %v6539_v44 = vld [vmem:[#allocation8 + $0xcd0] sm:$0xff]  ;;  %v12660_v5 = vcombine.low %v6291_v50, %v6299_v14  ;;  %v12583_v50 = vcombine.high %v6212_v57, %v6220_v39 }
 0x403   : > { %9572 = vmatprep.subr.bf16.mxu1 %v12997_v15  ;;  %v12916_v15 = vcombine.low %v6547_v48, %v6555_v11  ;;  %v12901_v37 = vcombine.high %v6531_v24, %v6539_v44  ;;  %v6196_v48 = vld [vmem:[#allocation8 + $0x218] sm:$0xff] }
 0x404   : > { %v6204_v11 = vld [vmem:[#allocation8 + $0x258] sm:$0xff] }
 0x405   : > { %9502 = vmatpush2.bf16.msra.mxu0 %v12740_v38  ;;  %v6515_v38 = vld [vmem:[#allocation8 + $0xc10] sm:$0xff] }
 0x406   : > { %9573 = vmatpush2.bf16.msra.mxu1 %v12996_v25  ;;  %9503 = vmatprep.subr.bf16.mxu0 %v12725_v36  ;;  %v6523_v25 = vld [vmem:[#allocation8 + $0xc50] sm:$0xff]  ;;  %v12644_v36 = vcombine.low %v6275_v4, %v6283_v46  ;;  %v12567_v4 = vcombine.high %v6196_v48, %v6204_v11 }
 0x407   : > { %9574 = vmatprep.subr.bf16.mxu1 %v12981_v23  ;;  %v12900_v23 = vcombine.low %v6531_v24, %v6539_v44  ;;  %v12885_v62 = vcombine.high %v6515_v38, %v6523_v25  ;;  %v6180_v24 = vld [vmem:[#allocation8 + $0x198] sm:$0xff] }
 0x408   : > { %v6188_v44 = vld [vmem:[#allocation8 + $0x1d8] sm:$0xff] }
 0x409   : > { %9504 = vmatpush2.bf16.msra.mxu0 %v12724_v22  ;;  %v6500_v22 = vld [vmem:[#allocation8 + $0xb98] sm:$0xff] }
 0x40a   : > { %9575 = vmatpush2.bf16.msra.mxu1 %v12980_v21  ;;  %9505 = vmatprep.subr.bf16.mxu0 %v12709_v31  ;;  %v6508_v21 = vld [vmem:[#allocation8 + $0xbd8] sm:$0xff]  ;;  %v12628_v31 = vcombine.low %v6259_v6, %v6267_v16  ;;  %v12551_v6 = vcombine.high %v6180_v24, %v6188_v44 }
 0x40b   : > { %9576 = vmatprep.subr.bf16.mxu1 %v12965_v40  ;;  %v12884_v40 = vcombine.low %v6515_v38, %v6523_v25  ;;  %v12871_v29 = vcombine.high %v6500_v22, %v6508_v21  ;;  %v6164_v38 = vld [vmem:[#allocation8 + $0x118] sm:$0xff] }
 0x40c   : > { %v6172_v25 = vld [vmem:[#allocation8 + $0x158] sm:$0xff] }
 0x40d   : > { %9506 = vmatpush2.bf16.msra.mxu0 %v12708_v8  ;;  %v6484_v8 = vld [vmem:[#allocation8 + $0xb18] sm:$0xff] }
 0x40e   : > { %9577 = vmatpush2.bf16.msra.mxu1 %v12964_v2  ;;  %9507 = vmatprep.subr.bf16.mxu0 %v12693_v19  ;;  %v6492_v2 = vld [vmem:[#allocation8 + $0xb58] sm:$0xff]  ;;  %v12614_v19 = vcombine.low %v6244_v53, %v6252_v45  ;;  %v12535_v53 = vcombine.high %v6164_v38, %v6172_v25 }
 0x40f   : > { %9578 = vmatprep.subr.bf16.mxu1 %v12949_v59  ;;  %v12870_v59 = vcombine.low %v6500_v22, %v6508_v21  ;;  %v12855_v33 = vcombine.high %v6484_v8, %v6492_v2  ;;  %v6148_v22 = vld [vmem:[#allocation8 + $0x98] sm:$0xff] }
 0x410   : > { %v6156_v21 = vld [vmem:[#allocation8 + $0xd8] sm:$0xff] }
 0x411   : > { %9508 = vmatpush2.bf16.msra.mxu0 %v12692_v0  ;;  %v6468_v0 = vld [vmem:[#allocation8 + $0xa98] sm:$0xff] }
 0x412   : > { %9579 = vmatpush2.bf16.msra.mxu1 %v12948_v49  ;;  %9509 = vmatprep.subr.bf16.mxu0 %v12677_v30  ;;  %v6476_v49 = vld [vmem:[#allocation8 + $0xad8] sm:$0xff]  ;;  %v12598_v30 = vcombine.low %v6228_v56, %v6236_v32  ;;  %v12519_v56 = vcombine.high %v6148_v22, %v6156_v21 }
 0x413   : > { %9580 = vmatprep.subr.bf16.mxu1 %v12933_v60  ;;  %v12854_v60 = vcombine.low %v6484_v8, %v6492_v2  ;;  %v12839_v14 = vcombine.high %v6468_v0, %v6476_v49  ;;  %v6132_v8 = vld [vmem:[#allocation8 + $0x18] sm:$0xff] }
 0x414   : > { %v6140_v2 = vld [vmem:[#allocation8 + $0x58] sm:$0xff] }
 0x415   : > { %9510 = vmatpush2.bf16.msra.mxu0 %v12676_v17  ;;  %v6452_v17 = vld [vmem:[#allocation8 + $0xa18] sm:$0xff] }
 0x416   : > { %9581 = vmatpush2.bf16.msra.mxu1 %v12932_v42  ;;  %9511 = vmatprep.subr.bf16.mxu0 %v12661_v3  ;;  %v6460_v42 = vld [vmem:[#allocation8 + $0xa58] sm:$0xff]  ;;  %v12582_v3 = vcombine.low %v6212_v57, %v6220_v39  ;;  %v12503_v57 = vcombine.high %v6132_v8, %v6140_v2 }
 0x417   : > { %9582 = vmatprep.subr.bf16.mxu1 %v12917_v12  ;;  %v12838_v12 = vcombine.low %v6468_v0, %v6476_v49  ;;  %v12823_v46 = vcombine.high %v6452_v17, %v6460_v42  ;;  %v6372_v0 = vld [vmem:[#allocation8 + $0x798] sm:$0xff] }
 0x418   : > { %v6380_v49 = vld [vmem:[#allocation8 + $0x7d8] sm:$0xff] }
 0x419   : > { %9512 = vmatpush2.bf16.msra.mxu0 %v12660_v5  ;;  %v6436_v5 = vld [vmem:[#allocation8 + $0x998] sm:$0xff] }
 0x41a   : > { %9583 = vmatpush2.bf16.msra.mxu1 %v12916_v15  ;;  %9513 = vmatprep.subr.bf16.mxu0 %v12645_v1  ;;  %v6444_v15 = vld [vmem:[#allocation8 + $0x9d8] sm:$0xff]  ;;  %v12566_v1 = vcombine.low %v6196_v48, %v6204_v11  ;;  %v12743_v48 = vcombine.high %v6372_v0, %v6380_v49 }
 0x41b   : > { %9584 = vmatprep.subr.bf16.mxu1 %v12901_v37  ;;  %v12822_v37 = vcombine.low %v6452_v17, %v6460_v42  ;;  %v12807_v16 = vcombine.high %v6436_v5, %v6444_v15  ;;  %v6356_v17 = vld [vmem:[#allocation8 + $0x718] sm:$0xff] }
 0x41c   : > { %v6364_v42 = vld [vmem:[#allocation8 + $0x758] sm:$0xff] }
 0x41d   : > { %9514 = vmatpush2.bf16.msra.mxu0 %v12644_v36  ;;  %v6420_v36 = vld [vmem:[#allocation8 + $0x918] sm:$0xff] }
 0x41e   : > { %9585 = vmatpush2.bf16.msra.mxu1 %v12900_v23  ;;  %9515 = vmatprep.subr.bf16.mxu0 %v12629_v47  ;;  %v6428_v23 = vld [vmem:[#allocation8 + $0x958] sm:$0xff]  ;;  %v12550_v47 = vcombine.low %v6180_v24, %v6188_v44  ;;  %v12727_v24 = vcombine.high %v6356_v17, %v6364_v42 }
 0x41f   : > { %9586 = vmatprep.subr.bf16.mxu1 %v12885_v62  ;;  %v12806_v62 = vcombine.low %v6436_v5, %v6444_v15  ;;  %v12791_v45 = vcombine.high %v6420_v36, %v6428_v23  ;;  %v6340_v5 = vld [vmem:[#allocation8 + $0x698] sm:$0xff] }
 0x420   : > { %v6348_v15 = vld [vmem:[#allocation8 + $0x6d8] sm:$0xff] }
 0x421   : > { %9516 = vmatpush2.bf16.msra.mxu0 %v12628_v31  ;;  %v6404_v31 = vld [vmem:[#allocation8 + $0x898] sm:$0xff] }
 0x422   : > { %9587 = vmatpush2.bf16.msra.mxu1 %v12884_v40  ;;  %9627 = vmatprep.subr.bf16.mxu0 %v12615_v52  ;;  %v6412_v40 = vld [vmem:[#allocation8 + $0x8d8] sm:$0xff]  ;;  %v12534_v52 = vcombine.low %v6164_v38, %v6172_v25  ;;  %v12711_v38 = vcombine.high %v6340_v5, %v6348_v15 }
 0x423   : > { %9698 = vmatprep.subr.bf16.mxu1 %v12871_v29  ;;  %v12790_v29 = vcombine.low %v6420_v36, %v6428_v23  ;;  %v12775_v32 = vcombine.high %v6404_v31, %v6412_v40  ;;  %v6324_v36 = vld [vmem:[#allocation8 + $0x618] sm:$0xff] }
 0x424   : > { %9518 = vmatmul.mubr.bf16.vlgmr.msra.gmra.mxu0 %v16206_v41  ;;  %v6332_v23 = vld [vmem:[#allocation8 + $0x658] sm:$0xff] }
 0x425   : > { %9589 = vmatmul.mubr.bf16.vlgmr.msra.gmra.mxu1 %v16208_v7  ;;  %9628 = vmatpush1.bf16.msra.mxu0 %v12614_v19  ;;  %v6388_v19 = vld [vmem:[#allocation8 + $0x818] sm:$0xff] }
 0x426   : > { %9699 = vmatpush1.bf16.msra.mxu1 %v12870_v59  ;;  %9629 = vmatprep.subr.bf16.mxu0 %v12599_v10  ;;  %v6396_v59 = vld [vmem:[#allocation8 + $0x858] sm:$0xff]  ;;  %v12518_v10 = vcombine.low %v6148_v22, %v6156_v21  ;;  %v12695_v22 = vcombine.high %v6324_v36, %v6332_v23 }
 0x427   : > { %9700 = vmatprep.subr.bf16.mxu1 %v12855_v33  ;;  %9527 = vmatprep.mubr.bf16.mxu0 %v16226_v27  ;;  %v12774_v33 = vcombine.low %v6404_v31, %v6412_v40  ;;  %v12759_v39 = vcombine.high %v6388_v19, %v6396_v59  ;;  %v6308_v31 = vld [vmem:[#allocation8 + $0x598] sm:$0xff] }
 0x428   : > { %9598 = vmatprep.mubr.bf16.mxu1 %v16235_v13  ;;  %v6316_v40 = vld [vmem:[#allocation8 + $0x5d8] sm:$0xff] }
 0x429   : > { %9630 = vmatpush1.bf16.msra.mxu0 %v12598_v30  ;;  %v6628_v30 = vld [vmem:[#allocation8 + $0xf98] sm:$0xff] }
 0x42a   : > { %9701 = vmatpush1.bf16.msra.mxu1 %v12854_v60  ;;  %9631 = vmatprep.subr.bf16.mxu0 %v12583_v50  ;;  %v6636_v60 = vld [vmem:[#allocation8 + $0xfd8] sm:$0xff]  ;;  %v12502_v50 = vcombine.low %v6132_v8, %v6140_v2  ;;  %v12679_v8 = vcombine.high %v6308_v31, %v6316_v40 }
 0x42b   : > { %9702 = vmatprep.subr.bf16.mxu1 %v12839_v14  ;;  %v12758_v14 = vcombine.low %v6388_v19, %v6396_v59  ;;  %v12999_v11 = vcombine.high %v6628_v30, %v6636_v60  ;;  %v6292_v19 = vld [vmem:[#allocation8 + $0x518] sm:$0xff] }
 0x42c   : > { %9528 = vmatmul.mubr.bf16.gmra.mxu0 %v16239_v34  ;;  %v6300_v59 = vld [vmem:[#allocation8 + $0x558] sm:$0xff] }
 0x42d   : > { %9599 = vmatmul.mubr.bf16.gmra.mxu1 %v16246_v18  ;;  %9632 = vmatpush1.bf16.msra.mxu0 %v12582_v3  ;;  %v6612_v3 = vld [vmem:[#allocation8 + $0xf18] sm:$0xff] }
 0x42e   : > { %9703 = vmatpush1.bf16.msra.mxu1 %v12838_v12  ;;  %9633 = vmatprep.subr.bf16.mxu0 %v12567_v4  ;;  %v6620_v12 = vld [vmem:[#allocation8 + $0xf58] sm:$0xff]  ;;  %v12742_v4 = vcombine.low %v6372_v0, %v6380_v49  ;;  %v12663_v0 = vcombine.high %v6292_v19, %v6300_v59 }
 0x42f   : > { %9704 = vmatprep.subr.bf16.mxu1 %v12823_v46  ;;  %9537 = vmatprep.mubr.bf16.mxu0 %v16272_v63  ;;  %v12998_v46 = vcombine.low %v6628_v30, %v6636_v60  ;;  %v12983_v44 = vcombine.high %v6612_v3, %v6620_v12  ;;  %v6276_v30 = vld [vmem:[#allocation8 + $0x498] sm:$0xff] }
 0x430   : > { %9608 = vmatprep.mubr.bf16.mxu1 %v16274_v28  ;;  %v6284_v60 = vld [vmem:[#allocation8 + $0x4d8] sm:$0xff] }
 0x431   : > { %9634 = vmatpush1.bf16.msra.mxu0 %v12566_v1  ;;  %v6596_v1 = vld [vmem:[#allocation8 + $0xe98] sm:$0xff] }
 0x432   : > { %9705 = vmatpush1.bf16.msra.mxu1 %v12822_v37  ;;  %9635 = vmatprep.subr.bf16.mxu0 %v12551_v6  ;;  %v6604_v37 = vld [vmem:[#allocation8 + $0xed8] sm:$0xff]  ;;  %v12726_v6 = vcombine.low %v6356_v17, %v6364_v42  ;;  %v12647_v17 = vcombine.high %v6276_v30, %v6284_v60 }
 0x433   : > { %9706 = vmatprep.subr.bf16.mxu1 %v12807_v16  ;;  %v12982_v16 = vcombine.low %v6612_v3, %v6620_v12  ;;  %v12967_v25 = vcombine.high %v6596_v1, %v6604_v37  ;;  %v6260_v3 = vld [vmem:[#allocation8 + $0x418] sm:$0xff] }
 0x434   : > { %9538 = vmatmul.mubr.bf16.gmra.mxu0 %v16295_v9  ;;  %v6268_v12 = vld [vmem:[#allocation8 + $0x458] sm:$0xff] }
 0x435   : > { %9609 = vmatmul.mubr.bf16.gmra.mxu1 %v16297_v61  ;;  %9636 = vmatpush1.bf16.msra.mxu0 %v12550_v47  ;;  %v6580_v47 = vld [vmem:[#allocation8 + $0xe18] sm:$0xff] }
 0x436   : > { %9707 = vmatpush1.bf16.msra.mxu1 %v12806_v62  ;;  %9637 = vmatprep.subr.bf16.mxu0 %v12535_v53  ;;  %v6588_v62 = vld [vmem:[#allocation8 + $0xe58] sm:$0xff]  ;;  %v12710_v53 = vcombine.low %v6340_v5, %v6348_v15  ;;  %v12631_v5 = vcombine.high %v6260_v3, %v6268_v12 }
 0x437   : > { %9708 = vmatprep.subr.bf16.mxu1 %v12791_v45  ;;  %9547 = vmatprep.mubr.bf16.mxu0 %v16301_v58  ;;  %v12966_v45 = vcombine.low %v6596_v1, %v6604_v37  ;;  %v12951_v21 = vcombine.high %v6580_v47, %v6588_v62  ;;  %v6245_v1 = vld [vmem:[#allocation8 + $0x3a0] sm:$0xff] }
 0x438   : > { %9618 = vmatprep.mubr.bf16.mxu1 %v16303_v20  ;;  %v6253_v37 = vld [vmem:[#allocation8 + $0x3e0] sm:$0xff] }
 0x439   : > { %9638 = vmatpush1.bf16.msra.mxu0 %v12534_v52  ;;  %v6564_v52 = vld [vmem:[#allocation8 + $0xd98] sm:$0xff] }
 0x43a   : > { %9709 = vmatpush1.bf16.msra.mxu1 %v12790_v29  ;;  %9639 = vmatprep.subr.bf16.mxu0 %v12519_v56  ;;  %v6572_v29 = vld [vmem:[#allocation8 + $0xdd8] sm:$0xff]  ;;  %v12694_v56 = vcombine.low %v6324_v36, %v6332_v23  ;;  %v12617_v36 = vcombine.high %v6245_v1, %v6253_v37 }
 0x43b   : > { %9710 = vmatprep.subr.bf16.mxu1 %v12775_v32  ;;  %v12950_v32 = vcombine.low %v6580_v47, %v6588_v62  ;;  %v12935_v2 = vcombine.high %v6564_v52, %v6572_v29  ;;  %v6229_v47 = vld [vmem:[#allocation8 + $0x320] sm:$0xff] }
 0x43c   : > { %9548 = vmatmul.mubr.bf16.gmra.mxu0 %v16309_v43  ;;  %v6237_v62 = vld [vmem:[#allocation8 + $0x360] sm:$0xff] }
 0x43d   : > { %9619 = vmatmul.mubr.bf16.gmra.mxu1 %v16311_v54  ;;  %9640 = vmatpush1.bf16.msra.mxu0 %v12518_v10  ;;  %v6548_v10 = vld [vmem:[#allocation8 + $0xd18] sm:$0xff] }
 0x43e   : > { %9711 = vmatpush1.bf16.msra.mxu1 %v12774_v33  ;;  %9641 = vmatprep.subr.bf16.mxu0 %v12503_v57  ;;  %v6556_v33 = vld [vmem:[#allocation8 + $0xd58] sm:$0xff]  ;;  %v12678_v57 = vcombine.low %v6308_v31, %v6316_v40  ;;  %v12601_v31 = vcombine.high %v6229_v47, %v6237_v62 }
 0x43f   : > { %9712 = vmatprep.subr.bf16.mxu1 %v12759_v39  ;;  %9659 = vmatprep.mubr.bf16.mxu0 %v16200_v35  ;;  %v12934_v39 = vcombine.low %v6564_v52, %v6572_v29  ;;  %v12919_v49 = vcombine.high %v6548_v10, %v6556_v33  ;;  %v6213_v52 = vld [vmem:[#allocation8 + $0x2a0] sm:$0xff] }
 0x440   : > { %9730 = vmatprep.mubr.bf16.mxu1 %v16202_v51  ;;  %v6221_v29 = vld [vmem:[#allocation8 + $0x2e0] sm:$0xff] }
 0x441   : > { %9642 = vmatpush1.bf16.msra.mxu0 %v12502_v50  ;;  %v6532_v50 = vld [vmem:[#allocation8 + $0xc98] sm:$0xff] }
 0x442   : > { %9713 = vmatpush1.bf16.msra.mxu1 %v12758_v14  ;;  %9643 = vmatprep.subr.bf16.mxu0 %v12743_v48  ;;  %v6540_v14 = vld [vmem:[#allocation8 + $0xcd8] sm:$0xff]  ;;  %v12662_v48 = vcombine.low %v6292_v19, %v6300_v59  ;;  %v12600_v59 = vcombine.low %v6229_v47, %v6237_v62 }
 0x443   : > { %9714 = vmatprep.subr.bf16.mxu1 %v12999_v11  ;;  %v12918_v11 = vcombine.low %v6548_v10, %v6556_v33  ;;  %v12903_v42 = vcombine.high %v6532_v50, %v6540_v14 }
 0x445   : > { %9644 = vmatpush2.bf16.msra.mxu0 %v12742_v4  ;;  %v6516_v4 = vld [vmem:[#allocation8 + $0xc18] sm:$0xff] }
 0x446   : > { %9715 = vmatpush2.bf16.msra.mxu1 %v12998_v46  ;;  %9645 = vmatprep.subr.bf16.mxu0 %v12727_v24  ;;  %v6524_v46 = vld [vmem:[#allocation8 + $0xc58] sm:$0xff]  ;;  %v12646_v24 = vcombine.low %v6276_v30, %v6284_v60  ;;  %v6197_v30 = vld [vmem:[#allocation8 + $0x220] sm:$0xff] }
 0x447   : > { %9716 = vmatprep.subr.bf16.mxu1 %v12983_v44  ;;  %v12902_v44 = vcombine.low %v6532_v50, %v6540_v14  ;;  %v12887_v15 = vcombine.high %v6516_v4, %v6524_v46  ;;  %v6205_v60 = vld [vmem:[#allocation8 + $0x260] sm:$0xff] }
 0x449   : > { %9646 = vmatpush2.bf16.msra.mxu0 %v12726_v6  ;;  %v6501_v6 = vld [vmem:[#allocation8 + $0xba0] sm:$0xff] }
 0x44a   : > { %9717 = vmatpush2.bf16.msra.mxu1 %v12982_v16  ;;  %9647 = vmatprep.subr.bf16.mxu0 %v12711_v38  ;;  %v6509_v16 = vld [vmem:[#allocation8 + $0xbe0] sm:$0xff]  ;;  %v12630_v38 = vcombine.low %v6260_v3, %v6268_v12 }
 0x44b   : > { %9718 = vmatprep.subr.bf16.mxu1 %v12967_v25  ;;  %v12886_v25 = vcombine.low %v6516_v4, %v6524_v46  ;;  %v12873_v23 = vcombine.high %v6501_v6, %v6509_v16  ;;  %v12569_v46 = vcombine.high %v6197_v30, %v6205_v60 }
 0x44d   : > { %9648 = vmatpush2.bf16.msra.mxu0 %v12710_v53  ;;  %v6485_v53 = vld [vmem:[#allocation8 + $0xb20] sm:$0xff] }
 0x44e   : > { %9719 = vmatpush2.bf16.msra.mxu1 %v12966_v45  ;;  %9649 = vmatprep.subr.bf16.mxu0 %v12695_v22  ;;  %v6493_v45 = vld [vmem:[#allocation8 + $0xb60] sm:$0xff]  ;;  %v12616_v22 = vcombine.low %v6245_v1, %v6253_v37 }
 0x44f   : > { %9720 = vmatprep.subr.bf16.mxu1 %v12951_v21  ;;  %v12872_v21 = vcombine.low %v6501_v6, %v6509_v16  ;;  %v12857_v40 = vcombine.high %v6485_v53, %v6493_v45  ;;  %v12856_v10 = vcombine.low %v6485_v53, %v6493_v45  ;;  %v6437_v37 = vld [vmem:[#allocation8 + $0x9a0] sm:$0xff] }
 0x450   : > { %v6445_v6 = vld [vmem:[#allocation8 + $0x9e0] sm:$0xff] }
 0x451   : > { %9650 = vmatpush2.bf16.msra.mxu0 %v12694_v56  ;;  %v6469_v56 = vld [vmem:[#allocation8 + $0xaa0] sm:$0xff]  ;;  %v12809_v53 = vcombine.high %v6437_v37, %v6445_v6 }
 0x452   : > { %9721 = vmatpush2.bf16.msra.mxu1 %v12950_v32  ;;  %9651 = vmatprep.subr.bf16.mxu0 %v12679_v8  ;;  %v6477_v32 = vld [vmem:[#allocation8 + $0xae0] sm:$0xff] }
 0x453   : > { %9722 = vmatprep.subr.bf16.mxu1 %v12935_v2  ;;  %v12840_v4 = vcombine.low %v6469_v56, %v6477_v32  ;;  %v6165_v45 = vld [vmem:[#allocation8 + $0x120] sm:$0xff] }
 0x455   : > { %9652 = vmatpush2.bf16.msra.mxu0 %v12678_v57 }
 0x456   : > { %9723 = vmatpush2.bf16.msra.mxu1 %v12934_v39  ;;  %9653 = vmatprep.subr.bf16.mxu0 %v12663_v0  ;;  %v12585_v39 = vcombine.high %v6213_v52, %v6221_v29  ;;  %v12841_v0 = vcombine.high %v6469_v56, %v6477_v32 }
 0x457   : > { %9724 = vmatprep.subr.bf16.mxu1 %v12919_v49 }
 0x459   : > { %9654 = vmatpush2.bf16.msra.mxu0 %v12662_v48  ;;  %v6453_v48 = vld [vmem:[#allocation8 + $0xa20] sm:$0xff] }
 0x45a   : > { %9725 = vmatpush2.bf16.msra.mxu1 %v12918_v11  ;;  %9655 = vmatprep.subr.bf16.mxu0 %v12647_v17  ;;  %v6461_v11 = vld [vmem:[#allocation8 + $0xa60] sm:$0xff] }
 0x45b   : > { %9726 = vmatprep.subr.bf16.mxu1 %v12903_v42  ;;  %v12584_v42 = vcombine.low %v6213_v52, %v6221_v29  ;;  %v6429_v52 = vld [vmem:[#allocation8 + $0x960] sm:$0xff] }
 0x45d   : > { %9656 = vmatpush2.bf16.msra.mxu0 %v12646_v24  ;;  %v12825_v24 = vcombine.high %v6453_v48, %v6461_v11 }
 0x45e   : > { %9727 = vmatpush2.bf16.msra.mxu1 %v12902_v44  ;;  %9657 = vmatprep.subr.bf16.mxu0 %v12631_v5  ;;  %v6181_v44 = vld [vmem:[#allocation8 + $0x1a0] sm:$0xff] }
 0x45f   : > { %9728 = vmatprep.subr.bf16.mxu1 %v12887_v15  ;;  %v6189_v5 = vld [vmem:[#allocation8 + $0x1e0] sm:$0xff] }
 0x460   : > { %v9235_v8 = vpop.f32.mrf.mxu0  ;;  %v9306_v2 = vpop.f32.mrf.mxu1  ;;  %v12553_v47 = vcombine.high %v6181_v44, %v6189_v5  ;;  %v12552_v56 = vcombine.low %v6181_v44, %v6189_v5  ;;  %v6133_v44 = vld [vmem:[#allocation8 + $0x20] sm:$0xff] }
 0x461   : > { %9658 = vmatpush2.bf16.msra.mxu0 %v12630_v38  ;;  %v16351_v19 = vadd.f32 %v9306_v2, %v9235_v8  ;;  %v12568_v38 = vcombine.low %v6197_v30, %v6205_v60  ;;  %v12808_v2 = vcombine.low %v6437_v37, %v6445_v6  ;;  %v6405_v30 = vld [vmem:[#allocation8 + $0x8a0] sm:$0xff] }
 0x462   : > { %9729 = vmatpush2.bf16.msra.mxu1 %v12886_v25  ;;  %9769 = vmatprep.subr.bf16.mxu0 %v12617_v36  ;;  %v9237_v33 = vpop.f32.mrf.mxu0  ;;  %v9308_v57 = vpop.f32.mrf.mxu1  ;;  %v6413_v60 = vld [vmem:[#allocation8 + $0x8e0] sm:$0xff] }
 0x463   : > { %9840 = vmatprep.subr.bf16.mxu1 %v12873_v23  ;;  %19355 = vst [vmem:[#allocation46_spill] sm:$0xff] %v16351_v19  ;;  %v16353_v49 = vadd.f32 %v9308_v57, %v9237_v33  ;;  %v12824_v23 = vcombine.low %v6453_v48, %v6461_v11  ;;  %v6149_v33 = vld [vmem:[#allocation8 + $0xa0] sm:$0xff] }
 0x464   : > { %9660 = vmatmul.mubr.bf16.vlgmr.msra.gmra.mxu0 %v16206_v41  ;;  %v9239_v50 = vpop.f32.mrf.mxu0  ;;  %v9310_v14 = vpop.f32.mrf.mxu1  ;;  %v6157_v57 = vld [vmem:[#allocation8 + $0xe0] sm:$0xff] }
 0x465   : > { %9731 = vmatmul.mubr.bf16.vlgmr.msra.gmra.mxu1 %v16208_v7  ;;  %9770 = vmatpush1.bf16.msra.mxu0 %v12616_v22  ;;  %19356 = vst [vmem:[#allocation47_spill] sm:$0xff] %v16353_v49  ;;  %v16357_v17 = vadd.f32 %v9310_v14, %v9239_v50  ;;  %v6173_v22 = vld [vmem:[#allocation8 + $0x160] sm:$0xff] }
 0x466   : > { %9841 = vmatpush1.bf16.msra.mxu1 %v12872_v21  ;;  %9771 = vmatprep.subr.bf16.mxu0 %v12601_v31  ;;  %v16359_v3 = vpop.f32.mrf.mxu0  ;;  %v16361_v12 = vpop.f32.mrf.mxu1  ;;  %v12536_v14 = vcombine.low %v6165_v45, %v6173_v22  ;;  %v6141_v5 = vld [vmem:[#allocation8 + $0x60] sm:$0xff] }
 0x467   : > { %9842 = vmatprep.subr.bf16.mxu1 %v12857_v40  ;;  %9669 = vmatprep.mubr.bf16.mxu0 %v16226_v27  ;;  %19357 = vst [vmem:[#allocation48_spill] sm:$0xff] %v16357_v17  ;;  %v6421_v40 = vld [vmem:[#allocation8 + $0x920] sm:$0xff] }
 0x468   : > { %9740 = vmatprep.mubr.bf16.mxu1 %v16235_v13  ;;  %v6389_v37 = vld [vmem:[#allocation8 + $0x820] sm:$0xff] }
 0x469   : > { %9772 = vmatpush1.bf16.msra.mxu0 %v12600_v59  ;;  %v12537_v59 = vcombine.high %v6165_v45, %v6173_v22  ;;  %v6397_v6 = vld [vmem:[#allocation8 + $0x860] sm:$0xff] }
 0x46a   : > { %9843 = vmatpush1.bf16.msra.mxu1 %v12856_v10  ;;  %9773 = vmatprep.subr.bf16.mxu0 %v12585_v39  ;;  %v12793_v10 = vcombine.high %v6421_v40, %v6429_v52  ;;  %v12761_v45 = vcombine.high %v6389_v37, %v6397_v6  ;;  %v6373_v22 = vld [vmem:[#allocation8 + $0x7a0] sm:$0xff] }
 0x46b   : > { %9844 = vmatprep.subr.bf16.mxu1 %v12841_v0  ;;  %v9245_v15 = vpop.f32.mrf.mxu0  ;;  %v9316_v1 = vpop.f32.mrf.mxu1 }
 0x46c   : > { %9670 = vmatmul.mubr.bf16.gmra.mxu0 %v16239_v34  ;;  %v16365_v16 = vadd.f32 %v9316_v1, %v9245_v15 }
 0x46d   : > { %9741 = vmatmul.mubr.bf16.gmra.mxu1 %v16246_v18  ;;  %9774 = vmatpush1.bf16.msra.mxu0 %v12584_v42  ;;  %v9247_v25 = vpop.f32.mrf.mxu0  ;;  %v9318_v36 = vpop.f32.mrf.mxu1  ;;  %v12792_v42 = vcombine.low %v6421_v40, %v6429_v52  ;;  %v6629_v52 = vld [vmem:[#allocation8 + $0xfa0] sm:$0xff] }
 0x46e   : > { %19358 = vst [vmem:[#allocation49_spill] sm:$0xff] %v16365_v16  ;;  %9845 = vmatpush1.bf16.msra.mxu1 %v12840_v4  ;;  %9775 = vmatprep.subr.bf16.mxu0 %v12569_v46  ;;  %v16367_v62 = vadd.f32 %v9318_v36, %v9247_v25  ;;  %v12521_v4 = vcombine.high %v6149_v33, %v6157_v57 }
 0x46f   : > { %9846 = vmatprep.subr.bf16.mxu1 %v12825_v24  ;;  %v9249_v21 = vpop.f32.mrf.mxu0  ;;  %v9320_v31 = vpop.f32.mrf.mxu1  ;;  %9679 = vmatprep.mubr.bf16.mxu0 %v16272_v63  ;;  %v12777_v24 = vcombine.high %v6405_v30, %v6413_v60  ;;  %v12520_v25 = vcombine.low %v6149_v33, %v6157_v57  ;;  %v12760_v57 = vcombine.low %v6389_v37, %v6397_v6  ;;  %v6341_v6 = vld [vmem:[#allocation8 + $0x6a0] sm:$0xff] }
 0x470   : > { %19359 = vst [vmem:[#allocation50_spill] sm:$0xff] %v16367_v62  ;;  %9750 = vmatprep.mubr.bf16.mxu1 %v16274_v28  ;;  %v16371_v29 = vadd.f32 %v9320_v31, %v9249_v21  ;;  %v6381_v21 = vld [vmem:[#allocation8 + $0x7e0] sm:$0xff] }
 0x471   : > { %9776 = vmatpush1.bf16.msra.mxu0 %v12568_v38  ;;  %v16373_v32 = vpop.f32.mrf.mxu0  ;;  %v16375_v8 = vpop.f32.mrf.mxu1 }
 0x472   : > { %19360 = vst [vmem:[#allocation51_spill] sm:$0xff] %v16371_v29  ;;  %9847 = vmatpush1.bf16.msra.mxu1 %v12824_v23  ;;  %9777 = vmatprep.subr.bf16.mxu0 %v12553_v47  ;;  %v12776_v47 = vcombine.low %v6405_v30, %v6413_v60  ;;  %v6357_v60 = vld [vmem:[#allocation8 + $0x720] sm:$0xff] }
 0x473   : > { %9848 = vmatprep.subr.bf16.mxu1 %v12809_v53  ;;  %v9255_v39 = vpop.f32.mrf.mxu0  ;;  %v12505_v53 = vcombine.high %v6133_v44, %v6141_v5 }
 0x474   : > { %9680 = vmatmul.mubr.bf16.gmra.mxu0 %v16295_v9  ;;  %v9326_v0 = vpop.f32.mrf.mxu1 }
 0x475   : > { %9751 = vmatmul.mubr.bf16.gmra.mxu1 %v16297_v61  ;;  %v16379_v50 = vadd.f32 %v9326_v0, %v9255_v39  ;;  %9778 = vmatpush1.bf16.msra.mxu0 %v12552_v56  ;;  %v9257_v48 = vpop.f32.mrf.mxu0  ;;  %v6637_v56 = vld [vmem:[#allocation8 + $0xfe0] sm:$0xff]  ;;  %v12745_v39 = vcombine.high %v6373_v22, %v6381_v21 }
 0x476   : > { %9849 = vmatpush1.bf16.msra.mxu1 %v12808_v2  ;;  %v9328_v11 = vpop.f32.mrf.mxu1  ;;  %9779 = vmatprep.subr.bf16.mxu0 %v12537_v59  ;;  %v12504_v59 = vcombine.low %v6133_v44, %v6141_v5  ;;  %v13001_v30 = vcombine.high %v6629_v52, %v6637_v56  ;;  %v13000_v44 = vcombine.low %v6629_v52, %v6637_v56  ;;  %v6581_v52 = vld [vmem:[#allocation8 + $0xe20] sm:$0xff] }
 0x477   : > { %19361 = vst [vmem:[#allocation52_spill] sm:$0xff] %v16379_v50  ;;  %v16381_v46 = vadd.f32 %v9328_v11, %v9257_v48  ;;  %9850 = vmatprep.subr.bf16.mxu1 %v12793_v10  ;;  %v9259_v15 = vpop.f32.mrf.mxu0  ;;  %9689 = vmatprep.mubr.bf16.mxu0 %v16301_v58  ;;  %v6613_v48 = vld [vmem:[#allocation8 + $0xf20] sm:$0xff] }
 0x478   : > { %v9330_v1 = vpop.f32.mrf.mxu1  ;;  %9760 = vmatprep.mubr.bf16.mxu1 %v16303_v20  ;;  %v6621_v11 = vld [vmem:[#allocation8 + $0xf60] sm:$0xff] }
 0x479   : > { %19362 = vst [vmem:[#allocation53_spill] sm:$0xff] %v16381_v46  ;;  %v16385_v38 = vadd.f32 %v9330_v1, %v9259_v15  ;;  %9780 = vmatpush1.bf16.msra.mxu0 %v12536_v14  ;;  %v16387_v36 = vpop.f32.mrf.mxu0  ;;  %v6365_v14 = vld [vmem:[#allocation8 + $0x760] sm:$0xff]  ;;  %v12985_v37 = vcombine.high %v6613_v48, %v6621_v11 }
 0x47a   : > { %9851 = vmatpush1.bf16.msra.mxu1 %v12792_v42  ;;  %v16389_v23 = vpop.f32.mrf.mxu1  ;;  %9781 = vmatprep.subr.bf16.mxu0 %v12521_v4  ;;  %v12729_v5 = vcombine.high %v6357_v60, %v6365_v14  ;;  %v6589_v56 = vld [vmem:[#allocation8 + $0xe60] sm:$0xff] }
 0x47b   : > { %19363 = vst [vmem:[#allocation54_spill] sm:$0xff] %v16385_v38  ;;  %9852 = vmatprep.subr.bf16.mxu1 %v12777_v24  ;;  %v9265_v31 = vpop.f32.mrf.mxu0  ;;  %v12744_v24 = vcombine.low %v6373_v22, %v6381_v21  ;;  %v6325_v21 = vld [vmem:[#allocation8 + $0x620] sm:$0xff] }
 0x47c   : > { %9690 = vmatmul.mubr.bf16.gmra.mxu0 %v16309_v43  ;;  %v9336_v40 = vpop.f32.mrf.mxu1 }
 0x47d   : > { %9761 = vmatmul.mubr.bf16.gmra.mxu1 %v16311_v54  ;;  %v16393_v2 = vadd.f32 %v9336_v40, %v9265_v31  ;;  %9782 = vmatpush1.bf16.msra.mxu0 %v12520_v25  ;;  %v9267_v10 = vpop.f32.mrf.mxu0  ;;  %v6349_v25 = vld [vmem:[#allocation8 + $0x6e0] sm:$0xff]  ;;  %v12984_v31 = vcombine.low %v6613_v48, %v6621_v11  ;;  %v12952_v11 = vcombine.low %v6581_v52, %v6589_v56 }
 0x47e   : > { %9853 = vmatpush1.bf16.msra.mxu1 %v12776_v47  ;;  %v9338_v33 = vpop.f32.mrf.mxu1  ;;  %9783 = vmatprep.subr.bf16.mxu0 %v12505_v53  ;;  %v6597_v47 = vld [vmem:[#allocation8 + $0xea0] sm:$0xff]  ;;  %v12713_v40 = vcombine.high %v6341_v6, %v6349_v25 }
 0x47f   : > { %19364 = vst [vmem:[#allocation55_spill] sm:$0xff] %v16393_v2  ;;  %v16395_v0 = vadd.f32 %v9338_v33, %v9267_v10  ;;  %9854 = vmatprep.subr.bf16.mxu1 %v12761_v45  ;;  %9801 = vmatprep.mubr.bf16.mxu0 %v16200_v35  ;;  %v9269_v42 = vpop.f32.mrf.mxu0  ;;  %v6605_v53 = vld [vmem:[#allocation8 + $0xee0] sm:$0xff]  ;;  %v12728_v45 = vcombine.low %v6357_v60, %v6365_v14 }
 0x480   : > { %v9340_v4 = vpop.f32.mrf.mxu1  ;;  %9872 = vmatprep.mubr.bf16.mxu1 %v16202_v51  ;;  %v12969_v22 = vcombine.high %v6597_v47, %v6605_v53  ;;  %v12712_v10 = vcombine.low %v6341_v6, %v6349_v25  ;;  %v12968_v33 = vcombine.low %v6597_v47, %v6605_v53  ;;  %v6317_v60 = vld [vmem:[#allocation8 + $0x5e0] sm:$0xff] }
 0x481   : > { %19365 = vst [vmem:[#allocation56_spill] sm:$0xff] %v16395_v0  ;;  %9784 = vmatpush1.bf16.msra.mxu0 %v12504_v59  ;;  %v9270_v15 = vpop.f32.mrf.mxu0  ;;  %v6333_v59 = vld [vmem:[#allocation8 + $0x660] sm:$0xff] }
 0x482   : > { %9855 = vmatpush1.bf16.msra.mxu1 %v12760_v57  ;;  %9785 = vmatprep.subr.bf16.mxu0 %v12745_v39  ;;  %v9341_v1 = vpop.f32.mrf.mxu1  ;;  %v12697_v57 = vcombine.high %v6325_v21, %v6333_v59  ;;  %v12953_v39 = vcombine.high %v6581_v52, %v6589_v56  ;;  %v6565_v14 = vld [vmem:[#allocation8 + $0xda0] sm:$0xff]  ;;  %v12696_v48 = vcombine.low %v6325_v21, %v6333_v59 }
 0x483   : > { %9856 = vmatprep.subr.bf16.mxu1 %v13001_v30  ;;  %v6309_v30 = vld [vmem:[#allocation8 + $0x5a0] sm:$0xff] }
 0x484   : > { %v6573_v42 = vld [vmem:[#allocation8 + $0xde0] sm:$0xff]  ;;  %v12681_v4 = vcombine.high %v6309_v30, %v6317_v60 }
 0x485   : > { %9786 = vmatpush2.bf16.msra.mxu0 %v12744_v24  ;;  %v12937_v24 = vcombine.high %v6565_v14, %v6573_v42  ;;  %v6549_v15 = vld [vmem:[#allocation8 + $0xd20] sm:$0xff]  ;;  %v12936_v6 = vcombine.low %v6565_v14, %v6573_v42  ;;  %v6246_v42 = vld [vmem:[#allocation8 + $0x3a8] sm:$0xff] }
 0x486   : > { %9857 = vmatpush2.bf16.msra.mxu1 %v13000_v44  ;;  %9787 = vmatprep.subr.bf16.mxu0 %v12729_v5  ;;  %v6293_v44 = vld [vmem:[#allocation8 + $0x520] sm:$0xff] }
 0x487   : > { %9858 = vmatprep.subr.bf16.mxu1 %v12985_v37  ;;  %v6301_v5 = vld [vmem:[#allocation8 + $0x560] sm:$0xff]  ;;  %v12680_v37 = vcombine.low %v6309_v30, %v6317_v60 }
 0x488   : > { %v6557_v1 = vld [vmem:[#allocation8 + $0xd60] sm:$0xff]  ;;  %v12665_v25 = vcombine.high %v6293_v44, %v6301_v5 }
 0x489   : > { %9788 = vmatpush2.bf16.msra.mxu0 %v12728_v45  ;;  %v12921_v47 = vcombine.high %v6549_v15, %v6557_v1  ;;  %v6277_v53 = vld [vmem:[#allocation8 + $0x4a0] sm:$0xff]  ;;  %v12920_v21 = vcombine.low %v6549_v15, %v6557_v1  ;;  %v6230_v1 = vld [vmem:[#allocation8 + $0x328] sm:$0xff] }
 0x48a   : > { %9859 = vmatpush2.bf16.msra.mxu1 %v12984_v31  ;;  %9789 = vmatprep.subr.bf16.mxu0 %v12713_v40  ;;  %v6285_v45 = vld [vmem:[#allocation8 + $0x4e0] sm:$0xff] }
 0x48b   : > { %9860 = vmatprep.subr.bf16.mxu1 %v12969_v22  ;;  %v6533_v31 = vld [vmem:[#allocation8 + $0xca0] sm:$0xff]  ;;  %v12664_v22 = vcombine.low %v6293_v44, %v6301_v5  ;;  %v12649_v59 = vcombine.high %v6277_v53, %v6285_v45 }
 0x48c   : > { %v6541_v40 = vld [vmem:[#allocation8 + $0xce0] sm:$0xff] }
 0x48d   : > { %9790 = vmatpush2.bf16.msra.mxu0 %v12712_v10  ;;  %v12905_v52 = vcombine.high %v6533_v31, %v6541_v40  ;;  %v6261_v56 = vld [vmem:[#allocation8 + $0x420] sm:$0xff]  ;;  %v12904_v30 = vcombine.low %v6533_v31, %v6541_v40  ;;  %v6214_v40 = vld [vmem:[#allocation8 + $0x2a8] sm:$0xff] }
 0x48e   : > { %9861 = vmatpush2.bf16.msra.mxu1 %v12968_v33  ;;  %9791 = vmatprep.subr.bf16.mxu0 %v12697_v57  ;;  %v6269_v10 = vld [vmem:[#allocation8 + $0x460] sm:$0xff] }
 0x48f   : > { %9862 = vmatprep.subr.bf16.mxu1 %v12953_v39  ;;  %v6517_v33 = vld [vmem:[#allocation8 + $0xc20] sm:$0xff]  ;;  %v12648_v39 = vcombine.low %v6277_v53, %v6285_v45  ;;  %v12633_v60 = vcombine.high %v6261_v56, %v6269_v10 }
 0x490   : > { %v6525_v57 = vld [vmem:[#allocation8 + $0xc60] sm:$0xff] }
 0x491   : > { %9792 = vmatpush2.bf16.msra.mxu0 %v12696_v48  ;;  %v12889_v14 = vcombine.high %v6517_v33, %v6525_v57  ;;  %v6254_v48 = vld [vmem:[#allocation8 + $0x3e8] sm:$0xff]  ;;  %v12888_v44 = vcombine.low %v6517_v33, %v6525_v57 }
 0x492   : > { %9863 = vmatpush2.bf16.msra.mxu1 %v12952_v11  ;;  %9793 = vmatprep.subr.bf16.mxu0 %v12681_v4  ;;  %v6502_v11 = vld [vmem:[#allocation8 + $0xba8] sm:$0xff]  ;;  %v12619_v5 = vcombine.high %v6246_v42, %v6254_v48 }
 0x493   : > { %9864 = vmatprep.subr.bf16.mxu1 %v12937_v24  ;;  %v6510_v4 = vld [vmem:[#allocation8 + $0xbe8] sm:$0xff]  ;;  %v12632_v24 = vcombine.low %v6261_v56, %v6269_v10 }
 0x494   : > { %v12875_v15 = vcombine.high %v6502_v11, %v6510_v4  ;;  %v12874_v53 = vcombine.low %v6502_v11, %v6510_v4  ;;  %v6478_v56 = vld [vmem:[#allocation8 + $0xae8] sm:$0xff] }
 0x495   : > { %9794 = vmatpush2.bf16.msra.mxu0 %v12680_v37  ;;  %v6238_v37 = vld [vmem:[#allocation8 + $0x368] sm:$0xff] }
 0x496   : > { %9865 = vmatpush2.bf16.msra.mxu1 %v12936_v6  ;;  %9795 = vmatprep.subr.bf16.mxu0 %v12665_v25  ;;  %v6486_v6 = vld [vmem:[#allocation8 + $0xb28] sm:$0xff]  ;;  %v12603_v45 = vcombine.high %v6230_v1, %v6238_v37  ;;  %v12602_v33 = vcombine.low %v6230_v1, %v6238_v37 }
 0x497   : > { %9866 = vmatprep.subr.bf16.mxu1 %v12921_v47  ;;  %v6494_v25 = vld [vmem:[#allocation8 + $0xb68] sm:$0xff]  ;;  %v12618_v47 = vcombine.low %v6246_v42, %v6254_v48 }
 0x498   : > { %v12859_v31 = vcombine.high %v6486_v6, %v6494_v25  ;;  %v6198_v4 = vld [vmem:[#allocation8 + $0x228] sm:$0xff] }
 0x499   : > { %9796 = vmatpush2.bf16.msra.mxu0 %v12664_v22  ;;  %v6222_v22 = vld [vmem:[#allocation8 + $0x2e8] sm:$0xff] }
 0x49a   : > { %9867 = vmatpush2.bf16.msra.mxu1 %v12920_v21  ;;  %9797 = vmatprep.subr.bf16.mxu0 %v12649_v59 }
 0x49b   : > { %9868 = vmatprep.subr.bf16.mxu1 %v12905_v52  ;;  %v6470_v52 = vld [vmem:[#allocation8 + $0xaa8] sm:$0xff] }
 0x49c   : > { %v12843_v42 = vcombine.high %v6470_v52, %v6478_v56 }
 0x49d   : > { %9798 = vmatpush2.bf16.msra.mxu0 %v12648_v39 }
 0x49e   : > { %9869 = vmatpush2.bf16.msra.mxu1 %v12904_v30  ;;  %9799 = vmatprep.subr.bf16.mxu0 %v12633_v60  ;;  %v12858_v30 = vcombine.low %v6486_v6, %v6494_v25  ;;  %v12587_v60 = vcombine.high %v6214_v40, %v6222_v22  ;;  %v12586_v6 = vcombine.low %v6214_v40, %v6222_v22 }
 0x49f   : > { %9870 = vmatprep.subr.bf16.mxu1 %v12889_v14  ;;  %v12842_v25 = vcombine.low %v6470_v52, %v6478_v56 }
 0x4a1   : > { %9800 = vmatpush2.bf16.msra.mxu0 %v12632_v24  ;;  %v6206_v24 = vld [vmem:[#allocation8 + $0x268] sm:$0xff] }
 0x4a2   : > { %9871 = vmatpush2.bf16.msra.mxu1 %v12888_v44  ;;  %9911 = vmatprep.subr.bf16.mxu0 %v12619_v5  ;;  %v6454_v5 = vld [vmem:[#allocation8 + $0xa28] sm:$0xff]  ;;  %v12570_v52 = vcombine.low %v6198_v4, %v6206_v24 }
 0x4a3   : > { %9982 = vmatprep.subr.bf16.mxu1 %v12875_v15  ;;  %v6462_v15 = vld [vmem:[#allocation8 + $0xa68] sm:$0xff] }
 0x4a4   : > { %v9377_v21 = vpop.f32.mrf.mxu0  ;;  %9802 = vmatmul.mubr.bf16.vlgmr.msra.gmra.mxu0 %v16206_v41  ;;  %v12826_v56 = vcombine.low %v6454_v5, %v6462_v15 }
 0x4a5   : > { %v9448_v59 = vpop.f32.mrf.mxu1  ;;  %9873 = vmatmul.mubr.bf16.vlgmr.msra.gmra.mxu1 %v16208_v7  ;;  %9912 = vmatpush1.bf16.msra.mxu0 %v12618_v47 }
 0x4a6   : > { %v16400_v10 = vadd.f32 %v9448_v59, %v9377_v21  ;;  %9983 = vmatpush1.bf16.msra.mxu1 %v12874_v53  ;;  %v9379_v57 = vpop.f32.mrf.mxu0  ;;  %9913 = vmatprep.subr.bf16.mxu0 %v12603_v45  ;;  %v12571_v53 = vcombine.high %v6198_v4, %v6206_v24  ;;  %v12827_v21 = vcombine.high %v6454_v5, %v6462_v15  ;;  %v6182_v59 = vld [vmem:[#allocation8 + $0x1a8] sm:$0xff] }
 0x4a7   : > { %v9450_v39 = vpop.f32.mrf.mxu1  ;;  %9984 = vmatprep.subr.bf16.mxu1 %v12859_v31  ;;  %9811 = vmatprep.mubr.bf16.mxu0 %v16226_v27 }
 0x4a8   : > { %19366 = vst [vmem:[#allocation57_spill] sm:$0xff] %v16400_v10  ;;  %v16403_v14 = vadd.f32 %v9450_v39, %v9379_v57  ;;  %v9381_v48 = vpop.f32.mrf.mxu0  ;;  %9882 = vmatprep.mubr.bf16.mxu1 %v16235_v13  ;;  %v6190_v57 = vld [vmem:[#allocation8 + $0x1e8] sm:$0xff] }
 0x4a9   : > { %v9452_v11 = vpop.f32.mrf.mxu1  ;;  %9914 = vmatpush1.bf16.msra.mxu0 %v12602_v33  ;;  %v6438_v39 = vld [vmem:[#allocation8 + $0x9a8] sm:$0xff]  ;;  %v12554_v5 = vcombine.low %v6182_v59, %v6190_v57 }
 0x4aa   : > { %19367 = vst [vmem:[#allocation58_spill] sm:$0xff] %v16403_v14  ;;  %v16407_v44 = vadd.f32 %v9452_v11, %v9381_v48  ;;  %9985 = vmatpush1.bf16.msra.mxu1 %v12858_v30  ;;  %v9383_v1 = vpop.f32.mrf.mxu0  ;;  %9915 = vmatprep.subr.bf16.mxu0 %v12587_v60  ;;  %v6446_v30 = vld [vmem:[#allocation8 + $0x9e8] sm:$0xff] }
 0x4ab   : > { %v9454_v37 = vpop.f32.mrf.mxu1  ;;  %9986 = vmatprep.subr.bf16.mxu1 %v12843_v42  ;;  %v12555_v42 = vcombine.high %v6182_v59, %v6190_v57  ;;  %v12810_v15 = vcombine.low %v6438_v39, %v6446_v30 }
 0x4ac   : > { %19368 = vst [vmem:[#allocation59_spill] sm:$0xff] %v16407_v44  ;;  %v16409_v47 = vadd.f32 %v9454_v37, %v9383_v1  ;;  %v9387_v45 = vpop.f32.mrf.mxu0  ;;  %9812 = vmatmul.mubr.bf16.gmra.mxu0 %v16239_v34  ;;  %v12811_v1 = vcombine.high %v6438_v39, %v6446_v30  ;;  %v6166_v37 = vld [vmem:[#allocation8 + $0x128] sm:$0xff] }
 0x4ad   : > { %v9458_v31 = vpop.f32.mrf.mxu1  ;;  %9883 = vmatmul.mubr.bf16.gmra.mxu1 %v16246_v18  ;;  %9916 = vmatpush1.bf16.msra.mxu0 %v12586_v6  ;;  %v6422_v6 = vld [vmem:[#allocation8 + $0x928] sm:$0xff] }
 0x4ae   : > { %19369 = vst [vmem:[#allocation60_spill] sm:$0xff] %v16409_v47  ;;  %v16412_v33 = vadd.f32 %v9458_v31, %v9387_v45  ;;  %9987 = vmatpush1.bf16.msra.mxu1 %v12842_v25  ;;  %v9389_v40 = vpop.f32.mrf.mxu0  ;;  %9917 = vmatprep.subr.bf16.mxu0 %v12571_v53  ;;  %v6174_v45 = vld [vmem:[#allocation8 + $0x168] sm:$0xff] }
 0x4af   : > { %v9460_v22 = vpop.f32.mrf.mxu1  ;;  %9988 = vmatprep.subr.bf16.mxu1 %v12827_v21  ;;  %9821 = vmatprep.mubr.bf16.mxu0 %v16272_v63  ;;  %v6430_v25 = vld [vmem:[#allocation8 + $0x968] sm:$0xff]  ;;  %v12539_v21 = vcombine.high %v6166_v37, %v6174_v45  ;;  %v12538_v39 = vcombine.low %v6166_v37, %v6174_v45 }
 0x4b0   : > { %19370 = vst [vmem:[#allocation61_spill] sm:$0xff] %v16412_v33  ;;  %v16415_v60 = vadd.f32 %v9460_v22, %v9389_v40  ;;  %v9391_v48 = vpop.f32.mrf.mxu0  ;;  %9892 = vmatprep.mubr.bf16.mxu1 %v16274_v28  ;;  %v12794_v30 = vcombine.low %v6422_v6, %v6430_v25 }
 0x4b1   : > { %v9462_v11 = vpop.f32.mrf.mxu1  ;;  %9918 = vmatpush1.bf16.msra.mxu0 %v12570_v52  ;;  %v6406_v52 = vld [vmem:[#allocation8 + $0x8a8] sm:$0xff] }
 0x4b2   : > { %19371 = vst [vmem:[#allocation62_spill] sm:$0xff] %v16415_v60  ;;  %v16418_v31 = vadd.f32 %v9462_v11, %v9391_v48  ;;  %9989 = vmatpush1.bf16.msra.mxu1 %v12826_v56  ;;  %v9393_v4 = vpop.f32.mrf.mxu0  ;;  %9919 = vmatprep.subr.bf16.mxu0 %v12555_v42  ;;  %v12795_v48 = vcombine.high %v6422_v6, %v6430_v25  ;;  %v6150_v11 = vld [vmem:[#allocation8 + $0xa8] sm:$0xff] }
 0x4b3   : > { %v9464_v24 = vpop.f32.mrf.mxu1  ;;  %9990 = vmatprep.subr.bf16.mxu1 %v12811_v1  ;;  %v6414_v56 = vld [vmem:[#allocation8 + $0x8e8] sm:$0xff]  ;;  %v12522_v6 = vcombine.low %v6150_v11, %v6158_v26 }
 0x4b4   : > { %19372 = vst [vmem:[#allocation63_spill] sm:$0xff] %v16418_v31  ;;  %v16421_v53 = vadd.f32 %v9464_v24, %v9393_v4  ;;  %v9397_v40 = vpop.f32.mrf.mxu0  ;;  %9822 = vmatmul.mubr.bf16.gmra.mxu0 %v16295_v9  ;;  %v12523_v4 = vcombine.high %v6150_v11, %v6158_v26  ;;  %v6134_v1 = vld [vmem:[#allocation8 + $0x28] sm:$0xff]  ;;  %v12778_v25 = vcombine.low %v6406_v52, %v6414_v56 }
 0x4b5   : > { %v9468_v22 = vpop.f32.mrf.mxu1  ;;  %9893 = vmatmul.mubr.bf16.gmra.mxu1 %v16297_v61  ;;  %9920 = vmatpush1.bf16.msra.mxu0 %v12554_v5  ;;  %v6398_v60 = vld [vmem:[#allocation8 + $0x868] sm:$0xff] }
 0x4b6   : > { %19373 = vst [vmem:[#allocation64_spill] sm:$0xff] %v16421_v53  ;;  %v16424_v55 = vadd.f32 %v9468_v22, %v9397_v40  ;;  %9991 = vmatpush1.bf16.msra.mxu1 %v12810_v15  ;;  %v9399_v59 = vpop.f32.mrf.mxu0  ;;  %9921 = vmatprep.subr.bf16.mxu0 %v12539_v21  ;;  %v12779_v40 = vcombine.high %v6406_v52, %v6414_v56  ;;  %v6142_v22 = vld [vmem:[#allocation8 + $0x68] sm:$0xff] }
 0x4b7   : > { %v9470_v57 = vpop.f32.mrf.mxu1  ;;  %9992 = vmatprep.subr.bf16.mxu1 %v12795_v48  ;;  %9831 = vmatprep.mubr.bf16.mxu0 %v16301_v58  ;;  %v12507_v21 = vcombine.high %v6134_v1, %v6142_v22  ;;  %v12506_v52 = vcombine.low %v6134_v1, %v6142_v22  ;;  %v6622_v31 = vld [vmem:[#allocation8 + $0xf68] sm:$0xff] }
 0x4b8   : > { %19374 = vst [vmem:[#allocation65_spill] sm:$0xff] %v16424_v55  ;;  %v16427_v42 = vadd.f32 %v9470_v57, %v9399_v59  ;;  %v9401_v24 = vpop.f32.mrf.mxu0  ;;  %v6390_v55 = vld [vmem:[#allocation8 + $0x828] sm:$0xff]  ;;  %9902 = vmatprep.mubr.bf16.mxu1 %v16303_v20 }
 0x4b9   : > { %v9472_v53 = vpop.f32.mrf.mxu1  ;;  %9922 = vmatpush1.bf16.msra.mxu0 %v12538_v39  ;;  %v12763_v48 = vcombine.high %v6390_v55, %v6398_v60  ;;  %v6374_v59 = vld [vmem:[#allocation8 + $0x7a8] sm:$0xff]  ;;  %v12762_v56 = vcombine.low %v6390_v55, %v6398_v60 }
 0x4ba   : > { %19375 = vst [vmem:[#allocation66_spill] sm:$0xff] %v16427_v42  ;;  %v16430_v5 = vadd.f32 %v9472_v53, %v9401_v24  ;;  %9993 = vmatpush1.bf16.msra.mxu1 %v12794_v30  ;;  %v9403_v37 = vpop.f32.mrf.mxu0  ;;  %9923 = vmatprep.subr.bf16.mxu0 %v12523_v4  ;;  %v6382_v53 = vld [vmem:[#allocation8 + $0x7e8] sm:$0xff] }
 0x4bb   : > { %v9474_v45 = vpop.f32.mrf.mxu1  ;;  %9994 = vmatprep.subr.bf16.mxu1 %v12779_v40  ;;  %v6630_v24 = vld [vmem:[#allocation8 + $0xfa8] sm:$0xff]  ;;  %v12747_v4 = vcombine.high %v6374_v59, %v6382_v53  ;;  %v12746_v1 = vcombine.low %v6374_v59, %v6382_v53 }
 0x4bc   : > { %19376 = vst [vmem:[#allocation67_spill] sm:$0xff] %v16430_v5  ;;  %v16433_v15 = vadd.f32 %v9474_v45, %v9403_v37  ;;  %v9407_v57 = vpop.f32.mrf.mxu0  ;;  %9832 = vmatmul.mubr.bf16.gmra.mxu0 %v16309_v43  ;;  %v6638_v5 = vld [vmem:[#allocation8 + $0xfe8] sm:$0xff] }
 0x4bd   : > { %v9478_v42 = vpop.f32.mrf.mxu1  ;;  %9903 = vmatmul.mubr.bf16.gmra.mxu1 %v16311_v54  ;;  %9924 = vmatpush1.bf16.msra.mxu0 %v12522_v6  ;;  %v13003_v37 = vcombine.high %v6630_v24, %v6638_v5  ;;  %v6358_v40 = vld [vmem:[#allocation8 + $0x728] sm:$0xff]  ;;  %v13002_v55 = vcombine.low %v6630_v24, %v6638_v5 }
 0x4be   : > { %19377 = vst [vmem:[#allocation68_spill] sm:$0xff] %v16433_v15  ;;  %v16436_v39 = vadd.f32 %v9478_v42, %v9407_v57  ;;  %9995 = vmatpush1.bf16.msra.mxu1 %v12778_v25  ;;  %v9409_v26 = vpop.f32.mrf.mxu0  ;;  %9925 = vmatprep.subr.bf16.mxu0 %v12507_v21  ;;  %v6366_v45 = vld [vmem:[#allocation8 + $0x768] sm:$0xff] }
 0x4bf   : > { %v9480_v11 = vpop.f32.mrf.mxu1  ;;  %9996 = vmatprep.subr.bf16.mxu1 %v12763_v48  ;;  %v6614_v15 = vld [vmem:[#allocation8 + $0xf28] sm:$0xff]  ;;  %9943 = vmatprep.mubr.bf16.mxu0 %v16200_v35  ;;  %v12731_v6 = vcombine.high %v6358_v40, %v6366_v45 }
 0x4c0   : > { %19378 = vst [vmem:[#allocation69_spill] sm:$0xff] %v16436_v39  ;;  %v16439_v30 = vadd.f32 %v9480_v11, %v9409_v26  ;;  %v9411_v42 = vpop.f32.mrf.mxu0  ;;  %10014 = vmatprep.mubr.bf16.mxu1 %v16202_v51  ;;  %v12987_v25 = vcombine.high %v6614_v15, %v6622_v31  ;;  %v6342_v21 = vld [vmem:[#allocation8 + $0x6a8] sm:$0xff] }
 0x4c1   : > { %v9482_v57 = vpop.f32.mrf.mxu1  ;;  %9926 = vmatpush1.bf16.msra.mxu0 %v12506_v52  ;;  %v6350_v48 = vld [vmem:[#allocation8 + $0x6e8] sm:$0xff]  ;;  %v12730_v42 = vcombine.low %v6358_v40, %v6366_v45 }
 0x4c2   : > { %19379 = vst [vmem:[#allocation70_spill] sm:$0xff] %v16439_v30  ;;  %9997 = vmatpush1.bf16.msra.mxu1 %v12762_v56  ;;  %v9412_v60 = vpop.f32.mrf.mxu0  ;;  %9927 = vmatprep.subr.bf16.mxu0 %v12747_v4  ;;  %v6598_v26 = vld [vmem:[#allocation8 + $0xea8] sm:$0xff]  ;;  %v12986_v57 = vcombine.low %v6614_v15, %v6622_v31  ;;  %v12715_v52 = vcombine.high %v6342_v21, %v6350_v48  ;;  %v16473_v30 = vld [vmem:[#allocation8 + $0x330] sm:$0xff] }
 0x4c3   : > { %v9483_v22 = vpop.f32.mrf.mxu1  ;;  %9998 = vmatprep.subr.bf16.mxu1 %v13003_v37  ;;  %v6606_v11 = vld [vmem:[#allocation8 + $0xee8] sm:$0xff]  ;;  %v12714_v4 = vcombine.low %v6342_v21, %v6350_v48 }
 0x4c4   : > { %v12971_v56 = vcombine.high %v6598_v26, %v6606_v11  ;;  %v6326_v59 = vld [vmem:[#allocation8 + $0x628] sm:$0xff]  ;;  %v12970_v37 = vcombine.low %v6598_v26, %v6606_v11 }
 0x4c5   : > { %9928 = vmatpush2.bf16.msra.mxu0 %v12746_v1  ;;  %v6334_v5 = vld [vmem:[#allocation8 + $0x668] sm:$0xff] }
 0x4c6   : > { %9999 = vmatpush2.bf16.msra.mxu1 %v13002_v55  ;;  %9929 = vmatprep.subr.bf16.mxu0 %v12731_v6  ;;  %v6582_v53 = vld [vmem:[#allocation8 + $0xe28] sm:$0xff]  ;;  %v12699_v60 = vcombine.high %v6326_v59, %v6334_v5  ;;  %v12698_v15 = vcombine.low %v6326_v59, %v6334_v5 }
 0x4c7   : > { %10000 = vmatprep.subr.bf16.mxu1 %v12987_v25  ;;  %v6590_v24 = vld [vmem:[#allocation8 + $0xe68] sm:$0xff] }
 0x4c8   : > { %v12955_v22 = vcombine.high %v6582_v53, %v6590_v24  ;;  %v6310_v1 = vld [vmem:[#allocation8 + $0x5a8] sm:$0xff]  ;;  %v12954_v45 = vcombine.low %v6582_v53, %v6590_v24 }
 0x4c9   : > { %9930 = vmatpush2.bf16.msra.mxu0 %v12730_v42  ;;  %v6318_v55 = vld [vmem:[#allocation8 + $0x5e8] sm:$0xff] }
 0x4ca   : > { %10001 = vmatpush2.bf16.msra.mxu1 %v12986_v57  ;;  %9931 = vmatprep.subr.bf16.mxu0 %v12715_v52  ;;  %v6566_v40 = vld [vmem:[#allocation8 + $0xda8] sm:$0xff]  ;;  %v12683_v6 = vcombine.high %v6310_v1, %v6318_v55  ;;  %v12682_v26 = vcombine.low %v6310_v1, %v6318_v55  ;;  %v16451_v55 = vld [vmem:[#allocation8 + $0x3b0] sm:$0xff] }
 0x4cb   : > { %10002 = vmatprep.subr.bf16.mxu1 %v12971_v56  ;;  %v6574_v31 = vld [vmem:[#allocation8 + $0xde8] sm:$0xff] }
 0x4cc   : > { %v12939_v25 = vcombine.high %v6566_v40, %v6574_v31  ;;  %v6294_v42 = vld [vmem:[#allocation8 + $0x528] sm:$0xff]  ;;  %v12938_v11 = vcombine.low %v6566_v40, %v6574_v31  ;;  %v16453_v40 = vld [vmem:[#allocation8 + $0x3f0] sm:$0xff] }
 0x4cd   : > { %9932 = vmatpush2.bf16.msra.mxu0 %v12714_v4  ;;  %v6302_v57 = vld [vmem:[#allocation8 + $0x568] sm:$0xff] }
 0x4ce   : > { %10003 = vmatpush2.bf16.msra.mxu1 %v12970_v37  ;;  %9933 = vmatprep.subr.bf16.mxu0 %v12699_v60  ;;  %v6550_v21 = vld [vmem:[#allocation8 + $0xd28] sm:$0xff]  ;;  %v12667_v52 = vcombine.high %v6294_v42, %v6302_v57 }
 0x4cf   : > { %10004 = vmatprep.subr.bf16.mxu1 %v12955_v22  ;;  %v6558_v48 = vld [vmem:[#allocation8 + $0xd68] sm:$0xff]  ;;  %v12666_v22 = vcombine.low %v6294_v42, %v6302_v57 }
 0x4d0   : > { %v12923_v56 = vcombine.high %v6550_v21, %v6558_v48  ;;  %v6278_v4 = vld [vmem:[#allocation8 + $0x4a8] sm:$0xff] }
 0x4d1   : > { %9934 = vmatpush2.bf16.msra.mxu0 %v12698_v15  ;;  %v6286_v37 = vld [vmem:[#allocation8 + $0x4e8] sm:$0xff]  ;;  %v12922_v15 = vcombine.low %v6550_v21, %v6558_v48 }
 0x4d2   : > { %10005 = vmatpush2.bf16.msra.mxu1 %v12954_v45  ;;  %9935 = vmatprep.subr.bf16.mxu0 %v12683_v6  ;;  %v6534_v59 = vld [vmem:[#allocation8 + $0xca8] sm:$0xff]  ;;  %v12651_v31 = vcombine.high %v6278_v4, %v6286_v37  ;;  %v16455_v6 = vld [vmem:[#allocation8 + $0xbb0] sm:$0xff]  ;;  %v12650_v42 = vcombine.low %v6278_v4, %v6286_v37 }
 0x4d3   : > { %10006 = vmatprep.subr.bf16.mxu1 %v12939_v25  ;;  %v6542_v5 = vld [vmem:[#allocation8 + $0xce8] sm:$0xff]  ;;  %v16457_v25 = vld [vmem:[#allocation8 + $0xbf0] sm:$0xff] }
 0x4d4   : > { %v16443_v53 = vld [vmem:[#allocation8 + $0x428] sm:$0xff]  ;;  %v12907_v45 = vcombine.high %v6534_v59, %v6542_v5  ;;  %v12906_v57 = vcombine.low %v6534_v59, %v6542_v5  ;;  %v16483_v59 = vld [vmem:[#allocation8 + $0xb30] sm:$0xff] }
 0x4d5   : > { %v16445_v24 = vld [vmem:[#allocation8 + $0x468] sm:$0xff]  ;;  %9936 = vmatpush2.bf16.msra.mxu0 %v12682_v26  ;;  %v16461_v26 = vadd.f32 %v16361_v12, %v16359_v3  ;;  %v16475_v3 = vld [vmem:[#allocation8 + $0x370] sm:$0xff]  ;;  %v10337_v12 = vadd.f32 %v16357_v17, %v16351_v19 }
 0x4d6   : > { %v16447_v60 = vld [vmem:[#allocation8 + $0xc28] sm:$0xff]  ;;  %10007 = vmatpush2.bf16.msra.mxu1 %v12938_v11  ;;  %9937 = vmatprep.subr.bf16.mxu0 %v12667_v52  ;;  %v12635_v21 = vcombine.high %v16443_v53, %v16445_v24  ;;  %v12634_v48 = vcombine.low %v16443_v53, %v16445_v24  ;;  %v16485_v5 = vld [vmem:[#allocation8 + $0xb70] sm:$0xff]  ;;  %v10561_v53 = vmul.f32 %v16351_v19, %v16351_v19 }
 0x4d7   : > { %v16449_v1 = vld [vmem:[#allocation8 + $0xc68] sm:$0xff]  ;;  %10008 = vmatprep.subr.bf16.mxu1 %v12923_v56  ;;  %19380 = vst [vmem:[#allocation71_spill] sm:$0xff] %v16461_v26  ;;  %v12621_v56 = vcombine.high %v16451_v55, %v16453_v40  ;;  %v10577_v24 = vmul.f32 %v16357_v17, %v16357_v17  ;;  %v12605_v37 = vcombine.high %v16473_v30, %v16475_v3  ;;  %v16514_v19 = vld [vmem:[#allocation8 + $0x2b0] sm:$0xff] }
 0x4d8   : > { %v12890_v11 = vcombine.low %v16447_v60, %v16449_v1  ;;  %v12891_v52 = vcombine.high %v16447_v60, %v16449_v1  ;;  %v12877_v60 = vcombine.high %v16455_v6, %v16457_v25  ;;  %v16498_v1 = vadd.f32 %v16375_v8, %v16373_v32 }
 0x4d9   : > { %9938 = vmatpush2.bf16.msra.mxu0 %v12666_v22  ;;  %v10350_v22 = vadd.f32 %v16461_v26, %v16353_v49  ;;  %v10578_v4 = vmul.f32 %v16461_v26, %v16461_v26  ;;  %v16516_v26 = vld [vmem:[#allocation8 + $0x2f0] sm:$0xff]  ;;  %v10609_v17 = vmul.f32 %v16371_v29, %v16371_v29 }
 0x4da   : > { %10009 = vmatpush2.bf16.msra.mxu1 %v12922_v15  ;;  %9939 = vmatprep.subr.bf16.mxu0 %v12651_v31  ;;  %v10338_v15 = vadd.f32 %v10337_v12, %v16365_v16  ;;  %19381 = vst [vmem:[#allocation72_spill] sm:$0xff] %v16498_v1  ;;  %v10593_v31 = vmul.f32 %v16365_v16, %v16365_v16 }
 0x4db   : > { %10010 = vmatprep.subr.bf16.mxu1 %v12907_v45  ;;  %v10562_v12 = vmul.f32 %v16353_v49, %v16353_v49  ;;  %v10351_v32 = vadd.f32 %v10350_v22, %v16367_v62  ;;  %v10673_v16 = vadd.f32 %v10577_v24, %v10561_v53  ;;  %v10594_v45 = vmul.f32 %v16367_v62, %v16367_v62 }
 0x4dc   : > { %v10339_v8 = vadd.f32 %v10338_v15, %v16371_v29  ;;  %v10342_v15 = vsel %vm5765_vm0, %v16393_v2, 0.0 }
 0x4dd   : > { %9940 = vmatpush2.bf16.msra.mxu0 %v12650_v42  ;;  %v10352_v49 = vadd.f32 %v10351_v32, %v16498_v1  ;;  %v16526_v42 = vadd.f32 %v16389_v23, %v16387_v36  ;;  %v10686_v53 = vadd.f32 %v10578_v4, %v10562_v12  ;;  %v10674_v24 = vadd.f32 %v10673_v16, %v10593_v31 }
 0x4de   : > { %10011 = vmatpush2.bf16.msra.mxu1 %v12906_v57  ;;  %9941 = vmatprep.subr.bf16.mxu0 %v12635_v21  ;;  %v10340_v22 = vadd.f32 %v10339_v8, %v16379_v50  ;;  %v12861_v57 = vcombine.high %v16483_v59, %v16485_v5  ;;  %v12589_v21 = vcombine.high %v16514_v19, %v16516_v26  ;;  %v10355_v4 = vsel %vm5765_vm0, %v16395_v0, 0.0 }
 0x4df   : > { %10012 = vmatprep.subr.bf16.mxu1 %v12891_v52  ;;  %19382 = vst [vmem:[#allocation73_spill] sm:$0xff] %v16526_v42  ;;  %v10610_v52 = vmul.f32 %v16498_v1, %v16498_v1  ;;  %v10353_v32 = vadd.f32 %v10352_v49, %v16381_v46  ;;  %v10687_v36 = vadd.f32 %v10686_v53, %v10594_v45  ;;  %v16680_v1 = vld [vmem:[#allocation8 + $0x770] sm:$0xff] }
 0x4e0   : > { %v10341_v8 = vadd.f32 %v10340_v22, %v16385_v38  ;;  %v10675_v23 = vadd.f32 %v10674_v24, %v10609_v17  ;;  %v10625_v16 = vmul.f32 %v16379_v50, %v16379_v50  ;;  %v10626_v31 = vmul.f32 %v16381_v46, %v16381_v46  ;;  %v16547_v17 = vld [vmem:[#allocation8 + $0xab0] sm:$0xff] }
 0x4e1   : > { %9942 = vmatpush2.bf16.msra.mxu0 %v12634_v48  ;;  %v10354_v12 = vadd.f32 %v10353_v32, %v16526_v42  ;;  %v10657_v48 = vmul.f32 %v16393_v2, %v16393_v2  ;;  %v16549_v22 = vld [vmem:[#allocation8 + $0xaf0] sm:$0xff]  ;;  %v10641_v53 = vmul.f32 %v16385_v38, %v16385_v38  ;;  %v10688_v24 = vadd.f32 %v10687_v36, %v10610_v52 }
 0x4e2   : > { %10013 = vmatpush2.bf16.msra.mxu1 %v12890_v11  ;;  %10053 = vmatprep.subr.bf16.mxu0 %v12621_v56  ;;  %v10343_v49 = vadd.f32 %v10342_v15, %v10341_v8  ;;  %v10658_v56 = vmul.f32 %v16395_v0, %v16395_v0  ;;  %v10642_v15 = vmul.f32 %v16526_v42, %v16526_v42  ;;  %v16631_v42 = vld [vmem:[#allocation8 + $0x8b0] sm:$0xff] }
 0x4e3   : > { %10124 = vmatprep.subr.bf16.mxu1 %v12877_v60  ;;  %v10356_v32 = vadd.f32 %v10355_v4, %v10354_v12  ;;  %v19384_v8 = vcombine.low %v16451_v55, %v16453_v40  ;;  %v19385_v2 = vcombine.low %v16455_v6, %v16457_v25  ;;  %v12845_v52 = vcombine.high %v16547_v17, %v16549_v22  ;;  %v16669_v46 = vld [vmem:[#allocation8 + $0xff0] sm:$0xff] }
 0x4e4   : > { %v9519_v11 = vpop.f32.mrf.mxu0  ;;  %9944 = vmatmul.mubr.bf16.vlgmr.msra.gmra.mxu0 %v16206_v41  ;;  %v10689_v36 = vadd.f32 %v10688_v24, %v10626_v31  ;;  %v10344_v4 = vrot.slane %v10343_v49, 4  ;;  %v10678_v12 = vsel %vm5765_vm0, %v10657_v48, 0.0  ;;  %v19388_v48 = vcombine.low %v16473_v30, %v16475_v3 }
 0x4e5   : > { %v9590_v45 = vpop.f32.mrf.mxu1  ;;  %10015 = vmatmul.mubr.bf16.vlgmr.msra.gmra.mxu1 %v16208_v7  ;;  %10054 = vmatpush1.bf16.msra.mxu0 %v19384_v8  ;;  %v10357_v31 = vrot.slane %v10356_v32, 4  ;;  %v19389_v24 = vcombine.low %v16483_v59, %v16485_v5  ;;  %v16589_v5 = vld [vmem:[#allocation8 + $0x1b0] sm:$0xff] }
 0x4e6   : > { %v16555_v60 = vadd.f32 %v9590_v45, %v9519_v11  ;;  %10125 = vmatpush1.bf16.msra.mxu1 %v19385_v2  ;;  %v9521_v0 = vpop.f32.mrf.mxu0  ;;  %v10676_v45 = vadd.f32 %v10675_v23, %v10625_v16  ;;  %10055 = vmatprep.subr.bf16.mxu0 %v12605_v37  ;;  %v6199_v2 = vld [vmem:[#allocation8 + $0x230] sm:$0xff]  ;;  %v10690_v16 = vadd.f32 %v10689_v36, %v10642_v15 }
 0x4e7   : > { %v9592_v11 = vpop.f32.mrf.mxu1  ;;  %10126 = vmatprep.subr.bf16.mxu1 %v12861_v57  ;;  %9953 = vmatprep.mubr.bf16.mxu0 %v16226_v27  ;;  %v6207_v37 = vld [vmem:[#allocation8 + $0x270] sm:$0xff]  ;;  %v12844_v15 = vcombine.low %v16547_v17, %v16549_v22  ;;  %v10345_v36 = vadd.f32 %v10344_v4, %v10343_v49 }
 0x4e8   : > { %19383 = vst [vmem:[#allocation74_spill] sm:$0xff] %v16555_v60  ;;  %v16567_v38 = vadd.f32 %v9592_v11, %v9521_v0  ;;  %v9523_v55 = vpop.f32.mrf.mxu0  ;;  %10024 = vmatprep.mubr.bf16.mxu1 %v16235_v13  ;;  %v10677_v6 = vadd.f32 %v10676_v45, %v10641_v53  ;;  %v10691_v0 = vsel %vm5765_vm0, %v10658_v56, 0.0  ;;  %v6455_v57 = vld [vmem:[#allocation8 + $0xa30] sm:$0xff]  ;;  %v12588_v53 = vcombine.low %v16514_v19, %v16516_v26 }
 0x4e9   : > { %v9594_v40 = vpop.f32.mrf.mxu1  ;;  %v6463_v23 = vld [vmem:[#allocation8 + $0xa70] sm:$0xff]  ;;  %10056 = vmatpush1.bf16.msra.mxu0 %v19388_v48  ;;  %v10692_v30 = vadd.f32 %v10691_v0, %v10690_v16  ;;  %v12572_v22 = vcombine.low %v6199_v2, %v6207_v37  ;;  %v10346_v0 = vrot.slane %v10345_v36, 2 }
 0x4ea   : > { %19386 = vst [vmem:[#allocation75_spill] sm:$0xff] %v16567_v38  ;;  %v16575_v25 = vadd.f32 %v9594_v40, %v9523_v55  ;;  %10127 = vmatpush1.bf16.msra.mxu1 %v19389_v24  ;;  %v9525_v8 = vpop.f32.mrf.mxu0  ;;  %v10679_v56 = vadd.f32 %v10678_v12, %v10677_v6  ;;  %10057 = vmatprep.subr.bf16.mxu0 %v12589_v21  ;;  %v6191_v19 = vld [vmem:[#allocation8 + $0x1f0] sm:$0xff] }
 0x4eb   : > { %v9596_v11 = vpop.f32.mrf.mxu1  ;;  %10128 = vmatprep.subr.bf16.mxu1 %v12845_v52  ;;  %v12573_v40 = vcombine.high %v6199_v2, %v6207_v37  ;;  %v12829_v59 = vcombine.high %v6455_v57, %v6463_v23  ;;  %v16594_v26 = vld [vmem:[#allocation8 + $0x9b0] sm:$0xff]  ;;  %v10358_v12 = vadd.f32 %v10357_v31, %v10356_v32  ;;  %v12828_v6 = vcombine.low %v6455_v57, %v6463_v23 }
 0x4ec   : > { %19387 = vst [vmem:[#allocation76_spill] sm:$0xff] %v16575_v25  ;;  %v16585_v45 = vadd.f32 %v9596_v11, %v9525_v8  ;;  %v9529_v3 = vpop.f32.mrf.mxu0  ;;  %9954 = vmatmul.mubr.bf16.gmra.mxu0 %v16239_v34  ;;  %v16596_v21 = vld [vmem:[#allocation8 + $0x9f0] sm:$0xff]  ;;  %v10680_v52 = vrot.slane %v10679_v56, 4  ;;  %v10693_v16 = vrot.slane %v10692_v30, 4  ;;  %v12557_v11 = vcombine.high %v16589_v5, %v6191_v19 }
 0x4ed   : > { %v9600_v55 = vpop.f32.mrf.mxu1  ;;  %10025 = vmatmul.mubr.bf16.gmra.mxu1 %v16246_v18  ;;  %10058 = vmatpush1.bf16.msra.mxu0 %v12588_v53  ;;  %v12813_v32 = vcombine.high %v16594_v26, %v16596_v21  ;;  %v16604_v31 = vld [vmem:[#allocation8 + $0x130] sm:$0xff]  ;;  %v10359_v23 = vrot.slane %v10358_v12, 2 }
 0x4ee   : > { %19390 = vst [vmem:[#allocation77_spill] sm:$0xff] %v16585_v45  ;;  %v16591_v48 = vadd.f32 %v9600_v55, %v9529_v3  ;;  %v9531_v49 = vpop.f32.mrf.mxu0  ;;  %10129 = vmatpush1.bf16.msra.mxu1 %v12844_v15  ;;  %10059 = vmatprep.subr.bf16.mxu0 %v12573_v40  ;;  %v16606_v53 = vld [vmem:[#allocation8 + $0x170] sm:$0xff]  ;;  %v12556_v55 = vcombine.low %v16589_v5, %v6191_v19 }
 0x4ef   : > { %v9602_v17 = vpop.f32.mrf.mxu1  ;;  %10130 = vmatprep.subr.bf16.mxu1 %v12829_v59  ;;  %9963 = vmatprep.mubr.bf16.mxu0 %v16272_v63  ;;  %v16611_v37 = vld [vmem:[#allocation8 + $0x930] sm:$0xff]  ;;  %v12812_v40 = vcombine.low %v16594_v26, %v16596_v21  ;;  %v16635_v19 = vadd.f32 %v10346_v0, %v10345_v36  ;;  %v16637_v26 = vadd.f32 %v10693_v16, %v10692_v30 }
 0x4f0   : > { %19391 = vst [vmem:[#allocation78_spill] sm:$0xff] %v16591_v48  ;;  %v16599_v4 = vadd.f32 %v9602_v17, %v9531_v49  ;;  %v9533_v24 = vpop.f32.mrf.mxu0  ;;  %v16613_v57 = vld [vmem:[#allocation8 + $0x970] sm:$0xff]  ;;  %10034 = vmatprep.mubr.bf16.mxu1 %v16274_v28  ;;  %v16623_v17 = vadd.f32 %v10680_v52, %v10679_v56  ;;  %v10579_v63 = vmul.f32 %v16407_v44, %v16407_v44 }
 0x4f1   : > { %v9604_v8 = vpop.f32.mrf.mxu1  ;;  %10060 = vmatpush1.bf16.msra.mxu0 %v12572_v22  ;;  %v16619_v59 = vld [vmem:[#allocation8 + $0xb0] sm:$0xff]  ;;  %v12540_v22 = vcombine.low %v16604_v31, %v16606_v53  ;;  %v12797_v52 = vcombine.high %v16611_v37, %v16613_v57  ;;  %v12796_v36 = vcombine.low %v16611_v37, %v16613_v57  ;;  %v10348_v29 = vrot.slane %v16635_v19, 1 }
 0x4f2   : > { %19392 = vst [vmem:[#allocation79_spill] sm:$0xff] %v16599_v4  ;;  %v16608_v2 = vadd.f32 %v9604_v8, %v9533_v24  ;;  %v9535_v15 = vpop.f32.mrf.mxu0  ;;  %v16621_v49 = vld [vmem:[#allocation8 + $0xf0] sm:$0xff]  ;;  %10131 = vmatpush1.bf16.msra.mxu1 %v12828_v6  ;;  %v12541_v8 = vcombine.high %v16604_v31, %v16606_v53  ;;  %10061 = vmatprep.subr.bf16.mxu0 %v12557_v11  ;;  %v10682_v50 = vrot.slane %v16623_v17, 2  ;;  %v10695_v62 = vrot.slane %v16637_v26, 2 }
 0x4f3   : > { %v9606_v3 = vpop.f32.mrf.mxu1  ;;  %v16633_v5 = vld [vmem:[#allocation8 + $0x8f0] sm:$0xff]  ;;  %10132 = vmatprep.subr.bf16.mxu1 %v12813_v32  ;;  %v12525_v0 = vcombine.high %v16619_v59, %v16621_v49  ;;  %v10360_v53 = vadd.f32 %v10359_v23, %v10358_v12 }
 0x4f4   : > { %19393 = vst [vmem:[#allocation80_spill] sm:$0xff] %v16608_v2  ;;  %v16625_v24 = vadd.f32 %v9606_v3, %v9535_v15  ;;  %v9539_v21 = vpop.f32.mrf.mxu0  ;;  %v16641_v6 = vld [vmem:[#allocation8 + $0x30] sm:$0xff]  ;;  %9964 = vmatmul.mubr.bf16.gmra.mxu0 %v16295_v9  ;;  %v12781_v57 = vcombine.high %v16631_v42, %v16633_v5  ;;  %v10696_v13 = vadd.f32 %v10695_v62, %v16637_v26 }
 0x4f5   : > { %v9610_v56 = vpop.f32.mrf.mxu1  ;;  %v16643_v15 = vld [vmem:[#allocation8 + $0x70] sm:$0xff]  ;;  %10035 = vmatmul.mubr.bf16.gmra.mxu1 %v16297_v61  ;;  %10062 = vmatpush1.bf16.msra.mxu0 %v12556_v55 }
 0x4f6   : > { %19394 = vst [vmem:[#allocation81_spill] sm:$0xff] %v16625_v24  ;;  %v16645_v31 = vadd.f32 %v9610_v56, %v9539_v21  ;;  %v16654_v16 = vld [vmem:[#allocation8 + $0x830] sm:$0xff]  ;;  %v9541_v3 = vpop.f32.mrf.mxu0  ;;  %10133 = vmatpush1.bf16.msra.mxu1 %v12812_v40  ;;  %v12509_v55 = vcombine.high %v16641_v6, %v16643_v15  ;;  %10063 = vmatprep.subr.bf16.mxu0 %v12541_v8  ;;  %v10361_v40 = vrot.slane %v10360_v53, 1 }
 0x4f7   : > { %v16656_v11 = vld [vmem:[#allocation8 + $0x870] sm:$0xff]  ;;  %v9612_v21 = vpop.f32.mrf.mxu1  ;;  %10134 = vmatprep.subr.bf16.mxu1 %v12797_v52  ;;  %9973 = vmatprep.mubr.bf16.mxu0 %v16301_v58  ;;  %v10683_v52 = vadd.f32 %v10682_v50, %v16623_v17  ;;  %v10563_v17 = vmul.f32 %v16400_v10, %v16400_v10 }
 0x4f8   : > { %19395 = vst [vmem:[#allocation82_spill] sm:$0xff] %v16645_v31  ;;  %v16658_v32 = vld [vmem:[#allocation8 + $0x7b0] sm:$0xff]  ;;  %v16672_v12 = vadd.f32 %v9612_v21, %v9541_v3  ;;  %v9543_v61 = vpop.f32.mrf.mxu0  ;;  %v12765_v3 = vcombine.high %v16654_v16, %v16656_v11  ;;  %10044 = vmatprep.mubr.bf16.mxu1 %v16303_v20 }
 0x4f9   : > { %v16665_v56 = vld [vmem:[#allocation8 + $0x7f0] sm:$0xff]  ;;  %v9614_v9 = vpop.f32.mrf.mxu1  ;;  %10064 = vmatpush1.bf16.msra.mxu0 %v12540_v22  ;;  %v10699_v50 = vadd.f32 %v10579_v63, %v10563_v17  ;;  %v10564_v63 = vmul.f32 %v16403_v14, %v16403_v14 }
 0x4fa   : > { %v16667_v30 = vld [vmem:[#allocation8 + $0xfb0] sm:$0xff]  ;;  %19396 = vst [vmem:[#allocation83_spill] sm:$0xff] %v16672_v12  ;;  %v16692_v28 = vadd.f32 %v9614_v9, %v9543_v61  ;;  %v9545_v18 = vpop.f32.mrf.mxu0  ;;  %10135 = vmatpush1.bf16.msra.mxu1 %v12796_v36  ;;  %v10349_v61 = vadd.f32 %v10348_v29, %v16635_v19  ;;  %10065 = vmatprep.subr.bf16.mxu0 %v12525_v0  ;;  %v10684_v36 = vrot.slane %v10683_v52, 1  ;;  %v10697_v9 = vrot.slane %v10696_v13, 1 }
 0x4fb   : > { %v16678_v37 = vld [vmem:[#allocation8 + $0x730] sm:$0xff]  ;;  %v9616_v34 = vpop.f32.mrf.mxu1  ;;  %10136 = vmatprep.subr.bf16.mxu1 %v12781_v57  ;;  %v10362_v29 = vadd.f32 %v10361_v40, %v10360_v53  ;;  %v10595_v19 = vmul.f32 %v16412_v33, %v16412_v33  ;;  %v10376_v0 = vadd.f32 %v16409_v47, %v16403_v14  ;;  %v19401_v57 = vcombine.low %v16631_v42, %v16633_v5  ;;  %v19405_v42 = vld [vmem:[#allocation62_spill] sm:$0xff] }
 0x4fc   : > { %v16688_v21 = vld [vmem:[#allocation8 + $0xf30] sm:$0xff]  ;;  %19397 = vst [vmem:[#allocation84_spill] sm:$0xff] %v16692_v28  ;;  %v16713_v22 = vadd.f32 %v9616_v34, %v9545_v18  ;;  %v9549_v27 = vpop.f32.mrf.mxu0  ;;  %v10363_v34 = vadd.f32 %v16407_v44, %v16400_v10  ;;  %9974 = vmatmul.mubr.bf16.gmra.mxu0 %v16309_v43 }
 0x4fd   : > { %v16690_v23 = vld [vmem:[#allocation8 + $0xf70] sm:$0xff]  ;;  %v9620_v7 = vpop.f32.mrf.mxu1  ;;  %10045 = vmatmul.mubr.bf16.gmra.mxu1 %v16311_v54  ;;  %10085 = vmatprep.mubr.bf16.mxu0 %v16200_v35  ;;  %v10377_v5 = vadd.f32 %v10376_v0, %v19405_v42  ;;  %v10685_v0 = vadd.f32 %v10684_v36, %v10683_v52  ;;  %v10659_v52 = vmul.f32 %v16436_v39, %v16436_v39 }
 0x4fe   : > { %v16708_v58 = vld [vmem:[#allocation8 + $0x6b0] sm:$0xff]  ;;  %19398 = vst [vmem:[#allocation85_spill] sm:$0xff] %v16713_v22  ;;  %v16725_v18 = vadd.f32 %v9620_v7, %v9549_v27  ;;  %v19400_v7 = vcombine.low %v16619_v59, %v16621_v49  ;;  %v9551_v27 = vpop.f32.mrf.mxu0  ;;  %v10364_v53 = vadd.f32 %v10363_v34, %v16412_v33  ;;  %10137 = vmatpush1.bf16.msra.mxu1 %v19401_v57  ;;  %v16753_v34 = vmul.f32 0.020408163, %v10349_v61  ;;  %v19409_v57 = vld [vmem:[#allocation64_spill] sm:$0xff] }
 0x4ff   : > { %v16710_v8 = vld [vmem:[#allocation8 + $0x6f0] sm:$0xff]  ;;  %v9622_v26 = vpop.f32.mrf.mxu1  ;;  %v10580_v59 = vmul.f32 %v16409_v47, %v16409_v47  ;;  %10138 = vmatprep.subr.bf16.mxu1 %v12765_v3  ;;  %10156 = vmatprep.mubr.bf16.mxu1 %v16202_v51  ;;  %v10596_v3 = vmul.f32 %v19405_v42, %v19405_v42  ;;  %v19407_v61 = vcombine.low %v16641_v6, %v16643_v15  ;;  %v10368_v15 = vsel %vm5765_vm0, %v16436_v39, 0.0 }
 0x500   : > { %19399 = vst [vmem:[#allocation86_spill] sm:$0xff] %v16725_v18  ;;  %10066 = vmatpush1.bf16.msra.mxu0 %v19400_v7  ;;  %v16746_v40 = vadd.f32 %v9622_v26, %v9551_v27  ;;  %v19403_v49 = vld [vmem:[#allocation63_spill] sm:$0xff]  ;;  %v9553_v62 = vpop.f32.mrf.mxu0  ;;  %19404 = vst [vmem:[#allocation88_spill] sm:$0xff] %v16753_v34 }
 0x501   : > { %10067 = vmatprep.subr.bf16.mxu0 %v12509_v55  ;;  %v10611_v7 = vmul.f32 %v19403_v49, %v19403_v49  ;;  %v9624_v20 = vpop.f32.mrf.mxu1  ;;  %v10365_v27 = vadd.f32 %v10364_v53, %v19403_v49  ;;  %v10700_v55 = vadd.f32 %v10699_v50, %v10595_v19  ;;  %v19406_v62 = vld [vmem:[#allocation65_spill] sm:$0xff]  ;;  %v16767_v53 = vmul.f32 0.020408163, %v10362_v29 }
 0x502   : > { %19402 = vst [vmem:[#allocation87_spill] sm:$0xff] %v16746_v40  ;;  %v10627_v20 = vmul.f32 %v19406_v62, %v19406_v62  ;;  %v9554_v17 = vpop.f32.mrf.mxu0  ;;  %v10378_v49 = vadd.f32 %v10377_v5, %v19409_v57  ;;  %v19410_v50 = vcombine.low %v16654_v16, %v16656_v11  ;;  %v19411_v19 = vcombine.high %v16658_v32, %v16665_v56  ;;  %v19413_v11 = vld [vmem:[#allocation66_spill] sm:$0xff]  ;;  %v19414_v5 = vld [vmem:[#allocation67_spill] sm:$0xff] }
 0x503   : > { %v9625_v26 = vpop.f32.mrf.mxu1  ;;  %19408 = vst [vmem:[#allocation89_spill] sm:$0xff] %v16767_v53  ;;  %v10366_v33 = vadd.f32 %v10365_v27, %v19406_v62  ;;  %v10712_v42 = vadd.f32 %v10580_v59, %v10564_v63  ;;  %v10701_v6 = vadd.f32 %v10700_v55, %v10611_v7  ;;  %v19412_v29 = vcombine.high %v16667_v30, %v16669_v46  ;;  %v6599_v7 = vld [vmem:[#allocation8 + $0xeb0] sm:$0xff] }
 0x504   : > { %10068 = vmatpush1.bf16.msra.mxu0 %v19407_v61  ;;  %10139 = vmatpush1.bf16.msra.mxu1 %v19410_v50  ;;  %v10612_v16 = vmul.f32 %v19409_v57, %v19409_v57  ;;  %v10379_v36 = vadd.f32 %v10378_v49, %v19413_v11  ;;  %v10643_v59 = vmul.f32 %v19414_v5, %v19414_v5  ;;  %v6607_v63 = vld [vmem:[#allocation8 + $0xef0] sm:$0xff]  ;;  %v19415_v26 = vld [vmem:[#allocation70_spill] sm:$0xff] }
 0x505   : > { %10069 = vmatprep.subr.bf16.mxu0 %v19411_v19  ;;  %10140 = vmatprep.subr.bf16.mxu1 %v19412_v29  ;;  %v10367_v27 = vadd.f32 %v10366_v33, %v19414_v5  ;;  %v10698_v55 = vadd.f32 %v10697_v9, %v10696_v13  ;;  %v10713_v61 = vadd.f32 %v10712_v42, %v10596_v3  ;;  %v10381_v50 = vsel %vm5765_vm0, %v19415_v26, 0.0  ;;  %v19417_v29 = vld [vmem:[#allocation68_spill] sm:$0xff] }
 0x506   : > { %v10702_v17 = vadd.f32 %v10701_v6, %v10627_v20  ;;  %v19416_v19 = vcombine.low %v16658_v32, %v16665_v56  ;;  %v10628_v49 = vmul.f32 %v19413_v11, %v19413_v11  ;;  %v10380_v33 = vadd.f32 %v10379_v36, %v19417_v29  ;;  %v16810_v20 = vld [vmem:[#allocation8 + $0x630] sm:$0xff] }
 0x507   : > { %v10369_v39 = vadd.f32 %v10368_v15, %v10367_v27  ;;  %v19418_v5 = vcombine.low %v16667_v30, %v16669_v46  ;;  %v19419_v13 = vcombine.high %v16678_v37, %v16680_v1  ;;  %v10704_v9 = vsel %vm5765_vm0, %v10659_v52, 0.0  ;;  %v6335_v6 = vld [vmem:[#allocation8 + $0x670] sm:$0xff] }
 0x508   : > { %10070 = vmatpush2.bf16.msra.mxu0 %v19416_v19  ;;  %v10660_v32 = vmul.f32 %v19415_v26, %v19415_v26  ;;  %v19420_v56 = vcombine.high %v16688_v21, %v16690_v23  ;;  %v12972_v42 = vcombine.low %v6599_v7, %v6607_v63  ;;  %v12973_v3 = vcombine.high %v6599_v7, %v6607_v63  ;;  %v16816_v52 = vld [vmem:[#allocation8 + $0xe70] sm:$0xff] }
 0x509   : > { %10141 = vmatpush2.bf16.msra.mxu1 %v19418_v5  ;;  %10071 = vmatprep.subr.bf16.mxu0 %v19419_v13  ;;  %v10714_v46 = vadd.f32 %v10713_v61, %v10612_v16  ;;  %v10703_v30 = vadd.f32 %v10702_v17, %v10643_v59  ;;  %v10644_v15 = vmul.f32 %v19417_v29, %v19417_v29  ;;  %v16814_v5 = vld [vmem:[#allocation8 + $0xe30] sm:$0xff]  ;;  %v16818_v27 = vmul.f32 0.020408163, %v10685_v0 }
 0x50a   : > { %10142 = vmatprep.subr.bf16.mxu1 %v19420_v56  ;;  %v10382_v36 = vadd.f32 %v10381_v50, %v10380_v33  ;;  %v16822_v19 = vmul.f32 %v16753_v34, %v16753_v34  ;;  %v16824_v7 = vmul.f32 0.020408163, %v10698_v55  ;;  %v16828_v16 = vmul.f32 %v16767_v53, %v16767_v53  ;;  %v16840_v33 = vld [vmem:[#allocation8 + $0x5b0] sm:$0xff] }
 0x50b   : > { %v19421_v59 = vcombine.low %v16678_v37, %v16680_v1  ;;  %v10715_v63 = vadd.f32 %v10714_v46, %v10628_v49  ;;  %v10370_v61 = vrot.slane %v10369_v39, 4  ;;  %v10705_v17 = vadd.f32 %v10704_v9, %v10703_v30  ;;  %v16842_v13 = vld [vmem:[#allocation8 + $0x5f0] sm:$0xff] }
 0x50c   : > { %v19422_v0 = vcombine.low %v16688_v21, %v16690_v23  ;;  %v19423_v50 = vcombine.high %v16708_v58, %v16710_v8  ;;  %v12701_v55 = vcombine.high %v16810_v20, %v6335_v6  ;;  %v10717_v1 = vsel %vm5765_vm0, %v10660_v32, 0.0  ;;  %v16847_v49 = vld [vmem:[#allocation8 + $0xdb0] sm:$0xff] }
 0x50d   : > { %10072 = vmatpush2.bf16.msra.mxu0 %v19421_v59  ;;  %v12957_v37 = vcombine.high %v16814_v5, %v16816_v52  ;;  %v16849_v23 = vld [vmem:[#allocation8 + $0xdf0] sm:$0xff]  ;;  %v10716_v21 = vadd.f32 %v10715_v63, %v10644_v15  ;;  %v10383_v9 = vrot.slane %v10382_v36, 4  ;;  %v12700_v56 = vcombine.low %v16810_v20, %v6335_v6 }
 0x50e   : > { %10143 = vmatpush2.bf16.msra.mxu1 %v19422_v0  ;;  %10073 = vmatprep.subr.bf16.mxu0 %v19423_v50  ;;  %v16852_v46 = vld [vmem:[#allocation8 + $0x530] sm:$0xff]  ;;  %v19424_v0 = vcombine.low %v16708_v58, %v16710_v8  ;;  %v12956_v15 = vcombine.low %v16814_v5, %v16816_v52  ;;  %v12685_v20 = vcombine.high %v16840_v33, %v16842_v13  ;;  %v10706_v26 = vrot.slane %v10705_v17, 4 }
 0x50f   : > { %10144 = vmatprep.subr.bf16.mxu1 %v12973_v3  ;;  %v16854_v30 = vld [vmem:[#allocation8 + $0x570] sm:$0xff]  ;;  %v10371_v32 = vadd.f32 %v10370_v61, %v10369_v39  ;;  %v10718_v29 = vadd.f32 %v10717_v1, %v10716_v21  ;;  %v12684_v58 = vcombine.low %v16840_v33, %v16842_v13  ;;  %v12940_v52 = vcombine.low %v16847_v49, %v16849_v23  ;;  %v16903_v21 = vld [vmem:[#allocation8 + $0x3b8] sm:$0xff] }
 0x510   : > { %v16856_v59 = vld [vmem:[#allocation8 + $0xd30] sm:$0xff]  ;;  %v12668_v39 = vcombine.low %v16852_v46, %v16854_v30  ;;  %v10384_v33 = vadd.f32 %v10383_v9, %v10382_v36  ;;  %v16917_v3 = vld [vmem:[#allocation8 + $0xbf8] sm:$0xff]  ;;  %v10707_v62 = vadd.f32 %v10706_v26, %v10705_v17 }
 0x511   : > { %10074 = vmatpush2.bf16.msra.mxu0 %v19424_v0  ;;  %v16869_v6 = vld [vmem:[#allocation8 + $0xd70] sm:$0xff]  ;;  %v12941_v0 = vcombine.high %v16847_v49, %v16849_v23  ;;  %v10372_v11 = vrot.slane %v10371_v32, 2  ;;  %v10719_v57 = vrot.slane %v10718_v29, 4  ;;  %v16921_v36 = vld [vmem:[#allocation8 + $0x338] sm:$0xff] }
 0x512   : > { %v16871_v63 = vld [vmem:[#allocation8 + $0x4b0] sm:$0xff]  ;;  %10145 = vmatpush2.bf16.msra.mxu1 %v12972_v42  ;;  %10075 = vmatprep.subr.bf16.mxu0 %v12701_v55  ;;  %v12669_v42 = vcombine.high %v16852_v46, %v16854_v30  ;;  %v12924_v13 = vcombine.low %v16856_v59, %v16869_v6  ;;  %v12925_v1 = vcombine.high %v16856_v59, %v16869_v6  ;;  %v16913_v59 = vld [vmem:[#allocation8 + $0x3f8] sm:$0xff]  ;;  %v10385_v17 = vrot.slane %v10384_v33, 2 }
 0x513   : > { %v16873_v50 = vld [vmem:[#allocation8 + $0x4f0] sm:$0xff]  ;;  %10146 = vmatprep.subr.bf16.mxu1 %v12957_v37  ;;  %v10389_v46 = vadd.f32 %v16575_v25, %v16555_v60  ;;  %v16915_v6 = vld [vmem:[#allocation8 + $0xbb8] sm:$0xff]  ;;  %v10373_v10 = vadd.f32 %v10372_v11, %v10371_v32  ;;  %v10720_v53 = vadd.f32 %v10719_v57, %v10718_v29  ;;  %v10566_v57 = vmul.f32 %v16567_v38, %v16567_v38 }
 0x514   : > { %v16877_v8 = vld [vmem:[#allocation8 + $0xcb0] sm:$0xff]  ;;  %v12653_v37 = vcombine.high %v16871_v63, %v16873_v50  ;;  %v16923_v9 = vld [vmem:[#allocation8 + $0x378] sm:$0xff]  ;;  %v10386_v11 = vadd.f32 %v10385_v17, %v10384_v33  ;;  %v10598_v29 = vmul.f32 %v16599_v4, %v16599_v4  ;;  %v10394_v32 = vsel %vm5765_vm0, %v16725_v18, 0.0 }
 0x515   : > { %v16879_v5 = vld [vmem:[#allocation8 + $0xcf0] sm:$0xff]  ;;  %10076 = vmatpush2.bf16.msra.mxu0 %v12700_v56  ;;  %v10390_v47 = vadd.f32 %v10389_v46, %v16591_v48  ;;  %v10565_v46 = vmul.f32 %v16555_v60, %v16555_v60  ;;  %v10613_v56 = vmul.f32 %v16608_v2, %v16608_v2  ;;  %v10721_v33 = vrot.slane %v10720_v53, 2  ;;  %v17129_v60 = vld [vmem:[#allocation8 + $0x38] sm:$0xff] }
 0x516   : > { %v16889_v61 = vld [vmem:[#allocation8 + $0x430] sm:$0xff]  ;;  %v12909_v30 = vcombine.high %v16877_v8, %v16879_v5  ;;  %10147 = vmatpush2.bf16.msra.mxu1 %v12956_v15  ;;  %10077 = vmatprep.subr.bf16.mxu0 %v12685_v20  ;;  %v10708_v15 = vrot.slane %v10707_v62, 2  ;;  %v10582_v20 = vmul.f32 %v16585_v45, %v16585_v45  ;;  %v10614_v17 = vmul.f32 %v16625_v24, %v16625_v24 }
 0x517   : > { %v16891_v55 = vld [vmem:[#allocation8 + $0x470] sm:$0xff]  ;;  %10148 = vmatprep.subr.bf16.mxu1 %v12941_v0  ;;  %v10581_v0 = vmul.f32 %v16575_v25, %v16575_v25  ;;  %v10391_v44 = vadd.f32 %v10390_v47, %v16608_v2  ;;  %v10402_v47 = vadd.f32 %v16585_v45, %v16567_v38  ;;  %v10387_v2 = vrot.slane %v10386_v11, 1  ;;  %v17127_v38 = vld [vmem:[#allocation8 + $0x8f8] sm:$0xff] }
 0x518   : > { %v16899_v49 = vld [vmem:[#allocation8 + $0xc30] sm:$0xff] }
 0x519   : > { %v16901_v23 = vld [vmem:[#allocation8 + $0xc70] sm:$0xff]  ;;  %10078 = vmatpush2.bf16.msra.mxu0 %v12684_v58  ;;  %v10597_v58 = vmul.f32 %v16591_v48, %v16591_v48  ;;  %v10392_v14 = vadd.f32 %v10391_v44, %v16645_v31  ;;  %v10374_v44 = vrot.slane %v10373_v10, 1 }
 0x51a   : > { %v12893_v26 = vcombine.high %v16899_v49, %v16901_v23  ;;  %10149 = vmatpush2.bf16.msra.mxu1 %v12940_v52  ;;  %10079 = vmatprep.subr.bf16.mxu0 %v12669_v42  ;;  %v10725_v52 = vadd.f32 %v10581_v0, %v10565_v46  ;;  %v10403_v42 = vadd.f32 %v10402_v47, %v16599_v4 }
 0x51b   : > { %10150 = vmatprep.subr.bf16.mxu1 %v12925_v1  ;;  %v10393_v48 = vadd.f32 %v10392_v14, %v16692_v28  ;;  %v10738_v1 = vadd.f32 %v10582_v20, %v10566_v57  ;;  %v10629_v46 = vmul.f32 %v16645_v31, %v16645_v31  ;;  %v10709_v47 = vadd.f32 %v10708_v15, %v10707_v62  ;;  %v16981_v62 = vld [vmem:[#allocation8 + $0xb78] sm:$0xff] }
 0x51c   : > { %v10726_v45 = vadd.f32 %v10725_v52, %v10597_v58  ;;  %v10404_v25 = vadd.f32 %v10403_v42, %v16625_v24  ;;  %v19425_v58 = vcombine.low %v16871_v63, %v16873_v50  ;;  %v19427_v63 = vcombine.high %v16889_v61, %v16891_v55 }
 0x51d   : > { %10080 = vmatpush2.bf16.msra.mxu0 %v12668_v39  ;;  %v10395_v0 = vadd.f32 %v10394_v32, %v10393_v48  ;;  %v10739_v14 = vadd.f32 %v10738_v1, %v10598_v29  ;;  %v10661_v39 = vmul.f32 %v16725_v18, %v16725_v18  ;;  %v16979_v48 = vld [vmem:[#allocation8 + $0xb38] sm:$0xff]  ;;  %v10375_v52 = vadd.f32 %v10374_v44, %v10373_v10 }
 0x51e   : > { %10151 = vmatpush2.bf16.msra.mxu1 %v12924_v13  ;;  %10081 = vmatprep.subr.bf16.mxu0 %v12653_v37  ;;  %v10727_v20 = vadd.f32 %v10726_v45, %v10613_v56  ;;  %v10405_v57 = vadd.f32 %v10404_v25, %v16672_v12  ;;  %v10630_v13 = vmul.f32 %v16672_v12, %v16672_v12  ;;  %v10407_v45 = vsel %vm5765_vm0, %v16746_v40, 0.0  ;;  %v17003_v1 = vld [vmem:[#allocation8 + $0x2f8] sm:$0xff] }
 0x51f   : > { %10152 = vmatprep.subr.bf16.mxu1 %v12909_v30  ;;  %v10645_v37 = vmul.f32 %v16692_v28, %v16692_v28  ;;  %v10722_v30 = vadd.f32 %v10721_v33, %v10720_v53  ;;  %v10740_v15 = vadd.f32 %v10739_v14, %v10614_v17  ;;  %v10662_v25 = vmul.f32 %v16746_v40, %v16746_v40  ;;  %v17005_v17 = vld [vmem:[#allocation8 + $0xab8] sm:$0xff] }
 0x520   : > { %v19426_v56 = vcombine.low %v16877_v8, %v16879_v5  ;;  %v10728_v50 = vadd.f32 %v10727_v20, %v10629_v46  ;;  %v10406_v29 = vadd.f32 %v10405_v57, %v16713_v22  ;;  %v10646_v53 = vmul.f32 %v16713_v22, %v16713_v22  ;;  %v17001_v5 = vld [vmem:[#allocation8 + $0x2b8] sm:$0xff] }
 0x521   : > { %10082 = vmatpush2.bf16.msra.mxu0 %v19425_v58  ;;  %v10396_v32 = vrot.slane %v10395_v0, 4  ;;  %v10730_v42 = vsel %vm5765_vm0, %v10661_v39, 0.0  ;;  %v10710_v46 = vrot.slane %v10709_v47, 1  ;;  %v10741_v14 = vadd.f32 %v10740_v15, %v10630_v13  ;;  %v17014_v44 = vld [vmem:[#allocation8 + $0x238] sm:$0xff] }
 0x522   : > { %10153 = vmatpush2.bf16.msra.mxu1 %v19426_v56  ;;  %10083 = vmatprep.subr.bf16.mxu0 %v19427_v63  ;;  %v10729_v20 = vadd.f32 %v10728_v50, %v10645_v37  ;;  %v17007_v57 = vadd.f32 %v10407_v45, %v10406_v29  ;;  %v19428_v10 = vcombine.low %v16889_v61, %v16891_v55  ;;  %v17016_v39 = vld [vmem:[#allocation8 + $0x278] sm:$0xff]  ;;  %v10723_v56 = vrot.slane %v10722_v30, 1 }
 0x523   : > { %10154 = vmatprep.subr.bf16.mxu1 %v12893_v26  ;;  %v17012_v26 = vld [vmem:[#allocation8 + $0xaf8] sm:$0xff]  ;;  %v10388_v58 = vadd.f32 %v10387_v2, %v10386_v11  ;;  %v10743_v63 = vsel %vm5765_vm0, %v10662_v25, 0.0  ;;  %v19429_v13 = vcombine.low %v16899_v49, %v16901_v23  ;;  %v19430_v37 = vcombine.high %v16903_v21, %v16913_v59 }
 0x524   : > { %v12863_v61 = vcombine.high %v16979_v48, %v16981_v62  ;;  %v10742_v55 = vadd.f32 %v10741_v14, %v10646_v53  ;;  %v17027_v15 = vadd.f32 %v10396_v32, %v10395_v0  ;;  %v17029_v45 = vadd.f32 %v10730_v42, %v10729_v20  ;;  %v17031_v2 = vpop.f32.mrf.mxu0  ;;  %v17040_v25 = vld [vmem:[#allocation8 + $0xa38] sm:$0xff] }
 0x525   : > { %10084 = vmatpush2.bf16.msra.mxu0 %v19428_v10  ;;  %v17033_v11 = vpop.f32.mrf.mxu1  ;;  %v19431_v49 = vcombine.high %v16915_v6, %v16917_v3  ;;  %v12591_v23 = vcombine.high %v17001_v5, %v17003_v1  ;;  %v17042_v50 = vld [vmem:[#allocation8 + $0xa78] sm:$0xff]  ;;  %v12847_v53 = vcombine.high %v17005_v17, %v17012_v26  ;;  %v17059_v10 = vmul.f32 0.020408163, %v10375_v52 }
 0x526   : > { %10155 = vmatpush2.bf16.msra.mxu1 %v19429_v13  ;;  %10195 = vmatprep.subr.bf16.mxu0 %v19430_v37  ;;  %v17053_v42 = vld [vmem:[#allocation8 + $0x1b8] sm:$0xff]  ;;  %v10711_v13 = vadd.f32 %v10710_v46, %v10709_v47  ;;  %v10409_v37 = vrot.slane %v17007_v57, 4  ;;  %v19434_v0 = vcombine.low %v16903_v21, %v16913_v59  ;;  %v17068_v32 = vpop.f32.mrf.mxu0  ;;  %v17078_v47 = vmul.f32 0.020408163, %v10388_v58 }
 0x527   : > { %10266 = vmatprep.subr.bf16.mxu1 %v19431_v49  ;;  %v17055_v14 = vld [vmem:[#allocation8 + $0x1f8] sm:$0xff]  ;;  %19432 = vst [vmem:[#allocation90_spill] sm:$0xff] %v17059_v10  ;;  %v17062_v49 = vadd.f32 %v10743_v63, %v10742_v55  ;;  %v17070_v8 = vpop.f32.mrf.mxu1  ;;  %v10724_v46 = vadd.f32 %v10723_v56, %v10722_v30  ;;  %v19436_v63 = vcombine.low %v16915_v6, %v16917_v3  ;;  %v10732_v58 = vrot.slane %v17029_v45, 4  ;;  %v19438_v56 = vld [vmem:[#allocation31_spill] sm:$0xff]  ;;  %v19439_v55 = vld [vmem:[#allocation37_spill] sm:$0xff] }
 0x528   : > { %10086 = vmatmul.mubr.bf16.vlgmr.msra.gmra.mxu0 %v16206_v41  ;;  %v17057_v20 = vld [vmem:[#allocation8 + $0x9b8] sm:$0xff]  ;;  %19435 = vst [vmem:[#allocation91_spill] sm:$0xff] %v17078_v47  ;;  %v19437_v21 = vcombine.high %v16921_v36, %v16923_v9  ;;  %v9665_v18 = vpop.f32.mrf.mxu0  ;;  %v17116_v31 = vmul.f32 0.020408163, %v10711_v13  ;;  %v17120_v59 = vmul.f32 %v17059_v10, %v17059_v10  ;;  %v19440_v22 = vcombine.low %v16921_v36, %v16923_v9  ;;  %v19450_v36 = vld [vmem:[#allocation41_spill] sm:$0xff] }
 0x529   : > { %v19433_v29 = vld [vmem:[#allocation36_spill] sm:$0xff]  ;;  %10196 = vmatpush1.bf16.msra.mxu0 %v19434_v0  ;;  %v10398_v0 = vrot.slane %v17027_v15, 2  ;;  %v9736_v30 = vpop.f32.mrf.mxu1  ;;  %10095 = vmatprep.mubr.bf16.mxu0 %v19438_v56  ;;  %v10745_v24 = vrot.slane %v17062_v49, 4  ;;  %v17133_v34 = vmul.f32 0.020408163, %v10724_v46  ;;  %v17137_v10 = vmul.f32 %v17078_v47, %v17078_v47 }
 0x52a   : > { %10157 = vmatmul.mubr.bf16.vlgmr.msra.gmra.mxu1 %v19433_v29  ;;  %v17072_v33 = vld [vmem:[#allocation8 + $0x9f8] sm:$0xff]  ;;  %10197 = vmatprep.subr.bf16.mxu0 %v19437_v21  ;;  %v9667_v3 = vpop.f32.mrf.mxu0  ;;  %v17184_v41 = vadd.f32 %v9736_v30, %v9665_v18  ;;  %v19447_v18 = vcombine.high %v17014_v44, %v17016_v39 }
 0x52b   : > { %v17074_v40 = vld [vmem:[#allocation8 + $0x138] sm:$0xff]  ;;  %10267 = vmatpush1.bf16.msra.mxu1 %v19436_v63  ;;  %10166 = vmatprep.mubr.bf16.mxu1 %v19439_v55  ;;  %v9738_v4 = vpop.f32.mrf.mxu1  ;;  %v10399_v9 = vadd.f32 %v10398_v0, %v17027_v15  ;;  %v10746_v47 = vadd.f32 %v10745_v24, %v17062_v49  ;;  %v19443_v15 = vld [vmem:[#allocation39_spill] sm:$0xff]  ;;  %v19446_v24 = vcombine.low %v17005_v17, %v17012_v26 }
 0x52c   : > { %v17076_v52 = vld [vmem:[#allocation8 + $0x178] sm:$0xff]  ;;  %10268 = vmatprep.subr.bf16.mxu1 %v12863_v61  ;;  %v10410_v61 = vadd.f32 %v10409_v37, %v17007_v57  ;;  %v19441_v57 = vcombine.low %v16979_v48, %v16981_v62  ;;  %v10733_v37 = vadd.f32 %v10732_v58, %v17029_v45  ;;  %v9671_v46 = vpop.f32.mrf.mxu0  ;;  %v19444_v45 = vcombine.low %v17001_v5, %v17003_v1 }
 0x52d   : > { %v17097_v63 = vld [vmem:[#allocation8 + $0x938] sm:$0xff]  ;;  %10198 = vmatpush1.bf16.msra.mxu0 %v19440_v22  ;;  %v9742_v55 = vpop.f32.mrf.mxu1  ;;  %19445 = vst [vmem:[#allocation92_spill] sm:$0xff] %v17184_v41  ;;  %v10400_v49 = vrot.slane %v10399_v9, 1  ;;  %v17193_v0 = vadd.f32 %v9738_v4, %v9667_v3  ;;  %v19448_v17 = vcombine.high %v17040_v25, %v17042_v50  ;;  %v17209_v4 = vadd.f32 %v17033_v11, %v17031_v2 }
 0x52e   : > { %v17099_v21 = vld [vmem:[#allocation8 + $0x978] sm:$0xff]  ;;  %10199 = vmatprep.subr.bf16.mxu0 %v12591_v23  ;;  %v10411_v22 = vrot.slane %v10410_v61, 2  ;;  %v17211_v3 = vadd.f32 %v9742_v55, %v9671_v46  ;;  %v10747_v26 = vrot.slane %v10746_v47, 2  ;;  %v17220_v1 = vadd.f32 %v17070_v8, %v17068_v32 }
 0x52f   : > { %v17110_v28 = vld [vmem:[#allocation8 + $0xb8] sm:$0xff]  ;;  %10269 = vmatpush1.bf16.msra.mxu1 %v19441_v57  ;;  %v19442_v57 = vld [vmem:[#allocation35_spill] sm:$0xff]  ;;  %19449 = vst [vmem:[#allocation93_spill] sm:$0xff] %v17209_v4  ;;  %v19451_v2 = vcombine.low %v17014_v44, %v17016_v39  ;;  %v19453_v8 = vcombine.low %v17040_v25, %v17042_v50  ;;  %v19454_v39 = vsub.f32 %v16824_v7, %v16828_v16 }
 0x530   : > { %v17112_v6 = vld [vmem:[#allocation8 + $0xf8] sm:$0xff]  ;;  %10270 = vmatprep.subr.bf16.mxu1 %v12847_v53  ;;  %10096 = vmatmul.mubr.bf16.gmra.mxu0 %v19442_v57  ;;  %v9673_v53 = vpop.f32.mrf.mxu0  ;;  %v9744_v57 = vpop.f32.mrf.mxu1  ;;  %v10412_v5 = vadd.f32 %v10411_v22, %v10410_v61  ;;  %v19455_v25 = vcombine.high %v17053_v42, %v17055_v14  ;;  %v19456_v50 = vcombine.high %v17057_v20, %v17072_v33 }
 0x531   : > { %v17114_v12 = vld [vmem:[#allocation8 + $0x8b8] sm:$0xff]  ;;  %10200 = vmatpush1.bf16.msra.mxu0 %v19444_v45  ;;  %v10734_v45 = vrot.slane %v10733_v37, 2  ;;  %10105 = vmatprep.mubr.bf16.mxu0 %v19450_v36  ;;  %v17230_v61 = vadd.f32 %v9744_v57, %v9673_v53  ;;  %v10930_v32 = vmax.f32 %v19454_v39, 0.0  ;;  %v10584_v57 = vmul.f32 %v17193_v0, %v17193_v0  ;;  %v19457_v53 = vld [vmem:[#allocation42_spill] sm:$0xff] }
 0x532   : > { %v17131_v13 = vld [vmem:[#allocation8 + $0x78] sm:$0xff]  ;;  %10167 = vmatmul.mubr.bf16.gmra.mxu1 %v19443_v15  ;;  %v9675_v15 = vpop.f32.mrf.mxu0  ;;  %v9746_v51 = vpop.f32.mrf.mxu1  ;;  %10201 = vmatprep.subr.bf16.mxu0 %v19447_v18  ;;  %v10567_v7 = vmul.f32 %v17209_v4, %v17209_v4  ;;  %v10599_v16 = vmul.f32 %v17211_v3, %v17211_v3  ;;  %v10415_v39 = vadd.f32 %v17184_v41, %v17209_v4 }
 0x533   : > { %v17152_v62 = vld [vmem:[#allocation8 + $0x838] sm:$0xff]  ;;  %10271 = vmatpush1.bf16.msra.mxu1 %v19446_v24  ;;  %v17232_v22 = vadd.f32 %v9746_v51, %v9675_v15  ;;  %v17244_v18 = vadd.f32 %v10734_v45, %v10733_v37  ;;  %v17263_v45 = vadd.f32 %v10747_v26, %v10746_v47  ;;  %v19460_v26 = vcombine.low %v17057_v20, %v17072_v33 }
 0x534   : > { %v17154_v23 = vld [vmem:[#allocation8 + $0x878] sm:$0xff]  ;;  %10272 = vmatprep.subr.bf16.mxu1 %v19448_v17  ;;  %v9677_v11 = vpop.f32.mrf.mxu0  ;;  %v9748_v55 = vpop.f32.mrf.mxu1  ;;  %v10583_v17 = vmul.f32 %v17184_v41, %v17184_v41  ;;  %v19461_v41 = vsub.f32 %v16818_v27, %v16822_v19  ;;  %v19463_v33 = vcombine.high %v17097_v63, %v17099_v21 }
 0x535   : > { %v17165_v58 = vld [vmem:[#allocation8 + $0x7b8] sm:$0xff]  ;;  %10202 = vmatpush1.bf16.msra.mxu0 %v19451_v2  ;;  %v17242_v2 = vadd.f32 %v10400_v49, %v10399_v9  ;;  %v17258_v9 = vadd.f32 %v9748_v55, %v9677_v11  ;;  %v10413_v49 = vrot.slane %v10412_v5, 1  ;;  %v10615_v47 = vmul.f32 %v17232_v22, %v17232_v22 }
 0x536   : > { %v17167_v48 = vld [vmem:[#allocation8 + $0x7f8] sm:$0xff]  ;;  %v9681_v51 = vpop.f32.mrf.mxu0  ;;  %v9752_v15 = vpop.f32.mrf.mxu1  ;;  %10203 = vmatprep.subr.bf16.mxu0 %v19455_v25  ;;  %v19458_v25 = vld [vmem:[#allocation43_spill] sm:$0xff] }
 0x537   : > { %v17178_v56 = vld [vmem:[#allocation8 + $0xfb8] sm:$0xff]  ;;  %10273 = vmatpush1.bf16.msra.mxu1 %v19453_v8  ;;  %v17260_v37 = vadd.f32 %v9752_v15, %v9681_v51  ;;  %v10568_v8 = vmul.f32 %v17220_v1, %v17220_v1  ;;  %v10751_v51 = vadd.f32 %v10583_v17, %v10567_v7  ;;  %v10600_v15 = vmul.f32 %v17230_v61, %v17230_v61 }
 0x538   : > { %v17180_v29 = vld [vmem:[#allocation8 + $0xff8] sm:$0xff]  ;;  %10274 = vmatprep.subr.bf16.mxu1 %v19456_v50  ;;  %10106 = vmatmul.mubr.bf16.gmra.mxu0 %v19457_v53  ;;  %v19459_v50 = vcombine.low %v17053_v42, %v17055_v14  ;;  %v9683_v11 = vpop.f32.mrf.mxu0  ;;  %v9754_v55 = vpop.f32.mrf.mxu1  ;;  %v17285_v42 = vmax.f32 %v19461_v41, 0.0  ;;  %v10428_v14 = vadd.f32 %v17193_v0, %v17220_v1  ;;  %v10416_v7 = vadd.f32 %v10415_v39, %v17211_v3 }
 0x539   : > { %v17203_v30 = vld [vmem:[#allocation8 + $0x738] sm:$0xff]  ;;  %v17280_v44 = vadd.f32 %v9754_v55, %v9683_v11  ;;  %v10764_v17 = vadd.f32 %v10584_v57, %v10568_v8  ;;  %v10752_v20 = vadd.f32 %v10751_v51, %v10599_v16  ;;  %v10616_v41 = vmul.f32 %v17258_v9, %v17258_v9 }
 0x53a   : > { %v17205_v24 = vld [vmem:[#allocation8 + $0x778] sm:$0xff]  ;;  %10204 = vmatpush1.bf16.msra.mxu0 %v19459_v50  ;;  %v9685_v50 = vpop.f32.mrf.mxu0  ;;  %v9756_v4 = vpop.f32.mrf.mxu1  ;;  %v10631_v27 = vmul.f32 %v17260_v37, %v17260_v37  ;;  %v17303_v8 = vadd.f32 1e-05, %v10930_v32  ;;  %v10414_v39 = vadd.f32 %v10413_v49, %v10412_v5  ;;  %v10417_v11 = vadd.f32 %v10416_v7, %v17232_v22 }
 0x53b   : > { %v19452_v46 = vld [vmem:[#allocation40_spill] sm:$0xff]  ;;  %10275 = vmatpush1.bf16.msra.mxu1 %v19460_v26  ;;  %v17300_v19 = vadd.f32 %v9756_v4, %v9685_v50  ;;  %v19465_v16 = vcombine.low %v17074_v40, %v17076_v52  ;;  %v19466_v26 = vld [vmem:[#allocation45_spill] sm:$0xff]  ;;  %v10753_v4 = vadd.f32 %v10752_v20, %v10615_v47  ;;  %v10632_v50 = vmul.f32 %v17280_v44, %v17280_v44 }
 0x53c   : > { %10176 = vmatprep.mubr.bf16.mxu1 %v19452_v46  ;;  %10276 = vmatprep.subr.bf16.mxu1 %v19463_v33  ;;  %v19464_v57 = vld [vmem:[#allocation44_spill] sm:$0xff]  ;;  %v9687_v55 = vpop.f32.mrf.mxu0  ;;  %v9758_v51 = vpop.f32.mrf.mxu1  ;;  %v10765_v33 = vadd.f32 %v10764_v17, %v10600_v15  ;;  %v19467_v5 = vcombine.low %v17097_v63, %v17099_v21  ;;  %v19468_v49 = vsub.f32 %v17116_v31, %v17120_v59  ;;  %v10749_v31 = vrot.slane %v17263_v45, 1 }
 0x53d   : > { %10177 = vmatmul.mubr.bf16.gmra.mxu1 %v19458_v25  ;;  %v19462_v25 = vcombine.high %v17074_v40, %v17076_v52  ;;  %10115 = vmatprep.mubr.bf16.mxu0 %v19464_v57  ;;  %v17316_v32 = vadd.f32 %v9758_v51, %v9687_v55  ;;  %v10647_v15 = vmul.f32 %v17300_v19, %v17300_v19  ;;  %13752 = vrsqrt.f32 %v17303_v8 }
 0x53e   : > { %10186 = vmatprep.mubr.bf16.mxu1 %v19466_v26  ;;  %v17321_v40 = vmax.f32 %v19468_v49, 0.0  ;;  %v9691_v47 = vpop.f32.mrf.mxu0  ;;  %v9762_v17 = vpop.f32.mrf.mxu1  ;;  %v19469_v63 = vcombine.high %v17110_v28, %v17112_v6  ;;  %v19470_v21 = vcombine.high %v17114_v12, %v17127_v38  ;;  %v10766_v59 = vadd.f32 %v10765_v33, %v10616_v41 }
 0x53f   : > { %10205 = vmatprep.subr.bf16.mxu0 %v19462_v25  ;;  %v10429_v25 = vadd.f32 %v10428_v14, %v17230_v61  ;;  %10277 = vmatpush1.bf16.msra.mxu1 %v19467_v5  ;;  %v10418_v14 = vadd.f32 %v10417_v11, %v17260_v37  ;;  %v10754_v7 = vadd.f32 %v10753_v4, %v10631_v27 }
 0x540   : > { %10206 = vmatpush1.bf16.msra.mxu0 %v19465_v16  ;;  %10278 = vmatprep.subr.bf16.mxu1 %v19470_v21  ;;  %v17334_v20 = vadd.f32 %v9762_v17, %v9691_v47  ;;  %v10648_v55 = vmul.f32 %v17316_v32, %v17316_v32  ;;  %v19471_v51 = vcombine.low %v17110_v28, %v17112_v6  ;;  %v9693_v41 = vpop.f32.mrf.mxu0  ;;  %v9764_v27 = vpop.f32.mrf.mxu1  ;;  %v17358_v28 = vmul.f32 0.020408163, %v10414_v39 }
 0x541   : > { %v10430_v52 = vadd.f32 %v10429_v25, %v17258_v9  ;;  %10207 = vmatprep.subr.bf16.mxu0 %v19469_v63  ;;  %10116 = vmatmul.mubr.bf16.gmra.mxu0 %v16309_v43  ;;  %v10736_v25 = vrot.slane %v17244_v18, 1  ;;  %v10419_v16 = vadd.f32 %v10418_v14, %v17300_v19  ;;  %v10767_v33 = vadd.f32 %v10766_v59, %v10632_v50  ;;  %v17364_v63 = vld [vmem:[#allocation8 + $0xf38] sm:$0xff] }
 0x542   : > { %v10420_v4 = vsel %vm5765_vm0, %v17334_v20, 0.0  ;;  %v10663_v5 = vmul.f32 %v17334_v20, %v17334_v20  ;;  %v19472_v49 = vcombine.low %v17114_v12, %v17127_v38  ;;  %v19473_v14 = vcombine.high %v17129_v60, %v17131_v13  ;;  %v17366_v38 = vld [vmem:[#allocation8 + $0xf78] sm:$0xff]  ;;  %v9695_v12 = vpop.f32.mrf.mxu0  ;;  %v9766_v21 = vpop.f32.mrf.mxu1  ;;  %10227 = vmatprep.mubr.bf16.mxu0 %v16200_v35 }
 0x543   : > { %v10431_v11 = vadd.f32 %v10430_v52, %v17280_v44  ;;  %v17353_v52 = vadd.f32 %v9764_v27, %v9693_v41  ;;  %v10755_v6 = vadd.f32 %v10754_v7, %v10647_v15  ;;  %v10421_v47 = vadd.f32 %v10420_v4, %v10419_v16 }
 0x544   : > { %10208 = vmatpush1.bf16.msra.mxu0 %v19471_v51  ;;  %10279 = vmatpush1.bf16.msra.mxu1 %v19472_v49  ;;  %v19474_v17 = vcombine.high %v17152_v62, %v17154_v23  ;;  %v10750_v59 = vadd.f32 %v10749_v31, %v17263_v45  ;;  %v10756_v39 = vsel %vm5765_vm0, %v10663_v5, 0.0  ;;  %v10768_v16 = vadd.f32 %v10767_v33, %v10648_v55  ;;  %v9696_v35 = vpop.f32.mrf.mxu0  ;;  %v9767_v45 = vpop.f32.mrf.mxu1 }
 0x545   : > { %10187 = vmatmul.mubr.bf16.gmra.mxu1 %v16311_v54  ;;  %10209 = vmatprep.subr.bf16.mxu0 %v19473_v14  ;;  %v10432_v50 = vadd.f32 %v10431_v11, %v17316_v32  ;;  %v10433_v15 = vsel %vm5765_vm0, %v17353_v52, 0.0  ;;  %v10664_v7 = vmul.f32 %v17353_v52, %v17353_v52  ;;  %v19475_v11 = vld [vmem:[#allocation32_spill] sm:$0xff]  ;;  %v10422_v51 = vrot.slane %v10421_v47, 4 }
 0x546   : > { %10280 = vmatprep.subr.bf16.mxu1 %v19474_v17  ;;  %10298 = vmatprep.mubr.bf16.mxu1 %v19475_v11  ;;  %v10757_v41 = vadd.f32 %v10756_v39, %v10755_v6  ;;  %v19476_v4 = vcombine.low %v17129_v60, %v17131_v13  ;;  %v17380_v31 = vmul.f32 0.020408163, %v17242_v2  ;;  %v10737_v5 = vadd.f32 %v10736_v25, %v17244_v18  ;;  %v17392_v13 = vld [vmem:[#allocation8 + $0x6b8] sm:$0xff] }
 0x547   : > { %v10434_v27 = vadd.f32 %v10433_v15, %v10432_v50  ;;  %v10769_v49 = vsel %vm5765_vm0, %v10664_v7, 0.0  ;;  %v19477_v14 = vcombine.low %v17152_v62, %v17154_v23  ;;  %v19478_v55 = vcombine.high %v17165_v58, %v17167_v48  ;;  %v6352_v25 = vld [vmem:[#allocation8 + $0x6f8] sm:$0xff] }
 0x548   : > { %10210 = vmatpush1.bf16.msra.mxu0 %v19476_v4  ;;  %v12991_v60 = vcombine.high %v17364_v63, %v17366_v38  ;;  %v10423_v33 = vadd.f32 %v10422_v51, %v10421_v47  ;;  %v10758_v2 = vrot.slane %v10757_v41, 4  ;;  %v10770_v50 = vadd.f32 %v10769_v49, %v10768_v16  ;;  %v6600_v62 = vld [vmem:[#allocation8 + $0xeb8] sm:$0xff] }
 0x549   : > { %10281 = vmatpush1.bf16.msra.mxu1 %v19477_v14  ;;  %10211 = vmatprep.subr.bf16.mxu0 %v19478_v55  ;;  %v10435_v6 = vrot.slane %v10434_v27, 4  ;;  %v19479_v18 = vcombine.high %v17178_v56, %v17180_v29  ;;  %v6608_v23 = vld [vmem:[#allocation8 + $0xef8] sm:$0xff]  ;;  %v10886_v17 = vmul.f32 0.020408163, %v10750_v59  ;;  %v10902_v12 = vmul.f32 %v17358_v28, %v17358_v28 }
 0x54a   : > { %v12734_v21 = vcombine.low %v17203_v30, %v17205_v24  ;;  %v12990_v47 = vcombine.low %v17364_v63, %v17366_v38  ;;  %v10424_v39 = vrot.slane %v10423_v33, 2  ;;  %v10759_v15 = vadd.f32 %v10758_v2, %v10757_v41  ;;  %v17415_v41 = vld [vmem:[#allocation8 + $0x638] sm:$0xff] }
 0x54b   : > { %10282 = vmatprep.subr.bf16.mxu1 %v19479_v18  ;;  %v10436_v7 = vadd.f32 %v10435_v6, %v10434_v27  ;;  %v10771_v11 = vrot.slane %v10770_v50, 4  ;;  %v19480_v16 = vcombine.low %v17165_v58, %v17167_v48  ;;  %v10885_v51 = vmul.f32 0.020408163, %v10737_v5  ;;  %v6336_v5 = vld [vmem:[#allocation8 + $0x678] sm:$0xff] }
 0x54c   : > { %v10901_v59 = vmul.f32 %v17380_v31, %v17380_v31  ;;  %v19481_v4 = vcombine.low %v17178_v56, %v17180_v29  ;;  %v19482_v35 = vcombine.high %v17203_v30, %v17205_v24  ;;  %v12719_v63 = vcombine.high %v17392_v13, %v6352_v25  ;;  %v6584_v49 = vld [vmem:[#allocation8 + $0xe38] sm:$0xff] }
 0x54d   : > { %10212 = vmatpush2.bf16.msra.mxu0 %v19480_v16  ;;  %v12975_v38 = vcombine.high %v6600_v62, %v6608_v23  ;;  %v10425_v27 = vadd.f32 %v10424_v39, %v10423_v33  ;;  %v10760_v48 = vrot.slane %v10759_v15, 2  ;;  %v10437_v58 = vrot.slane %v10436_v7, 2  ;;  %v6592_v14 = vld [vmem:[#allocation8 + $0xe78] sm:$0xff] }
 0x54e   : > { %10283 = vmatpush2.bf16.msra.mxu1 %v19481_v4  ;;  %10213 = vmatprep.subr.bf16.mxu0 %v19482_v35  ;;  %v10772_v45 = vadd.f32 %v10771_v11, %v10770_v50  ;;  %v19483_v29 = vsub.f32 %v17133_v34, %v17137_v10  ;;  %v10918_v55 = vsub.f32 %v10886_v17, %v10902_v12  ;;  %v6312_v39 = vld [vmem:[#allocation8 + $0x5b8] sm:$0xff] }
 0x54f   : > { %10284 = vmatprep.subr.bf16.mxu1 %v12991_v60  ;;  %v12718_v30 = vcombine.low %v17392_v13, %v6352_v25  ;;  %v12974_v24 = vcombine.low %v6600_v62, %v6608_v23  ;;  %v10426_v2 = vrot.slane %v10425_v27, 1  ;;  %v10761_v6 = vadd.f32 %v10760_v48, %v10759_v15  ;;  %v6320_v13 = vld [vmem:[#allocation8 + $0x5f8] sm:$0xff] }
 0x550   : > { %v10932_v56 = vmax.f32 %v19483_v29, 0.0  ;;  %v10438_v18 = vadd.f32 %v10437_v58, %v10436_v7  ;;  %v10773_v16 = vrot.slane %v10772_v45, 2  ;;  %v10917_v33 = vsub.f32 %v10885_v51, %v10901_v59  ;;  %v6568_v25 = vld [vmem:[#allocation8 + $0xdb8] sm:$0xff] }
 0x551   : > { %10214 = vmatpush2.bf16.msra.mxu0 %v12734_v21  ;;  %v12703_v60 = vcombine.high %v17415_v41, %v6336_v5  ;;  %v12959_v50 = vcombine.high %v6584_v49, %v6592_v14  ;;  %v10427_v34 = vadd.f32 %v10426_v2, %v10425_v27  ;;  %v10762_v10 = vrot.slane %v10761_v6, 1  ;;  %v6576_v62 = vld [vmem:[#allocation8 + $0xdf8] sm:$0xff] }
 0x552   : > { %10285 = vmatpush2.bf16.msra.mxu1 %v12990_v47  ;;  %10215 = vmatprep.subr.bf16.mxu0 %v12719_v63  ;;  %v10439_v17 = vrot.slane %v10438_v18, 1  ;;  %v10774_v12 = vadd.f32 %v10773_v16, %v10772_v45  ;;  %v10949_v23 = vadd.f32 1e-05, %v17321_v40  ;;  %v10950_v21 = vadd.f32 1e-05, %v10932_v56  ;;  %v6304_v58 = vld [vmem:[#allocation8 + $0x578] sm:$0xff] }
 0x553   : > { %10286 = vmatprep.subr.bf16.mxu1 %v12975_v38  ;;  %v10934_v15 = vmax.f32 %v10918_v55, 0.0  ;;  %v12702_v8 = vcombine.low %v17415_v41, %v6336_v5  ;;  %v17425_v47 = vmul.f32 0.020408163, %v10427_v34  ;;  %v10763_v7 = vadd.f32 %v10762_v10, %v10761_v6  ;;  %v6296_v41 = vld [vmem:[#allocation8 + $0x538] sm:$0xff] }
 0x554   : > { %v10440_v11 = vadd.f32 %v10439_v17, %v10438_v18  ;;  %v10775_v51 = vrot.slane %v10774_v12, 1  ;;  %v10933_v59 = vmax.f32 %v10917_v33, 0.0  ;;  %v12958_v4 = vcombine.low %v6584_v49, %v6592_v14  ;;  %v6552_v29 = vld [vmem:[#allocation8 + $0xd38] sm:$0xff] }
 0x555   : > { %10216 = vmatpush2.bf16.msra.mxu0 %v12718_v30  ;;  %v12687_v35 = vcombine.high %v6312_v39, %v6320_v13  ;;  %v12943_v63 = vcombine.high %v6568_v25, %v6576_v62  ;;  %v10887_v38 = vmul.f32 0.020408163, %v10763_v7  ;;  %v10903_v40 = vmul.f32 %v17425_v47, %v17425_v47  ;;  %v6560_v56 = vld [vmem:[#allocation8 + $0xd78] sm:$0xff] }
 0x556   : > { %10287 = vmatpush2.bf16.msra.mxu1 %v12974_v24  ;;  %10217 = vmatprep.subr.bf16.mxu0 %v12703_v60  ;;  %v17429_v27 = vmul.f32 0.020408163, %v10440_v11  ;;  %v10776_v48 = vadd.f32 %v10775_v51, %v10774_v12  ;;  %v10947_v45 = vadd.f32 1e-05, %v17285_v42  ;;  %13754 = vrsqrt.f32 %v10950_v21  ;;  %v6280_v33 = vld [vmem:[#allocation8 + $0x4b8] sm:$0xff] }
 0x557   : > { %10288 = vmatprep.subr.bf16.mxu1 %v12959_v50  ;;  %v12686_v5 = vcombine.low %v6312_v39, %v6320_v13  ;;  %v10952_v55 = vadd.f32 1e-05, %v10934_v15  ;;  %v10919_v49 = vsub.f32 %v10887_v38, %v10903_v40  ;;  %13756 = vrsqrt.f32 %v10949_v23  ;;  %v6288_v60 = vld [vmem:[#allocation8 + $0x4f8] sm:$0xff] }
 0x558   : > { %v10888_v14 = vmul.f32 0.020408163, %v10776_v48  ;;  %v10904_v30 = vmul.f32 %v17429_v27, %v17429_v27  ;;  %v12942_v24 = vcombine.low %v6568_v25, %v6576_v62  ;;  %v12671_v2 = vcombine.high %v6296_v41, %v6304_v58  ;;  %v6536_v50 = vld [vmem:[#allocation8 + $0xcb8] sm:$0xff]  ;;  %v13753_v25 = vpop.eup %13752 }
 0x559   : > { %10218 = vmatpush2.bf16.msra.mxu0 %v12702_v8  ;;  %v10951_v6 = vadd.f32 1e-05, %v10933_v59  ;;  %v10935_v18 = vmax.f32 %v10919_v49, 0.0  ;;  %v12927_v42 = vcombine.high %v6552_v29, %v6560_v56  ;;  %13758 = vrsqrt.f32 %v10947_v45  ;;  %v6544_v39 = vld [vmem:[#allocation8 + $0xcf8] sm:$0xff] }
 0x55a   : > { %10289 = vmatpush2.bf16.msra.mxu1 %v12958_v4  ;;  %10219 = vmatprep.subr.bf16.mxu0 %v12687_v35  ;;  %v10920_v16 = vsub.f32 %v10888_v14, %v10904_v30  ;;  %13760 = vrsqrt.f32 %v10952_v55  ;;  %v12670_v17 = vcombine.low %v6296_v41, %v6304_v58  ;;  %v12926_v12 = vcombine.low %v6552_v29, %v6560_v56  ;;  %v6264_v21 = vld [vmem:[#allocation8 + $0x438] sm:$0xff]  ;;  %v19484_v55 = vld [vmem:[#allocation38_spill] sm:$0xff] }
 0x55b   : > { %10290 = vmatprep.subr.bf16.mxu1 %v12943_v63  ;;  %v10953_v34 = vadd.f32 1e-05, %v10935_v18  ;;  %v12655_v13 = vcombine.high %v6280_v33, %v6288_v60  ;;  %13762 = vrsqrt.f32 %v10951_v6  ;;  %v12911_v23 = vcombine.high %v6536_v50, %v6544_v39  ;;  %v6272_v15 = vld [vmem:[#allocation8 + $0x478] sm:$0xff]  ;;  %v19485_v14 = vld [vmem:[#allocation18_spill] sm:$0xff] }
 0x55c   : > { %v10936_v10 = vmax.f32 %v10920_v16, 0.0  ;;  %v6520_v8 = vld [vmem:[#allocation8 + $0xc38] sm:$0xff]  ;;  %v12654_v11 = vcombine.low %v6280_v33, %v6288_v60  ;;  %v12910_v51 = vcombine.low %v6536_v50, %v6544_v39  ;;  %v12639_v59 = vcombine.high %v6264_v21, %v6272_v15  ;;  %v19488_v16 = vld [vmem:[#allocation31_spill] sm:$0xff]  ;;  %v19489_v60 = vld [vmem:[#allocation37_spill] sm:$0xff] }
 0x55d   : > { %10220 = vmatpush2.bf16.msra.mxu0 %v12686_v5  ;;  %13764 = vrsqrt.f32 %v10953_v34  ;;  %v6528_v7 = vld [vmem:[#allocation8 + $0xc78] sm:$0xff]  ;;  %v12638_v63 = vcombine.low %v6264_v21, %v6272_v15 }
 0x55e   : > { %10291 = vmatpush2.bf16.msra.mxu1 %v12942_v24  ;;  %10221 = vmatprep.subr.bf16.mxu0 %v12671_v2  ;;  %v10954_v62 = vadd.f32 1e-05, %v10936_v10  ;;  %v12895_v4 = vcombine.high %v6520_v8, %v6528_v7  ;;  %v12894_v38 = vcombine.low %v6520_v8, %v6528_v7  ;;  %v19487_v6 = vld [vmem:[#allocation36_spill] sm:$0xff] }
 0x55f   : > { %10292 = vmatprep.subr.bf16.mxu1 %v12927_v42 }
 0x560   : > { %13766 = vrsqrt.f32 %v10954_v62 }
 0x561   : > { %10222 = vmatpush2.bf16.msra.mxu0 %v12670_v17 }
 0x562   : > { %10293 = vmatpush2.bf16.msra.mxu1 %v12926_v12  ;;  %10223 = vmatprep.subr.bf16.mxu0 %v12655_v13 }
 0x563   : > { %10294 = vmatprep.subr.bf16.mxu1 %v12911_v23  ;;  %v13755_v35 = vpop.eup %13754 }
 0x564   : > { %v13757_v40 = vpop.eup %13756  ;;  %v9803_v5 = vpop.f32.mrf.mxu0 }
 0x565   : > { %10224 = vmatpush2.bf16.msra.mxu0 %v12654_v11  ;;  %v10996_v41 = vcombine.low %v13757_v40, %v13755_v35  ;;  %v9874_v56 = vpop.f32.mrf.mxu1  ;;  %v19494_v35 = vld [vmem:[#allocation39_spill] sm:$0xff] }
 0x566   : > { %10295 = vmatpush2.bf16.msra.mxu1 %v12910_v51  ;;  %10225 = vmatprep.subr.bf16.mxu0 %v12639_v59  ;;  %v13759_v48 = vpop.eup %13758  ;;  %v17436_v2 = vadd.f32 %v9874_v56, %v9803_v5  ;;  %v9805_v18 = vpop.f32.mrf.mxu0  ;;  %v19493_v51 = vld [vmem:[#allocation35_spill] sm:$0xff]  ;;  %v19497_v5 = vld [vmem:[#allocation17_spill] sm:$0xff] }
 0x567   : > { %10296 = vmatprep.subr.bf16.mxu1 %v12895_v4  ;;  %v13761_v58 = vpop.eup %13760  ;;  %v10995_v45 = vcombine.low %v13759_v48, %v13753_v25  ;;  %v11012_v30 = vrot.slane %v10996_v41, %v19485_v14  ;;  %v9876_v33 = vpop.f32.mrf.mxu1  ;;  %v17464_v56 = vsub.s32 5, %v19497_v5 }
 0x568   : > { %v13763_v29 = vpop.eup %13762  ;;  %19486 = vst [vmem:[#allocation41_spill] sm:$0xff] %v17436_v2  ;;  %v17442_v34 = vadd.f32 %v9876_v33, %v9805_v18  ;;  %v9807_v10 = vpop.f32.mrf.mxu0  ;;  %v19502_v18 = vld [vmem:[#allocation34_spill] sm:$0xff] }
 0x569   : > { %10226 = vmatpush2.bf16.msra.mxu0 %v12638_v63  ;;  %v10997_v24 = vcombine.low %v13763_v29, %v13761_v58  ;;  %v11005_v50 = vrot.slane %v10995_v45, %v19485_v14  ;;  %v9878_v17 = vpop.f32.mrf.mxu1  ;;  %v17461_v29 = vsub.s32 4, %v19497_v5 }
 0x56a   : > { %10297 = vmatpush2.bf16.msra.mxu1 %v12894_v38  ;;  %v13765_v49 = vpop.eup %13764  ;;  %19490 = vst [vmem:[#allocation40_spill] sm:$0xff] %v17442_v34  ;;  %v17446_v62 = vadd.f32 %v9878_v17, %v9807_v10  ;;  %v9809_v23 = vpop.f32.mrf.mxu0  ;;  %v10945_v38 = vld [vmem:[#allocation10] sm:$0xff]  ;;  %v19527_v34 = vld [vmem:[#allocation71_spill] sm:$0xff] }
 0x56b   : > { %v11027_v12 = vcombine.low %v11005_v50, %v11012_v30  ;;  %v11019_v13 = vrot.slane %v10997_v24, %v19485_v14  ;;  %v9880_v21 = vpop.f32.mrf.mxu1 }
 0x56c   : > { %10228 = vmatmul.mubr.bf16.vlgmr.msra.gmra.mxu0 %v19484_v55  ;;  %19491 = vst [vmem:[#allocation42_spill] sm:$0xff] %v17446_v62  ;;  %v17448_v8 = vadd.f32 %v9880_v21, %v9809_v23  ;;  %v9813_v7 = vpop.f32.mrf.mxu0  ;;  %v17467_v55 = vsub.s32 6, %v19497_v5 }
 0x56d   : > { %10299 = vmatmul.mubr.bf16.vlgmr.msra.gmra.mxu1 %v19487_v6  ;;  %10237 = vmatprep.mubr.bf16.mxu0 %v19488_v16  ;;  %v13767_v42 = vpop.eup %13766  ;;  %v9884_v11 = vpop.f32.mrf.mxu1  ;;  %v11035_v59 = vrot.slane %v11027_v12, %v19485_v14 }
 0x56e   : > { %10308 = vmatprep.mubr.bf16.mxu1 %v19489_v60  ;;  %v10998_v39 = vcombine.low %v13765_v49, %v13767_v42  ;;  %19492 = vst [vmem:[#allocation44_spill] sm:$0xff] %v17448_v8  ;;  %v9815_v63 = vpop.f32.mrf.mxu0  ;;  %v17454_v40 = vadd.f32 %v9884_v11, %v9813_v7  ;;  %19498 = vst [vmem:[#allocation38_spill] sm:$0xff] %v17467_v55  ;;  %v17470_v49 = vsub.s32 7, %v19497_v5  ;;  %v19503_v42 = vld [vmem:[#allocation33_spill] sm:$0xff] }
 0x56f   : > { %v9886_v48 = vpop.f32.mrf.mxu1  ;;  %v19504_v60 = vld [vmem:[#allocation29_spill] sm:$0xff] }
 0x570   : > { %v11026_v25 = vrot.slane %v10998_v39, %v19485_v14  ;;  %19495 = vst [vmem:[#allocation45_spill] sm:$0xff] %v17454_v40  ;;  %v17458_v58 = vadd.f32 %v9886_v48, %v9815_v63  ;;  %v9817_v45 = vpop.f32.mrf.mxu0  ;;  %v19505_v39 = vld [vmem:[#allocation30_spill] sm:$0xff]  ;;  %v19509_v11 = vld [vmem:[#allocation89_spill] sm:$0xff] }
 0x571   : > { %v9888_v30 = vpop.f32.mrf.mxu1 }
 0x572   : > { %v11028_v15 = vcombine.low %v11019_v13, %v11026_v25  ;;  %19496 = vst [vmem:[#allocation32_spill] sm:$0xff] %v17458_v58  ;;  %v17472_v24 = vadd.f32 %v9888_v30, %v9817_v45  ;;  %v19526_v58 = vld [vmem:[#allocation48_spill] sm:$0xff] }
 0x573   : > { %v17476_v6 = vpop.f32.mrf.mxu1 }
 0x574   : > { %10238 = vmatmul.mubr.bf16.gmra.mxu0 %v19493_v51  ;;  %v11042_v4 = vrot.slane %v11028_v15, %v19485_v14  ;;  %19499 = vst [vmem:[#allocation36_spill] sm:$0xff] %v17472_v24  ;;  %19501 = vst [vmem:[#allocation37_spill] sm:$0xff] %v17476_v6  ;;  %v19508_v15 = vld [vmem:[#allocation88_spill] sm:$0xff] }
 0x575   : > { %10309 = vmatmul.mubr.bf16.gmra.mxu1 %v19494_v35  ;;  %10247 = vmatprep.mubr.bf16.mxu0 %v19450_v36  ;;  %v17504_v21 = vpop.f32.mrf.mxu1  ;;  %v19511_v35 = vld [vmem:[#allocation91_spill] sm:$0xff] }
 0x576   : > { %10318 = vmatprep.mubr.bf16.mxu1 %v19452_v46  ;;  %v11043_v41 = vcombine.low %v11035_v59, %v11042_v4  ;;  %v17474_v46 = vpop.f32.mrf.mxu0  ;;  %19507 = vst [vmem:[#allocation39_spill] sm:$0xff] %v17504_v21  ;;  %v19510_v59 = vld [vmem:[#allocation90_spill] sm:$0xff] }
 0x577   : > { %19500 = vst [vmem:[#allocation31_spill] sm:$0xff] %v17474_v46  ;;  %v17526_v30 = vpop.f32.mrf.mxu1 }
 0x578   : > { %v11095_v36 = vmul.f32 %v11043_v41, %v10945_v38  ;;  %v17490_v17 = vpop.f32.mrf.mxu0  ;;  %v19512_v38 = vld [vmem:[#allocation43_spill] sm:$0xff]  ;;  %19514 = vst [vmem:[#allocation33_spill] sm:$0xff] %v17526_v30 }
 0x579   : > { %19506 = vst [vmem:[#allocation35_spill] sm:$0xff] %v17490_v17  ;;  %v19546_v17 = vld [vmem:[#allocation64_spill] sm:$0xff] }
 0x57a   : > { %v17479_v16 = vrot.slane %v11095_v36, %v19502_v18  ;;  %v17482_v33 = vrot.slane %v11095_v36, %v19503_v42  ;;  %v17485_v50 = vrot.slane %v11095_v36, %v19504_v60  ;;  %v17488_v10 = vrot.slane %v11095_v36, %v19505_v39  ;;  %v17516_v48 = vpop.f32.mrf.mxu0 }
 0x57b   : > { %v17493_v12 = vrot.slane %v11095_v36, %v17461_v29  ;;  %v17496_v13 = vrot.slane %v11095_v36, %v17464_v56  ;;  %v17499_v25 = vrot.slane %v11095_v36, %v17467_v55  ;;  %v17502_v23 = vrot.slane %v11095_v36, %v17470_v49  ;;  %19513 = vst [vmem:[#allocation34_spill] sm:$0xff] %v17516_v48 }
 0x57c   : > { %10248 = vmatmul.mubr.bf16.gmra.mxu0 %v19457_v53  ;;  %v11181_v7 = vmul.f32 %v17479_v16, %v19508_v15  ;;  %v11182_v51 = vmul.f32 %v17482_v33, %v19509_v11  ;;  %v11183_v4 = vmul.f32 %v17485_v50, %v19510_v59  ;;  %v11184_v63 = vmul.f32 %v17488_v10, %v19511_v35  ;;  %v19515_v11 = vld [vmem:[#allocation46_spill] sm:$0xff] }
 0x57d   : > { %10319 = vmatmul.mubr.bf16.gmra.mxu1 %v19512_v38  ;;  %v11185_v41 = vmul.f32 %v17493_v12, %v17380_v31  ;;  %v11186_v53 = vmul.f32 %v17496_v13, %v17358_v28  ;;  %v11187_v45 = vmul.f32 %v17499_v25, %v17425_v47  ;;  %v11188_v5 = vmul.f32 %v17502_v23, %v17429_v27  ;;  %v19516_v31 = vld [vmem:[#allocation47_spill] sm:$0xff]  ;;  %v17537_v28 = vpop.f32.mrf.mxu0  ;;  %v19518_v38 = vld [vmem:[#allocation57_spill] sm:$0xff] }
 0x57e   : > { %10257 = vmatprep.mubr.bf16.mxu0 %v19464_v57  ;;  %v11213_v36 = vcombine.low %v11181_v7, %v11182_v51  ;;  %v11214_v15 = vcombine.low %v11183_v4, %v11184_v63  ;;  %v17531_v59 = vmul.f32 %v17479_v16, %v19515_v11  ;;  %v17535_v35 = vmul.f32 %v17482_v33, %v19516_v31  ;;  %v19519_v57 = vld [vmem:[#allocation58_spill] sm:$0xff]  ;;  %v17548_v51 = vpop.f32.mrf.mxu1 }
 0x57f   : > { %19517 = vst [vmem:[#allocation29_spill] sm:$0xff] %v17537_v28  ;;  %10328 = vmatprep.mubr.bf16.mxu1 %v19466_v26  ;;  %v11215_v47 = vcombine.low %v11185_v41, %v11186_v53  ;;  %v11216_v27 = vcombine.low %v11187_v45, %v11188_v5  ;;  %v17542_v24 = vmul.f32 %v17485_v50, %v19518_v38  ;;  %19520 = vst [vmem:[#allocation30_spill] sm:$0xff] %v17548_v51  ;;  %v19521_v11 = vld [vmem:[#allocation74_spill] sm:$0xff]  ;;  %v19522_v26 = vld [vmem:[#allocation75_spill] sm:$0xff]  ;;  %v17560_v53 = vpop.f32.mrf.mxu0 }
 0x580   : > { %v17546_v7 = vmul.f32 %v17488_v10, %v19519_v57  ;;  %v11223_v4 = vrot.slane %v11213_v36, %v19485_v14  ;;  %v11230_v63 = vrot.slane %v11214_v15, %v19485_v14  ;;  %v17554_v31 = vmul.f32 %v17493_v12, %v19521_v11  ;;  %19523 = vst [vmem:[#allocation88_spill] sm:$0xff] %v17560_v53  ;;  %v19524_v38 = vld [vmem:[#allocation93_spill] sm:$0xff]  ;;  %v17572_v15 = vpop.f32.mrf.mxu1  ;;  %v11097_v51 = vld [vmem:[#allocation11] sm:$0xff] }
 0x581   : > { %v17558_v41 = vmul.f32 %v17496_v13, %v19522_v26  ;;  %v11237_v45 = vrot.slane %v11215_v47, %v19485_v14  ;;  %v11244_v5 = vrot.slane %v11216_v27, %v19485_v14  ;;  %v17566_v57 = vmul.f32 %v17499_v25, %v19524_v38  ;;  %19525 = vst [vmem:[#allocation89_spill] sm:$0xff] %v17572_v15  ;;  %v19528_v27 = vld [vmem:[#allocation59_spill] sm:$0xff]  ;;  %v17586_v38 = vpop.f32.mrf.mxu0 }
 0x582   : > { %v17570_v36 = vmul.f32 %v17502_v23, %v17220_v1  ;;  %v11245_v11 = vcombine.low %v11223_v4, %v11230_v63  ;;  %v17576_v26 = vmul.f32 %v17479_v16, %v19526_v58  ;;  %v17580_v47 = vmul.f32 %v17482_v33, %v19527_v34  ;;  %19529 = vst [vmem:[#allocation90_spill] sm:$0xff] %v17586_v38  ;;  %v19530_v1 = vld [vmem:[#allocation60_spill] sm:$0xff]  ;;  %v19532_v58 = vld [vmem:[#allocation77_spill] sm:$0xff]  ;;  %v17600_v34 = vpop.f32.mrf.mxu1 }
 0x583   : > { %v17584_v40 = vmul.f32 %v17485_v50, %v19528_v27  ;;  %v11246_v8 = vcombine.low %v11237_v45, %v11244_v5  ;;  %v17590_v62 = vmul.f32 %v17488_v10, %v19530_v1  ;;  %v19531_v4 = vld [vmem:[#allocation76_spill] sm:$0xff]  ;;  %v17598_v2 = vmul.f32 %v17496_v13, %v19532_v58  ;;  %19533 = vst [vmem:[#allocation91_spill] sm:$0xff] %v17600_v34  ;;  %v19535_v1 = vld [vmem:[#allocation49_spill] sm:$0xff]  ;;  %v17617_v58 = vpop.f32.mrf.mxu0  ;;  %v19537_v34 = vld [vmem:[#allocation50_spill] sm:$0xff] }
 0x584   : > { %v17594_v63 = vmul.f32 %v17493_v12, %v19531_v4  ;;  %10258 = vmatmul.mubr.bf16.gmra.mxu0 %v16309_v43  ;;  %v11253_v27 = vrot.slane %v11245_v11, %v19485_v14  ;;  %v19534_v38 = vld [vmem:[#allocation92_spill] sm:$0xff]  ;;  %v17610_v5 = vmul.f32 %v17502_v23, %v17193_v0  ;;  %v17614_v4 = vmul.f32 %v17479_v16, %v19535_v1  ;;  %v19539_v0 = vld [vmem:[#allocation62_spill] sm:$0xff]  ;;  %v17632_v1 = vpop.f32.mrf.mxu1 }
 0x585   : > { %v17606_v45 = vmul.f32 %v17499_v25, %v19534_v38  ;;  %10329 = vmatmul.mubr.bf16.gmra.mxu1 %v16311_v54  ;;  %19536 = vst [vmem:[#allocation43_spill] sm:$0xff] %v17617_v58  ;;  %v11260_v43 = vrot.slane %v11246_v8, %v19485_v14  ;;  %v17622_v11 = vmul.f32 %v17482_v33, %v19537_v34  ;;  %v19538_v38 = vld [vmem:[#allocation61_spill] sm:$0xff]  ;;  %19540 = vst [vmem:[#allocation46_spill] sm:$0xff] %v17632_v1  ;;  %v19541_v54 = vld [vmem:[#allocation78_spill] sm:$0xff] }
 0x586   : > { %v17626_v15 = vmul.f32 %v17485_v50, %v19538_v38  ;;  %v17630_v53 = vmul.f32 %v17488_v10, %v19539_v0  ;;  %v17636_v58 = vmul.f32 %v17493_v12, %v19541_v54  ;;  %v19542_v8 = vld [vmem:[#allocation79_spill] sm:$0xff]  ;;  %v17644_v34 = vmul.f32 %v17499_v25, %v17211_v3  ;;  %v9837_v0 = vpop.f32.mrf.mxu0  ;;  %v19544_v54 = vld [vmem:[#allocation72_spill] sm:$0xff]  ;;  %v9908_v3 = vpop.f32.mrf.mxu1 }
 0x587   : > { %v17640_v14 = vmul.f32 %v17496_v13, %v19542_v8  ;;  %v17648_v38 = vmul.f32 %v17502_v23, %v17230_v61  ;;  %v11261_v28 = vcombine.low %v11253_v27, %v11260_v43  ;;  %v19543_v1 = vld [vmem:[#allocation51_spill] sm:$0xff]  ;;  %v17656_v48 = vmul.f32 %v17482_v33, %v19544_v54  ;;  %v19548_v61 = vld [vmem:[#allocation80_spill] sm:$0xff]  ;;  %v19550_v43 = vld [vmem:[#allocation81_spill] sm:$0xff] }
 0x588   : > { %v17652_v30 = vmul.f32 %v17479_v16, %v19543_v1  ;;  %v19545_v8 = vld [vmem:[#allocation63_spill] sm:$0xff]  ;;  %v17664_v6 = vmul.f32 %v17488_v10, %v19546_v17  ;;  %v17668_v27 = vmul.f32 %v17493_v12, %v19548_v61  ;;  %v17672_v1 = vmul.f32 %v17496_v13, %v19550_v43  ;;  %v9838_v54 = vpop.f32.mrf.mxu0  ;;  %v19552_v17 = vld [vmem:[#allocation52_spill] sm:$0xff]  ;;  %v19553_v61 = vld [vmem:[#allocation53_spill] sm:$0xff]  ;;  %v9909_v43 = vpop.f32.mrf.mxu1 }
 0x589   : > { %v17660_v21 = vmul.f32 %v17485_v50, %v19545_v8  ;;  %v17676_v0 = vmul.f32 %v17499_v25, %v17232_v22  ;;  %v11313_v8 = vsub.f32 %v11097_v51, %v11261_v28  ;;  %v17680_v3 = vmul.f32 %v17502_v23, %v17258_v9  ;;  %v19555_v22 = vld [vmem:[#allocation66_spill] sm:$0xff]  ;;  %v19559_v54 = vld [vmem:[#allocation83_spill] sm:$0xff] }
 0x58a   : > { %19547 = vst [vmem:[#allocation47_spill] sm:$0xff] %v17664_v6  ;;  %19549 = vst [vmem:[#allocation57_spill] sm:$0xff] %v17668_v27  ;;  %v17684_v46 = vmul.f32 %v17479_v16, %v19552_v17  ;;  %v17688_v27 = vmul.f32 %v17482_v33, %v19553_v61  ;;  %v17696_v28 = vmul.f32 %v17488_v10, %v19555_v22  ;;  %v19557_v51 = vld [vmem:[#allocation82_spill] sm:$0xff] }
 0x58b   : > { %19551 = vst [vmem:[#allocation58_spill] sm:$0xff] %v17672_v1  ;;  %v19554_v1 = vld [vmem:[#allocation65_spill] sm:$0xff]  ;;  %v17700_v9 = vmul.f32 %v17493_v12, %v19557_v51  ;;  %v17704_v17 = vmul.f32 %v17496_v13, %v19559_v54  ;;  %v17708_v61 = vmul.f32 %v17499_v25, %v17260_v37  ;;  %v19563_v43 = vld [vmem:[#allocation54_spill] sm:$0xff] }
 0x58c   : > { %v17692_v6 = vmul.f32 %v17485_v50, %v19554_v1  ;;  %19556 = vst [vmem:[#allocation74_spill] sm:$0xff] %v17696_v28  ;;  %v17712_v1 = vmul.f32 %v17502_v23, %v17280_v44  ;;  %v17716_v22 = vmul.f32 %v17479_v16, %v19563_v43  ;;  %v19564_v28 = vld [vmem:[#allocation73_spill] sm:$0xff] }
 0x58d   : > { %19558 = vst [vmem:[#allocation75_spill] sm:$0xff] %v17700_v9  ;;  %19560 = vst [vmem:[#allocation93_spill] sm:$0xff] %v17704_v17  ;;  %v17720_v51 = vmul.f32 %v17482_v33, %v19564_v28  ;;  %v19565_v9 = vld [vmem:[#allocation67_spill] sm:$0xff]  ;;  %v19567_v17 = vld [vmem:[#allocation68_spill] sm:$0xff]  ;;  %v17740_v28 = vmul.f32 %v17499_v25, %v17300_v19 }
 0x58e   : > { %19561 = vst [vmem:[#allocation48_spill] sm:$0xff] %v17708_v61  ;;  %19562 = vst [vmem:[#allocation71_spill] sm:$0xff] %v17712_v1  ;;  %v17724_v54 = vmul.f32 %v17485_v50, %v19565_v9  ;;  %v17728_v37 = vmul.f32 %v17488_v10, %v19567_v17  ;;  %v19569_v61 = vld [vmem:[#allocation84_spill] sm:$0xff]  ;;  %v19571_v1 = vld [vmem:[#allocation85_spill] sm:$0xff]  ;;  %v17744_v9 = vmul.f32 %v17502_v23, %v17316_v32 }
 0x58f   : > { %v17732_v44 = vmul.f32 %v17493_v12, %v19569_v61  ;;  %v17736_v43 = vmul.f32 %v17496_v13, %v19571_v1  ;;  %19573 = vst [vmem:[#allocation92_spill] sm:$0xff] %v17740_v28  ;;  %v19579_v28 = vld [vmem:[#allocation86_spill] sm:$0xff] }
 0x590   : > { %19566 = vst [vmem:[#allocation59_spill] sm:$0xff] %v17724_v54  ;;  %19568 = vst [vmem:[#allocation60_spill] sm:$0xff] %v17728_v37  ;;  %v19575_v54 = vld [vmem:[#allocation55_spill] sm:$0xff]  ;;  %v19576_v37 = vld [vmem:[#allocation56_spill] sm:$0xff]  ;;  %v17764_v32 = vmul.f32 %v17493_v12, %v19579_v28  ;;  %v17785_v12 = vrot.slane %v11313_v8, %v19504_v60 }
 0x591   : > { %19570 = vst [vmem:[#allocation76_spill] sm:$0xff] %v17732_v44  ;;  %19572 = vst [vmem:[#allocation77_spill] sm:$0xff] %v17736_v43  ;;  %v17748_v17 = vmul.f32 %v17479_v16, %v19575_v54  ;;  %v17752_v61 = vmul.f32 %v17482_v33, %v19576_v37  ;;  %v19577_v44 = vld [vmem:[#allocation69_spill] sm:$0xff]  ;;  %v19578_v43 = vld [vmem:[#allocation70_spill] sm:$0xff]  ;;  %v17772_v33 = vmul.f32 %v17499_v25, %v17334_v20 }
 0x592   : > { %19574 = vst [vmem:[#allocation49_spill] sm:$0xff] %v17744_v9  ;;  %v17756_v1 = vmul.f32 %v17485_v50, %v19577_v44  ;;  %v17760_v19 = vmul.f32 %v17488_v10, %v19578_v43  ;;  %v19580_v9 = vld [vmem:[#allocation87_spill] sm:$0xff]  ;;  %v17776_v50 = vmul.f32 %v17502_v23, %v17353_v52  ;;  %v17779_v54 = vrot.slane %v11313_v8, %v19502_v18 }
 0x593   : > { %v17768_v16 = vmul.f32 %v17496_v13, %v19580_v9  ;;  %v17782_v10 = vrot.slane %v11313_v8, %v19503_v42  ;;  %v17788_v13 = vrot.slane %v11313_v8, %v19505_v39  ;;  %v17791_v37 = vrot.slane %v11313_v8, %v17461_v29 }
 0x594   : > { %v17794_v20 = vrot.slane %v11313_v8, %v17464_v56  ;;  %v17797_v52 = vrot.slane %v11313_v8, %v17467_v55  ;;  %v17800_v25 = vrot.slane %v11313_v8, %v17470_v49  ;;  %v11509_v23 = vadd.f32 %v17779_v54, %v17531_v59 }
 0x595   : > { %v11510_v44 = vadd.f32 %v17782_v10, %v17535_v35  ;;  %v11511_v43 = vadd.f32 %v17785_v12, %v17542_v24  ;;  %v11512_v28 = vadd.f32 %v17788_v13, %v17546_v7  ;;  %v11513_v9 = vadd.f32 %v17791_v37, %v17554_v31 }
 0x596   : > { %v11514_v55 = vadd.f32 %v17794_v20, %v17558_v41  ;;  %v11515_v8 = vadd.f32 %v17797_v52, %v17566_v57  ;;  %v11516_v59 = vadd.f32 %v17800_v25, %v17570_v36  ;;  %v11525_v35 = vadd.f32 %v17779_v54, %v17576_v26  ;;  %11621 = vst [vmem:[%s19040_s7] sm:$0xff] %v11509_v23 }
 0x597   : > { %v11526_v24 = vadd.f32 %v17782_v10, %v17580_v47  ;;  %11622 = vst [vmem:[%s19040_s7 + $0x8] sm:$0xff] %v11510_v44  ;;  %v11527_v7 = vadd.f32 %v17785_v12, %v17584_v40  ;;  %v11528_v31 = vadd.f32 %v17788_v13, %v17590_v62  ;;  %v11529_v41 = vadd.f32 %v17791_v37, %v17594_v63 }
 0x598   : > { %v11530_v57 = vadd.f32 %v17794_v20, %v17598_v2  ;;  %11623 = vst [vmem:[%s19040_s7 + $0x10] sm:$0xff] %v11511_v43  ;;  %11624 = vst [vmem:[%s19040_s7 + $0x18] sm:$0xff] %v11512_v28  ;;  %v11531_v62 = vadd.f32 %v17797_v52, %v17606_v45  ;;  %v11532_v2 = vadd.f32 %v17800_v25, %v17610_v5  ;;  %v19586_v28 = vld [vmem:[#allocation93_spill] sm:$0xff] }
 0x599   : > { %11625 = vst [vmem:[%s19040_s7 + $0x20] sm:$0xff] %v11513_v9  ;;  %11626 = vst [vmem:[%s19040_s7 + $0x28] sm:$0xff] %v11514_v55  ;;  %v11541_v40 = vadd.f32 %v17779_v54, %v17614_v4  ;;  %v11542_v36 = vadd.f32 %v17782_v10, %v17622_v11  ;;  %v11543_v55 = vadd.f32 %v17785_v12, %v17626_v15  ;;  %v19582_v4 = vld [vmem:[#allocation57_spill] sm:$0xff]  ;;  %v19583_v11 = vld [vmem:[#allocation58_spill] sm:$0xff] }
 0x59a   : > { %11627 = vst [vmem:[%s19040_s7 + $0x30] sm:$0xff] %v11515_v8  ;;  %11628 = vst [vmem:[%s19040_s7 + $0x38] sm:$0xff] %v11516_v59  ;;  %v11544_v26 = vadd.f32 %v17788_v13, %v17630_v53  ;;  %v11545_v47 = vadd.f32 %v17791_v37, %v17636_v58  ;;  %v11546_v63 = vadd.f32 %v17794_v20, %v17640_v14  ;;  %v19588_v59 = vld [vmem:[#allocation71_spill] sm:$0xff] }
 0x59b   : > { %11637 = vst [vmem:[%s19040_s7 + $0x80] sm:$0xff] %v11525_v35  ;;  %11638 = vst [vmem:[%s19040_s7 + $0x88] sm:$0xff] %v11526_v24  ;;  %v11547_v53 = vadd.f32 %v17797_v52, %v17644_v34  ;;  %v11548_v14 = vadd.f32 %v17800_v25, %v17648_v38  ;;  %v11557_v15 = vadd.f32 %v17779_v54, %v17652_v30 }
 0x59c   : > { %11639 = vst [vmem:[%s19040_s7 + $0x90] sm:$0xff] %v11527_v7  ;;  %11640 = vst [vmem:[%s19040_s7 + $0x98] sm:$0xff] %v11528_v31  ;;  %v11558_v45 = vadd.f32 %v17782_v10, %v17656_v48  ;;  %v11559_v30 = vadd.f32 %v17785_v12, %v17660_v21  ;;  %v19581_v48 = vld [vmem:[#allocation47_spill] sm:$0xff]  ;;  %v11561_v58 = vadd.f32 %v17791_v37, %v19582_v4 }
 0x59d   : > { %11641 = vst [vmem:[%s19040_s7 + $0xa0] sm:$0xff] %v11529_v41  ;;  %11642 = vst [vmem:[%s19040_s7 + $0xa8] sm:$0xff] %v11530_v57  ;;  %v11560_v5 = vadd.f32 %v17788_v13, %v19581_v48  ;;  %v11562_v34 = vadd.f32 %v17794_v20, %v19583_v11  ;;  %v11563_v21 = vadd.f32 %v17797_v52, %v17676_v0  ;;  %v19591_v57 = vld [vmem:[#allocation76_spill] sm:$0xff]  ;;  %v19611_v4 = vld [vmem:[#allocation91_spill] sm:$0xff] }
 0x59e   : > { %11643 = vst [vmem:[%s19040_s7 + $0xb0] sm:$0xff] %v11531_v62  ;;  %11644 = vst [vmem:[%s19040_s7 + $0xb8] sm:$0xff] %v11532_v2  ;;  %v11564_v38 = vadd.f32 %v17800_v25, %v17680_v3  ;;  %v11573_v23 = vadd.f32 %v17779_v54, %v17684_v46  ;;  %v11574_v44 = vadd.f32 %v17782_v10, %v17688_v27  ;;  %v19584_v27 = vld [vmem:[#allocation74_spill] sm:$0xff]  ;;  %v19585_v3 = vld [vmem:[#allocation75_spill] sm:$0xff] }
 0x59f   : > { %11653 = vst [vmem:[%s19040_s7 + $0x100] sm:$0xff] %v11541_v40  ;;  %11654 = vst [vmem:[%s19040_s7 + $0x108] sm:$0xff] %v11542_v36  ;;  %v11575_v46 = vadd.f32 %v17785_v12, %v17692_v6  ;;  %v11576_v0 = vadd.f32 %v17788_v13, %v19584_v27  ;;  %v11577_v43 = vadd.f32 %v17791_v37, %v19585_v3  ;;  %v19587_v6 = vld [vmem:[#allocation48_spill] sm:$0xff]  ;;  %v19592_v2 = vld [vmem:[#allocation77_spill] sm:$0xff] }
 0x5a0   : > { %11655 = vst [vmem:[%s19040_s7 + $0x110] sm:$0xff] %v11543_v55  ;;  %11656 = vst [vmem:[%s19040_s7 + $0x118] sm:$0xff] %v11544_v26  ;;  %v11578_v9 = vadd.f32 %v17794_v20, %v19586_v28  ;;  %v11579_v8 = vadd.f32 %v17797_v52, %v19587_v6  ;;  %v11580_v35 = vadd.f32 %v17800_v25, %v19588_v59  ;;  %v19593_v36 = vld [vmem:[#allocation92_spill] sm:$0xff]  ;;  %v19594_v26 = vld [vmem:[#allocation49_spill] sm:$0xff] }
 0x5a1   : > { %11657 = vst [vmem:[%s19040_s7 + $0x120] sm:$0xff] %v11545_v47  ;;  %11658 = vst [vmem:[%s19040_s7 + $0x128] sm:$0xff] %v11546_v63  ;;  %v11589_v24 = vadd.f32 %v17779_v54, %v17716_v22  ;;  %v11590_v7 = vadd.f32 %v17782_v10, %v17720_v51  ;;  %v19589_v22 = vld [vmem:[#allocation59_spill] sm:$0xff]  ;;  %v19590_v51 = vld [vmem:[#allocation60_spill] sm:$0xff]  ;;  %v11593_v62 = vadd.f32 %v17791_v37, %v19591_v57 }
 0x5a2   : > { %11659 = vst [vmem:[%s19040_s7 + $0x130] sm:$0xff] %v11547_v53  ;;  %11660 = vst [vmem:[%s19040_s7 + $0x138] sm:$0xff] %v11548_v14  ;;  %v11591_v31 = vadd.f32 %v17785_v12, %v19589_v22  ;;  %v11592_v41 = vadd.f32 %v17788_v13, %v19590_v51  ;;  %v11594_v40 = vadd.f32 %v17794_v20, %v19592_v2  ;;  %v19605_v14 = vld [vmem:[#allocation30_spill] sm:$0xff]  ;;  %v19613_v11 = vld [vmem:[#allocation43_spill] sm:$0xff] }
 0x5a3   : > { %11669 = vst [vmem:[%s19040_s7 + $0x180] sm:$0xff] %v11557_v15  ;;  %11670 = vst [vmem:[%s19040_s7 + $0x188] sm:$0xff] %v11558_v45  ;;  %v11595_v55 = vadd.f32 %v17797_v52, %v19593_v36  ;;  %v11596_v47 = vadd.f32 %v17800_v25, %v19594_v26  ;;  %v11605_v63 = vadd.f32 %v17779_v54, %v17748_v17  ;;  %v19607_v45 = vld [vmem:[#allocation88_spill] sm:$0xff] }
 0x5a4   : > { %11671 = vst [vmem:[%s19040_s7 + $0x190] sm:$0xff] %v11559_v30  ;;  %11672 = vst [vmem:[%s19040_s7 + $0x198] sm:$0xff] %v11560_v5  ;;  %v11606_v53 = vadd.f32 %v17782_v10, %v17752_v61  ;;  %v11607_v17 = vadd.f32 %v17785_v12, %v17756_v1  ;;  %v11608_v61 = vadd.f32 %v17788_v13, %v17760_v19  ;;  %v19599_v12 = vld [vmem:[#allocation39_spill] sm:$0xff]  ;;  %v19608_v30 = vld [vmem:[#allocation89_spill] sm:$0xff] }
 0x5a5   : > { %11673 = vst [vmem:[%s19040_s7 + $0x1a0] sm:$0xff] %v11561_v58  ;;  %11674 = vst [vmem:[%s19040_s7 + $0x1a8] sm:$0xff] %v11562_v34  ;;  %v11609_v54 = vadd.f32 %v17791_v37, %v17764_v32  ;;  %v11610_v10 = vadd.f32 %v17794_v20, %v17768_v16  ;;  %v11611_v1 = vadd.f32 %v17797_v52, %v17772_v33  ;;  %v19595_v32 = vld [vmem:[#allocation31_spill] sm:$0xff]  ;;  %v19596_v16 = vld [vmem:[#allocation37_spill] sm:$0xff] }
 0x5a6   : > { %11675 = vst [vmem:[%s19040_s7 + $0x1b0] sm:$0xff] %v11563_v21  ;;  %11676 = vst [vmem:[%s19040_s7 + $0x1b8] sm:$0xff] %v11564_v38  ;;  %v11612_v19 = vadd.f32 %v17800_v25, %v17776_v50  ;;  %v18078_v33 = vadd.f32 %v19596_v16, %v19595_v32  ;;  %v19598_v50 = vld [vmem:[#allocation35_spill] sm:$0xff]  ;;  %v19601_v37 = vld [vmem:[#allocation34_spill] sm:$0xff]  ;;  %v18100_v48 = vadd.f32 %v19608_v30, %v19607_v45  ;;  %v9945_v38 = vpop.f32.mrf.mxu0 }
 0x5a7   : > { %11685 = vst [vmem:[%s19040_s7 + $0x200] sm:$0xff] %v11573_v23  ;;  %11686 = vst [vmem:[%s19040_s7 + $0x208] sm:$0xff] %v11574_v44  ;;  %v18082_v13 = vadd.f32 %v19599_v12, %v19598_v50  ;;  %v19602_v20 = vld [vmem:[#allocation33_spill] sm:$0xff]  ;;  %v19610_v5 = vld [vmem:[#allocation90_spill] sm:$0xff]  ;;  %v10016_v23 = vpop.f32.mrf.mxu1 }
 0x5a8   : > { %11687 = vst [vmem:[%s19040_s7 + $0x210] sm:$0xff] %v11575_v46  ;;  %11688 = vst [vmem:[%s19040_s7 + $0x218] sm:$0xff] %v11576_v0  ;;  %v18086_v52 = vadd.f32 %v19602_v20, %v19601_v37  ;;  %v19604_v25 = vld [vmem:[#allocation29_spill] sm:$0xff]  ;;  %v18104_v58 = vadd.f32 %v19611_v4, %v19610_v5  ;;  %v19614_v34 = vld [vmem:[#allocation46_spill] sm:$0xff]  ;;  %v18110_v44 = vadd.f32 %v10016_v23, %v9945_v38  ;;  %v9947_v46 = vpop.f32.mrf.mxu0 }
 0x5a9   : > { %11689 = vst [vmem:[%s19040_s7 + $0x220] sm:$0xff] %v11577_v43  ;;  %11690 = vst [vmem:[%s19040_s7 + $0x228] sm:$0xff] %v11578_v9  ;;  %v18096_v15 = vadd.f32 %v19605_v14, %v19604_v25  ;;  %v18108_v21 = vadd.f32 %v19614_v34, %v19613_v11  ;;  %v10018_v27 = vpop.f32.mrf.mxu1 }
 0x5aa   : > { %11691 = vst [vmem:[%s19040_s7 + $0x230] sm:$0xff] %v11579_v8  ;;  %11692 = vst [vmem:[%s19040_s7 + $0x238] sm:$0xff] %v11580_v35  ;;  %v18112_v0 = vadd.f32 %v10018_v27, %v9947_v46  ;;  %v9949_v3 = vpop.f32.mrf.mxu0 }
 0x5ab   : > { %11701 = vst [vmem:[%s19040_s7 + $0x280] sm:$0xff] %v11589_v24  ;;  %11702 = vst [vmem:[%s19040_s7 + $0x288] sm:$0xff] %v11590_v7  ;;  %v10020_v43 = vpop.f32.mrf.mxu1 }
 0x5ac   : > { %11703 = vst [vmem:[%s19040_s7 + $0x290] sm:$0xff] %v11591_v31  ;;  %11704 = vst [vmem:[%s19040_s7 + $0x298] sm:$0xff] %v11592_v41  ;;  %v18114_v28 = vadd.f32 %v10020_v43, %v9949_v3  ;;  %v9951_v9 = vpop.f32.mrf.mxu0 }
 0x5ad   : > { %11705 = vst [vmem:[%s19040_s7 + $0x2a0] sm:$0xff] %v11593_v62  ;;  %11706 = vst [vmem:[%s19040_s7 + $0x2a8] sm:$0xff] %v11594_v40  ;;  %v10022_v6 = vpop.f32.mrf.mxu1 }
 0x5ae   : > { %11707 = vst [vmem:[%s19040_s7 + $0x2b0] sm:$0xff] %v11595_v55  ;;  %11708 = vst [vmem:[%s19040_s7 + $0x2b8] sm:$0xff] %v11596_v47  ;;  %v18116_v8 = vadd.f32 %v10022_v6, %v9951_v9  ;;  %v9955_v59 = vpop.f32.mrf.mxu0 }
 0x5af   : > { %11717 = vst [vmem:[%s19040_s7 + $0x300] sm:$0x1] %v11605_v63  ;;  %11718 = vst [vmem:[%s19040_s7 + $0x308] sm:$0x1] %v11606_v53  ;;  %v10026_v35 = vpop.f32.mrf.mxu1 }
 0x5b0   : > { %11719 = vst [vmem:[%s19040_s7 + $0x310] sm:$0x1] %v11607_v17  ;;  %11720 = vst [vmem:[%s19040_s7 + $0x318] sm:$0x1] %v11608_v61  ;;  %v9957_v24 = vpop.f32.mrf.mxu0  ;;  %v18118_v7 = vadd.f32 %v10026_v35, %v9955_v59 }
 0x5b1   : > { %11721 = vst [vmem:[%s19040_s7 + $0x320] sm:$0x1] %v11609_v54  ;;  %11722 = vst [vmem:[%s19040_s7 + $0x328] sm:$0x1] %v11610_v10  ;;  %v10028_v22 = vpop.f32.mrf.mxu1 }
 0x5b2   : > { %19597 = vst [vmem:[#allocation50_spill] sm:$0xff] %v18078_v33  ;;  %19600 = vst [vmem:[#allocation61_spill] sm:$0xff] %v18082_v13  ;;  %v18120_v31 = vadd.f32 %v10028_v22, %v9957_v24  ;;  %v9959_v51 = vpop.f32.mrf.mxu0 }
 0x5b3   : > { %19603 = vst [vmem:[#allocation62_spill] sm:$0xff] %v18086_v52  ;;  %11723 = vst [vmem:[%s19040_s7 + $0x330] sm:$0x1] %v11611_v1  ;;  %v10030_v41 = vpop.f32.mrf.mxu1 }
 0x5b4   : > { %11724 = vst [vmem:[%s19040_s7 + $0x338] sm:$0x1] %v11612_v19  ;;  %19606 = vst [vmem:[#allocation78_spill] sm:$0xff] %v18096_v15  ;;  %v18122_v57 = vadd.f32 %v10030_v41, %v9959_v51  ;;  %v9961_v62 = vpop.f32.mrf.mxu0 }
 0x5b5   : > { %19609 = vst [vmem:[#allocation79_spill] sm:$0xff] %v18100_v48  ;;  %19612 = vst [vmem:[#allocation51_spill] sm:$0xff] %v18104_v58  ;;  %v10032_v2 = vpop.f32.mrf.mxu1 }
 0x5b6   : > { %19615 = vst [vmem:[#allocation72_spill] sm:$0xff] %v18108_v21  ;;  %19616 = vst [vmem:[#allocation63_spill] sm:$0xff] %v18114_v28  ;;  %v9965_v40 = vpop.f32.mrf.mxu0  ;;  %v18124_v36 = vadd.f32 %v10032_v2, %v9961_v62 }
 0x5b7   : > { %19617 = vst [vmem:[#allocation64_spill] sm:$0xff] %v18116_v8  ;;  %19618 = vst [vmem:[#allocation80_spill] sm:$0xff] %v18118_v7  ;;  %v10036_v55 = vpop.f32.mrf.mxu1 }
 0x5b8   : > { %19619 = vst [vmem:[#allocation81_spill] sm:$0xff] %v18120_v31  ;;  %19620 = vst [vmem:[#allocation52_spill] sm:$0xff] %v18122_v57  ;;  %v18126_v26 = vadd.f32 %v10036_v55, %v9965_v40  ;;  %v9967_v47 = vpop.f32.mrf.mxu0 }
 0x5b9   : > { %19621 = vst [vmem:[#allocation53_spill] sm:$0xff] %v18124_v36  ;;  %v10038_v63 = vpop.f32.mrf.mxu1 }
 0x5ba   : > { %19622 = vst [vmem:[#allocation65_spill] sm:$0xff] %v18126_v26  ;;  %v18128_v53 = vadd.f32 %v10038_v63, %v9967_v47  ;;  %v9969_v17 = vpop.f32.mrf.mxu0 }
 0x5bb   : > { %v10040_v61 = vpop.f32.mrf.mxu1 }
 0x5bc   : > { %19623 = vst [vmem:[#allocation66_spill] sm:$0xff] %v18128_v53  ;;  %v18130_v54 = vadd.f32 %v10040_v61, %v9969_v17  ;;  %v9971_v10 = vpop.f32.mrf.mxu0 }
 0x5bd   : > { %v10042_v1 = vpop.f32.mrf.mxu1 }
 0x5be   : > { %19624 = vst [vmem:[#allocation82_spill] sm:$0xff] %v18130_v54  ;;  %v18132_v19 = vadd.f32 %v10042_v1, %v9971_v10  ;;  %v9975_v32 = vpop.f32.mrf.mxu0 }
 0x5bf   : > { %v10046_v16 = vpop.f32.mrf.mxu1 }
 0x5c0   : > { %19625 = vst [vmem:[#allocation83_spill] sm:$0xff] %v18132_v19  ;;  %v18134_v50 = vadd.f32 %v10046_v16, %v9975_v32  ;;  %v9977_v12 = vpop.f32.mrf.mxu0 }
 0x5c1   : > { %v10048_v37 = vpop.f32.mrf.mxu1 }
 0x5c2   : > { %19626 = vst [vmem:[#allocation54_spill] sm:$0xff] %v18134_v50  ;;  %v18136_v20 = vadd.f32 %v10048_v37, %v9977_v12  ;;  %v9979_v25 = vpop.f32.mrf.mxu0  ;;  %v19634_v37 = vld [vmem:[#allocation41_spill] sm:$0xff] }
 0x5c3   : > { %v10050_v14 = vpop.f32.mrf.mxu1  ;;  %v19635_v25 = vld [vmem:[#allocation42_spill] sm:$0xff] }
 0x5c4   : > { %19627 = vst [vmem:[#allocation73_spill] sm:$0xff] %v18136_v20  ;;  %v9980_v45 = vpop.f32.mrf.mxu0  ;;  %v10441_v14 = vadd.f32 %v19635_v25, %v19634_v37 }
 0x5c5   : > { %v10051_v30 = vpop.f32.mrf.mxu1  ;;  %v10585_v45 = vmul.f32 %v19635_v25, %v19635_v25  ;;  %v10446_v25 = vsel %vm5765_vm0, %v18104_v58, 0.0 }
 0x5e8   : > { %v10087_v5 = vpop.f32.mrf.mxu0 }
 0x5ea   : > { %v10158_v4 = vpop.f32.mrf.mxu1  ;;  %v10089_v34 = vpop.f32.mrf.mxu0 }
 0x5eb   : > { %v18138_v11 = vadd.f32 %v10158_v4, %v10087_v5 }
 0x5ec   : > { %v10160_v38 = vpop.f32.mrf.mxu1  ;;  %v10091_v46 = vpop.f32.mrf.mxu0 }
 0x5ed   : > { %v18140_v23 = vadd.f32 %v10160_v38, %v10089_v34  ;;  %v10569_v34 = vmul.f32 %v19634_v37, %v19634_v37  ;;  %v19637_v38 = vld [vmem:[#allocation44_spill] sm:$0xff] }
 0x5ee   : > { %v10162_v27 = vpop.f32.mrf.mxu1  ;;  %v10093_v43 = vpop.f32.mrf.mxu0 }
 0x5ef   : > { %v18142_v3 = vadd.f32 %v10162_v27, %v10091_v46  ;;  %v10586_v46 = vmul.f32 %v19637_v38, %v19637_v38  ;;  %v19638_v27 = vld [vmem:[#allocation45_spill] sm:$0xff] }
 0x5f0   : > { %v10164_v9 = vpop.f32.mrf.mxu1  ;;  %v10097_v59 = vpop.f32.mrf.mxu0 }
 0x5f1   : > { %v18144_v6 = vadd.f32 %v10164_v9, %v10093_v43  ;;  %v10442_v43 = vadd.f32 %v10441_v14, %v19638_v27  ;;  %v10601_v9 = vmul.f32 %v19638_v27, %v19638_v27 }
 0x5f2   : > { %v10168_v35 = vpop.f32.mrf.mxu1  ;;  %v10099_v24 = vpop.f32.mrf.mxu0 }
 0x5f3   : > { %v18146_v22 = vadd.f32 %v10168_v35, %v10097_v59  ;;  %v19639_v35 = vld [vmem:[#allocation40_spill] sm:$0xff] }
 0x5f4   : > { %v10170_v51 = vpop.f32.mrf.mxu1  ;;  %v10101_v62 = vpop.f32.mrf.mxu0 }
 0x5f5   : > { %19628 = vst [vmem:[#allocation67_spill] sm:$0xff] %v18146_v22  ;;  %v18148_v41 = vadd.f32 %v10170_v51, %v10099_v24  ;;  %v10570_v24 = vmul.f32 %v19639_v35, %v19639_v35 }
 0x5f6   : > { %v10172_v2 = vpop.f32.mrf.mxu1  ;;  %v10103_v55 = vpop.f32.mrf.mxu0 }
 0x5f7   : > { %19629 = vst [vmem:[#allocation68_spill] sm:$0xff] %v18148_v41  ;;  %v18150_v40 = vadd.f32 %v10172_v2, %v10101_v62  ;;  %v10777_v2 = vadd.f32 %v10585_v45, %v10569_v34  ;;  %v10790_v27 = vadd.f32 %v10586_v46, %v10570_v24 }
 0x5f8   : > { %v10174_v47 = vpop.f32.mrf.mxu1  ;;  %v10107_v17 = vpop.f32.mrf.mxu0 }
 0x5f9   : > { %19630 = vst [vmem:[#allocation84_spill] sm:$0xff] %v18150_v40  ;;  %v18152_v63 = vadd.f32 %v10174_v47, %v10103_v55  ;;  %v10454_v55 = vadd.f32 %v19637_v38, %v19639_v35  ;;  %v19641_v47 = vld [vmem:[#allocation32_spill] sm:$0xff]  ;;  %v10618_v38 = vmul.f32 %v18078_v33, %v18078_v33 }
 0x5fa   : > { %v10109_v1 = vpop.f32.mrf.mxu0 }
 0x5fb   : > { %19631 = vst [vmem:[#allocation85_spill] sm:$0xff] %v18152_v63 }
 0x5fc   : > { %v10111_v12 = vpop.f32.mrf.mxu0 }
 0x5fd   : > { %v10178_v61 = vpop.f32.mrf.mxu1 }
 0x5fe   : > { %v18154_v10 = vadd.f32 %v10178_v61, %v10107_v17  ;;  %v10113_v4 = vpop.f32.mrf.mxu0  ;;  %v10602_v17 = vmul.f32 %v19641_v47, %v19641_v47  ;;  %v19642_v61 = vld [vmem:[#allocation36_spill] sm:$0xff] }
 0x5ff   : > { %v10180_v32 = vpop.f32.mrf.mxu1 }
 0x600   : > { %19632 = vst [vmem:[#allocation55_spill] sm:$0xff] %v18154_v10  ;;  %v18156_v16 = vadd.f32 %v10180_v32, %v10109_v1  ;;  %v10443_v1 = vadd.f32 %v10442_v43, %v19642_v61  ;;  %v10633_v43 = vmul.f32 %v18082_v13, %v18082_v13 }
 0x601   : > { %v10182_v30 = vpop.f32.mrf.mxu1  ;;  %v10117_v62 = vpop.f32.mrf.mxu0 }
 0x602   : > { %19633 = vst [vmem:[#allocation56_spill] sm:$0xff] %v18156_v16  ;;  %v18162_v5 = vadd.f32 %v10182_v30, %v10111_v12  ;;  %v10617_v12 = vmul.f32 %v19642_v61, %v19642_v61  ;;  %v10444_v45 = vadd.f32 %v10443_v1, %v18082_v13  ;;  %v10649_v1 = vmul.f32 %v18096_v15, %v18096_v15 }
 0x603   : > { %v10184_v59 = vpop.f32.mrf.mxu1  ;;  %v10119_v30 = vpop.f32.mrf.mxu0 }
 0x604   : > { %19636 = vst [vmem:[#allocation69_spill] sm:$0xff] %v18162_v5  ;;  %v18173_v51 = vadd.f32 %v10184_v59, %v10113_v4  ;;  %v10778_v4 = vadd.f32 %v10777_v2, %v10601_v9  ;;  %v10455_v59 = vadd.f32 %v10454_v55, %v19641_v47  ;;  %v10445_v46 = vadd.f32 %v10444_v45, %v18096_v15 }
 0x605   : > { %v10188_v32 = vpop.f32.mrf.mxu1  ;;  %v10634_v55 = vmul.f32 %v18086_v52, %v18086_v52 }
 0x606   : > { %19640 = vst [vmem:[#allocation70_spill] sm:$0xff] %v18173_v51  ;;  %v18182_v14 = vadd.f32 %v10188_v32, %v10117_v62  ;;  %v10121_v62 = vpop.f32.mrf.mxu0  ;;  %v10791_v32 = vadd.f32 %v10790_v27, %v10602_v17  ;;  %v10779_v24 = vadd.f32 %v10778_v4, %v10617_v12  ;;  %v10456_v2 = vadd.f32 %v10455_v59, %v18078_v33 }
 0x607   : > { %v10190_v34 = vpop.f32.mrf.mxu1  ;;  %v10447_v47 = vadd.f32 %v10446_v25, %v10445_v46  ;;  %v10666_v12 = vmul.f32 %v18108_v21, %v18108_v21  ;;  %v10650_v4 = vmul.f32 %v18100_v48, %v18100_v48  ;;  %v10459_v59 = vsel %vm5765_vm0, %v18108_v21, 0.0 }
 0x608   : > { %19643 = vst [vmem:[#allocation86_spill] sm:$0xff] %v18182_v14  ;;  %v18192_v61 = vadd.f32 %v10190_v34, %v10119_v30  ;;  %v10122_v13 = vpop.f32.mrf.mxu0  ;;  %v10665_v30 = vmul.f32 %v18104_v58, %v18104_v58  ;;  %v10792_v62 = vadd.f32 %v10791_v32, %v10618_v38  ;;  %v10780_v27 = vadd.f32 %v10779_v24, %v10633_v43 }
 0x609   : > { %v10192_v9 = vpop.f32.mrf.mxu1  ;;  %v10457_v17 = vadd.f32 %v10456_v2, %v18086_v52  ;;  %v10587_v46 = vmul.f32 %v18114_v28, %v18114_v28  ;;  %v10448_v38 = vrot.slane %v10447_v47, 4  ;;  %v10480_v32 = vadd.f32 %v18116_v8, %v18112_v0 }
 0x60a   : > { %19644 = vst [vmem:[#allocation87_spill] sm:$0xff] %v18192_v61  ;;  %v10793_v45 = vadd.f32 %v10792_v62, %v10634_v55  ;;  %v10781_v13 = vadd.f32 %v10780_v27, %v10649_v1  ;;  %v10782_v43 = vsel %vm5765_vm0, %v10665_v30, 0.0  ;;  %v10588_v9 = vmul.f32 %v18116_v8, %v18116_v8 }
 0x60b   : > { %v10193_v34 = vpop.f32.mrf.mxu1  ;;  %v10458_v25 = vadd.f32 %v10457_v17, %v18100_v48  ;;  %v10795_v2 = vsel %vm5765_vm0, %v10666_v12, 0.0  ;;  %v10571_v55 = vmul.f32 %v18110_v44, %v18110_v44  ;;  %v10603_v1 = vmul.f32 %v18118_v7, %v18118_v7 }
 0x60c   : > { %v10572_v34 = vmul.f32 %v18112_v0, %v18112_v0  ;;  %v10467_v30 = vadd.f32 %v18114_v28, %v18110_v44  ;;  %v10481_v62 = vadd.f32 %v10480_v32, %v18120_v31  ;;  %v10604_v27 = vmul.f32 %v18120_v31, %v18120_v31 }
 0x60d   : > { %v10460_v24 = vadd.f32 %v10459_v59, %v10458_v25  ;;  %v10794_v17 = vadd.f32 %v10793_v45, %v10650_v4  ;;  %v10783_v59 = vadd.f32 %v10782_v43, %v10781_v13  ;;  %v10803_v12 = vadd.f32 %v10587_v46, %v10571_v55 }
 0x60e   : > { %v10619_v25 = vmul.f32 %v18122_v57, %v18122_v57  ;;  %v10449_v21 = vadd.f32 %v10448_v38, %v10447_v47  ;;  %v10816_v58 = vadd.f32 %v10588_v9, %v10572_v34  ;;  %v10468_v48 = vadd.f32 %v10467_v30, %v18118_v7 }
 0x60f   : > { %v10482_v15 = vadd.f32 %v10481_v62, %v18124_v36  ;;  %v10461_v52 = vrot.slane %v10460_v24, 4  ;;  %v10796_v33 = vadd.f32 %v10795_v2, %v10794_v17  ;;  %v10804_v8 = vadd.f32 %v10803_v12, %v10603_v1 }
 0x610   : > { %v10620_v32 = vmul.f32 %v18124_v36, %v18124_v36  ;;  %v10817_v28 = vadd.f32 %v10816_v58, %v10604_v27  ;;  %v10469_v4 = vadd.f32 %v10468_v48, %v18122_v57  ;;  %v10635_v45 = vmul.f32 %v18126_v26, %v18126_v26 }
 0x611   : > { %v10483_v13 = vadd.f32 %v10482_v15, %v18128_v53  ;;  %v10805_v47 = vadd.f32 %v10804_v8, %v10619_v25  ;;  %v10636_v46 = vmul.f32 %v18128_v53, %v18128_v53  ;;  %v10667_v38 = vmul.f32 %v18134_v50, %v18134_v50 }
 0x612   : > { %v10485_v43 = vsel %vm5765_vm0, %v18136_v20, 0.0  ;;  %v10470_v9 = vadd.f32 %v10469_v4, %v18126_v26  ;;  %v10651_v48 = vmul.f32 %v18130_v54, %v18130_v54  ;;  %v10668_v15 = vmul.f32 %v18136_v20, %v18136_v20 }
 0x613   : > { %v10484_v58 = vadd.f32 %v10483_v13, %v18132_v19  ;;  %v10784_v8 = vrot.slane %v10783_v59, 4  ;;  %v10818_v2 = vadd.f32 %v10817_v28, %v10620_v32  ;;  %v10652_v55 = vmul.f32 %v18132_v19, %v18132_v19 }
 0x614   : > { %v10472_v1 = vsel %vm5765_vm0, %v18134_v50, 0.0  ;;  %v10806_v34 = vadd.f32 %v10805_v47, %v10635_v45  ;;  %v10471_v30 = vadd.f32 %v10470_v9, %v18130_v54  ;;  %v10808_v17 = vsel %vm5765_vm0, %v10667_v38, 0.0 }
 0x615   : > { %v10486_v62 = vadd.f32 %v10485_v43, %v10484_v58  ;;  %v10819_v27 = vadd.f32 %v10818_v2, %v10636_v46  ;;  %v10797_v12 = vrot.slane %v10796_v33, 4  ;;  %v10821_v13 = vsel %vm5765_vm0, %v10668_v15, 0.0 }
 0x616   : > { %v10807_v25 = vadd.f32 %v10806_v34, %v10651_v48  ;;  %v10473_v4 = vadd.f32 %v10472_v1, %v10471_v30  ;;  %v10450_v20 = vrot.slane %v10449_v21, 2  ;;  %v18258_v28 = vadd.f32 %v10784_v8, %v10783_v59 }
 0x617   : > { %v10462_v32 = vadd.f32 %v10461_v52, %v10460_v24  ;;  %v10820_v19 = vadd.f32 %v10819_v27, %v10652_v55  ;;  %v10487_v26 = vrot.slane %v10486_v62, 4  ;;  %v10798_v45 = vadd.f32 %v10797_v12, %v10796_v33 }
 0x618   : > { %v10809_v53 = vadd.f32 %v10808_v17, %v10807_v25  ;;  %v10474_v47 = vrot.slane %v10473_v4, 4  ;;  %v10493_v46 = vadd.f32 %v18142_v3, %v18138_v11  ;;  %v18262_v43 = vadd.f32 %v10450_v20, %v10449_v21 }
 0x619   : > { %v10822_v50 = vadd.f32 %v10821_v13, %v10820_v19  ;;  %v10463_v9 = vrot.slane %v10462_v32, 2  ;;  %v10589_v48 = vmul.f32 %v18142_v3, %v18142_v3  ;;  %v10488_v58 = vadd.f32 %v10487_v26, %v10486_v62 }
 0x61a   : > { %v10810_v59 = vrot.slane %v10809_v53, 4  ;;  %v10506_v52 = vadd.f32 %v18144_v6, %v18140_v23  ;;  %v10494_v19 = vadd.f32 %v10493_v46, %v18146_v22  ;;  %v10573_v24 = vmul.f32 %v18138_v11, %v18138_v11 }
 0x61b   : > { %v10823_v33 = vrot.slane %v10822_v50, 4  ;;  %v10590_v21 = vmul.f32 %v18144_v6, %v18144_v6  ;;  %v10605_v20 = vmul.f32 %v18146_v22, %v18146_v22  ;;  %v10799_v15 = vrot.slane %v10798_v45, 2 }
 0x61c   : > { %v10475_v8 = vadd.f32 %v10474_v47, %v10473_v4  ;;  %v10507_v2 = vadd.f32 %v10506_v52, %v18148_v41  ;;  %v10495_v26 = vadd.f32 %v10494_v19, %v18150_v40  ;;  %v10574_v55 = vmul.f32 %v18140_v23, %v18140_v23 }
 0x61d   : > { %v10829_v1 = vadd.f32 %v10589_v48, %v10573_v24  ;;  %v10606_v34 = vmul.f32 %v18148_v41, %v18148_v41  ;;  %v10621_v30 = vmul.f32 %v18150_v40, %v18150_v40  ;;  %v10811_v62 = vadd.f32 %v10810_v59, %v10809_v53 }
 0x61e   : > { %v10489_v27 = vrot.slane %v10488_v58, 2  ;;  %v10508_v17 = vadd.f32 %v10507_v2, %v18152_v63  ;;  %v10496_v12 = vadd.f32 %v10495_v26, %v18154_v10  ;;  %v10824_v25 = vadd.f32 %v10823_v33, %v10822_v50 }
 0x61f   : > { %v10842_v4 = vadd.f32 %v10590_v21, %v10574_v55  ;;  %v10830_v13 = vadd.f32 %v10829_v1, %v10605_v20  ;;  %v10498_v47 = vsel %vm5765_vm0, %v18182_v14, 0.0  ;;  %v10622_v46 = vmul.f32 %v18152_v63, %v18152_v63 }
 0x620   : > { %v10637_v48 = vmul.f32 %v18154_v10, %v18154_v10  ;;  %v10509_v52 = vadd.f32 %v10508_v17, %v18156_v16  ;;  %v10497_v53 = vadd.f32 %v10496_v12, %v18162_v5  ;;  %v10669_v50 = vmul.f32 %v18182_v14, %v18182_v14 }
 0x621   : > { %v10843_v59 = vadd.f32 %v10842_v4, %v10606_v34  ;;  %v10831_v19 = vadd.f32 %v10830_v13, %v10621_v30  ;;  %v10511_v33 = vsel %vm5765_vm0, %v18192_v61, 0.0  ;;  %v10638_v24 = vmul.f32 %v18156_v16, %v18156_v16 }
 0x622   : > { %v10653_v21 = vmul.f32 %v18162_v5, %v18162_v5  ;;  %v10510_v20 = vadd.f32 %v10509_v52, %v18173_v51  ;;  %v10499_v2 = vadd.f32 %v10498_v47, %v10497_v53  ;;  %v10464_v26 = vadd.f32 %v10463_v9, %v10462_v32 }
 0x623   : > { %v10476_v55 = vrot.slane %v10475_v8, 2  ;;  %v10812_v1 = vrot.slane %v10811_v62, 2  ;;  %v10670_v34 = vmul.f32 %v18192_v61, %v18192_v61  ;;  %v10844_v30 = vadd.f32 %v10843_v59, %v10622_v46 }
 0x624   : > { %v10832_v17 = vadd.f32 %v10831_v19, %v10637_v48  ;;  %v10654_v12 = vmul.f32 %v18173_v51, %v18173_v51  ;;  %v10512_v4 = vadd.f32 %v10511_v33, %v10510_v20  ;;  %v10452_v13 = vrot.slane %v18262_v43, 1 }
 0x625   : > { %v10800_v38 = vadd.f32 %v10799_v15, %v10798_v45  ;;  %v10490_v14 = vadd.f32 %v10489_v27, %v10488_v58  ;;  %v10834_v5 = vsel %vm5765_vm0, %v10669_v50, 0.0  ;;  %v10825_v47 = vrot.slane %v10824_v25, 2 }
 0x626   : > { %v10845_v32 = vadd.f32 %v10844_v30, %v10638_v24  ;;  %v10833_v9 = vadd.f32 %v10832_v17, %v10653_v21  ;;  %v10500_v53 = vrot.slane %v10499_v2, 4  ;;  %v10465_v16 = vrot.slane %v10464_v26, 1 }
 0x627   : > { %v10477_v61 = vadd.f32 %v10476_v55, %v10475_v8  ;;  %v10847_v46 = vsel %vm5765_vm0, %v10670_v34, 0.0  ;;  %v10813_v59 = vadd.f32 %v10812_v1, %v10811_v62  ;;  %v10513_v20 = vrot.slane %v10512_v4, 4 }
 0x628   : > { %v10846_v19 = vadd.f32 %v10845_v32, %v10654_v12  ;;  %v10835_v33 = vadd.f32 %v10834_v5, %v10833_v9  ;;  %v10453_v45 = vadd.f32 %v10452_v13, %v18262_v43  ;;  %v19645_v58 = vrot.slane %v18258_v28, 2 }
 0x629   : > { %v10801_v27 = vrot.slane %v10800_v38, 1  ;;  %v10491_v24 = vrot.slane %v10490_v14, 1  ;;  %v10826_v21 = vadd.f32 %v10825_v47, %v10824_v25  ;;  %v10501_v30 = vadd.f32 %v10500_v53, %v10499_v2 }
 0x62a   : > { %v10787_v15 = vadd.f32 %v19645_v58, %v18258_v28  ;;  %v10848_v8 = vadd.f32 %v10847_v46, %v10846_v19  ;;  %v10466_v34 = vadd.f32 %v10465_v16, %v10464_v26  ;;  %v10478_v62 = vrot.slane %v10477_v61, 1 }
 0x62b   : > { %v10814_v1 = vrot.slane %v10813_v59, 1  ;;  %v10836_v5 = vrot.slane %v10835_v33, 4  ;;  %v10514_v12 = vadd.f32 %v10513_v20, %v10512_v4  ;;  %v18314_v9 = vmul.f32 0.020408163, %v10453_v45 }
 0x62c   : > { %v10229_v52 = vpop.f32.mrf.mxu0  ;;  %v10788_v43 = vrot.slane %v10787_v15, 1  ;;  %v10802_v13 = vadd.f32 %v10801_v27, %v10800_v38  ;;  %v10492_v28 = vadd.f32 %v10491_v24, %v10490_v14  ;;  %v10827_v58 = vrot.slane %v10826_v21, 1 }
 0x62d   : > { %v10300_v54 = vpop.f32.mrf.mxu1  ;;  %v10502_v63 = vrot.slane %v10501_v30, 2  ;;  %v10849_v40 = vrot.slane %v10848_v8, 4  ;;  %v18316_v2 = vmul.f32 0.020408163, %v10466_v34  ;;  %v10479_v16 = vadd.f32 %v10478_v62, %v10477_v61 }
 0x62e   : > { %v10231_v48 = vpop.f32.mrf.mxu0  ;;  %v10815_v26 = vadd.f32 %v10814_v1, %v10813_v59  ;;  %v10837_v53 = vadd.f32 %v10836_v5, %v10835_v33  ;;  %v10515_v46 = vrot.slane %v10514_v12, 2  ;;  %v18318_v4 = vadd.f32 %v10788_v43, %v10787_v15 }
 0x62f   : > { %v10302_v51 = vpop.f32.mrf.mxu1  ;;  %v18322_v20 = vmul.f32 %v18314_v9, %v18314_v9  ;;  %v18324_v38 = vmul.f32 0.020408163, %v10802_v13  ;;  %v18328_v27 = vmul.f32 0.020408163, %v10492_v28  ;;  %v10828_v24 = vadd.f32 %v10827_v58, %v10826_v21 }
 0x630   : > { %v10233_v50 = vpop.f32.mrf.mxu0  ;;  %v10503_v34 = vadd.f32 %v10502_v63, %v10501_v30  ;;  %v10850_v61 = vadd.f32 %v10849_v40, %v10848_v8  ;;  %v18332_v33 = vmul.f32 %v18316_v2, %v18316_v2  ;;  %v18334_v15 = vadd.f32 %v10300_v54, %v10229_v52 }
 0x631   : > { %v10304_v55 = vpop.f32.mrf.mxu1  ;;  %v10838_v43 = vrot.slane %v10837_v53, 2  ;;  %v10516_v21 = vadd.f32 %v10515_v46, %v10514_v12  ;;  %v18344_v40 = vadd.f32 %v10302_v51, %v10231_v48 }
 0x632   : > { %v10235_v17 = vpop.f32.mrf.mxu0  ;;  %v18326_v14 = vadd.f32 %v10304_v55, %v10233_v50  ;;  %v18340_v50 = vmul.f32 0.020408163, %v10479_v16  ;;  %v18342_v55 = vmul.f32 0.020408163, %v10815_v26  ;;  %v10851_v13 = vrot.slane %v10850_v61, 2 }
 0x633   : > { %v10306_v32 = vpop.f32.mrf.mxu1  ;;  %v10575_v51 = vmul.f32 %v18334_v15, %v18334_v15  ;;  %v10517_v16 = vrot.slane %v10516_v21, 1 }
 0x634   : > { %v10239_v10 = vpop.f32.mrf.mxu0  ;;  %v18336_v62 = vadd.f32 %v10306_v32, %v10235_v17  ;;  %v10591_v30 = vmul.f32 %v18326_v14, %v18326_v14  ;;  %v18356_v17 = vmul.f32 %v18328_v27, %v18328_v27  ;;  %v10504_v32 = vrot.slane %v10503_v34, 1 }
 0x635   : > { %v10310_v25 = vpop.f32.mrf.mxu1  ;;  %v10519_v26 = vadd.f32 %v18326_v14, %v18334_v15 }
 0x636   : > { %v10241_v47 = vpop.f32.mrf.mxu0  ;;  %v18338_v1 = vadd.f32 %v10310_v25, %v10239_v10  ;;  %v18352_v10 = vmul.f32 0.020408163, %v10828_v24  ;;  %v10592_v48 = vmul.f32 %v18336_v62, %v18336_v62  ;;  %v10855_v24 = vadd.f32 %v10591_v30, %v10575_v51 }
 0x637   : > { %v10312_v19 = vpop.f32.mrf.mxu1  ;;  %v10505_v31 = vadd.f32 %v10504_v32, %v10503_v34 }
 0x638   : > { %v10243_v45 = vpop.f32.mrf.mxu0  ;;  %19646 = vst [vmem:[#allocation47_spill] sm:$0xff] %v18338_v1  ;;  %v18348_v8 = vadd.f32 %v10312_v19, %v10241_v47  ;;  %v10607_v28 = vmul.f32 %v18338_v1, %v18338_v1  ;;  %v18366_v47 = vadd.f32 %v10838_v43, %v10837_v53  ;;  %v10852_v53 = vadd.f32 %v10851_v13, %v10850_v61 }
 0x639   : > { %v10314_v59 = vpop.f32.mrf.mxu1  ;;  %v10532_v43 = vadd.f32 %v18336_v62, %v18344_v40  ;;  %v10520_v36 = vadd.f32 %v10519_v26, %v18338_v1 }
 0x63a   : > { %v10245_v5 = vpop.f32.mrf.mxu0  ;;  %v18350_v54 = vadd.f32 %v10314_v59, %v10243_v45  ;;  %v10576_v45 = vmul.f32 %v18344_v40, %v18344_v40  ;;  %v10608_v59 = vmul.f32 %v18348_v8, %v18348_v8  ;;  %v10856_v41 = vadd.f32 %v10855_v24, %v10607_v28 }
 0x63b   : > { %v10316_v63 = vpop.f32.mrf.mxu1  ;;  %v10533_v7 = vadd.f32 %v10532_v43, %v18348_v8  ;;  %v10853_v43 = vrot.slane %v10852_v53, 1 }
 0x63c   : > { %v10249_v52 = vpop.f32.mrf.mxu0  ;;  %v18364_v58 = vadd.f32 %v10316_v63, %v10245_v5  ;;  %v10623_v5 = vmul.f32 %v18350_v54, %v18350_v54  ;;  %v10868_v57 = vadd.f32 %v10592_v48, %v10576_v45  ;;  %v10521_v61 = vadd.f32 %v10520_v36, %v18350_v54 }
 0x63d   : > { %v10320_v12 = vpop.f32.mrf.mxu1 }
 0x63e   : > { %v10251_v25 = vpop.f32.mrf.mxu0  ;;  %v18370_v46 = vadd.f32 %v10320_v12, %v10249_v52  ;;  %v10624_v30 = vmul.f32 %v18364_v58, %v18364_v58  ;;  %v10857_v1 = vadd.f32 %v10856_v41, %v10623_v5  ;;  %v10534_v45 = vadd.f32 %v10533_v7, %v18364_v58 }
 0x63f   : > { %v10322_v19 = vpop.f32.mrf.mxu1 }
 0x640   : > { %19647 = vst [vmem:[#allocation57_spill] sm:$0xff] %v18370_v46  ;;  %v10253_v63 = vpop.f32.mrf.mxu0  ;;  %v18381_v52 = vadd.f32 %v10322_v19, %v10251_v25  ;;  %v10639_v13 = vmul.f32 %v18370_v46, %v18370_v46  ;;  %v10518_v25 = vadd.f32 %v10517_v16, %v10516_v21  ;;  %v10869_v19 = vadd.f32 %v10868_v57, %v10608_v59 }
 0x641   : > { %v10324_v12 = vpop.f32.mrf.mxu1  ;;  %v10522_v24 = vadd.f32 %v10521_v61, %v18370_v46 }
 0x642   : > { %19648 = vst [vmem:[#allocation58_spill] sm:$0xff] %v18381_v52  ;;  %v18385_v51 = vadd.f32 %v10324_v12, %v10253_v63  ;;  %v10255_v22 = vpop.f32.mrf.mxu0  ;;  %v10640_v34 = vmul.f32 %v18381_v52, %v18381_v52  ;;  %v10840_v63 = vrot.slane %v18366_v47, 1  ;;  %v10870_v21 = vadd.f32 %v10869_v19, %v10624_v30 }
 0x643   : > { %v10326_v26 = vpop.f32.mrf.mxu1  ;;  %v10858_v41 = vadd.f32 %v10857_v1, %v10639_v13  ;;  %v10535_v16 = vadd.f32 %v10534_v45, %v18381_v52  ;;  %v18406_v12 = vmul.f32 0.020408163, %v10518_v25 }
 0x644   : > { %19649 = vst [vmem:[#allocation74_spill] sm:$0xff] %v18385_v51  ;;  %v18391_v48 = vadd.f32 %v10326_v26, %v10255_v22  ;;  %v10259_v28 = vpop.f32.mrf.mxu0  ;;  %v10655_v36 = vmul.f32 %v18385_v51, %v18385_v51  ;;  %v10523_v7 = vadd.f32 %v10522_v24, %v18385_v51  ;;  %v10871_v1 = vadd.f32 %v10870_v21, %v10640_v34 }
 0x645   : > { %v10330_v32 = vpop.f32.mrf.mxu1  ;;  %v18422_v21 = vmul.f32 0.020408163, %v10505_v31 }
 0x646   : > { %v18400_v57 = vadd.f32 %v10330_v32, %v10259_v28  ;;  %v10261_v22 = vpop.f32.mrf.mxu0  ;;  %v10656_v59 = vmul.f32 %v18391_v48, %v18391_v48  ;;  %v10859_v13 = vadd.f32 %v10858_v41, %v10655_v36  ;;  %v10536_v28 = vadd.f32 %v10535_v16, %v18391_v48 }
 0x647   : > { %v10332_v5 = vpop.f32.mrf.mxu1  ;;  %v10854_v32 = vadd.f32 %v10853_v43, %v10852_v53  ;;  %v10907_v36 = vmul.f32 %v18340_v50, %v18340_v50  ;;  %v10841_v53 = vadd.f32 %v10840_v63, %v18366_v47  ;;  %v10922_v47 = vsub.f32 %v18324_v38, %v18332_v33 }
 0x648   : > { %19650 = vst [vmem:[#allocation75_spill] sm:$0xff] %v18400_v57  ;;  %v10524_v61 = vsel %vm5765_vm0, %v18400_v57, 0.0  ;;  %v10671_v30 = vmul.f32 %v18400_v57, %v18400_v57  ;;  %v18412_v26 = vadd.f32 %v10332_v5, %v10261_v22  ;;  %v10263_v19 = vpop.f32.mrf.mxu0  ;;  %v10872_v57 = vadd.f32 %v10871_v1, %v10656_v59 }
 0x649   : > { %v10525_v45 = vadd.f32 %v10524_v61, %v10523_v7  ;;  %v10334_v24 = vpop.f32.mrf.mxu1  ;;  %v10894_v59 = vmul.f32 0.020408163, %v10854_v32  ;;  %v10893_v63 = vmul.f32 0.020408163, %v10841_v53 }
 0x64a   : > { %19651 = vst [vmem:[#allocation93_spill] sm:$0xff] %v18412_v26  ;;  %v10860_v51 = vsel %vm5765_vm0, %v10671_v30, 0.0  ;;  %v10537_v25 = vsel %vm5765_vm0, %v18412_v26, 0.0  ;;  %v10672_v52 = vmul.f32 %v18412_v26, %v18412_v26  ;;  %v10264_v46 = vpop.f32.mrf.mxu0  ;;  %v10910_v30 = vmul.f32 %v18406_v12, %v18406_v12 }
 0x64b   : > { %v10526_v22 = vrot.slane %v10525_v45, 4  ;;  %v10861_v5 = vadd.f32 %v10860_v51, %v10859_v13  ;;  %v10538_v19 = vadd.f32 %v10537_v25, %v10536_v28  ;;  %v10335_v34 = vpop.f32.mrf.mxu1  ;;  %v10889_v46 = vmul.f32 0.020408163, %v18318_v4 }
 0x64c   : > { %v10873_v43 = vsel %vm5765_vm0, %v10672_v52, 0.0  ;;  %v10924_v51 = vsub.f32 %v18352_v10, %v18356_v17  ;;  %v10923_v52 = vsub.f32 %v18342_v55, %v10907_v36  ;;  %v10909_v4 = vmul.f32 %v18422_v21, %v18422_v21 }
 0x64d   : > { %v10527_v41 = vadd.f32 %v10526_v22, %v10525_v45  ;;  %v10862_v16 = vrot.slane %v10861_v5, 4  ;;  %v10539_v7 = vrot.slane %v10538_v19, 4  ;;  %v10874_v61 = vadd.f32 %v10873_v43, %v10872_v57 }
 0x64e   : > { %v10921_v24 = vsub.f32 %v10889_v46, %v18322_v20  ;;  %v10940_v32 = vmax.f32 %v10924_v51, 0.0  ;;  %v10926_v25 = vsub.f32 %v10894_v59, %v10910_v30  ;;  %v10938_v43 = vmax.f32 %v10922_v47, 0.0 }
 0x64f   : > { %v10528_v1 = vrot.slane %v10527_v41, 2  ;;  %v10863_v31 = vadd.f32 %v10862_v16, %v10861_v5  ;;  %v10540_v13 = vadd.f32 %v10539_v7, %v10538_v19  ;;  %v10875_v28 = vrot.slane %v10874_v61, 4 }
 0x650   : > { %v10939_v38 = vmax.f32 %v10923_v52, 0.0  ;;  %v10925_v33 = vsub.f32 %v10893_v63, %v10909_v4  ;;  %v10937_v7 = vmax.f32 %v10921_v24, 0.0  ;;  %v10956_v51 = vadd.f32 1e-05, %v10938_v43 }
 0x651   : > { %v10529_v57 = vadd.f32 %v10528_v1, %v10527_v41  ;;  %v10864_v45 = vrot.slane %v10863_v31, 2  ;;  %v10541_v10 = vrot.slane %v10540_v13, 2  ;;  %v10876_v17 = vadd.f32 %v10875_v28, %v10874_v61 }
 0x652   : > { %v10958_v41 = vadd.f32 1e-05, %v10940_v32  ;;  %v10942_v1 = vmax.f32 %v10926_v25, 0.0  ;;  %v10957_v59 = vadd.f32 1e-05, %v10939_v38  ;;  %v10941_v30 = vmax.f32 %v10925_v33, 0.0 }
 0x653   : > { %v10530_v22 = vrot.slane %v10529_v57, 1  ;;  %v10865_v5 = vadd.f32 %v10864_v45, %v10863_v31  ;;  %v10542_v19 = vadd.f32 %v10541_v10, %v10540_v13  ;;  %v10877_v34 = vrot.slane %v10876_v17, 2 }
 0x654   : > { %v10955_v52 = vadd.f32 1e-05, %v10937_v7  ;;  %13768 = vrsqrt.f32 %v10958_v41  ;;  %v10960_v63 = vadd.f32 1e-05, %v10942_v1  ;;  %v10959_v10 = vadd.f32 1e-05, %v10941_v30 }
 0x655   : > { %v10531_v55 = vadd.f32 %v10530_v22, %v10529_v57  ;;  %v10866_v36 = vrot.slane %v10865_v5, 1  ;;  %v10543_v53 = vrot.slane %v10542_v19, 1  ;;  %v10878_v16 = vadd.f32 %v10877_v34, %v10876_v17 }
 0x656   : > { %13770 = vrsqrt.f32 %v10956_v51 }
 0x657   : > { %v18437_v26 = vmul.f32 0.020408163, %v10531_v55  ;;  %v10867_v61 = vadd.f32 %v10866_v36, %v10865_v5  ;;  %v10544_v20 = vadd.f32 %v10543_v53, %v10542_v19  ;;  %v10879_v46 = vrot.slane %v10878_v16, 1 }
 0x658   : > { %13772 = vrsqrt.f32 %v10957_v59 }
 0x659   : > { %v10895_v31 = vmul.f32 0.020408163, %v10867_v61  ;;  %v10911_v13 = vmul.f32 %v18437_v26, %v18437_v26  ;;  %v10560_v28 = vmul.f32 0.020408163, %v10544_v20  ;;  %v10880_v47 = vadd.f32 %v10879_v46, %v10878_v16  ;;  %v19652_v16 = vld [vmem:[#allocation18_spill] sm:$0xff] }
 0x65a   : > { %13774 = vrsqrt.f32 %v10955_v52 }
 0x65b   : > { %v10927_v4 = vsub.f32 %v10895_v31, %v10911_v13  ;;  %v10896_v57 = vmul.f32 0.020408163, %v10880_v47  ;;  %v10912_v45 = vmul.f32 %v10560_v28, %v10560_v28  ;;  %13776 = vrsqrt.f32 %v10960_v63  ;;  %v10946_v47 = vld [vmem:[#allocation10 + $0x8] sm:$0xff] }
 0x65c   : > { %13778 = vrsqrt.f32 %v10959_v10 }
 0x65d   : > { %v10943_v17 = vmax.f32 %v10927_v4, 0.0  ;;  %v10928_v24 = vsub.f32 %v10896_v57, %v10912_v45 }
 0x65f   : > { %v10961_v32 = vadd.f32 1e-05, %v10943_v17  ;;  %v10944_v25 = vmax.f32 %v10928_v24, 0.0 }
 0x661   : > { %v10962_v22 = vadd.f32 1e-05, %v10944_v25  ;;  %13780 = vrsqrt.f32 %v10961_v32  ;;  %v13769_v5 = vpop.eup %13768  ;;  %v19653_v32 = vld [vmem:[#allocation38_spill] sm:$0xff] }
 0x663   : > { %13782 = vrsqrt.f32 %v10962_v22  ;;  %v13771_v19 = vpop.eup %13770 }
 0x665   : > { %v13773_v34 = vpop.eup %13772 }
 0x666   : > { %v11045_v38 = vcombine.low %v13773_v34, %v13769_v5 }
 0x667   : > { %v13775_v43 = vpop.eup %13774 }
 0x668   : > { %v13777_v33 = vpop.eup %13776  ;;  %v11044_v55 = vcombine.low %v13775_v43, %v13771_v19  ;;  %v11061_v7 = vrot.slane %v11045_v38, %v19652_v16 }
 0x669   : > { %v13779_v36 = vpop.eup %13778 }
 0x66a   : > { %v11046_v41 = vcombine.low %v13779_v36, %v13777_v33  ;;  %v11054_v61 = vrot.slane %v11044_v55, %v19652_v16 }
 0x66c   : > { %v11076_v46 = vcombine.low %v11054_v61, %v11061_v7  ;;  %v11068_v51 = vrot.slane %v11046_v41, %v19652_v16 }
 0x66e   : > { %v13781_v53 = vpop.eup %13780  ;;  %v11084_v31 = vrot.slane %v11076_v46, %v19652_v16  ;;  %v19655_v46 = vld [vmem:[#allocation44_spill] sm:$0xff] }
 0x670   : > { %v13783_v1 = vpop.eup %13782 }
 0x671   : > { %v11047_v20 = vcombine.low %v13781_v53, %v13783_v1 }
 0x673   : > { %v11075_v59 = vrot.slane %v11047_v20, %v19652_v16  ;;  %v19654_v20 = vld [vmem:[#allocation42_spill] sm:$0xff] }
 0x675   : > { %v11077_v30 = vcombine.low %v11068_v51, %v11075_v59  ;;  %v19656_v51 = vld [vmem:[#allocation63_spill] sm:$0xff] }
 0x677   : > { %v11091_v13 = vrot.slane %v11077_v30, %v19652_v16 }
 0x679   : > { %v11092_v52 = vcombine.low %v11084_v31, %v11091_v13 }
 0x67b   : > { %v11096_v63 = vmul.f32 %v11092_v52, %v10946_v47 }
 0x67d   : > { %v18448_v4 = vrot.slane %v11096_v63, %v19502_v18  ;;  %v18451_v57 = vrot.slane %v11096_v63, %v19503_v42  ;;  %v18454_v45 = vrot.slane %v11096_v63, %v19504_v60  ;;  %v18457_v10 = vrot.slane %v11096_v63, %v19505_v39 }
 0x67e   : > { %v18460_v17 = vrot.slane %v11096_v63, %v17461_v29  ;;  %v18463_v24 = vrot.slane %v11096_v63, %v17464_v56  ;;  %v18466_v25 = vrot.slane %v11096_v63, %v19653_v32  ;;  %v18469_v22 = vrot.slane %v11096_v63, %v17470_v49 }
 0x67f   : > { %v11189_v5 = vmul.f32 %v18448_v4, %v18314_v9  ;;  %v11190_v19 = vmul.f32 %v18451_v57, %v18316_v2  ;;  %v11191_v34 = vmul.f32 %v18454_v45, %v18340_v50  ;;  %v11192_v43 = vmul.f32 %v18457_v10, %v18328_v27 }
 0x680   : > { %v11193_v38 = vmul.f32 %v18460_v17, %v18422_v21  ;;  %v11194_v33 = vmul.f32 %v18463_v24, %v18406_v12  ;;  %v11195_v55 = vmul.f32 %v18466_v25, %v18437_v26  ;;  %v11196_v9 = vmul.f32 %v18469_v22, %v10560_v28 }
 0x681   : > { %v11262_v36 = vcombine.low %v11189_v5, %v11190_v19  ;;  %v11263_v53 = vcombine.low %v11191_v34, %v11192_v43  ;;  %v18488_v2 = vmul.f32 %v18448_v4, %v19634_v37  ;;  %v18492_v27 = vmul.f32 %v18451_v57, %v19639_v35  ;;  %v19658_v5 = vld [vmem:[#allocation45_spill] sm:$0xff]  ;;  %v19659_v34 = vld [vmem:[#allocation32_spill] sm:$0xff] }
 0x682   : > { %v11264_v50 = vcombine.low %v11193_v38, %v11194_v33  ;;  %v11265_v21 = vcombine.low %v11195_v55, %v11196_v9  ;;  %v18496_v12 = vmul.f32 %v18454_v45, %v18110_v44  ;;  %v18500_v26 = vmul.f32 %v18457_v10, %v18112_v0  ;;  %v19660_v43 = vld [vmem:[#allocation80_spill] sm:$0xff]  ;;  %v19662_v55 = vld [vmem:[#allocation67_spill] sm:$0xff] }
 0x683   : > { %v11272_v28 = vrot.slane %v11262_v36, %v19652_v16  ;;  %v11279_v7 = vrot.slane %v11263_v53, %v19652_v16  ;;  %v18506_v37 = vmul.f32 %v18460_v17, %v18138_v11  ;;  %v18510_v35 = vmul.f32 %v18463_v24, %v18140_v23  ;;  %v19663_v36 = vld [vmem:[#allocation68_spill] sm:$0xff]  ;;  %v19664_v53 = vld [vmem:[#allocation47_spill] sm:$0xff] }
 0x684   : > { %v11286_v41 = vrot.slane %v11264_v50, %v19652_v16  ;;  %v11293_v44 = vrot.slane %v11265_v21, %v19652_v16  ;;  %v18516_v0 = vmul.f32 %v18466_v25, %v18334_v15  ;;  %v18520_v1 = vmul.f32 %v18469_v22, %v18344_v40  ;;  %v19657_v15 = vld [vmem:[#allocation64_spill] sm:$0xff] }
 0x685   : > { %v11294_v61 = vcombine.low %v11272_v28, %v11279_v7  ;;  %v18524_v11 = vmul.f32 %v18448_v4, %v19654_v20  ;;  %v18528_v23 = vmul.f32 %v18451_v57, %v19655_v46  ;;  %v18532_v59 = vmul.f32 %v18454_v45, %v19656_v51  ;;  %v19665_v7 = vld [vmem:[#allocation36_spill] sm:$0xff]  ;;  %v19668_v51 = vld [vmem:[#allocation53_spill] sm:$0xff] }
 0x686   : > { %v11295_v30 = vcombine.low %v11286_v41, %v11293_v44  ;;  %v18536_v31 = vmul.f32 %v18457_v10, %v19657_v15  ;;  %v18540_v40 = vmul.f32 %v18460_v17, %v18142_v3  ;;  %v18544_v13 = vmul.f32 %v18463_v24, %v18144_v6  ;;  %v19666_v44 = vld [vmem:[#allocation50_spill] sm:$0xff]  ;;  %v19667_v20 = vld [vmem:[#allocation52_spill] sm:$0xff] }
 0x687   : > { %v11302_v47 = vrot.slane %v11294_v61, %v19652_v16  ;;  %v18549_v52 = vmul.f32 %v18466_v25, %v18326_v14  ;;  %v18553_v63 = vmul.f32 %v18469_v22, %v18336_v62  ;;  %v18557_v19 = vmul.f32 %v18448_v4, %v19658_v5  ;;  %v19661_v14 = vld [vmem:[#allocation81_spill] sm:$0xff]  ;;  %v11098_v62 = vld [vmem:[#allocation11 + $0x8] sm:$0xff] }
 0x688   : > { %v11309_v3 = vrot.slane %v11295_v30, %v19652_v16  ;;  %v18562_v6 = vmul.f32 %v18451_v57, %v19659_v34  ;;  %v18566_v38 = vmul.f32 %v18454_v45, %v19660_v43  ;;  %v18570_v33 = vmul.f32 %v18457_v10, %v19661_v14  ;;  %v19669_v15 = vld [vmem:[#allocation84_spill] sm:$0xff]  ;;  %v19671_v14 = vld [vmem:[#allocation61_spill] sm:$0xff] }
 0x689   : > { %v18574_v9 = vmul.f32 %v18460_v17, %v19662_v55  ;;  %v18578_v16 = vmul.f32 %v18463_v24, %v19663_v36  ;;  %v18582_v50 = vmul.f32 %v18466_v25, %v19664_v53  ;;  %v18586_v21 = vmul.f32 %v18469_v22, %v18348_v8  ;;  %v19672_v36 = vld [vmem:[#allocation62_spill] sm:$0xff] }
 0x68a   : > { %v11310_v28 = vcombine.low %v11302_v47, %v11309_v3  ;;  %v18590_v41 = vmul.f32 %v18448_v4, %v19665_v7  ;;  %v18594_v61 = vmul.f32 %v18451_v57, %v19666_v44  ;;  %v18598_v46 = vmul.f32 %v18454_v45, %v19667_v20  ;;  %v19670_v47 = vld [vmem:[#allocation85_spill] sm:$0xff]  ;;  %v19674_v20 = vld [vmem:[#allocation66_spill] sm:$0xff] }
 0x68b   : > { %v18602_v30 = vmul.f32 %v18457_v10, %v19668_v51  ;;  %v18606_v8 = vmul.f32 %v18460_v17, %v19669_v15  ;;  %v18610_v5 = vmul.f32 %v18463_v24, %v19670_v47  ;;  %v18614_v3 = vmul.f32 %v18466_v25, %v18350_v54  ;;  %v19673_v7 = vld [vmem:[#allocation65_spill] sm:$0xff] }
 0x68c   : > { %v11314_v34 = vsub.f32 %v11098_v62, %v11310_v28  ;;  %v18618_v43 = vmul.f32 %v18469_v22, %v18364_v58  ;;  %v18622_v55 = vmul.f32 %v18448_v4, %v19671_v14  ;;  %v18626_v53 = vmul.f32 %v18451_v57, %v19672_v36  ;;  %v19676_v62 = vld [vmem:[#allocation55_spill] sm:$0xff]  ;;  %v19678_v28 = vld [vmem:[#allocation56_spill] sm:$0xff]  ;;  %v19680_v15 = vld [vmem:[#allocation57_spill] sm:$0xff] }
 0x68d   : > { %v18630_v44 = vmul.f32 %v18454_v45, %v19673_v7  ;;  %v18634_v54 = vmul.f32 %v18457_v10, %v19674_v20  ;;  %v18638_v58 = vmul.f32 %v18460_v17, %v19676_v62  ;;  %v18642_v51 = vmul.f32 %v18463_v24, %v19678_v28  ;;  %v19682_v14 = vld [vmem:[#allocation58_spill] sm:$0xff] }
 0x68e   : > { %v18646_v47 = vmul.f32 %v18466_v25, %v19680_v15  ;;  %v18650_v36 = vmul.f32 %v18469_v22, %v19682_v14  ;;  %v19684_v7 = vld [vmem:[#allocation78_spill] sm:$0xff] }
 0x68f   : > { %19675 = vst [vmem:[#allocation48_spill] sm:$0xff] %v18634_v54  ;;  %19677 = vst [vmem:[#allocation71_spill] sm:$0xff] %v18638_v58  ;;  %v18654_v20 = vmul.f32 %v18448_v4, %v19684_v7  ;;  %v19686_v54 = vld [vmem:[#allocation79_spill] sm:$0xff]  ;;  %v19687_v58 = vld [vmem:[#allocation82_spill] sm:$0xff] }
 0x690   : > { %19679 = vst [vmem:[#allocation59_spill] sm:$0xff] %v18642_v51  ;;  %19681 = vst [vmem:[#allocation60_spill] sm:$0xff] %v18646_v47  ;;  %v18658_v62 = vmul.f32 %v18451_v57, %v19686_v54  ;;  %v18662_v28 = vmul.f32 %v18454_v45, %v19687_v58  ;;  %v19689_v51 = vld [vmem:[#allocation83_spill] sm:$0xff]  ;;  %v19691_v47 = vld [vmem:[#allocation69_spill] sm:$0xff]  ;;  %v18682_v58 = vmul.f32 %v18469_v22, %v18391_v48 }
 0x691   : > { %19683 = vst [vmem:[#allocation76_spill] sm:$0xff] %v18650_v36  ;;  %19685 = vst [vmem:[#allocation77_spill] sm:$0xff] %v18654_v20  ;;  %v18666_v15 = vmul.f32 %v18457_v10, %v19689_v51  ;;  %v18670_v14 = vmul.f32 %v18460_v17, %v19691_v47  ;;  %v19693_v36 = vld [vmem:[#allocation70_spill] sm:$0xff] }
 0x692   : > { %19688 = vst [vmem:[#allocation92_spill] sm:$0xff] %v18662_v28  ;;  %v18674_v7 = vmul.f32 %v18463_v24, %v19693_v36  ;;  %v19695_v20 = vld [vmem:[#allocation74_spill] sm:$0xff]  ;;  %19697 = vst [vmem:[#allocation39_spill] sm:$0xff] %v18682_v58  ;;  %v19698_v28 = vld [vmem:[#allocation51_spill] sm:$0xff] }
 0x693   : > { %19690 = vst [vmem:[#allocation49_spill] sm:$0xff] %v18666_v15  ;;  %19692 = vst [vmem:[#allocation31_spill] sm:$0xff] %v18670_v14  ;;  %v18678_v54 = vmul.f32 %v18466_v25, %v19695_v20  ;;  %v18686_v51 = vmul.f32 %v18448_v4, %v19698_v28  ;;  %v19699_v15 = vld [vmem:[#allocation72_spill] sm:$0xff]  ;;  %v19700_v14 = vld [vmem:[#allocation54_spill] sm:$0xff] }
 0x694   : > { %19694 = vst [vmem:[#allocation37_spill] sm:$0xff] %v18674_v7  ;;  %v18690_v47 = vmul.f32 %v18451_v57, %v19699_v15  ;;  %v18694_v36 = vmul.f32 %v18454_v45, %v19700_v14  ;;  %v19701_v7 = vld [vmem:[#allocation73_spill] sm:$0xff]  ;;  %v19703_v58 = vld [vmem:[#allocation87_spill] sm:$0xff]  ;;  %v18717_v14 = vrot.slane %v11314_v34, %v19502_v18  ;;  %v18738_v18 = vrot.slane %v11314_v34, %v17470_v49 }
 0x695   : > { %19696 = vst [vmem:[#allocation35_spill] sm:$0xff] %v18678_v54  ;;  %v18698_v20 = vmul.f32 %v18457_v10, %v19701_v7  ;;  %v19702_v54 = vld [vmem:[#allocation86_spill] sm:$0xff]  ;;  %v18706_v4 = vmul.f32 %v18463_v24, %v19703_v58  ;;  %v19704_v28 = vld [vmem:[#allocation75_spill] sm:$0xff]  ;;  %v19705_v15 = vld [vmem:[#allocation93_spill] sm:$0xff]  ;;  %v18720_v10 = vrot.slane %v11314_v34, %v19503_v42  ;;  %v18726_v24 = vrot.slane %v11314_v34, %v19505_v39 }
 0x696   : > { %v18702_v48 = vmul.f32 %v18460_v17, %v19702_v54  ;;  %v18710_v57 = vmul.f32 %v18466_v25, %v19704_v28  ;;  %v18714_v45 = vmul.f32 %v18469_v22, %v19705_v15  ;;  %v18723_v17 = vrot.slane %v11314_v34, %v19504_v60 }
 0x697   : > { %v18729_v7 = vrot.slane %v11314_v34, %v17461_v29  ;;  %v18732_v25 = vrot.slane %v11314_v34, %v17464_v56  ;;  %v18735_v22 = vrot.slane %v11314_v34, %v19653_v32  ;;  %v11517_v42 = vadd.f32 %v18717_v14, %v18488_v2 }
 0x698   : > { %v11518_v60 = vadd.f32 %v18720_v10, %v18492_v27  ;;  %v11519_v39 = vadd.f32 %v18723_v17, %v18496_v12  ;;  %v11520_v29 = vadd.f32 %v18726_v24, %v18500_v26  ;;  %v11524_v2 = vadd.f32 %v18738_v18, %v18520_v1  ;;  %v19710_v54 = vld [vmem:[#allocation76_spill] sm:$0xff]  ;;  %v19711_v28 = vld [vmem:[#allocation77_spill] sm:$0xff] }
 0x699   : > { %v11521_v56 = vadd.f32 %v18729_v7, %v18506_v37  ;;  %v11522_v32 = vadd.f32 %v18732_v25, %v18510_v35  ;;  %v11523_v49 = vadd.f32 %v18735_v22, %v18516_v0  ;;  %v11533_v27 = vadd.f32 %v18717_v14, %v18524_v11  ;;  %11629 = vst [vmem:[%s19040_s7 + $0x40] sm:$0xff] %v11517_v42 }
 0x69a   : > { %v11534_v12 = vadd.f32 %v18720_v10, %v18528_v23  ;;  %11630 = vst [vmem:[%s19040_s7 + $0x48] sm:$0xff] %v11518_v60  ;;  %v11535_v26 = vadd.f32 %v18723_v17, %v18532_v59  ;;  %v11536_v37 = vadd.f32 %v18726_v24, %v18536_v31  ;;  %v11537_v35 = vadd.f32 %v18729_v7, %v18540_v40  ;;  %v19712_v60 = vld [vmem:[#allocation92_spill] sm:$0xff] }
 0x69b   : > { %v11538_v0 = vadd.f32 %v18732_v25, %v18544_v13  ;;  %11631 = vst [vmem:[%s19040_s7 + $0x50] sm:$0xff] %v11519_v39  ;;  %11632 = vst [vmem:[%s19040_s7 + $0x58] sm:$0xff] %v11520_v29  ;;  %v11539_v1 = vadd.f32 %v18735_v22, %v18549_v52  ;;  %v11540_v11 = vadd.f32 %v18738_v18, %v18553_v63 }
 0x69c   : > { %11633 = vst [vmem:[%s19040_s7 + $0x60] sm:$0xff] %v11521_v56  ;;  %11634 = vst [vmem:[%s19040_s7 + $0x68] sm:$0xff] %v11522_v32  ;;  %v11549_v23 = vadd.f32 %v18717_v14, %v18557_v19  ;;  %v11550_v59 = vadd.f32 %v18720_v10, %v18562_v6  ;;  %v11551_v31 = vadd.f32 %v18723_v17, %v18566_v38  ;;  %v19714_v56 = vld [vmem:[#allocation31_spill] sm:$0xff] }
 0x69d   : > { %11635 = vst [vmem:[%s19040_s7 + $0x70] sm:$0xff] %v11523_v49  ;;  %11636 = vst [vmem:[%s19040_s7 + $0x78] sm:$0xff] %v11524_v2  ;;  %v11552_v40 = vadd.f32 %v18726_v24, %v18570_v33  ;;  %v11553_v13 = vadd.f32 %v18729_v7, %v18574_v9  ;;  %v11554_v52 = vadd.f32 %v18732_v25, %v18578_v16  ;;  %v19715_v49 = vld [vmem:[#allocation37_spill] sm:$0xff] }
 0x69e   : > { %11645 = vst [vmem:[%s19040_s7 + $0xc0] sm:$0xff] %v11533_v27  ;;  %11646 = vst [vmem:[%s19040_s7 + $0xc8] sm:$0xff] %v11534_v12  ;;  %v11555_v63 = vadd.f32 %v18735_v22, %v18582_v50  ;;  %v11556_v19 = vadd.f32 %v18738_v18, %v18586_v21  ;;  %v11565_v6 = vadd.f32 %v18717_v14, %v18590_v41  ;;  %v19716_v27 = vld [vmem:[#allocation35_spill] sm:$0xff] }
 0x69f   : > { %11647 = vst [vmem:[%s19040_s7 + $0xd0] sm:$0xff] %v11535_v26  ;;  %11648 = vst [vmem:[%s19040_s7 + $0xd8] sm:$0xff] %v11536_v37  ;;  %v11566_v38 = vadd.f32 %v18720_v10, %v18594_v61  ;;  %v11567_v33 = vadd.f32 %v18723_v17, %v18598_v46  ;;  %v11568_v9 = vadd.f32 %v18726_v24, %v18602_v30  ;;  %v19717_v26 = vld [vmem:[#allocation39_spill] sm:$0xff] }
 0x6a0   : > { %11649 = vst [vmem:[%s19040_s7 + $0xe0] sm:$0xff] %v11537_v35  ;;  %11650 = vst [vmem:[%s19040_s7 + $0xe8] sm:$0xff] %v11538_v0  ;;  %v11569_v16 = vadd.f32 %v18729_v7, %v18606_v8  ;;  %v11570_v50 = vadd.f32 %v18732_v25, %v18610_v5  ;;  %v11571_v21 = vadd.f32 %v18735_v22, %v18614_v3  ;;  %v19706_v8 = vld [vmem:[#allocation48_spill] sm:$0xff]  ;;  %v19707_v3 = vld [vmem:[#allocation71_spill] sm:$0xff] }
 0x6a1   : > { %11651 = vst [vmem:[%s19040_s7 + $0xf0] sm:$0xff] %v11539_v1  ;;  %11652 = vst [vmem:[%s19040_s7 + $0xf8] sm:$0xff] %v11540_v11  ;;  %v11572_v41 = vadd.f32 %v18738_v18, %v18618_v43  ;;  %v11581_v61 = vadd.f32 %v18717_v14, %v18622_v55  ;;  %v11582_v46 = vadd.f32 %v18720_v10, %v18626_v53  ;;  %v19708_v43 = vld [vmem:[#allocation59_spill] sm:$0xff]  ;;  %v19709_v53 = vld [vmem:[#allocation60_spill] sm:$0xff] }
 0x6a2   : > { %11661 = vst [vmem:[%s19040_s7 + $0x140] sm:$0xff] %v11549_v23  ;;  %11662 = vst [vmem:[%s19040_s7 + $0x148] sm:$0xff] %v11550_v59  ;;  %v11583_v30 = vadd.f32 %v18723_v17, %v18630_v44  ;;  %v11584_v5 = vadd.f32 %v18726_v24, %v19706_v8  ;;  %v11585_v34 = vadd.f32 %v18729_v7, %v19707_v3 }
 0x6a3   : > { %11663 = vst [vmem:[%s19040_s7 + $0x150] sm:$0xff] %v11551_v31  ;;  %11664 = vst [vmem:[%s19040_s7 + $0x158] sm:$0xff] %v11552_v40  ;;  %v11586_v55 = vadd.f32 %v18732_v25, %v19708_v43  ;;  %v11587_v44 = vadd.f32 %v18735_v22, %v19709_v53  ;;  %v11588_v58 = vadd.f32 %v18738_v18, %v19710_v54 }
 0x6a4   : > { %11665 = vst [vmem:[%s19040_s7 + $0x160] sm:$0xff] %v11553_v13  ;;  %11666 = vst [vmem:[%s19040_s7 + $0x168] sm:$0xff] %v11554_v52  ;;  %v11597_v15 = vadd.f32 %v18717_v14, %v19711_v28  ;;  %v11598_v42 = vadd.f32 %v18720_v10, %v18658_v62  ;;  %v11599_v39 = vadd.f32 %v18723_v17, %v19712_v60  ;;  %v19713_v62 = vld [vmem:[#allocation49_spill] sm:$0xff] }
 0x6a5   : > { %11667 = vst [vmem:[%s19040_s7 + $0x170] sm:$0xff] %v11555_v63  ;;  %11668 = vst [vmem:[%s19040_s7 + $0x178] sm:$0xff] %v11556_v19  ;;  %v11600_v29 = vadd.f32 %v18726_v24, %v19713_v62  ;;  %v11601_v32 = vadd.f32 %v18729_v7, %v19714_v56  ;;  %v11602_v2 = vadd.f32 %v18732_v25, %v19715_v49 }
 0x6a6   : > { %11677 = vst [vmem:[%s19040_s7 + $0x1c0] sm:$0xff] %v11565_v6  ;;  %11678 = vst [vmem:[%s19040_s7 + $0x1c8] sm:$0xff] %v11566_v38  ;;  %v11603_v12 = vadd.f32 %v18735_v22, %v19716_v27  ;;  %v11604_v37 = vadd.f32 %v18738_v18, %v19717_v26  ;;  %v11613_v35 = vadd.f32 %v18717_v14, %v18686_v51 }
 0x6a7   : > { %11679 = vst [vmem:[%s19040_s7 + $0x1d0] sm:$0xff] %v11567_v33  ;;  %11680 = vst [vmem:[%s19040_s7 + $0x1d8] sm:$0xff] %v11568_v9  ;;  %v11614_v0 = vadd.f32 %v18720_v10, %v18690_v47  ;;  %v11615_v51 = vadd.f32 %v18723_v17, %v18694_v36  ;;  %v11616_v47 = vadd.f32 %v18726_v24, %v18698_v20 }
 0x6a8   : > { %11681 = vst [vmem:[%s19040_s7 + $0x1e0] sm:$0xff] %v11569_v16  ;;  %11682 = vst [vmem:[%s19040_s7 + $0x1e8] sm:$0xff] %v11570_v50  ;;  %v11617_v14 = vadd.f32 %v18729_v7, %v18702_v48  ;;  %v11618_v10 = vadd.f32 %v18732_v25, %v18706_v4  ;;  %v11619_v36 = vadd.f32 %v18735_v22, %v18710_v57 }
 0x6a9   : > { %11683 = vst [vmem:[%s19040_s7 + $0x1f0] sm:$0xff] %v11571_v21  ;;  %11684 = vst [vmem:[%s19040_s7 + $0x1f8] sm:$0xff] %v11572_v41  ;;  %v11620_v20 = vadd.f32 %v18738_v18, %v18714_v45 }
 0x6aa   : > { %11693 = vst [vmem:[%s19040_s7 + $0x240] sm:$0xff] %v11581_v61  ;;  %11694 = vst [vmem:[%s19040_s7 + $0x248] sm:$0xff] %v11582_v46 }
 0x6ab   : > { %11695 = vst [vmem:[%s19040_s7 + $0x250] sm:$0xff] %v11583_v30  ;;  %11696 = vst [vmem:[%s19040_s7 + $0x258] sm:$0xff] %v11584_v5 }
 0x6ac   : > { %11697 = vst [vmem:[%s19040_s7 + $0x260] sm:$0xff] %v11585_v34  ;;  %11698 = vst [vmem:[%s19040_s7 + $0x268] sm:$0xff] %v11586_v55 }
 0x6ad   : > { %11699 = vst [vmem:[%s19040_s7 + $0x270] sm:$0xff] %v11587_v44  ;;  %11700 = vst [vmem:[%s19040_s7 + $0x278] sm:$0xff] %v11588_v58 }
 0x6ae   : > { %11709 = vst [vmem:[%s19040_s7 + $0x2c0] sm:$0xff] %v11597_v15  ;;  %11710 = vst [vmem:[%s19040_s7 + $0x2c8] sm:$0xff] %v11598_v42 }
 0x6af   : > { %11711 = vst [vmem:[%s19040_s7 + $0x2d0] sm:$0xff] %v11599_v39  ;;  %11712 = vst [vmem:[%s19040_s7 + $0x2d8] sm:$0xff] %v11600_v29 }
 0x6b0   : > { %11713 = vst [vmem:[%s19040_s7 + $0x2e0] sm:$0xff] %v11601_v32  ;;  %11714 = vst [vmem:[%s19040_s7 + $0x2e8] sm:$0xff] %v11602_v2 }
 0x6b1   : > { %11715 = vst [vmem:[%s19040_s7 + $0x2f0] sm:$0xff] %v11603_v12  ;;  %11716 = vst [vmem:[%s19040_s7 + $0x2f8] sm:$0xff] %v11604_v37 }
 0x6b2   : > { %11725 = vst [vmem:[%s19040_s7 + $0x340] sm:$0x1] %v11613_v35  ;;  %11726 = vst [vmem:[%s19040_s7 + $0x348] sm:$0x1] %v11614_v0 }
 0x6b3   : > { %11727 = vst [vmem:[%s19040_s7 + $0x350] sm:$0x1] %v11615_v51  ;;  %11728 = vst [vmem:[%s19040_s7 + $0x358] sm:$0x1] %v11616_v47 }
 0x6b4   : > { %11729 = vst [vmem:[%s19040_s7 + $0x360] sm:$0x1] %v11617_v14  ;;  %11730 = vst [vmem:[%s19040_s7 + $0x368] sm:$0x1] %v11618_v10 }
 0x6b5   : > { %11731 = vst [vmem:[%s19040_s7 + $0x370] sm:$0x1] %v11619_v36  ;;  %11732 = vst [vmem:[%s19040_s7 + $0x378] sm:$0x1] %v11620_v20 }
 0x6b6 PF: > { %p20_p0 = scmp.ge.s32.totalorder %s14137_s14, 5   ;;  %s19718_s24 = smov %s13980_s25 }
 0x6b7   : > { %s19719_s25 = smov %s13984_s26  ;;  %s19720_s26 = smov %s14148_s22 }
 0x6b8   : > { %s19721_s27 = smov %s14137_s14  ;;  %22 = sbr.rel (!%p20_p0) target bundleno = 6 (0x6), region = 115 }
 0x6bd   :  { %11744 = vsyncpa [#allocation4], 1 }
 0x6be   :  { %11746 = vsyncpa [#allocation4 + $0x1], 1 }
 0x6bf   :  { %11747 = vsyncpa [#allocation6], 1 }
 0x6c0   :  { %11748 = vsyncpa [#allocation9], 1 }
 0x6c1   :  { %11749 = vsyncpa [#allocation12], 1 }

</bundles_post_ra>
